<compile_context>
chip_gen: v5e
topology: v5e:2x2
jax: 0.10.0
libtpu: 0.0.40
codegen_flags: <defaults>
</compile_context>

<pallas_src>
import functools

import numpy as np
import jax
import jax.numpy as jnp
from jax.experimental import pallas as pl
from jax.experimental.pallas import tpu as pltpu

LEAK = 0.1     # LeakyReLU negative slope


def _lrelu(v):
    return jnp.where(v >= 0, v, LEAK * v)


# ----------------------------------------------------------------------------
# Pallas kernels
# ----------------------------------------------------------------------------
def _gemm_t_kernel(w_ref, p_ref, s_ref, b_ref, o_ref, *, act):
    """out_T (Cout, TM) = epilogue( w_T (Cout,K) @ patches_T (K,TM) )."""
    acc = jnp.dot(w_ref[...], p_ref[...], preferred_element_type=jnp.float32)
    y = acc * s_ref[...] + b_ref[...]          # folded BN, or plain bias (scale==1)
    if act:
        y = _lrelu(y)
    o_ref[...] = y                             # lane-dense (Cout, TM) store


def _deconv_phase_kernel(w_ref, p_ref, b_ref, o_ref):
    """One sub-pixel phase of ConvTranspose3d(k=4,s=2,p=1) + bias + LeakyReLU."""
    acc = jnp.dot(w_ref[...], p_ref[...], preferred_element_type=jnp.float32)
    o_ref[...] = _lrelu(acc + b_ref[...])


def _deep_stage_kernel(x_ref,
                       wc2, s2, b2, wc21, s21, b21,
                       wc3, s3, b3, wc31, s31, b31,
                       wres, sres, bres,
                       wd2, bd2, wd1a, wd1b, bd1,
                       o_ref):
    """conv2, conv2_1, conv3, conv3_1, resconv_1..5, deconv2, deconv1 fused.

    Each layer is a pre-folded dense matrix on the flattened NDHWC activation
    (spatial 4^3 / 2^3, C=4), so the whole deep stage is a chain of tiny
    matmuls that never leaves VMEM.
    """
    def conv_bn_lrelu(h, w_r, s_r, b_r):
        a = jnp.dot(h.astype(w_r.dtype), w_r[...],
                    preferred_element_type=jnp.float32)
        return _lrelu(a * s_r[...] + b_r[...])

    oc2 = conv_bn_lrelu(x_ref[...], wc2, s2, b2)     # (N, 256)  conv2
    oc2 = conv_bn_lrelu(oc2, wc21, s21, b21)         # (N, 256)  conv2_1 (= out_conv2)
    h = conv_bn_lrelu(oc2, wc3, s3, b3)              # (N, 32)   conv3
    h = conv_bn_lrelu(h, wc31, s31, b31)             # (N, 32)   conv3_1 (= out_conv3)

    for i in range(5):                               # resconv_i + identity + ReLU
        y = jnp.dot(h.astype(wres.dtype), wres[i],
                    preferred_element_type=jnp.float32)
        y = _lrelu(y * sres[i] + bres[i])
        h = jnp.maximum(y + h, 0.0)

    od2 = _lrelu(jnp.dot(h.astype(wd2.dtype), wd2[...],
                         preferred_element_type=jnp.float32) + bd2[...])  # deconv2
    # deconv1(concat(out_conv2, out_deconv2)) split into its two channel blocks
    od1 = (jnp.dot(oc2.astype(wd1a.dtype), wd1a[...],
                   preferred_element_type=jnp.float32)
           + jnp.dot(od2.astype(wd1b.dtype), wd1b[...],
                     preferred_element_type=jnp.float32)
           + bd1[...])
    o_ref[...] = _lrelu(od1)                         # (N, 2048) out_deconv1


# ----------------------------------------------------------------------------
# pallas_call wrappers
# ----------------------------------------------------------------------------
def _pick_tile(m):
    for cand in (2048, 1024, 512, 256, 128):
        if m % cand == 0 and m // cand >= 2:
            return cand
    return m


def gemm_t(w_t, patches_t, scale, shift, *, act):
    """out_T (Cout, M) = epilogue(w_T @ patches_T) with lane-dense output."""
    cout, k = w_t.shape
    m = patches_t.shape[1]
    m_pad = m if m % 128 == 0 else ((m + 127) // 128) * 128
    if m_pad != m:
        patches_t = jnp.pad(patches_t, ((0, 0), (0, m_pad - m)))
    tm = _pick_tile(m_pad)
    grid = (m_pad // tm,)
    out = pl.pallas_call(
        functools.partial(_gemm_t_kernel, act=act),
        out_shape=jax.ShapeDtypeStruct((cout, m_pad), jnp.float32),
        grid_spec=pltpu.PrefetchScalarGridSpec(
            num_scalar_prefetch=0,
            grid=grid,
            in_specs=[
                pl.BlockSpec((cout, k), lambda i: (0, 0)),
                pl.BlockSpec((k, tm), lambda i: (0, i)),
                pl.BlockSpec((cout, 1), lambda i: (0, 0)),
                pl.BlockSpec((cout, 1), lambda i: (0, 0)),
            ],
            out_specs=pl.BlockSpec((cout, tm), lambda i: (0, i)),
        ),
        compiler_params=pltpu.CompilerParams(
            dimension_semantics=("parallel",)),
    )(w_t, patches_t, scale, shift)
    return out[:, :m]


def deconv_phase(patches, w_phases, bias):
    """patches (8, K, M), w_phases (8, Cout, K), bias (Cout,1) -> (8, Cout, M)."""
    _, k, m = patches.shape
    cout = w_phases.shape[1]
    return pl.pallas_call(
        _deconv_phase_kernel,
        out_shape=jax.ShapeDtypeStruct((8, cout, m), jnp.float32),
        grid_spec=pltpu.PrefetchScalarGridSpec(
            num_scalar_prefetch=0,
            grid=(8,),
            in_specs=[
                pl.BlockSpec((None, cout, k), lambda p: (p, 0, 0)),
                pl.BlockSpec((None, k, m), lambda p: (p, 0, 0)),
                pl.BlockSpec((cout, 1), lambda p: (0, 0)),
            ],
            out_specs=pl.BlockSpec((None, cout, m), lambda p: (p, 0, 0)),
        ),
        compiler_params=pltpu.CompilerParams(
            dimension_semantics=("parallel",)),
    )(w_phases, patches, bias)


def deep_stage(out_conv1, d):
    """Run the fused conv2..deconv1 kernel on the flattened 8^3 activation."""
    n = out_conv1.shape[0]
    flat = out_conv1.reshape(n, -1).astype(jnp.bfloat16)
    vmem = pl.BlockSpec(memory_space=pltpu.MemorySpace.VMEM)
    return pl.pallas_call(
        _deep_stage_kernel,
        out_shape=jax.ShapeDtypeStruct((n, d['wd1a'].shape[1]), jnp.float32),
        in_specs=[vmem] * 21,
        out_specs=vmem,
    )(flat,
      d['wc2'], d['s2'], d['b2'], d['wc21'], d['s21'], d['b21'],
      d['wc3'], d['s3'], d['b3'], d['wc31'], d['s31'], d['b31'],
      d['wres'], d['sres'], d['bres'],
      d['wd2'], d['bd2'], d['wd1a'], d['wd1b'], d['bd1'])


# ----------------------------------------------------------------------------
# im2col / phase-patch glue (plain JAX: slicing + reshape only)
# ----------------------------------------------------------------------------
def im2col_t(x, k, stride, pad):
    """x (N,D,H,W,C) -> patches_T (k^3*C, N*Do*Ho*Wo); K order (kd,kh,kw,c)."""
    n, d, h, w, c = x.shape
    xp = jnp.pad(x, ((0, 0), (pad, pad), (pad, pad), (pad, pad), (0, 0)))
    do = (d + 2 * pad - k) // stride + 1
    ho = (h + 2 * pad - k) // stride + 1
    wo = (w + 2 * pad - k) // stride + 1
    cols = []
    for kd in range(k):
        for kh in range(k):
            for kw in range(k):
                v = xp[:, kd:kd + do * stride:stride,
                          kh:kh + ho * stride:stride,
                          kw:kw + wo * stride:stride, :]
                cols.append(jnp.transpose(v, (4, 0, 1, 2, 3)).reshape(c, -1))
    return jnp.concatenate(cols, axis=0), (n, do, ho, wo)


def phase_patches(x):
    """x (N,D,D,D,Cin) -> (8, 8*Cin, N*D^3) sub-pixel patches for
    ConvTranspose3d(k=4,s=2,p=1); phase order (pd,ph,pw), tap order (td,th,tw,ci)."""
    n, d = x.shape[0], x.shape[1]
    cin = x.shape[-1]
    xp = jnp.pad(x, ((0, 0), (1, 1), (1, 1), (1, 1), (0, 0)))
    m = n * d * d * d
    sl = {}
    for sd in range(3):
        for sh in range(3):
            for sw in range(3):
                v = xp[:, sd:sd + d, sh:sh + d, sw:sw + d, :]
                sl[(sd, sh, sw)] = jnp.transpose(v, (4, 0, 1, 2, 3)).reshape(cin, m)
    phases = []
    for pd in range(2):
        for ph in range(2):
            for pw in range(2):
                taps = [sl[(pd + td, ph + th, pw + tw)]
                        for td in range(2) for th in range(2) for tw in range(2)]
                phases.append(jnp.concatenate(taps, axis=0))
    return jnp.stack(phases, axis=0)


# ----------------------------------------------------------------------------
# Static spatial operators (numpy) used to fold small convs into dense matmuls
# ----------------------------------------------------------------------------
def _conv_spatial_op(din, k, stride, pad):
    dout = (din + 2 * pad - k) // stride + 1
    s = np.zeros((k ** 3, din ** 3, dout ** 3), np.float32)
    for kd in range(k):
        for kh in range(k):
            for kw in range(k):
                t = (kd * k + kh) * k + kw
                for od in range(dout):
                    for oh in range(dout):
                        for ow in range(dout):
                            i_d = od * stride - pad + kd
                            i_h = oh * stride - pad + kh
                            i_w = ow * stride - pad + kw
                            if 0 <= i_d < din and 0 <= i_h < din and 0 <= i_w < din:
                                s[t, (i_d * din + i_h) * din + i_w,
                                     (od * dout + oh) * dout + ow] = 1.0
    return s, dout


def _deconv_spatial_op(din, k=4, stride=2, pad=1):
    dout = (din - 1) * stride - 2 * pad + k
    s = np.zeros((k ** 3, din ** 3, dout ** 3), np.float32)
    for kd in range(k):
        for kh in range(k):
            for kw in range(k):
                t = (kd * k + kh) * k + kw
                for i_d in range(din):
                    for i_h in range(din):
                        for i_w in range(din):
                            od = i_d * stride - pad + kd
                            oh = i_h * stride - pad + kh
                            ow = i_w * stride - pad + kw
                            if 0 <= od < dout and 0 <= oh < dout and 0 <= ow < dout:
                                s[t, (i_d * din + i_h) * din + i_w,
                                     (od * dout + oh) * dout + ow] = 1.0
    return s, dout


# ----------------------------------------------------------------------------
# Parameter initialization (deterministic, synthetic; matches PyTorch layout)
# ----------------------------------------------------------------------------
def init_params(key, C, k):
    keys = iter(jax.random.split(key, 64))

    def conv_params(cin, cout, ksz):
        k1, k2, k3, k4, k5 = jax.random.split(next(keys), 5)
        w = 0.1 * jax.random.normal(k1, (cout, cin, ksz, ksz, ksz), jnp.float32)
        gamma = 1.0 + 0.1 * jax.random.normal(k2, (cout,), jnp.float32)
        beta = 0.1 * jax.random.normal(k3, (cout,), jnp.float32)
        mean = 0.1 * jax.random.normal(k4, (cout,), jnp.float32)
        var = jnp.abs(jax.random.normal(k5, (cout,), jnp.float32)) + 0.5
        scale = gamma / jnp.sqrt(var + 1e-5)      # folded BN (eval mode)
        shift = beta - mean * scale
        return dict(w=w, scale=scale, shift=shift)

    def deconv_params(cin, cout):
        k1, k2 = jax.random.split(next(keys), 2)
        w = 0.1 * jax.random.normal(k1, (cin, cout, 4, 4, 4), jnp.float32)
        b = 0.1 * jax.random.normal(k2, (cout,), jnp.float32)
        return dict(w=w, b=b)

    k1, k2 = jax.random.split(next(keys), 2)
    return {
        'conv1': conv_params(C, C, k),
        'conv2': conv_params(C, C, k),
        'conv2_1': conv_params(C, C, k),
        'conv3': conv_params(C, C, k),
        'conv3_1': conv_params(C, C, k),
        'resconv_1': conv_params(C, C, k),
        'resconv_2': conv_params(C, C, k),
        'resconv_3': conv_params(C, C, k),
        'resconv_4': conv_params(C, C, k),
        'resconv_5': conv_params(C, C, k),
        'deconv2': deconv_params(C, C),
        'deconv1': deconv_params(2 * C, C),
        'deconv0': deconv_params(2 * C, C),
        'output_layer0': dict(
            w=0.1 * jax.random.normal(k1, (C, 2 * C, k, k, k), jnp.float32),
            b=0.1 * jax.random.normal(k2, (C,), jnp.float32)),
    }


# ----------------------------------------------------------------------------
# One-time weight folding (outside the jitted forward)
# ----------------------------------------------------------------------------
def prepare_params(P):
    C = P['conv1']['w'].shape[0]

    def conv_wt(w):   # (Cout,Cin,kd,kh,kw) -> (Cout, k^3*Cin), K order (kd,kh,kw,ci)
        return jnp.transpose(w, (0, 2, 3, 4, 1)).reshape(w.shape[0], -1)

    prep = {
        'conv1': dict(
            wT=conv_wt(P['conv1']['w']).astype(jnp.bfloat16),
            scale=P['conv1']['scale'].reshape(C, 1).astype(jnp.float32),
            shift=P['conv1']['shift'].reshape(C, 1).astype(jnp.float32)),
        'out': dict(
            wT=conv_wt(P['output_layer0']['w']).astype(jnp.bfloat16),
            scale=jnp.ones((C, 1), jnp.float32),
            shift=P['output_layer0']['b'].reshape(C, 1).astype(jnp.float32)),
    }

    def dense_conv(p, din, stride):
        w_taps = jnp.transpose(p['w'], (2, 3, 4, 1, 0)).reshape(27, C, C)
        s_op, dout = _conv_spatial_op(din, 3, stride, 1)
        dense = jnp.einsum('tio,tcd->icod', jnp.asarray(s_op), w_taps)
        dense = dense.reshape(din ** 3 * C, dout ** 3 * C).astype(jnp.bfloat16)
        scale = jnp.tile(p['scale'], dout ** 3).reshape(1, -1).astype(jnp.float32)
        shift = jnp.tile(p['shift'], dout ** 3).reshape(1, -1).astype(jnp.float32)
        return dense, scale, shift

    def dense_deconv(wt, din):
        cin, cout = wt.shape[0], wt.shape[1]
        w_taps = jnp.transpose(wt, (2, 3, 4, 0, 1)).reshape(64, cin, cout)
        s_op, dout = _deconv_spatial_op(din)
        dense = jnp.einsum('tio,tcd->icod', jnp.asarray(s_op), w_taps)
        return dense.reshape(din ** 3 * cin, dout ** 3 * cout).astype(jnp.bfloat16), dout

    wc2, s2, b2 = dense_conv(P['conv2'], 8, 2)
    wc21, s21, b21 = dense_conv(P['conv2_1'], 4, 1)
    wc3, s3, b3 = dense_conv(P['conv3'], 4, 2)
    wc31, s31, b31 = dense_conv(P['conv3_1'], 2, 1)
    res_w, res_s, res_b = [], [], []
    for name in ('resconv_1', 'resconv_2', 'resconv_3', 'resconv_4', 'resconv_5'):
        wd, sd, bd = dense_conv(P[name], 2, 1)
        res_w.append(wd); res_s.append(sd); res_b.append(bd)
    wd2, dout2 = dense_deconv(P['deconv2']['w'], 2)
    bd2 = jnp.tile(P['deconv2']['b'], dout2 ** 3).reshape(1, -1).astype(jnp.float32)
    wd1a, dout1 = dense_deconv(P['deconv1']['w'][:C], 4)   # out_conv2 channel block
    wd1b, _ = dense_deconv(P['deconv1']['w'][C:], 4)       # out_deconv2 channel block
    bd1 = jnp.tile(P['deconv1']['b'], dout1 ** 3).reshape(1, -1).astype(jnp.float32)
    prep['deep'] = dict(
        wc2=wc2, s2=s2, b2=b2, wc21=wc21, s21=s21, b21=b21,
        wc3=wc3, s3=s3, b3=b3, wc31=wc31, s31=s31, b31=b31,
        wres=jnp.stack(res_w, 0), sres=jnp.stack(res_s, 0), bres=jnp.stack(res_b, 0),
        wd2=wd2, bd2=bd2, wd1a=wd1a, wd1b=wd1b, bd1=bd1)

    # sub-pixel phase weights for deconv0: phase (pd,ph,pw), tap (td,th,tw) uses
    # kernel index 3 - phase - 2*tap along each dim.
    wt0 = P['deconv0']['w']                                # (2C, C, 4, 4, 4)
    cin0 = wt0.shape[0]
    wph = []
    for pd in range(2):
        for ph in range(2):
            for pw in range(2):
                taps = [wt0[:, :, 3 - pd - 2 * td, 3 - ph - 2 * th, 3 - pw - 2 * tw]
                        for td in range(2) for th in range(2) for tw in range(2)]
                wk = jnp.stack(taps, 0).reshape(8 * cin0, C)   # K order (td,th,tw,ci)
                wph.append(wk.T)
    prep['deconv0'] = dict(
        wph=jnp.stack(wph, 0).astype(jnp.bfloat16),            # (8, C, 8*2C)
        bias=P['deconv0']['b'].reshape(C, 1).astype(jnp.float32))
    return prep


# ----------------------------------------------------------------------------
# Full forward pass
# ----------------------------------------------------------------------------
def u_net_forward(x_ncdhw, prep):
    x = jnp.transpose(x_ncdhw, (0, 2, 3, 4, 1))            # NCDHW -> NDHWC
    n, c = x.shape[0], x.shape[-1]

    # conv1: 16^3 -> 8^3 (im2col GEMM with fused BN + LeakyReLU)
    p1, (_, d1, _, _) = im2col_t(x.astype(jnp.bfloat16), 3, 2, 1)
    c1 = prep['conv1']
    oc1_t = gemm_t(c1['wT'], p1, c1['scale'], c1['shift'], act=True)      # (C, N*8^3)
    out_conv1 = oc1_t.reshape(c, n, d1, d1, d1).transpose(1, 2, 3, 4, 0)  # (N,8,8,8,C)

    # fused deep stage: conv2 ... deconv1 (all 4^3 / 2^3 layers in one kernel)
    out_deconv1 = deep_stage(out_conv1, prep['deep']).reshape(n, d1, d1, d1, c)

    # deconv0: 8^3 -> 16^3 via sub-pixel phase decomposition (+bias+LeakyReLU)
    concat1 = jnp.concatenate([out_conv1, out_deconv1], axis=-1)          # (N,8,8,8,2C)
    pp = phase_patches(concat1.astype(jnp.bfloat16))                      # (8, 8*2C, N*8^3)
    dz = prep['deconv0']
    od0 = deconv_phase(pp, dz['wph'], dz['bias'])                         # (8, C, N*8^3)
    out_deconv0 = od0.reshape(2, 2, 2, c, n, d1, d1, d1)
    out_deconv0 = out_deconv0.transpose(4, 5, 0, 6, 1, 7, 2, 3)
    out_deconv0 = out_deconv0.reshape(n, 2 * d1, 2 * d1, 2 * d1, c)       # (N,16,16,16,C)

    # output_layer0: Conv3d(2C -> C, k=3, s=1, p=1, bias=True), no activation
    concat0 = jnp.concatenate([x, out_deconv0], axis=-1)                  # (N,16,16,16,2C)
    p0, (_, ds, _, _) = im2col_t(concat0.astype(jnp.bfloat16), 3, 1, 1)
    o = prep['out']
    out_t = gemm_t(o['wT'], p0, o['scale'], o['shift'], act=False)        # (C, N*16^3)
    return out_t.reshape(c, n, ds, ds, ds).transpose(1, 0, 2, 3, 4)       # NCDHW


# ----------------------------------------------------------------------------
if __name__ == "__main__":
    # U_net(input_channels=4, output_channels=4, kernel_size=3, dropout_rate=0.0)
    # Dropout / BatchNorm are eval-mode (identity / folded running stats).
    N, C, S, K = 2, 4, 16, 3
    key = jax.random.PRNGKey(0)
    kx, kp = jax.random.split(key)
    x = jax.random.normal(kx, (N, C, S, S, S), jnp.float32)   # NCDHW 5-D input
    params = init_params(kp, C, K)
    prep = prepare_params(params)          # one-time weight folding (outside jit)

    fwd = jax.jit(u_net_forward)
    out = jax.block_until_ready(fwd(x, prep))

    assert out.shape == (N, C, S, S, S), out.shape
    assert bool(jnp.all(jnp.isfinite(out)))
    print("KERNEL_OK")
</pallas_src>

<mosaic_0001>
module attributes {stable_mosaic.version = 11 : i64} {
  func.func @_gemm_t_kernel(%arg0: i32, %arg1: memref<4x108xbf16, #tpu.memory_space<vmem>>, %arg2: memref<108x512xbf16, #tpu.memory_space<vmem>>, %arg3: memref<4x1xf32, #tpu.memory_space<vmem>>, %arg4: memref<4x1xf32, #tpu.memory_space<vmem>>, %arg5: memref<4x512xf32, #tpu.memory_space<vmem>>) attributes {dimension_semantics = [#tpu.dimension_semantics<parallel>], iteration_bounds = array<i64: 2>, scalar_prefetch = 0 : i64, scratch_operands = 0 : i64, tpu.core_type = #tpu.core_type<tc>, window_params = [{pipeline_mode = #tpu.pipeline_mode<synchronous>, transform_indices = @transform_0, window_bounds = array<i64: 4, 108>}, {transform_indices = @transform_1, window_bounds = array<i64: 108, 512>}, {pipeline_mode = #tpu.pipeline_mode<synchronous>, transform_indices = @transform_2, window_bounds = array<i64: 4, 1>}, {pipeline_mode = #tpu.pipeline_mode<synchronous>, transform_indices = @transform_3, window_bounds = array<i64: 4, 1>}, {transform_indices = @transform_4, window_bounds = array<i64: 4, 512>}]} {
    %c0 = arith.constant 0 : index
    %c0_0 = arith.constant 0 : index
    %0 = vector.load %arg1[%c0, %c0_0] : memref<4x108xbf16, #tpu.memory_space<vmem>>, vector<4x108xbf16>
    %c0_1 = arith.constant 0 : index
    %c0_2 = arith.constant 0 : index
    %1 = vector.load %arg2[%c0_1, %c0_2] : memref<108x512xbf16, #tpu.memory_space<vmem>>, vector<108x512xbf16>
    %cst = arith.constant dense<0.000000e+00> : vector<4x512xf32>
    %2 = tpu.matmul %0, %1, %cst {dimension_numbers = #tpu.dot_dimension_numbers<[1], [0], [0], [1], [0, 0, 1, 1], [], []>} : vector<4x108xbf16>, vector<108x512xbf16>, vector<4x512xf32> -> vector<4x512xf32>
    %c0_3 = arith.constant 0 : index
    %c0_4 = arith.constant 0 : index
    %3 = vector.load %arg3[%c0_3, %c0_4] : memref<4x1xf32, #tpu.memory_space<vmem>>, vector<4x1xf32>
    %4 = vector.broadcast %3 : vector<4x1xf32> to vector<4x512xf32>
    %5 = arith.mulf %2, %4 : vector<4x512xf32>
    %c0_5 = arith.constant 0 : index
    %c0_6 = arith.constant 0 : index
    %6 = vector.load %arg4[%c0_5, %c0_6] : memref<4x1xf32, #tpu.memory_space<vmem>>, vector<4x1xf32>
    %7 = vector.broadcast %6 : vector<4x1xf32> to vector<4x512xf32>
    %8 = arith.addf %5, %7 : vector<4x512xf32>
    %cst_7 = arith.constant 0.000000e+00 : f32
    %9 = vector.broadcast %cst_7 : f32 to vector<4x512xf32>
    %10 = arith.cmpf oge, %8, %9 : vector<4x512xf32>
    %cst_8 = arith.constant 1.000000e-01 : f32
    %11 = vector.broadcast %cst_8 : f32 to vector<4x512xf32>
    %12 = arith.mulf %11, %8 : vector<4x512xf32>
    %13 = arith.select %10, %8, %12 : vector<4x512xi1>, vector<4x512xf32>
    %c0_9 = arith.constant 0 : index
    %c0_10 = arith.constant 0 : index
    %14 = vector.load %arg5[%c0_9, %c0_10] : memref<4x512xf32, #tpu.memory_space<vmem>>, vector<4x512xf32>
    tpu.vector_store %arg5[%c0_9, %c0_10], %13 {strides = array<i32>} : memref<4x512xf32, #tpu.memory_space<vmem>>, vector<4x512xf32>,
    return
  }
  func.func @transform_0(%arg0: i32) -> (i32, i32) {
    %c0_i32 = arith.constant 0 : i32
    %c0_i32_0 = arith.constant 0 : i32
    %c0_i32_1 = arith.constant 0 : i32
    return %c0_i32, %c0_i32_0 : i32, i32
  }
  func.func @transform_1(%arg0: i32) -> (i32, i32) {
    %c0_i32 = arith.constant 0 : i32
    %c0_i32_0 = arith.constant 0 : i32
    return %c0_i32, %arg0 : i32, i32
  }
  func.func @transform_2(%arg0: i32) -> (i32, i32) {
    %c0_i32 = arith.constant 0 : i32
    %c0_i32_0 = arith.constant 0 : i32
    %c0_i32_1 = arith.constant 0 : i32
    return %c0_i32, %c0_i32_0 : i32, i32
  }
  func.func @transform_3(%arg0: i32) -> (i32, i32) {
    %c0_i32 = arith.constant 0 : i32
    %c0_i32_0 = arith.constant 0 : i32
    %c0_i32_1 = arith.constant 0 : i32
    return %c0_i32, %c0_i32_0 : i32, i32
  }
  func.func @transform_4(%arg0: i32) -> (i32, i32) {
    %c0_i32 = arith.constant 0 : i32
    %c0_i32_0 = arith.constant 0 : i32
    return %c0_i32, %arg0 : i32, i32
  }
}

module attributes {stable_mosaic.version = 11 : i64} {
  func.func @_deep_stage_kernel(%arg0: memref<2x2048xbf16, #tpu.memory_space<vmem>>, %arg1: memref<2048x256xbf16, #tpu.memory_space<vmem>>, %arg2: memref<1x256xf32, #tpu.memory_space<vmem>>, %arg3: memref<1x256xf32, #tpu.memory_space<vmem>>, %arg4: memref<256x256xbf16, #tpu.memory_space<vmem>>, %arg5: memref<1x256xf32, #tpu.memory_space<vmem>>, %arg6: memref<1x256xf32, #tpu.memory_space<vmem>>, %arg7: memref<256x32xbf16, #tpu.memory_space<vmem>>, %arg8: memref<1x32xf32, #tpu.memory_space<vmem>>, %arg9: memref<1x32xf32, #tpu.memory_space<vmem>>, %arg10: memref<32x32xbf16, #tpu.memory_space<vmem>>, %arg11: memref<1x32xf32, #tpu.memory_space<vmem>>, %arg12: memref<1x32xf32, #tpu.memory_space<vmem>>, %arg13: memref<5x32x32xbf16, #tpu.memory_space<vmem>>, %arg14: memref<5x1x32xf32, #tpu.memory_space<vmem>>, %arg15: memref<5x1x32xf32, #tpu.memory_space<vmem>>, %arg16: memref<32x256xbf16, #tpu.memory_space<vmem>>, %arg17: memref<1x256xf32, #tpu.memory_space<vmem>>, %arg18: memref<256x2048xbf16, #tpu.memory_space<vmem>>, %arg19: memref<256x2048xbf16, #tpu.memory_space<vmem>>, %arg20: memref<1x2048xf32, #tpu.memory_space<vmem>>, %arg21: memref<2x2048xf32, #tpu.memory_space<vmem>>) attributes {dimension_semantics = [], scalar_prefetch = 0 : i64, scratch_operands = 0 : i64, tpu.core_type = #tpu.core_type<tc>} {
    %c0 = arith.constant 0 : index
    %c0_0 = arith.constant 0 : index
    %0 = vector.load %arg0[%c0, %c0_0] : memref<2x2048xbf16, #tpu.memory_space<vmem>>, vector<2x2048xbf16>
    %c0_1 = arith.constant 0 : index
    %c0_2 = arith.constant 0 : index
    %1 = vector.load %arg1[%c0_1, %c0_2] : memref<2048x256xbf16, #tpu.memory_space<vmem>>, vector<2048x256xbf16>
    %cst = arith.constant dense<0.000000e+00> : vector<2x256xf32>
    %2 = tpu.matmul %0, %1, %cst {dimension_numbers = #tpu.dot_dimension_numbers<[1], [0], [0], [1], [0, 0, 1, 1], [], []>} : vector<2x2048xbf16>, vector<2048x256xbf16>, vector<2x256xf32> -> vector<2x256xf32>
    %c0_3 = arith.constant 0 : index
    %c0_4 = arith.constant 0 : index
    %3 = vector.load %arg2[%c0_3, %c0_4] : memref<1x256xf32, #tpu.memory_space<vmem>>, vector<1x256xf32>
    %4 = vector.broadcast %3 : vector<1x256xf32> to vector<2x256xf32>
    %5 = arith.mulf %2, %4 : vector<2x256xf32>
    %c0_5 = arith.constant 0 : index
    %c0_6 = arith.constant 0 : index
    %6 = vector.load %arg3[%c0_5, %c0_6] : memref<1x256xf32, #tpu.memory_space<vmem>>, vector<1x256xf32>
    %7 = vector.broadcast %6 : vector<1x256xf32> to vector<2x256xf32>
    %8 = arith.addf %5, %7 : vector<2x256xf32>
    %cst_7 = arith.constant 0.000000e+00 : f32
    %9 = vector.broadcast %cst_7 : f32 to vector<2x256xf32>
    %10 = arith.cmpf oge, %8, %9 : vector<2x256xf32>
    %cst_8 = arith.constant 1.000000e-01 : f32
    %11 = vector.broadcast %cst_8 : f32 to vector<2x256xf32>
    %12 = arith.mulf %11, %8 : vector<2x256xf32>
    %13 = arith.select %10, %8, %12 : vector<2x256xi1>, vector<2x256xf32>
    %14 = arith.truncf %13 : vector<2x256xf32> to vector<2x256xbf16>
    %c0_9 = arith.constant 0 : index
    %c0_10 = arith.constant 0 : index
    %15 = vector.load %arg4[%c0_9, %c0_10] : memref<256x256xbf16, #tpu.memory_space<vmem>>, vector<256x256xbf16>
    %cst_11 = arith.constant dense<0.000000e+00> : vector<2x256xf32>
    %16 = tpu.matmul %14, %15, %cst_11 {dimension_numbers = #tpu.dot_dimension_numbers<[1], [0], [0], [1], [0, 0, 1, 1], [], []>} : vector<2x256xbf16>, vector<256x256xbf16>, vector<2x256xf32> -> vector<2x256xf32>
    %c0_12 = arith.constant 0 : index
    %c0_13 = arith.constant 0 : index
    %17 = vector.load %arg5[%c0_12, %c0_13] : memref<1x256xf32, #tpu.memory_space<vmem>>, vector<1x256xf32>
    %18 = vector.broadcast %17 : vector<1x256xf32> to vector<2x256xf32>
    %19 = arith.mulf %16, %18 : vector<2x256xf32>
    %c0_14 = arith.constant 0 : index
    %c0_15 = arith.constant 0 : index
    %20 = vector.load %arg6[%c0_14, %c0_15] : memref<1x256xf32, #tpu.memory_space<vmem>>, vector<1x256xf32>
    %21 = vector.broadcast %20 : vector<1x256xf32> to vector<2x256xf32>
    %22 = arith.addf %19, %21 : vector<2x256xf32>
    %cst_16 = arith.constant 0.000000e+00 : f32
    %23 = vector.broadcast %cst_16 : f32 to vector<2x256xf32>
    %24 = arith.cmpf oge, %22, %23 : vector<2x256xf32>
    %cst_17 = arith.constant 1.000000e-01 : f32
    %25 = vector.broadcast %cst_17 : f32 to vector<2x256xf32>
    %26 = arith.mulf %25, %22 : vector<2x256xf32>
    %27 = arith.select %24, %22, %26 : vector<2x256xi1>, vector<2x256xf32>
    %28 = arith.truncf %27 : vector<2x256xf32> to vector<2x256xbf16>
    %c0_18 = arith.constant 0 : index
    %c0_19 = arith.constant 0 : index
    %29 = vector.load %arg7[%c0_18, %c0_19] : memref<256x32xbf16, #tpu.memory_space<vmem>>, vector<256x32xbf16>
    %cst_20 = arith.constant dense<0.000000e+00> : vector<2x32xf32>
    %30 = tpu.matmul %28, %29, %cst_20 {dimension_numbers = #tpu.dot_dimension_numbers<[1], [0], [0], [1], [0, 0, 1, 1], [], []>} : vector<2x256xbf16>, vector<256x32xbf16>, vector<2x32xf32> -> vector<2x32xf32>
    %c0_21 = arith.constant 0 : index
    %c0_22 = arith.constant 0 : index
    %31 = vector.load %arg8[%c0_21, %c0_22] : memref<1x32xf32, #tpu.memory_space<vmem>>, vector<1x32xf32>
    %32 = vector.broadcast %31 : vector<1x32xf32> to vector<2x32xf32>
    %33 = arith.mulf %30, %32 : vector<2x32xf32>
    %c0_23 = arith.constant 0 : index
    %c0_24 = arith.constant 0 : index
    %34 = vector.load %arg9[%c0_23, %c0_24] : memref<1x32xf32, #tpu.memory_space<vmem>>, vector<1x32xf32>
    %35 = vector.broadcast %34 : vector<1x32xf32> to vector<2x32xf32>
    %36 = arith.addf %33, %35 : vector<2x32xf32>
    %cst_25 = arith.constant 0.000000e+00 : f32
    %37 = vector.broadcast %cst_25 : f32 to vector<2x32xf32>
    %38 = arith.cmpf oge, %36, %37 : vector<2x32xf32>
    %cst_26 = arith.constant 1.000000e-01 : f32
    %39 = vector.broadcast %cst_26 : f32 to vector<2x32xf32>
    %40 = arith.mulf %39, %36 : vector<2x32xf32>
    %41 = arith.select %38, %36, %40 : vector<2x32xi1>, vector<2x32xf32>
    %42 = arith.truncf %41 : vector<2x32xf32> to vector<2x32xbf16>
    %c0_27 = arith.constant 0 : index
    %c0_28 = arith.constant 0 : index
    %43 = vector.load %arg10[%c0_27, %c0_28] : memref<32x32xbf16, #tpu.memory_space<vmem>>, vector<32x32xbf16>
    %cst_29 = arith.constant dense<0.000000e+00> : vector<2x32xf32>
    %44 = tpu.matmul %42, %43, %cst_29 {dimension_numbers = #tpu.dot_dimension_numbers<[1], [0], [0], [1], [0, 0, 1, 1], [], []>} : vector<2x32xbf16>, vector<32x32xbf16>, vector<2x32xf32> -> vector<2x32xf32>
    %c0_30 = arith.constant 0 : index
    %c0_31 = arith.constant 0 : index
    %45 = vector.load %arg11[%c0_30, %c0_31] : memref<1x32xf32, #tpu.memory_space<vmem>>, vector<1x32xf32>
    %46 = vector.broadcast %45 : vector<1x32xf32> to vector<2x32xf32>
    %47 = arith.mulf %44, %46 : vector<2x32xf32>
    %c0_32 = arith.constant 0 : index
    %c0_33 = arith.constant 0 : index
    %48 = vector.load %arg12[%c0_32, %c0_33] : memref<1x32xf32, #tpu.memory_space<vmem>>, vector<1x32xf32>
    %49 = vector.broadcast %48 : vector<1x32xf32> to vector<2x32xf32>
    %50 = arith.addf %47, %49 : vector<2x32xf32>
    %cst_34 = arith.constant 0.000000e+00 : f32
    %51 = vector.broadcast %cst_34 : f32 to vector<2x32xf32>
    %52 = arith.cmpf oge, %50, %51 : vector<2x32xf32>
    %cst_35 = arith.constant 1.000000e-01 : f32
    %53 = vector.broadcast %cst_35 : f32 to vector<2x32xf32>
    %54 = arith.mulf %53, %50 : vector<2x32xf32>
    %55 = arith.select %52, %50, %54 : vector<2x32xi1>, vector<2x32xf32>
    %56 = arith.truncf %55 : vector<2x32xf32> to vector<2x32xbf16>
    %c0_36 = arith.constant 0 : index
    %c0_37 = arith.constant 0 : index
    %c0_38 = arith.constant 0 : index
    %57 = vector.load %arg13[%c0_36, %c0_37, %c0_38] : memref<5x32x32xbf16, #tpu.memory_space<vmem>>, vector<1x32x32xbf16>
    %58 = vector.shape_cast %57 : vector<1x32x32xbf16> to vector<32x32xbf16>
    %cst_39 = arith.constant dense<0.000000e+00> : vector<2x32xf32>
    %59 = tpu.matmul %56, %58, %cst_39 {dimension_numbers = #tpu.dot_dimension_numbers<[1], [0], [0], [1], [0, 0, 1, 1], [], []>} : vector<2x32xbf16>, vector<32x32xbf16>, vector<2x32xf32> -> vector<2x32xf32>
    %c0_40 = arith.constant 0 : index
    %c0_41 = arith.constant 0 : index
    %c0_42 = arith.constant 0 : index
    %60 = vector.load %arg14[%c0_40, %c0_41, %c0_42] : memref<5x1x32xf32, #tpu.memory_space<vmem>>, vector<1x1x32xf32>
    %61 = vector.shape_cast %60 : vector<1x1x32xf32> to vector<1x32xf32>
    %62 = vector.broadcast %61 : vector<1x32xf32> to vector<2x32xf32>
    %63 = arith.mulf %59, %62 : vector<2x32xf32>
    %c0_43 = arith.constant 0 : index
    %c0_44 = arith.constant 0 : index
    %c0_45 = arith.constant 0 : index
    %64 = vector.load %arg15[%c0_43, %c0_44, %c0_45] : memref<5x1x32xf32, #tpu.memory_space<vmem>>, vector<1x1x32xf32>
    %65 = vector.shape_cast %64 : vector<1x1x32xf32> to vector<1x32xf32>
    %66 = vector.broadcast %65 : vector<1x32xf32> to vector<2x32xf32>
    %67 = arith.addf %63, %66 : vector<2x32xf32>
    %cst_46 = arith.constant 0.000000e+00 : f32
    %68 = vector.broadcast %cst_46 : f32 to vector<2x32xf32>
    %69 = arith.cmpf oge, %67, %68 : vector<2x32xf32>
    %cst_47 = arith.constant 1.000000e-01 : f32
    %70 = vector.broadcast %cst_47 : f32 to vector<2x32xf32>
    %71 = arith.mulf %70, %67 : vector<2x32xf32>
    %72 = arith.select %69, %67, %71 : vector<2x32xi1>, vector<2x32xf32>
    %73 = arith.addf %72, %55 : vector<2x32xf32>
    %cst_48 = arith.constant 0.000000e+00 : f32
    %74 = vector.broadcast %cst_48 : f32 to vector<2x32xf32>
    %75 = arith.maximumf %73, %74 : vector<2x32xf32>
    %76 = arith.truncf %75 : vector<2x32xf32> to vector<2x32xbf16>
    %c1 = arith.constant 1 : index
    %c0_49 = arith.constant 0 : index
    %c0_50 = arith.constant 0 : index
    %77 = vector.load %arg13[%c1, %c0_49, %c0_50] : memref<5x32x32xbf16, #tpu.memory_space<vmem>>, vector<1x32x32xbf16>
    %78 = vector.shape_cast %77 : vector<1x32x32xbf16> to vector<32x32xbf16>
    %cst_51 = arith.constant dense<0.000000e+00> : vector<2x32xf32>
    %79 = tpu.matmul %76, %78, %cst_51 {dimension_numbers = #tpu.dot_dimension_numbers<[1], [0], [0], [1], [0, 0, 1, 1], [], []>} : vector<2x32xbf16>, vector<32x32xbf16>, vector<2x32xf32> -> vector<2x32xf32>
    %c1_52 = arith.constant 1 : index
    %c0_53 = arith.constant 0 : index
    %c0_54 = arith.constant 0 : index
    %80 = vector.load %arg14[%c1_52, %c0_53, %c0_54] : memref<5x1x32xf32, #tpu.memory_space<vmem>>, vector<1x1x32xf32>
    %81 = vector.shape_cast %80 : vector<1x1x32xf32> to vector<1x32xf32>
    %82 = vector.broadcast %81 : vector<1x32xf32> to vector<2x32xf32>
    %83 = arith.mulf %79, %82 : vector<2x32xf32>
    %c1_55 = arith.constant 1 : index
    %c0_56 = arith.constant 0 : index
    %c0_57 = arith.constant 0 : index
    %84 = vector.load %arg15[%c1_55, %c0_56, %c0_57] : memref<5x1x32xf32, #tpu.memory_space<vmem>>, vector<1x1x32xf32>
    %85 = vector.shape_cast %84 : vector<1x1x32xf32> to vector<1x32xf32>
    %86 = vector.broadcast %85 : vector<1x32xf32> to vector<2x32xf32>
    %87 = arith.addf %83, %86 : vector<2x32xf32>
    %cst_58 = arith.constant 0.000000e+00 : f32
    %88 = vector.broadcast %cst_58 : f32 to vector<2x32xf32>
    %89 = arith.cmpf oge, %87, %88 : vector<2x32xf32>
    %cst_59 = arith.constant 1.000000e-01 : f32
    %90 = vector.broadcast %cst_59 : f32 to vector<2x32xf32>
    %91 = arith.mulf %90, %87 : vector<2x32xf32>
    %92 = arith.select %89, %87, %91 : vector<2x32xi1>, vector<2x32xf32>
    %93 = arith.addf %92, %75 : vector<2x32xf32>
    %cst_60 = arith.constant 0.000000e+00 : f32
    %94 = vector.broadcast %cst_60 : f32 to vector<2x32xf32>
    %95 = arith.maximumf %93, %94 : vector<2x32xf32>
    %96 = arith.truncf %95 : vector<2x32xf32> to vector<2x32xbf16>
    %c2 = arith.constant 2 : index
    %c0_61 = arith.constant 0 : index
    %c0_62 = arith.constant 0 : index
    %97 = vector.load %arg13[%c2, %c0_61, %c0_62] : memref<5x32x32xbf16, #tpu.memory_space<vmem>>, vector<1x32x32xbf16>
    %98 = vector.shape_cast %97 : vector<1x32x32xbf16> to vector<32x32xbf16>
    %cst_63 = arith.constant dense<0.000000e+00> : vector<2x32xf32>
    %99 = tpu.matmul %96, %98, %cst_63 {dimension_numbers = #tpu.dot_dimension_numbers<[1], [0], [0], [1], [0, 0, 1, 1], [], []>} : vector<2x32xbf16>, vector<32x32xbf16>, vector<2x32xf32> -> vector<2x32xf32>
    %c2_64 = arith.constant 2 : index
    %c0_65 = arith.constant 0 : index
    %c0_66 = arith.constant 0 : index
    %100 = vector.load %arg14[%c2_64, %c0_65, %c0_66] : memref<5x1x32xf32, #tpu.memory_space<vmem>>, vector<1x1x32xf32>
    %101 = vector.shape_cast %100 : vector<1x1x32xf32> to vector<1x32xf32>
    %102 = vector.broadcast %101 : vector<1x32xf32> to vector<2x32xf32>
    %103 = arith.mulf %99, %102 : vector<2x32xf32>
    %c2_67 = arith.constant 2 : index
    %c0_68 = arith.constant 0 : index
    %c0_69 = arith.constant 0 : index
    %104 = vector.load %arg15[%c2_67, %c0_68, %c0_69] : memref<5x1x32xf32, #tpu.memory_space<vmem>>, vector<1x1x32xf32>
    %105 = vector.shape_cast %104 : vector<1x1x32xf32> to vector<1x32xf32>
    %106 = vector.broadcast %105 : vector<1x32xf32> to vector<2x32xf32>
    %107 = arith.addf %103, %106 : vector<2x32xf32>
    %cst_70 = arith.constant 0.000000e+00 : f32
    %108 = vector.broadcast %cst_70 : f32 to vector<2x32xf32>
    %109 = arith.cmpf oge, %107, %108 : vector<2x32xf32>
    %cst_71 = arith.constant 1.000000e-01 : f32
    %110 = vector.broadcast %cst_71 : f32 to vector<2x32xf32>
    %111 = arith.mulf %110, %107 : vector<2x32xf32>
    %112 = arith.select %109, %107, %111 : vector<2x32xi1>, vector<2x32xf32>
    %113 = arith.addf %112, %95 : vector<2x32xf32>
    %cst_72 = arith.constant 0.000000e+00 : f32
    %114 = vector.broadcast %cst_72 : f32 to vector<2x32xf32>
    %115 = arith.maximumf %113, %114 : vector<2x32xf32>
    %116 = arith.truncf %115 : vector<2x32xf32> to vector<2x32xbf16>
    %c3 = arith.constant 3 : index
    %c0_73 = arith.constant 0 : index
    %c0_74 = arith.constant 0 : index
    %117 = vector.load %arg13[%c3, %c0_73, %c0_74] : memref<5x32x32xbf16, #tpu.memory_space<vmem>>, vector<1x32x32xbf16>
    %118 = vector.shape_cast %117 : vector<1x32x32xbf16> to vector<32x32xbf16>
    %cst_75 = arith.constant dense<0.000000e+00> : vector<2x32xf32>
    %119 = tpu.matmul %116, %118, %cst_75 {dimension_numbers = #tpu.dot_dimension_numbers<[1], [0], [0], [1], [0, 0, 1, 1], [], []>} : vector<2x32xbf16>, vector<32x32xbf16>, vector<2x32xf32> -> vector<2x32xf32>
    %c3_76 = arith.constant 3 : index
    %c0_77 = arith.constant 0 : index
    %c0_78 = arith.constant 0 : index
    %120 = vector.load %arg14[%c3_76, %c0_77, %c0_78] : memref<5x1x32xf32, #tpu.memory_space<vmem>>, vector<1x1x32xf32>
    %121 = vector.shape_cast %120 : vector<1x1x32xf32> to vector<1x32xf32>
    %122 = vector.broadcast %121 : vector<1x32xf32> to vector<2x32xf32>
    %123 = arith.mulf %119, %122 : vector<2x32xf32>
    %c3_79 = arith.constant 3 : index
    %c0_80 = arith.constant 0 : index
    %c0_81 = arith.constant 0 : index
    %124 = vector.load %arg15[%c3_79, %c0_80, %c0_81] : memref<5x1x32xf32, #tpu.memory_space<vmem>>, vector<1x1x32xf32>
    %125 = vector.shape_cast %124 : vector<1x1x32xf32> to vector<1x32xf32>
    %126 = vector.broadcast %125 : vector<1x32xf32> to vector<2x32xf32>
    %127 = arith.addf %123, %126 : vector<2x32xf32>
    %cst_82 = arith.constant 0.000000e+00 : f32
    %128 = vector.broadcast %cst_82 : f32 to vector<2x32xf32>
    %129 = arith.cmpf oge, %127, %128 : vector<2x32xf32>
    %cst_83 = arith.constant 1.000000e-01 : f32
    %130 = vector.broadcast %cst_83 : f32 to vector<2x32xf32>
    %131 = arith.mulf %130, %127 : vector<2x32xf32>
    %132 = arith.select %129, %127, %131 : vector<2x32xi1>, vector<2x32xf32>
    %133 = arith.addf %132, %115 : vector<2x32xf32>
    %cst_84 = arith.constant 0.000000e+00 : f32
    %134 = vector.broadcast %cst_84 : f32 to vector<2x32xf32>
    %135 = arith.maximumf %133, %134 : vector<2x32xf32>
    %136 = arith.truncf %135 : vector<2x32xf32> to vector<2x32xbf16>
    %c4 = arith.constant 4 : index
    %c0_85 = arith.constant 0 : index
    %c0_86 = arith.constant 0 : index
    %137 = vector.load %arg13[%c4, %c0_85, %c0_86] : memref<5x32x32xbf16, #tpu.memory_space<vmem>>, vector<1x32x32xbf16>
    %138 = vector.shape_cast %137 : vector<1x32x32xbf16> to vector<32x32xbf16>
    %cst_87 = arith.constant dense<0.000000e+00> : vector<2x32xf32>
    %139 = tpu.matmul %136, %138, %cst_87 {dimension_numbers = #tpu.dot_dimension_numbers<[1], [0], [0], [1], [0, 0, 1, 1], [], []>} : vector<2x32xbf16>, vector<32x32xbf16>, vector<2x32xf32> -> vector<2x32xf32>
    %c4_88 = arith.constant 4 : index
    %c0_89 = arith.constant 0 : index
    %c0_90 = arith.constant 0 : index
    %140 = vector.load %arg14[%c4_88, %c0_89, %c0_90] : memref<5x1x32xf32, #tpu.memory_space<vmem>>, vector<1x1x32xf32>
    %141 = vector.shape_cast %140 : vector<1x1x32xf32> to vector<1x32xf32>
    %142 = vector.broadcast %141 : vector<1x32xf32> to vector<2x32xf32>
    %143 = arith.mulf %139, %142 : vector<2x32xf32>
    %c4_91 = arith.constant 4 : index
    %c0_92 = arith.constant 0 : index
    %c0_93 = arith.constant 0 : index
    %144 = vector.load %arg15[%c4_91, %c0_92, %c0_93] : memref<5x1x32xf32, #tpu.memory_space<vmem>>, vector<1x1x32xf32>
    %145 = vector.shape_cast %144 : vector<1x1x32xf32> to vector<1x32xf32>
    %146 = vector.broadcast %145 : vector<1x32xf32> to vector<2x32xf32>
    %147 = arith.addf %143, %146 : vector<2x32xf32>
    %cst_94 = arith.constant 0.000000e+00 : f32
    %148 = vector.broadcast %cst_94 : f32 to vector<2x32xf32>
    %149 = arith.cmpf oge, %147, %148 : vector<2x32xf32>
    %cst_95 = arith.constant 1.000000e-01 : f32
    %150 = vector.broadcast %cst_95 : f32 to vector<2x32xf32>
    %151 = arith.mulf %150, %147 : vector<2x32xf32>
    %152 = arith.select %149, %147, %151 : vector<2x32xi1>, vector<2x32xf32>
    %153 = arith.addf %152, %135 : vector<2x32xf32>
    %cst_96 = arith.constant 0.000000e+00 : f32
    %154 = vector.broadcast %cst_96 : f32 to vector<2x32xf32>
    %155 = arith.maximumf %153, %154 : vector<2x32xf32>
    %156 = arith.truncf %155 : vector<2x32xf32> to vector<2x32xbf16>
    %c0_97 = arith.constant 0 : index
    %c0_98 = arith.constant 0 : index
    %157 = vector.load %arg16[%c0_97, %c0_98] : memref<32x256xbf16, #tpu.memory_space<vmem>>, vector<32x256xbf16>
    %cst_99 = arith.constant dense<0.000000e+00> : vector<2x256xf32>
    %158 = tpu.matmul %156, %157, %cst_99 {dimension_numbers = #tpu.dot_dimension_numbers<[1], [0], [0], [1], [0, 0, 1, 1], [], []>} : vector<2x32xbf16>, vector<32x256xbf16>, vector<2x256xf32> -> vector<2x256xf32>
    %c0_100 = arith.constant 0 : index
    %c0_101 = arith.constant 0 : index
    %159 = vector.load %arg17[%c0_100, %c0_101] : memref<1x256xf32, #tpu.memory_space<vmem>>, vector<1x256xf32>
    %160 = vector.broadcast %159 : vector<1x256xf32> to vector<2x256xf32>
    %161 = arith.addf %158, %160 : vector<2x256xf32>
    %cst_102 = arith.constant 0.000000e+00 : f32
    %162 = vector.broadcast %cst_102 : f32 to vector<2x256xf32>
    %163 = arith.cmpf oge, %161, %162 : vector<2x256xf32>
    %cst_103 = arith.constant 1.000000e-01 : f32
    %164 = vector.broadcast %cst_103 : f32 to vector<2x256xf32>
    %165 = arith.mulf %164, %161 : vector<2x256xf32>
    %166 = arith.select %163, %161, %165 : vector<2x256xi1>, vector<2x256xf32>
    %167 = arith.truncf %27 : vector<2x256xf32> to vector<2x256xbf16>
    %c0_104 = arith.constant 0 : index
    %c0_105 = arith.constant 0 : index
    %168 = vector.load %arg18[%c0_104, %c0_105] : memref<256x2048xbf16, #tpu.memory_space<vmem>>, vector<256x2048xbf16>
    %cst_106 = arith.constant dense<0.000000e+00> : vector<2x2048xf32>
    %169 = tpu.matmul %167, %168, %cst_106 {dimension_numbers = #tpu.dot_dimension_numbers<[1], [0], [0], [1], [0, 0, 1, 1], [], []>} : vector<2x256xbf16>, vector<256x2048xbf16>, vector<2x2048xf32> -> vector<2x2048xf32>
    %170 = arith.truncf %166 : vector<2x256xf32> to vector<2x256xbf16>
    %c0_107 = arith.constant 0 : index
    %c0_108 = arith.constant 0 : index
    %171 = vector.load %arg19[%c0_107, %c0_108] : memref<256x2048xbf16, #tpu.memory_space<vmem>>, vector<256x2048xbf16>
    %cst_109 = arith.constant dense<0.000000e+00> : vector<2x2048xf32>
    %172 = tpu.matmul %170, %171, %cst_109 {dimension_numbers = #tpu.dot_dimension_numbers<[1], [0], [0], [1], [0, 0, 1, 1], [], []>} : vector<2x256xbf16>, vector<256x2048xbf16>, vector<2x2048xf32> -> vector<2x2048xf32>
    %173 = arith.addf %169, %172 : vector<2x2048xf32>
    %c0_110 = arith.constant 0 : index
    %c0_111 = arith.constant 0 : index
    %174 = vector.load %arg20[%c0_110, %c0_111] : memref<1x2048xf32, #tpu.memory_space<vmem>>, vector<1x2048xf32>
    %175 = vector.broadcast %174 : vector<1x2048xf32> to vector<2x2048xf32>
    %176 = arith.addf %173, %175 : vector<2x2048xf32>
    %cst_112 = arith.constant 0.000000e+00 : f32
    %177 = vector.broadcast %cst_112 : f32 to vector<2x2048xf32>
    %178 = arith.cmpf oge, %176, %177 : vector<2x2048xf32>
    %cst_113 = arith.constant 1.000000e-01 : f32
    %179 = vector.broadcast %cst_113 : f32 to vector<2x2048xf32>
    %180 = arith.mulf %179, %176 : vector<2x2048xf32>
    %181 = arith.select %178, %176, %180 : vector<2x2048xi1>, vector<2x2048xf32>
    %c0_114 = arith.constant 0 : index
    %c0_115 = arith.constant 0 : index
    %182 = vector.load %arg21[%c0_114, %c0_115] : memref<2x2048xf32, #tpu.memory_space<vmem>>, vector<2x2048xf32>
    tpu.vector_store %arg21[%c0_114, %c0_115], %181 {strides = array<i32>} : memref<2x2048xf32, #tpu.memory_space<vmem>>, vector<2x2048xf32>,
    return
  }
}

module attributes {stable_mosaic.version = 11 : i64} {
  func.func @_deconv_phase_kernel(%arg0: i32, %arg1: memref<1x4x64xbf16, #tpu.memory_space<vmem>>, %arg2: memref<1x64x1024xbf16, #tpu.memory_space<vmem>>, %arg3: memref<4x1xf32, #tpu.memory_space<vmem>>, %arg4: memref<1x4x1024xf32, #tpu.memory_space<vmem>>) attributes {dimension_semantics = [#tpu.dimension_semantics<parallel>], iteration_bounds = array<i64: 8>, scalar_prefetch = 0 : i64, scratch_operands = 0 : i64, tpu.core_type = #tpu.core_type<tc>, window_params = [{transform_indices = @transform_0, window_bounds = array<i64: 1, 4, 64>}, {transform_indices = @transform_1, window_bounds = array<i64: 1, 64, 1024>}, {pipeline_mode = #tpu.pipeline_mode<synchronous>, transform_indices = @transform_2, window_bounds = array<i64: 4, 1>}, {transform_indices = @transform_3, window_bounds = array<i64: 1, 4, 1024>}]} {
    %c0 = arith.constant 0 : index
    %c0_0 = arith.constant 0 : index
    %c0_1 = arith.constant 0 : index
    %0 = vector.load %arg1[%c0, %c0_0, %c0_1] : memref<1x4x64xbf16, #tpu.memory_space<vmem>>, vector<1x4x64xbf16>
    %1 = vector.shape_cast %0 : vector<1x4x64xbf16> to vector<4x64xbf16>
    %c0_2 = arith.constant 0 : index
    %c0_3 = arith.constant 0 : index
    %c0_4 = arith.constant 0 : index
    %2 = vector.load %arg2[%c0_2, %c0_3, %c0_4] : memref<1x64x1024xbf16, #tpu.memory_space<vmem>>, vector<1x64x1024xbf16>
    %3 = vector.shape_cast %2 : vector<1x64x1024xbf16> to vector<64x1024xbf16>
    %cst = arith.constant dense<0.000000e+00> : vector<4x1024xf32>
    %4 = tpu.matmul %1, %3, %cst {dimension_numbers = #tpu.dot_dimension_numbers<[1], [0], [0], [1], [0, 0, 1, 1], [], []>} : vector<4x64xbf16>, vector<64x1024xbf16>, vector<4x1024xf32> -> vector<4x1024xf32>
    %c0_5 = arith.constant 0 : index
    %c0_6 = arith.constant 0 : index
    %5 = vector.load %arg3[%c0_5, %c0_6] : memref<4x1xf32, #tpu.memory_space<vmem>>, vector<4x1xf32>
    %6 = vector.broadcast %5 : vector<4x1xf32> to vector<4x1024xf32>
    %7 = arith.addf %4, %6 : vector<4x1024xf32>
    %cst_7 = arith.constant 0.000000e+00 : f32
    %8 = vector.broadcast %cst_7 : f32 to vector<4x1024xf32>
    %9 = arith.cmpf oge, %7, %8 : vector<4x1024xf32>
    %cst_8 = arith.constant 1.000000e-01 : f32
    %10 = vector.broadcast %cst_8 : f32 to vector<4x1024xf32>
    %11 = arith.mulf %10, %7 : vector<4x1024xf32>
    %12 = arith.select %9, %7, %11 : vector<4x1024xi1>, vector<4x1024xf32>
    %c0_9 = arith.constant 0 : index
    %c0_10 = arith.constant 0 : index
    %c0_11 = arith.constant 0 : index
    %13 = vector.load %arg4[%c0_9, %c0_10, %c0_11] : memref<1x4x1024xf32, #tpu.memory_space<vmem>>, vector<1x4x1024xf32>
    %14 = vector.shape_cast %13 : vector<1x4x1024xf32> to vector<4x1024xf32>
    %15 = vector.shape_cast %12 : vector<4x1024xf32> to vector<1x4x1024xf32>
    tpu.vector_store %arg4[%c0_9, %c0_10, %c0_11], %15 {strides = array<i32>} : memref<1x4x1024xf32, #tpu.memory_space<vmem>>, vector<1x4x1024xf32>,
    return
  }
  func.func @transform_0(%arg0: i32) -> (i32, i32, i32) {
    %c0_i32 = arith.constant 0 : i32
    %c0_i32_0 = arith.constant 0 : i32
    %c0_i32_1 = arith.constant 0 : i32
    return %arg0, %c0_i32, %c0_i32_0 : i32, i32, i32
  }
  func.func @transform_1(%arg0: i32) -> (i32, i32, i32) {
    %c0_i32 = arith.constant 0 : i32
    %c0_i32_0 = arith.constant 0 : i32
    %c0_i32_1 = arith.constant 0 : i32
    return %arg0, %c0_i32, %c0_i32_0 : i32, i32, i32
  }
  func.func @transform_2(%arg0: i32) -> (i32, i32) {
    %c0_i32 = arith.constant 0 : i32
    %c0_i32_0 = arith.constant 0 : i32
    %c0_i32_1 = arith.constant 0 : i32
    return %c0_i32, %c0_i32_0 : i32, i32
  }
  func.func @transform_3(%arg0: i32) -> (i32, i32, i32) {
    %c0_i32 = arith.constant 0 : i32
    %c0_i32_0 = arith.constant 0 : i32
    %c0_i32_1 = arith.constant 0 : i32
    return %arg0, %c0_i32, %c0_i32_0 : i32, i32, i32
  }
}

module attributes {stable_mosaic.version = 11 : i64} {
  func.func @_gemm_t_kernel(%arg0: i32, %arg1: memref<4x216xbf16, #tpu.memory_space<vmem>>, %arg2: memref<216x2048xbf16, #tpu.memory_space<vmem>>, %arg3: memref<4x1xf32, #tpu.memory_space<vmem>>, %arg4: memref<4x1xf32, #tpu.memory_space<vmem>>, %arg5: memref<4x2048xf32, #tpu.memory_space<vmem>>) attributes {dimension_semantics = [#tpu.dimension_semantics<parallel>], iteration_bounds = array<i64: 4>, scalar_prefetch = 0 : i64, scratch_operands = 0 : i64, tpu.core_type = #tpu.core_type<tc>, window_params = [{pipeline_mode = #tpu.pipeline_mode<synchronous>, transform_indices = @transform_0, window_bounds = array<i64: 4, 216>}, {transform_indices = @transform_1, window_bounds = array<i64: 216, 2048>}, {pipeline_mode = #tpu.pipeline_mode<synchronous>, transform_indices = @transform_2, window_bounds = array<i64: 4, 1>}, {pipeline_mode = #tpu.pipeline_mode<synchronous>, transform_indices = @transform_3, window_bounds = array<i64: 4, 1>}, {transform_indices = @transform_4, window_bounds = array<i64: 4, 2048>}]} {
    %c0 = arith.constant 0 : index
    %c0_0 = arith.constant 0 : index
    %0 = vector.load %arg1[%c0, %c0_0] : memref<4x216xbf16, #tpu.memory_space<vmem>>, vector<4x216xbf16>
    %c0_1 = arith.constant 0 : index
    %c0_2 = arith.constant 0 : index
    %1 = vector.load %arg2[%c0_1, %c0_2] : memref<216x2048xbf16, #tpu.memory_space<vmem>>, vector<216x2048xbf16>
    %cst = arith.constant dense<0.000000e+00> : vector<4x2048xf32>
    %2 = tpu.matmul %0, %1, %cst {dimension_numbers = #tpu.dot_dimension_numbers<[1], [0], [0], [1], [0, 0, 1, 1], [], []>} : vector<4x216xbf16>, vector<216x2048xbf16>, vector<4x2048xf32> -> vector<4x2048xf32>
    %c0_3 = arith.constant 0 : index
    %c0_4 = arith.constant 0 : index
    %3 = vector.load %arg3[%c0_3, %c0_4] : memref<4x1xf32, #tpu.memory_space<vmem>>, vector<4x1xf32>
    %4 = vector.broadcast %3 : vector<4x1xf32> to vector<4x2048xf32>
    %5 = arith.mulf %2, %4 : vector<4x2048xf32>
    %c0_5 = arith.constant 0 : index
    %c0_6 = arith.constant 0 : index
    %6 = vector.load %arg4[%c0_5, %c0_6] : memref<4x1xf32, #tpu.memory_space<vmem>>, vector<4x1xf32>
    %7 = vector.broadcast %6 : vector<4x1xf32> to vector<4x2048xf32>
    %8 = arith.addf %5, %7 : vector<4x2048xf32>
    %c0_7 = arith.constant 0 : index
    %c0_8 = arith.constant 0 : index
    %9 = vector.load %arg5[%c0_7, %c0_8] : memref<4x2048xf32, #tpu.memory_space<vmem>>, vector<4x2048xf32>
    tpu.vector_store %arg5[%c0_7, %c0_8], %8 {strides = array<i32>} : memref<4x2048xf32, #tpu.memory_space<vmem>>, vector<4x2048xf32>,
    return
  }
  func.func @transform_0(%arg0: i32) -> (i32, i32) {
    %c0_i32 = arith.constant 0 : i32
    %c0_i32_0 = arith.constant 0 : i32
    %c0_i32_1 = arith.constant 0 : i32
    return %c0_i32, %c0_i32_0 : i32, i32
  }
  func.func @transform_1(%arg0: i32) -> (i32, i32) {
    %c0_i32 = arith.constant 0 : i32
    %c0_i32_0 = arith.constant 0 : i32
    return %c0_i32, %arg0 : i32, i32
  }
  func.func @transform_2(%arg0: i32) -> (i32, i32) {
    %c0_i32 = arith.constant 0 : i32
    %c0_i32_0 = arith.constant 0 : i32
    %c0_i32_1 = arith.constant 0 : i32
    return %c0_i32, %c0_i32_0 : i32, i32
  }
  func.func @transform_3(%arg0: i32) -> (i32, i32) {
    %c0_i32 = arith.constant 0 : i32
    %c0_i32_0 = arith.constant 0 : i32
    %c0_i32_1 = arith.constant 0 : i32
    return %c0_i32, %c0_i32_0 : i32, i32
  }
  func.func @transform_4(%arg0: i32) -> (i32, i32) {
    %c0_i32 = arith.constant 0 : i32
    %c0_i32_0 = arith.constant 0 : i32
    return %c0_i32, %arg0 : i32, i32
  }
}

</mosaic_0001>

<bundles_post_ra>
// kernel: u_net_forward.4
= control target key start
LH: loop header
LB: loop body
LE: loop exit
PB: predicated region body
PF: predicated region fallthrough
CT: control target
= control target key end

     0   :  { %s850_s15 = smov 0   ;;  %s852_s16 = smov 0   ;;  %s1035_s0 = inlined_call_operand.vmem [shape: bf16[4,108], index: 0, kind: input, shape index: {}]   ;;  %s1036_s1 = inlined_call_operand.vmem [shape: bf16[108,1024], index: 1, kind: input, shape index: {}]   ;;  %s1037_s2 = inlined_call_operand.vmem [shape: f32[4,1], index: 2, kind: input, shape index: {}]   ;;  %s1038_s3 = inlined_call_operand.vmem [shape: f32[4,1], index: 3, kind: input, shape index: {}]   ;;  %s1039_s4 = inlined_call_operand.vmem [shape: f32[4,1024], index: 4, kind: output, shape index: {}]  }
   0x1   :  { %s854_s17 = smov 0  }
   0x2 LB: > { %s616_s18 = sadd.s32 4294967295, %s822_s17   ;;  %s867_s19 = sadd.s32 1, %s822_s17   ;;  %s822_s17 = sphi %s854_s17, %s1042_s17   ;;  %s818_s16 = sphi %s852_s16, %s1041_s16   ;;  %s814_s15 = sphi %s850_s15, %s1040_s15  }
   0x3   : > { %s39_s20 = ssub.s32 %s822_s17, %s867_s19  ;;  %s42_s21 = sadd.s32 1, %s818_s16 }
   0x4   : > { %p40_p0 = scmp.eq.s32.totalorder %s39_s20, 0  ;;  %p49_p1 = scmp.ne.s32.totalorder %s818_s16, %s814_s15 }
   0x5   : > { %p50_p2 = scmp.eq.s32.totalorder %s822_s17, 0  ;;  %p619_p4 = scmp.ge.s32.totalorder %s822_s17, 2 }
   0x6   : > { %s876_s22 = scalar_select %p40_p0, %s818_s16, %s42_s21  }
   0x7   : > { %p51_p3 = por %p50_p2, %p49_p1  ;;  %152 = sbr.rel (%p619_p4) target bundleno = 44 (0x2c), region = 28 }
   0xc   : > { %155 = sbr.rel (!%p51_p3) target bundleno = 44 (0x2c), region = 32  ;;  %s157_s23 = sand.u32 (%p51_p3), 1, %s818_s16  }
   0xd   : > { %s743_s24 = sshll.u32 (%p51_p3), %s822_s17, 4  ;;  %s772_s25 = smul.u32 (%p51_p3), 224, %s157_s23 }
   0xe   : > { %s884_s28 = scalar_lea.vmem (%p51_p3), %s1036_s1, %s743_s24 }
   0xf   : > { %v175_v0 = vld [vmem:[%s884_s28] sm:$0xff] (%p51_p3)  ;;  %v177_v1 = vld [vmem:[%s884_s28 + $0x8] sm:$0xff] (%p51_p3)  ;;  %s889_s29 = scalar_lea.vmem (%p51_p3), [#allocation2], %s772_s25 }
  0x10   : > { %v179_v2 = vld [vmem:[%s884_s28 + $0x20] sm:$0xff] (%p51_p3)  ;;  %176 = vst [vmem:[%s889_s29] sm:$0xff] (%p51_p3), %v175_v0  ;;  %v181_v3 = vld [vmem:[%s884_s28 + $0x28] sm:$0xff] (%p51_p3) }
  0x11   : > { %178 = vst [vmem:[%s889_s29 + $0x8] sm:$0xff] %v177_v1  ;;  %v183_v4 = vld [vmem:[%s884_s28 + $0x40] sm:$0xff]  ;;  %v185_v5 = vld [vmem:[%s884_s28 + $0x48] sm:$0xff] }
  0x12   : > { %180 = vst [vmem:[%s889_s29 + $0x10] sm:$0xff] %v179_v2  ;;  %v187_v6 = vld [vmem:[%s884_s28 + $0x60] sm:$0xff]  ;;  %v189_v7 = vld [vmem:[%s884_s28 + $0x68] sm:$0xff] }
  0x13   : > { %182 = vst [vmem:[%s889_s29 + $0x18] sm:$0xff] %v181_v3  ;;  %v191_v8 = vld [vmem:[%s884_s28 + $0x80] sm:$0xff]  ;;  %v193_v9 = vld [vmem:[%s884_s28 + $0x88] sm:$0xff] }
  0x14   : > { %184 = vst [vmem:[%s889_s29 + $0x20] sm:$0xff] %v183_v4  ;;  %v195_v10 = vld [vmem:[%s884_s28 + $0xa0] sm:$0xff]  ;;  %v197_v11 = vld [vmem:[%s884_s28 + $0xa8] sm:$0xff] }
  0x15   : > { %186 = vst [vmem:[%s889_s29 + $0x28] sm:$0xff] %v185_v5  ;;  %v199_v12 = vld [vmem:[%s884_s28 + $0xc0] sm:$0xff]  ;;  %v201_v13 = vld [vmem:[%s884_s28 + $0xc8] sm:$0xff] }
  0x16   : > { %188 = vst [vmem:[%s889_s29 + $0x30] sm:$0xff] %v187_v6  ;;  %v203_v14 = vld [vmem:[%s884_s28 + $0xe0] sm:$0xff]  ;;  %v205_v15 = vld [vmem:[%s884_s28 + $0xe8] sm:$0xff] }
  0x17   : > { %190 = vst [vmem:[%s889_s29 + $0x38] sm:$0xff] %v189_v7  ;;  %v207_v16 = vld [vmem:[%s884_s28 + $0x100] sm:$0xff]  ;;  %v209_v17 = vld [vmem:[%s884_s28 + $0x108] sm:$0xff] }
  0x18   : > { %192 = vst [vmem:[%s889_s29 + $0x40] sm:$0xff] %v191_v8  ;;  %v211_v18 = vld [vmem:[%s884_s28 + $0x120] sm:$0xff]  ;;  %v213_v19 = vld [vmem:[%s884_s28 + $0x128] sm:$0xff] }
  0x19   : > { %194 = vst [vmem:[%s889_s29 + $0x48] sm:$0xff] %v193_v9  ;;  %v215_v20 = vld [vmem:[%s884_s28 + $0x140] sm:$0xff]  ;;  %v217_v21 = vld [vmem:[%s884_s28 + $0x148] sm:$0xff] }
  0x1a   : > { %196 = vst [vmem:[%s889_s29 + $0x50] sm:$0xff] %v195_v10  ;;  %v219_v22 = vld [vmem:[%s884_s28 + $0x160] sm:$0xff]  ;;  %v221_v23 = vld [vmem:[%s884_s28 + $0x168] sm:$0xff] }
  0x1b   : > { %198 = vst [vmem:[%s889_s29 + $0x58] sm:$0xff] %v197_v11  ;;  %v223_v24 = vld [vmem:[%s884_s28 + $0x180] sm:$0xff]  ;;  %v225_v25 = vld [vmem:[%s884_s28 + $0x188] sm:$0xff] }
  0x1c   : > { %200 = vst [vmem:[%s889_s29 + $0x60] sm:$0xff] %v199_v12  ;;  %v227_v26 = vld [vmem:[%s884_s28 + $0x1a0] sm:$0xff]  ;;  %v229_v27 = vld [vmem:[%s884_s28 + $0x1a8] sm:$0xff] }
  0x1d   : > { %202 = vst [vmem:[%s889_s29 + $0x68] sm:$0xff] %v201_v13 }
  0x1e   : > { %204 = vst [vmem:[%s889_s29 + $0x70] sm:$0xff] %v203_v14 }
  0x1f   : > { %206 = vst [vmem:[%s889_s29 + $0x78] sm:$0xff] %v205_v15 }
  0x20   : > { %208 = vst [vmem:[%s889_s29 + $0x80] sm:$0xff] %v207_v16 }
  0x21   : > { %210 = vst [vmem:[%s889_s29 + $0x88] sm:$0xff] %v209_v17 }
  0x22   : > { %212 = vst [vmem:[%s889_s29 + $0x90] sm:$0xff] %v211_v18 }
  0x23   : > { %214 = vst [vmem:[%s889_s29 + $0x98] sm:$0xff] %v213_v19 }
  0x24   : > { %216 = vst [vmem:[%s889_s29 + $0xa0] sm:$0xff] %v215_v20 }
  0x25   : > { %218 = vst [vmem:[%s889_s29 + $0xa8] sm:$0xff] %v217_v21 }
  0x26   : > { %220 = vst [vmem:[%s889_s29 + $0xb0] sm:$0xff] %v219_v22 }
  0x27   : > { %222 = vst [vmem:[%s889_s29 + $0xb8] sm:$0xff] %v221_v23 }
  0x28   : > { %224 = vst [vmem:[%s889_s29 + $0xc0] sm:$0xff] %v223_v24 }
  0x29   : > { %226 = vst [vmem:[%s889_s29 + $0xc8] sm:$0xff] %v225_v25 }
  0x2a   : > { %228 = vst [vmem:[%s889_s29 + $0xd0] sm:$0xff] %v227_v26 }
  0x2b   : > { %230 = vst [vmem:[%s889_s29 + $0xd8] sm:$0xff] %v229_v27 }
  0x2c PF: > { %p622_p5 = scmp.ge.s32.totalorder %s822_s17, 1  ;;  %p235_p6 = scmp.lt.s32.totalorder %s822_s17, 3 }
  0x2e   : > { %p236_p7 = pnand %p622_p5, %p235_p6 }
  0x2f   : > { %s242_s30 = sand.u32 (!%p236_p7), 1, %s814_s15   ;;  %s623_s13 = sshll.u32 (!%p236_p7), %s616_s18, 2 }
  0x30   : > { %239 = sbr.rel (%p236_p7) target bundleno = 229 (0xe5), region = 55  ;;  %p269_p8 = scmp.lt.s32.totalorder (!%p236_p7), %s623_s13, 7 }
  0x31   : > { %s773_s5 = smul.u32 (!%p236_p7), 224, %s242_s30 }
  0x33   : > { %s947_s6 = scalar_lea.vmem (!%p236_p7), [#allocation2], %s773_s5 }
  0x35   : > { %vm444_vm0 = vcmask 1045504   ;;  %v723_v28 = vld [vmem:[%s947_s6 + $0xc0] sm:$0xf]  ;;  %v770_v29 = vld [vmem:[%s947_s6 + $0xcc] sm:$0x30]  ;;  %v824_v49 = vmov 0  }
  0x36   : > { %v768_v30 = vld [vmem:[%s947_s6 + $0xc4] sm:$0xf]  ;;  %v724_v31 = vor.u32 %v770_v29, %v723_v28  ;;  %v725_v32 = vld [vmem:[%s947_s6 + $0xd0] sm:$0x30]  ;;  %v731_v33 = vld [vmem:[%s947_s6 + $0xc8] sm:$0xf]  ;;  %799 = vset.pattern.permute.xlu0 %v824_v49 }
  0x37   : > { %v771_v34 = vld [vmem:[%s947_s6 + $0xd4] sm:$0x30]  ;;  %v728_v35 = vor.u32 %v768_v30, %v725_v32  ;;  %v769_v37 = vld [vmem:[%s947_s6 + $0xcc] sm:$0xf]  ;;  %v733_v38 = vld [vmem:[%s947_s6 + $0xd8] sm:$0x30] }
  0x38   : > { %v732_v36 = vor.u32 %v771_v34, %v731_v33  ;;  %v707_v39 = vld [vmem:[%s947_s6 + $0xa0] sm:$0xf]  ;;  %v446_v40 = vsel %vm444_vm0, %v724_v31, 0  ;;  %v736_v41 = vor.u32 %v769_v37, %v733_v38  ;;  %v766_v42 = vld [vmem:[%s947_s6 + $0xac] sm:$0xf0]  ;;  %vm440_vm1 = vcmask 883712  }
  0x39   : > { %v764_v43 = vld [vmem:[%s947_s6 + $0xa4] sm:$0xf]  ;;  %458 = vmatpush.bf16.msra.mxu0 %v446_v40  ;;  %v449_v44 = vsel %vm444_vm0, %v728_v35, 0  ;;  %v708_v46 = vor.u32 %v766_v42, %v707_v39  ;;  %v709_v47 = vld [vmem:[%s947_s6 + $0xb0] sm:$0xf0]  ;;  %s1044_s13 = smov (!%p269_p8, %s623_s13), 7 }
  0x3a   : > { %v452_v45 = vsel %vm444_vm0, %v732_v36, 0  ;;  %v715_v48 = vld [vmem:[%s947_s6 + $0xa8] sm:$0xf]  ;;  %471 = vmatpush.bf16.msra.mxu1 %v449_v44  ;;  %v455_v50 = vsel %vm444_vm0, %v736_v41, 0  ;;  %v712_v51 = vor.u32 %v764_v43, %v709_v47  ;;  %v767_v52 = vld [vmem:[%s947_s6 + $0xb4] sm:$0xf0] }
  0x3b   : > { %484 = vmatpush.bf16.msra.mxu2 %v452_v45  ;;  %v765_v53 = vld [vmem:[%s947_s6 + $0xac] sm:$0xf]  ;;  %497 = vmatpush.bf16.msra.mxu3 %v455_v50  ;;  %v716_v54 = vor.u32 %v767_v52, %v715_v48  ;;  %v717_v55 = vld [vmem:[%s947_s6 + $0xb8] sm:$0xf0]  ;;  %v691_v56 = vld [vmem:[%s947_s6 + $0x80] sm:$0xf] }
  0x3c   : > { %v762_v57 = vld [vmem:[%s947_s6 + $0x8c] sm:$0xf0]  ;;  %v720_v58 = vor.u32 %v765_v53, %v717_v55  ;;  %v760_v59 = vld [vmem:[%s947_s6 + $0x84] sm:$0xf]  ;;  %v693_v60 = vld [vmem:[%s947_s6 + $0x90] sm:$0xf0] }
  0x3d   : > { %v699_v61 = vld [vmem:[%s947_s6 + $0x88] sm:$0xf]  ;;  %459 = vmatpush.bf16.msra.mxu0 %v708_v46  ;;  %v692_v62 = vor.u32 %v762_v57, %v691_v56  ;;  %v763_v63 = vld [vmem:[%s947_s6 + $0x94] sm:$0xf0]  ;;  %v761_v0 = vld [vmem:[%s947_s6 + $0x8c] sm:$0xf]  ;;  %v696_v2 = vor.u32 %v760_v59, %v693_v60 }
  0x3e   : > { %v701_v1 = vld [vmem:[%s947_s6 + $0x98] sm:$0xf0]  ;;  %472 = vmatpush.bf16.msra.mxu1 %v712_v51  ;;  %v700_v3 = vor.u32 %v763_v63, %v699_v61  ;;  %v675_v4 = vld [vmem:[%s947_s6 + $0x60] sm:$0xf]  ;;  %v758_v5 = vld [vmem:[%s947_s6 + $0x6c] sm:$0xf0] }
  0x3f   : > { %485 = vmatpush.bf16.msra.mxu2 %v716_v54  ;;  %v756_v6 = vld [vmem:[%s947_s6 + $0x64] sm:$0xf]  ;;  %498 = vmatpush.bf16.msra.mxu3 %v720_v58  ;;  %v704_v7 = vor.u32 %v761_v0, %v701_v1  ;;  %v677_v8 = vld [vmem:[%s947_s6 + $0x70] sm:$0xf0]  ;;  %v683_v9 = vld [vmem:[%s947_s6 + $0x68] sm:$0xf]  ;;  %v676_v13 = vor.u32 %v758_v5, %v675_v4 }
  0x40   : > { %v759_v10 = vld [vmem:[%s947_s6 + $0x74] sm:$0xf0]  ;;  %v757_v11 = vld [vmem:[%s947_s6 + $0x6c] sm:$0xf]  ;;  %v685_v12 = vld [vmem:[%s947_s6 + $0x78] sm:$0xf0]  ;;  %v680_v14 = vor.u32 %v756_v6, %v677_v8 }
  0x41   : > { %460 = vmatpush.bf16.msra.mxu0 %v692_v62  ;;  %v684_v15 = vor.u32 %v759_v10, %v683_v9  ;;  %v659_v16 = vld [vmem:[%s947_s6 + $0x40] sm:$0xf]  ;;  %v754_v17 = vld [vmem:[%s947_s6 + $0x4c] sm:$0xf0]  ;;  %v752_v18 = vld [vmem:[%s947_s6 + $0x44] sm:$0xf]  ;;  %v688_v19 = vor.u32 %v757_v11, %v685_v12 }
  0x42   : > { %473 = vmatpush.bf16.msra.mxu1 %v696_v2  ;;  %v661_v20 = vld [vmem:[%s947_s6 + $0x50] sm:$0xf0]  ;;  %v667_v21 = vld [vmem:[%s947_s6 + $0x48] sm:$0xf]  ;;  %v755_v22 = vld [vmem:[%s947_s6 + $0x54] sm:$0xf0]  ;;  %v660_v25 = vor.u32 %v754_v17, %v659_v16 }
  0x43   : > { %486 = vmatpush.bf16.msra.mxu2 %v700_v3  ;;  %499 = vmatpush.bf16.msra.mxu3 %v704_v7  ;;  %v753_v23 = vld [vmem:[%s947_s6 + $0x4c] sm:$0xf]  ;;  %v669_v24 = vld [vmem:[%s947_s6 + $0x58] sm:$0xf0]  ;;  %v664_v26 = vor.u32 %v752_v18, %v661_v20  ;;  %v668_v27 = vor.u32 %v755_v22, %v667_v21  ;;  %v643_v28 = vld [vmem:[%s947_s6 + $0x20] sm:$0xf] }
  0x44   : > { %v750_v29 = vld [vmem:[%s947_s6 + $0x2c] sm:$0xf0]  ;;  %v748_v30 = vld [vmem:[%s947_s6 + $0x24] sm:$0xf]  ;;  %v672_v31 = vor.u32 %v753_v23, %v669_v24  ;;  %v645_v32 = vld [vmem:[%s947_s6 + $0x30] sm:$0xf0] }
  0x45   : > { %461 = vmatpush.bf16.msra.mxu0 %v676_v13  ;;  %v651_v33 = vld [vmem:[%s947_s6 + $0x28] sm:$0xf]  ;;  %v751_v34 = vld [vmem:[%s947_s6 + $0x34] sm:$0xf0]  ;;  %v749_v35 = vld [vmem:[%s947_s6 + $0x2c] sm:$0xf]  ;;  %v644_v38 = vor.u32 %v750_v29, %v643_v28  ;;  %v648_v39 = vor.u32 %v748_v30, %v645_v32 }
  0x46   : > { %474 = vmatpush.bf16.msra.mxu1 %v680_v14  ;;  %v653_v36 = vld [vmem:[%s947_s6 + $0x38] sm:$0xf0]  ;;  %v509_v37 = vld [vmem:[%s1037_s2] sm:$0xf]  ;;  %v652_v40 = vor.u32 %v751_v34, %v651_v33  ;;  %v746_v42 = vld [vmem:[%s947_s6 + $0xc] sm:$0xf0] }
  0x47   : > { %487 = vmatpush.bf16.msra.mxu2 %v684_v15  ;;  %500 = vmatpush.bf16.msra.mxu3 %v688_v19  ;;  %v627_v41 = vld [vmem:[%s947_s6] sm:$0xf]  ;;  %v744_v43 = vld [vmem:[%s947_s6 + $0x4] sm:$0xf]  ;;  %v656_v44 = vor.u32 %v749_v35, %v653_v36  ;;  %v629_v45 = vld [vmem:[%s947_s6 + $0x10] sm:$0xf0] }
  0x48   : > { %512 = vperm.xlu0 %799, %v509_v37   ;;  %v635_v46 = vld [vmem:[%s947_s6 + $0x8] sm:$0xf]  ;;  %v747_v47 = vld [vmem:[%s947_s6 + $0x14] sm:$0xf0]  ;;  %v745_v48 = vld [vmem:[%s947_s6 + $0xc] sm:$0xf]  ;;  %v628_v50 = vor.u32 %v746_v42, %v627_v41  ;;  %v632_v51 = vor.u32 %v744_v43, %v629_v45 }
  0x49   : > { %462 = vmatpush.bf16.msra.mxu0 %v660_v25  ;;  %v637_v49 = vld [vmem:[%s947_s6 + $0x18] sm:$0xf0]  ;;  %v636_v52 = vor.u32 %v747_v47, %v635_v46  ;;  %v519_v53 = vld [vmem:[%s1038_s3] sm:$0xf]  ;;  %s624_s14 = sshll.u32 %s1044_s13, 2  ;;  %vm547_vm4 = vcmask 1043456  }
  0x4a   : > { %475 = vmatpush.bf16.msra.mxu1 %v664_v26  ;;  %v640_v54 = vor.u32 %v745_v48, %v637_v49  ;;  %v275_v55 = vld [vmem:[%s1035_s0] sm:$0x3]  ;;  %s272_s18 = scalar_lea.vmem %s1039_s4, %s624_s14 }
  0x4b   : > { %488 = vmatpush.bf16.msra.mxu2 %v668_v27  ;;  %501 = vmatpush.bf16.msra.mxu3 %v672_v31 }
  0x4d   : > { %463 = vmatpush.bf16.msra.mxu0 %v644_v38 }
  0x4e   : > { %476 = vmatpush.bf16.msra.mxu1 %v648_v39 }
  0x4f   : > { %489 = vmatpush.bf16.msra.mxu2 %v652_v40  ;;  %502 = vmatpush.bf16.msra.mxu3 %v656_v44 }
  0x50   : > { %522 = vperm.xlu0 %799, %v519_v53  }
  0x51   : > { %464 = vmatpush.bf16.msra.mxu0 %v628_v50 }
  0x52   : > { %477 = vmatpush.bf16.msra.mxu1 %v632_v51 }
  0x53   : > { %490 = vmatpush.bf16.msra.mxu2 %v636_v52  ;;  %503 = vmatpush.bf16.msra.mxu3 %v640_v54 }
  0x54   : > { %737 = vmatmul.msk.bf16.vlgmr.msra.gmra.mxu0 %vm440_vm1, %v275_v55 }
  0x55   : > { %738 = vmatmul.msk.bf16.vlgmr.msra.gmra.mxu1 %vm440_vm1, %v275_v55 }
  0x56   : > { %739 = vmatmul.msk.bf16.vlgmr.msra.gmra.mxu2 %vm440_vm1, %v275_v55  ;;  %740 = vmatmul.msk.bf16.vlgmr.msra.gmra.mxu3 %vm440_vm1, %v275_v55 }
  0xba   : > { %v513_v56 = vpop.permute.xlu0 %512 }
  0xc2   : > { %v523_v60 = vpop.permute.xlu0 %522 }
  0xd1   : > { %v466_v57 = vpop.f32.mrf.mxu0 }
  0xd2   : > { %v515_v58 = vmul.f32 %v513_v56, %v466_v57  ;;  %v479_v59 = vpop.f32.mrf.mxu1 }
  0xd3   : > { %v516_v61 = vmul.f32 %v513_v56, %v479_v59 }
  0xd4   : > { %v525_v62 = vadd.f32 %v523_v60, %v515_v58 }
  0xd5   : > { %v526_v63 = vadd.f32 %v523_v60, %v516_v61 }
  0xd6   : > { %v533_v0 = vmul.f32 0.1, %v525_v62  ;;  %vm529_vm3 = vcmp.ge.f32.partialorder %v525_v62, 0.0 }
  0xd7   : > { %vm530_vm2 = vcmp.ge.f32.partialorder %v526_v63, 0.0  ;;  %v534_v1 = vmul.f32 0.1, %v526_v63 }
  0xd8   : > { %v537_v10 = vsel %vm529_vm3, %v525_v62, %v533_v0 }
  0xd9   : > { %v492_v2 = vpop.f32.mrf.mxu2  ;;  %v538_v3 = vsel %vm530_vm2, %v526_v63, %v534_v1  ;;  %v505_v5 = vpop.f32.mrf.mxu3 }
  0xda   : > { %v517_v4 = vmul.f32 %v513_v56, %v492_v2  ;;  %v468_v6 = vpop.f32.mrf.mxu0  ;;  %v545_v7 = vrot.slane %v538_v3, 4  ;;  %v518_v8 = vmul.f32 %v513_v56, %v505_v5  ;;  %v481_v9 = vpop.f32.mrf.mxu1 }
  0xdc   : > { %v527_v11 = vadd.f32 %v523_v60, %v517_v4  ;;  %v548_v12 = vsel %vm547_vm4, %v537_v10, %v545_v7  ;;  %v528_v13 = vadd.f32 %v523_v60, %v518_v8 }
  0xdd   : > { %552 = vst [vmem:[%s272_s18] sm:$0xff] %v548_v12 }
  0xde   : > { %v535_v14 = vmul.f32 0.1, %v527_v11  ;;  %vm532_vm5 = vcmp.ge.f32.partialorder %v528_v13, 0.0  ;;  %v536_v15 = vmul.f32 0.1, %v528_v13  ;;  %vm531_vm6 = vcmp.ge.f32.partialorder %v527_v11, 0.0 }
  0xe0   : > { %v540_v16 = vsel %vm532_vm5, %v528_v13, %v536_v15  ;;  %v539_v20 = vsel %vm531_vm6, %v527_v11, %v535_v14 }
  0xe1   : > { %v494_v17 = vpop.f32.mrf.mxu2  ;;  %v546_v18 = vrot.slane %v540_v16, 4  ;;  %v507_v19 = vpop.f32.mrf.mxu3 }
  0xe3   : > { %v549_v21 = vsel %vm547_vm4, %v539_v20, %v546_v18 }
  0xe4   : > { %553 = vst [vmem:[%s272_s18 + $0x8] sm:$0xff] %v549_v21 }
  0xe5 PF: > { %p11_p9 = scmp.ge.s32.totalorder %s867_s19, 4   ;;  %s1040_s15 = smov %s818_s16 }
  0xe6   : > { %s1041_s16 = smov %s876_s22  ;;  %s1042_s17 = smov %s867_s19 }
  0xe7   :  { %13 = sbr.rel (!%p11_p9) target bundleno = 2 (0x2), region = 94 }

// kernel: u_net_forward.5
= control target key start
LH: loop header
LB: loop body
LE: loop exit
PB: predicated region body
PF: predicated region fallthrough
CT: control target
= control target key end

     0   :  { %vm2535_vm5 = vcmask 261120   ;;  %s16508_s1 = inlined_call_operand.vmem [shape: bf16[2048,256], index: 1, kind: input, shape index: {}]   ;;  %s16509_s0 = inlined_call_operand.vmem [shape: bf16[2,2048], index: 0, kind: input, shape index: {}]   ;;  %s16510_s4 = inlined_call_operand.vmem [shape: bf16[256,256], index: 4, kind: input, shape index: {}]   ;;  %s16511_s2 = inlined_call_operand.vmem [shape: f32[1,256], index: 2, kind: input, shape index: {}]   ;;  %s16512_s3 = inlined_call_operand.vmem [shape: f32[1,256], index: 3, kind: input, shape index: {}]   ;;  %s16513_s7 = inlined_call_operand.vmem [shape: bf16[256,32], index: 7, kind: input, shape index: {}]   ;;  %s16514_s5 = inlined_call_operand.vmem [shape: f32[1,256], index: 5, kind: input, shape index: {}]   ;;  %s16515_s6 = inlined_call_operand.vmem [shape: f32[1,256], index: 6, kind: input, shape index: {}]   ;;  %s16516_s8 = inlined_call_operand.vmem [shape: f32[1,32], index: 8, kind: input, shape index: {}]   ;;  %s16517_s9 = inlined_call_operand.vmem [shape: f32[1,32], index: 9, kind: input, shape index: {}]   ;;  %s16518_s11 = inlined_call_operand.vmem [shape: f32[1,32], index: 11, kind: input, shape index: {}]   ;;  %s16519_s12 = inlined_call_operand.vmem [shape: f32[1,32], index: 12, kind: input, shape index: {}]   ;;  %s16520_s10 = inlined_call_operand.vmem [shape: bf16[32,32], index: 10, kind: input, shape index: {}]   ;;  %s16521_s14 = inlined_call_operand.vmem [shape: f32[5,1,32], index: 14, kind: input, shape index: {}]   ;;  %s16522_s15 = inlined_call_operand.vmem [shape: f32[5,1,32], index: 15, kind: input, shape index: {}]   ;;  %s16523_s13 = inlined_call_operand.vmem [shape: bf16[5,32,32], index: 13, kind: input, shape index: {}]   ;;  %s16524_s16 = inlined_call_operand.vmem [shape: bf16[32,256], index: 16, kind: input, shape index: {}]   ;;  %s16525_s19 = inlined_call_operand.vmem [shape: bf16[256,2048], index: 19, kind: input, shape index: {}]   ;;  %s16526_s17 = inlined_call_operand.vmem [shape: f32[1,256], index: 17, kind: input, shape index: {}]   ;;  %s16527_s18 = inlined_call_operand.vmem [shape: bf16[256,2048], index: 18, kind: input, shape index: {}]   ;;  %s16528_s20 = inlined_call_operand.vmem [shape: f32[1,2048], index: 20, kind: input, shape index: {}]   ;;  %s16529_s21 = inlined_call_operand.vmem [shape: f32[2,2048], index: 21, kind: output, shape index: {}]  }
   0x1   :  { %16534 = sst [smem:[#allocation2_spill]] %s16508_s1 }
   0x2   :  { %16535 = sst [smem:[#allocation3_spill]] %s16509_s0 }
   0x3   :  { %16536 = sst [smem:[#allocation4_spill]] %s16510_s4 }
   0x4   :  { %16537 = sst [smem:[#allocation5_spill]] %s16511_s2 }
   0x5   :  { %16538 = sst [smem:[#allocation6_spill]] %s16512_s3 }
   0x6   :  { %16539 = sst [smem:[#allocation7_spill]] %s16513_s7 }
   0x7   :  { %s16540_s26 = sld [smem:[#allocation2_spill]] }
   0x8   :  { %s16541_s27 = sld [smem:[#allocation3_spill]] }
   0x9   :  { %s16542_s24 = sld [smem:[#allocation4_spill]] }
   0xa   :  { %s16543_s23 = sld [smem:[#allocation5_spill]] }
   0xb   :  { %s16545_s1 = sld [smem:[#allocation7_spill]] }
   0xd   :  { %v7002_v0 = vld [vmem:[%s16540_s26 + $0x70] sm:$0xf]  ;;  %v10319_v1 = vld [vmem:[%s16540_s26 + $0x74] sm:$0xf0]  ;;  %v6994_v11 = vld [vmem:[%s16540_s26 + $0x60] sm:$0xf] }
   0xe   :  { %v7066_v2 = vld [vmem:[%s16540_s26 + $0xf0] sm:$0xf]  ;;  %v7003_v3 = vor.u32 %v10319_v1, %v7002_v0  ;;  %v10335_v4 = vld [vmem:[%s16540_s26 + $0xf4] sm:$0xf0]  ;;  %v10317_v13 = vld [vmem:[%s16540_s26 + $0x64] sm:$0xf0] }
   0xf   :  { %v7130_v5 = vld [vmem:[%s16540_s26 + $0x170] sm:$0xf]  ;;  %v10351_v6 = vld [vmem:[%s16540_s26 + $0x174] sm:$0xf0]  ;;  %v7067_v7 = vor.u32 %v10335_v4, %v7066_v2  ;;  %v7058_v14 = vld [vmem:[%s16540_s26 + $0xe0] sm:$0xf]  ;;  %v6995_v16 = vor.u32 %v10317_v13, %v6994_v11 }
  0x10   :  { %v7131_v8 = vor.u32 %v10351_v6, %v7130_v5  ;;  %v7194_v9 = vld [vmem:[%s16540_s26 + $0x1f0] sm:$0xf]  ;;  %v10367_v10 = vld [vmem:[%s16540_s26 + $0x1f4] sm:$0xf0]  ;;  %1643 = vmatpush.bf16.msra.mxu0 %v7003_v3  ;;  %v10333_v15 = vld [vmem:[%s16540_s26 + $0xe4] sm:$0xf0] }
  0x11   :  { %v7195_v12 = vor.u32 %v10367_v10, %v7194_v9  ;;  %1656 = vmatpush.bf16.msra.mxu1 %v7067_v7  ;;  %v7059_v17 = vor.u32 %v10333_v15, %v7058_v14  ;;  %v7122_v18 = vld [vmem:[%s16540_s26 + $0x160] sm:$0xf]  ;;  %v10349_v19 = vld [vmem:[%s16540_s26 + $0x164] sm:$0xf0]  ;;  %v6986_v23 = vld [vmem:[%s16540_s26 + $0x50] sm:$0xf] }
  0x12   :  { %1669 = vmatpush.bf16.msra.mxu2 %v7131_v8  ;;  %v7186_v20 = vld [vmem:[%s16540_s26 + $0x1e0] sm:$0xf]  ;;  %v7123_v21 = vor.u32 %v10349_v19, %v7122_v18  ;;  %v10365_v22 = vld [vmem:[%s16540_s26 + $0x1e4] sm:$0xf0]  ;;  %v10315_v24 = vld [vmem:[%s16540_s26 + $0x54] sm:$0xf0] }
  0x13   :  { %1682 = vmatpush.bf16.msra.mxu3 %v7195_v12  ;;  %v7187_v25 = vor.u32 %v10365_v22, %v7186_v20  ;;  %v7050_v26 = vld [vmem:[%s16540_s26 + $0xd0] sm:$0xf]  ;;  %v10331_v27 = vld [vmem:[%s16540_s26 + $0xd4] sm:$0xf0]  ;;  %v6987_v29 = vor.u32 %v10315_v24, %v6986_v23  ;;  %v6978_v35 = vld [vmem:[%s16540_s26 + $0x40] sm:$0xf] }
  0x14   :  { %v7114_v28 = vld [vmem:[%s16540_s26 + $0x150] sm:$0xf]  ;;  %1644 = vmatpush.bf16.msra.mxu0 %v6995_v16  ;;  %v10347_v30 = vld [vmem:[%s16540_s26 + $0x154] sm:$0xf0]  ;;  %v7051_v33 = vor.u32 %v10331_v27, %v7050_v26  ;;  %v10313_v36 = vld [vmem:[%s16540_s26 + $0x44] sm:$0xf0] }
  0x15   :  { %v7178_v31 = vld [vmem:[%s16540_s26 + $0x1d0] sm:$0xf]  ;;  %v10363_v32 = vld [vmem:[%s16540_s26 + $0x1d4] sm:$0xf0]  ;;  %1657 = vmatpush.bf16.msra.mxu1 %v7059_v17  ;;  %v7115_v34 = vor.u32 %v10347_v30, %v7114_v28  ;;  %v7042_v37 = vld [vmem:[%s16540_s26 + $0xc0] sm:$0xf]  ;;  %v6979_v44 = vor.u32 %v10313_v36, %v6978_v35 }
  0x16   :  { %1670 = vmatpush.bf16.msra.mxu2 %v7123_v21  ;;  %v7179_v38 = vor.u32 %v10363_v32, %v7178_v31  ;;  %v10329_v39 = vld [vmem:[%s16540_s26 + $0xc4] sm:$0xf0]  ;;  %v7106_v40 = vld [vmem:[%s16540_s26 + $0x140] sm:$0xf]  ;;  %v6970_v47 = vld [vmem:[%s16540_s26 + $0x30] sm:$0xf] }
  0x17   :  { %1683 = vmatpush.bf16.msra.mxu3 %v7187_v25  ;;  %v10345_v41 = vld [vmem:[%s16540_s26 + $0x144] sm:$0xf0]  ;;  %v7170_v42 = vld [vmem:[%s16540_s26 + $0x1c0] sm:$0xf]  ;;  %v7043_v45 = vor.u32 %v10329_v39, %v7042_v37  ;;  %v10311_v48 = vld [vmem:[%s16540_s26 + $0x34] sm:$0xf0] }
  0x18   :  { %v10361_v43 = vld [vmem:[%s16540_s26 + $0x1c4] sm:$0xf0]  ;;  %1645 = vmatpush.bf16.msra.mxu0 %v6987_v29  ;;  %v7107_v46 = vor.u32 %v10345_v41, %v7106_v40  ;;  %v7034_v49 = vld [vmem:[%s16540_s26 + $0xb0] sm:$0xf]  ;;  %v10327_v51 = vld [vmem:[%s16540_s26 + $0xb4] sm:$0xf0]  ;;  %v6971_v56 = vor.u32 %v10311_v48, %v6970_v47 }
  0x19   :  { %1658 = vmatpush.bf16.msra.mxu1 %v7051_v33  ;;  %v7171_v50 = vor.u32 %v10361_v43, %v7170_v42  ;;  %v7098_v52 = vld [vmem:[%s16540_s26 + $0x130] sm:$0xf]  ;;  %v10343_v53 = vld [vmem:[%s16540_s26 + $0x134] sm:$0xf0]  ;;  %v7035_v57 = vor.u32 %v10327_v51, %v7034_v49  ;;  %v6962_v59 = vld [vmem:[%s16540_s26 + $0x20] sm:$0xf] }
  0x1a   :  { %1671 = vmatpush.bf16.msra.mxu2 %v7115_v34  ;;  %v7162_v54 = vld [vmem:[%s16540_s26 + $0x1b0] sm:$0xf]  ;;  %v10359_v55 = vld [vmem:[%s16540_s26 + $0x1b4] sm:$0xf0]  ;;  %v7099_v58 = vor.u32 %v10343_v53, %v7098_v52  ;;  %v10309_v60 = vld [vmem:[%s16540_s26 + $0x24] sm:$0xf0] }
  0x1b   :  { %1684 = vmatpush.bf16.msra.mxu3 %v7179_v38  ;;  %v7026_v61 = vld [vmem:[%s16540_s26 + $0xa0] sm:$0xf]  ;;  %v7163_v62 = vor.u32 %v10359_v55, %v7162_v54  ;;  %v10325_v63 = vld [vmem:[%s16540_s26 + $0xa4] sm:$0xf0]  ;;  %v6963_v4 = vor.u32 %v10309_v60, %v6962_v59  ;;  %v6954_v7 = vld [vmem:[%s16540_s26 + $0x10] sm:$0xf] }
  0x1c   :  { %1646 = vmatpush.bf16.msra.mxu0 %v6979_v44  ;;  %v7090_v0 = vld [vmem:[%s16540_s26 + $0x120] sm:$0xf]  ;;  %v10341_v1 = vld [vmem:[%s16540_s26 + $0x124] sm:$0xf0]  ;;  %v7027_v5 = vor.u32 %v10325_v63, %v7026_v61  ;;  %v10307_v8 = vld [vmem:[%s16540_s26 + $0x14] sm:$0xf0] }
  0x1d   :  { %1659 = vmatpush.bf16.msra.mxu1 %v7043_v45  ;;  %v7154_v2 = vld [vmem:[%s16540_s26 + $0x1a0] sm:$0xf]  ;;  %v10357_v3 = vld [vmem:[%s16540_s26 + $0x1a4] sm:$0xf0]  ;;  %v7091_v6 = vor.u32 %v10341_v1, %v7090_v0  ;;  %v7018_v9 = vld [vmem:[%s16540_s26 + $0x90] sm:$0xf]  ;;  %v6955_v16 = vor.u32 %v10307_v8, %v6954_v7 }
  0x1e   :  { %1672 = vmatpush.bf16.msra.mxu2 %v7107_v46  ;;  %v7155_v10 = vor.u32 %v10357_v3, %v7154_v2  ;;  %v10323_v11 = vld [vmem:[%s16540_s26 + $0x94] sm:$0xf0]  ;;  %v7082_v12 = vld [vmem:[%s16540_s26 + $0x110] sm:$0xf]  ;;  %v6946_v17 = vld [vmem:[%s16540_s26] sm:$0xf] }
  0x1f   :  { %1685 = vmatpush.bf16.msra.mxu3 %v7171_v50  ;;  %v10339_v13 = vld [vmem:[%s16540_s26 + $0x114] sm:$0xf0]  ;;  %v7146_v14 = vld [vmem:[%s16540_s26 + $0x190] sm:$0xf]  ;;  %v10305_v18 = vld [vmem:[%s16540_s26 + $0x4] sm:$0xf0]  ;;  %v7019_v19 = vor.u32 %v10323_v11, %v7018_v9 }
  0x20   :  { %1647 = vmatpush.bf16.msra.mxu0 %v6971_v56  ;;  %v10355_v15 = vld [vmem:[%s16540_s26 + $0x194] sm:$0xf0]  ;;  %v7083_v20 = vor.u32 %v10339_v13, %v7082_v12  ;;  %v7010_v21 = vld [vmem:[%s16540_s26 + $0x80] sm:$0xf]  ;;  %v10321_v22 = vld [vmem:[%s16540_s26 + $0x84] sm:$0xf0]  ;;  %v6947_v31 = vor.u32 %v10305_v18, %v6946_v17 }
  0x21   :  { %1660 = vmatpush.bf16.msra.mxu1 %v7035_v57  ;;  %v7074_v23 = vld [vmem:[%s16540_s26 + $0x100] sm:$0xf]  ;;  %v7147_v24 = vor.u32 %v10355_v15, %v7146_v14  ;;  %v10337_v25 = vld [vmem:[%s16540_s26 + $0x104] sm:$0xf0]  ;;  %v7258_v28 = vld [vmem:[%s16540_s26 + $0x270] sm:$0xf]  ;;  %v7011_v35 = vor.u32 %v10321_v22, %v7010_v21 }
  0x22   :  { %1673 = vmatpush.bf16.msra.mxu2 %v7099_v58  ;;  %v7138_v26 = vld [vmem:[%s16540_s26 + $0x180] sm:$0xf]  ;;  %v10353_v27 = vld [vmem:[%s16540_s26 + $0x184] sm:$0xf0]  ;;  %v10383_v29 = vld [vmem:[%s16540_s26 + $0x274] sm:$0xf0]  ;;  %v7075_v36 = vor.u32 %v10337_v25, %v7074_v23 }
  0x23   :  { %1686 = vmatpush.bf16.msra.mxu3 %v7163_v62  ;;  %v7322_v30 = vld [vmem:[%s16540_s26 + $0x2f0] sm:$0xf]  ;;  %v10399_v32 = vld [vmem:[%s16540_s26 + $0x2f4] sm:$0xf0]  ;;  %v7139_v39 = vor.u32 %v10353_v27, %v7138_v26  ;;  %v7259_v40 = vor.u32 %v10383_v29, %v7258_v28  ;;  %v7250_v43 = vld [vmem:[%s16540_s26 + $0x260] sm:$0xf] }
  0x24   :  { %1648 = vmatpush.bf16.msra.mxu0 %v6963_v4  ;;  %v7386_v33 = vld [vmem:[%s16540_s26 + $0x370] sm:$0xf]  ;;  %v10415_v34 = vld [vmem:[%s16540_s26 + $0x374] sm:$0xf0]  ;;  %v7323_v41 = vor.u32 %v10399_v32, %v7322_v30  ;;  %v10381_v44 = vld [vmem:[%s16540_s26 + $0x264] sm:$0xf0] }
  0x25   :  { %1661 = vmatpush.bf16.msra.mxu1 %v7027_v5  ;;  %v7450_v37 = vld [vmem:[%s16540_s26 + $0x3f0] sm:$0xf]  ;;  %v10431_v38 = vld [vmem:[%s16540_s26 + $0x3f4] sm:$0xf0]  ;;  %v7387_v42 = vor.u32 %v10415_v34, %v7386_v33  ;;  %v7314_v45 = vld [vmem:[%s16540_s26 + $0x2e0] sm:$0xf]  ;;  %v7251_v52 = vor.u32 %v10381_v44, %v7250_v43 }
  0x26   :  { %1674 = vmatpush.bf16.msra.mxu2 %v7091_v6  ;;  %v7451_v46 = vor.u32 %v10431_v38, %v7450_v37  ;;  %v10397_v47 = vld [vmem:[%s16540_s26 + $0x2e4] sm:$0xf0]  ;;  %v7378_v48 = vld [vmem:[%s16540_s26 + $0x360] sm:$0xf]  ;;  %v7242_v53 = vld [vmem:[%s16540_s26 + $0x250] sm:$0xf] }
  0x27   :  { %1687 = vmatpush.bf16.msra.mxu3 %v7155_v10  ;;  %v10413_v49 = vld [vmem:[%s16540_s26 + $0x364] sm:$0xf0]  ;;  %v7442_v50 = vld [vmem:[%s16540_s26 + $0x3e0] sm:$0xf]  ;;  %v10379_v54 = vld [vmem:[%s16540_s26 + $0x254] sm:$0xf0]  ;;  %v7315_v55 = vor.u32 %v10397_v47, %v7314_v45 }
  0x28   :  { %1649 = vmatpush.bf16.msra.mxu0 %v6955_v16  ;;  %v10429_v51 = vld [vmem:[%s16540_s26 + $0x3e4] sm:$0xf0]  ;;  %v7379_v56 = vor.u32 %v10413_v49, %v7378_v48  ;;  %v7306_v57 = vld [vmem:[%s16540_s26 + $0x2d0] sm:$0xf]  ;;  %v10395_v58 = vld [vmem:[%s16540_s26 + $0x2d4] sm:$0xf0]  ;;  %v7243_v1 = vor.u32 %v10379_v54, %v7242_v53 }
  0x29   :  { %1662 = vmatpush.bf16.msra.mxu1 %v7019_v19  ;;  %v69_v59 = vld [vmem:[%s16541_s27] sm:$0xff]  ;;  %v7443_v60 = vor.u32 %v10429_v51, %v7442_v50  ;;  %v7370_v61 = vld [vmem:[%s16540_s26 + $0x350] sm:$0xf]  ;;  %v10411_v62 = vld [vmem:[%s16540_s26 + $0x354] sm:$0xf0]  ;;  %v7307_v2 = vor.u32 %v10395_v58, %v7306_v57 }
  0x2a   :  { %1675 = vmatpush.bf16.msra.mxu2 %v7083_v20  ;;  %328 = vst [vmem:[#allocation1] ss:$9 sm:$0xff] %v69_v59  ;;  %v7434_v63 = vld [vmem:[%s16540_s26 + $0x3d0] sm:$0xf]  ;;  %v10427_v0 = vld [vmem:[%s16540_s26 + $0x3d4] sm:$0xf0]  ;;  %v7371_v3 = vor.u32 %v10411_v62, %v7370_v61 }
  0x2b   :  { %1688 = vmatpush.bf16.msra.mxu3 %v7147_v24  ;;  %v7234_v4 = vld [vmem:[%s16540_s26 + $0x240] sm:$0xf]  ;;  %v10377_v5 = vld [vmem:[%s16540_s26 + $0x244] sm:$0xf0]  ;;  %v7435_v7 = vor.u32 %v10427_v0, %v7434_v63  ;;  %v7226_v13 = vld [vmem:[%s16540_s26 + $0x230] sm:$0xf] }
  0x2c   :  { %1650 = vmatpush.bf16.msra.mxu0 %v6947_v31  ;;  %v7298_v6 = vld [vmem:[%s16540_s26 + $0x2c0] sm:$0xf]  ;;  %v10393_v8 = vld [vmem:[%s16540_s26 + $0x2c4] sm:$0xf0]  ;;  %v7235_v14 = vor.u32 %v10377_v5, %v7234_v4  ;;  %v10375_v15 = vld [vmem:[%s16540_s26 + $0x234] sm:$0xf0] }
  0x2d   :  { %1663 = vmatpush.bf16.msra.mxu1 %v7011_v35  ;;  %v7362_v9 = vld [vmem:[%s16540_s26 + $0x340] sm:$0xf]  ;;  %v10409_v10 = vld [vmem:[%s16540_s26 + $0x344] sm:$0xf0]  ;;  %v7290_v16 = vld [vmem:[%s16540_s26 + $0x2b0] sm:$0xf]  ;;  %v7299_v18 = vor.u32 %v10393_v8, %v7298_v6  ;;  %v7227_v29 = vor.u32 %v10375_v15, %v7226_v13 }
  0x2e   :  { %1676 = vmatpush.bf16.msra.mxu2 %v7075_v36  ;;  %v7426_v11 = vld [vmem:[%s16540_s26 + $0x3c0] sm:$0xf]  ;;  %v10425_v12 = vld [vmem:[%s16540_s26 + $0x3c4] sm:$0xf0]  ;;  %v10391_v17 = vld [vmem:[%s16540_s26 + $0x2b4] sm:$0xf0]  ;;  %v7363_v19 = vor.u32 %v10409_v10, %v7362_v9 }
  0x2f   :  { %1689 = vmatpush.bf16.msra.mxu3 %v7139_v39  ;;  %v7427_v23 = vor.u32 %v10425_v12, %v7426_v11  ;;  %v7354_v24 = vld [vmem:[%s16540_s26 + $0x330] sm:$0xf]  ;;  %v10407_v25 = vld [vmem:[%s16540_s26 + $0x334] sm:$0xf0]  ;;  %v7291_v30 = vor.u32 %v10391_v17, %v7290_v16  ;;  %v7218_v32 = vld [vmem:[%s16540_s26 + $0x220] sm:$0xf] }
  0x30   :  { %1695 = vmatpush.bf16.msrb.mxu0 %v7259_v40  ;;  %v7418_v27 = vld [vmem:[%s16540_s26 + $0x3b0] sm:$0xf]  ;;  %v10423_v28 = vld [vmem:[%s16540_s26 + $0x3b4] sm:$0xf0]  ;;  %v7355_v31 = vor.u32 %v10407_v25, %v7354_v24  ;;  %v10373_v33 = vld [vmem:[%s16540_s26 + $0x224] sm:$0xf0] }
  0x31   :  { %1708 = vmatpush.bf16.msrb.mxu1 %v7323_v41  ;;  %v11571_v20 = vld [vmem:[#allocation1 + $0x12] sm:$0xff]  ;;  %v11573_v21 = vld [vmem:[#allocation1] sm:$0xff]  ;;  %v11584_v26 = vld [vmem:[#allocation1 + $0x9] sm:$0xff]  ;;  %v7419_v35 = vor.u32 %v10423_v28, %v7418_v27  ;;  %v7219_v41 = vor.u32 %v10373_v33, %v7218_v32 }
  0x32   :  { %1721 = vmatpush.bf16.msrb.mxu2 %v7387_v42  ;;  %v11575_v22 = vld [vmem:[#allocation1 + $0x1b] sm:$0xff]  ;;  %1651 = vmatmul.bf16.vlgmr.msra.gmra.mxu0 %v11573_v21  ;;  %v10389_v36 = vld [vmem:[%s16540_s26 + $0x2a4] sm:$0xf0]  ;;  %v7210_v42 = vld [vmem:[%s16540_s26 + $0x210] sm:$0xf] }
  0x33   :  { %1734 = vmatpush.bf16.msrb.mxu3 %v7451_v46  ;;  %1677 = vmatmul.bf16.vlgmr.msra.gmra.mxu2 %v11571_v20  ;;  %v7282_v34 = vld [vmem:[%s16540_s26 + $0x2a0] sm:$0xf]  ;;  %v10405_v38 = vld [vmem:[%s16540_s26 + $0x324] sm:$0xf0]  ;;  %v10371_v46 = vld [vmem:[%s16540_s26 + $0x214] sm:$0xf0] }
  0x34   :  { %1696 = vmatpush.bf16.msrb.mxu0 %v7251_v52  ;;  %1690 = vmatmul.bf16.vlgmr.msra.gmra.mxu3 %v11575_v22  ;;  %v7346_v37 = vld [vmem:[%s16540_s26 + $0x320] sm:$0xf]  ;;  %v10421_v40 = vld [vmem:[%s16540_s26 + $0x3a4] sm:$0xf0]  ;;  %v7283_v44 = vor.u32 %v10389_v36, %v7282_v34  ;;  %v7274_v47 = vld [vmem:[%s16540_s26 + $0x290] sm:$0xf] }
  0x35   :  { %1709 = vmatpush.bf16.msrb.mxu1 %v7315_v55  ;;  %v7410_v39 = vld [vmem:[%s16540_s26 + $0x3a0] sm:$0xf]  ;;  %v70_v43 = vld [vmem:[%s16541_s27 + $0x8] sm:$0xff]  ;;  %v7347_v45 = vor.u32 %v10405_v38, %v7346_v37  ;;  %v10387_v48 = vld [vmem:[%s16540_s26 + $0x294] sm:$0xf0]  ;;  %s16544_s27 = sld [smem:[#allocation6_spill]] }
  0x36   :  { %1722 = vmatpush.bf16.msrb.mxu2 %v7379_v56  ;;  %1664 = vmatmul.bf16.vlgmr.msra.gmra.mxu1 %v11584_v26  ;;  %v7411_v49 = vor.u32 %v10421_v40, %v7410_v39  ;;  %v7338_v50 = vld [vmem:[%s16540_s26 + $0x310] sm:$0xf]  ;;  %v10403_v51 = vld [vmem:[%s16540_s26 + $0x314] sm:$0xf0]  ;;  %v7202_v54 = vld [vmem:[%s16540_s26 + $0x200] sm:$0xf]  ;;  %v7211_v56 = vor.u32 %v10371_v46, %v7210_v42  ;;  %v7275_v62 = vor.u32 %v10387_v48, %v7274_v47 }
  0x37   :  { %1735 = vmatpush.bf16.msrb.mxu3 %v7443_v60  ;;  %v7402_v52 = vld [vmem:[%s16540_s26 + $0x390] sm:$0xf]  ;;  %v10419_v53 = vld [vmem:[%s16540_s26 + $0x394] sm:$0xf0]  ;;  %v10369_v55 = vld [vmem:[%s16540_s26 + $0x204] sm:$0xf0]  ;;  %v7339_v63 = vor.u32 %v10403_v51, %v7338_v50 }
  0x38   :  { %1697 = vmatpush.bf16.msrb.mxu0 %v7243_v1  ;;  %v7266_v57 = vld [vmem:[%s16540_s26 + $0x280] sm:$0xf]  ;;  %v10385_v58 = vld [vmem:[%s16540_s26 + $0x284] sm:$0xf0]  ;;  %v11664_v61 = vld [vmem:[#allocation1 + $0x36] sm:$0xff]  ;;  %v7203_v9 = vor.u32 %v10369_v55, %v7202_v54 }
  0x39   :  { %1710 = vmatpush.bf16.msrb.mxu1 %v7307_v2  ;;  %v7330_v59 = vld [vmem:[%s16540_s26 + $0x300] sm:$0xf]  ;;  %v10401_v60 = vld [vmem:[%s16540_s26 + $0x304] sm:$0xf0]  ;;  %v11670_v2 = vld [vmem:[#allocation1 + $0x2d] sm:$0xff]  ;;  %v7267_v13 = vor.u32 %v10385_v58, %v7266_v57 }
  0x3a   :  { %1723 = vmatpush.bf16.msrb.mxu2 %v7371_v3  ;;  %v11666_v0 = vld [vmem:[#allocation1 + $0x24] sm:$0xff]  ;;  %v7403_v3 = vor.u32 %v10419_v53, %v7402_v52  ;;  %v7394_v4 = vld [vmem:[%s16540_s26 + $0x380] sm:$0xf]  ;;  %v7514_v6 = vld [vmem:[%s16540_s26 + $0x470] sm:$0xf] }
  0x3b   :  { %1736 = vmatpush.bf16.msrb.mxu3 %v7435_v7  ;;  %v11668_v1 = vld [vmem:[#allocation1 + $0x3f] sm:$0xff]  ;;  %v10417_v5 = vld [vmem:[%s16540_s26 + $0x384] sm:$0xf0]  ;;  %v10447_v7 = vld [vmem:[%s16540_s26 + $0x474] sm:$0xf0] }
  0x3c   :  { %1698 = vmatpush.bf16.msrb.mxu0 %v7235_v14  ;;  %338 = vst [vmem:[#allocation1] ss:$9 sm:$0xff] %v70_v43  ;;  %v7578_v8 = vld [vmem:[%s16540_s26 + $0x4f0] sm:$0xf]  ;;  %v10463_v10 = vld [vmem:[%s16540_s26 + $0x4f4] sm:$0xf0]  ;;  %v7331_v14 = vor.u32 %v10401_v60, %v7330_v59  ;;  %v7395_v17 = vor.u32 %v10417_v5, %v7394_v4 }
  0x3d   :  { %1711 = vmatpush.bf16.msrb.mxu1 %v7299_v18  ;;  %v7642_v11 = vld [vmem:[%s16540_s26 + $0x570] sm:$0xf]  ;;  %v10479_v12 = vld [vmem:[%s16540_s26 + $0x574] sm:$0xf0]  ;;  %v7515_v18 = vor.u32 %v10447_v7, %v7514_v6  ;;  %v7506_v24 = vld [vmem:[%s16540_s26 + $0x460] sm:$0xf] }
  0x3e   :  { %1724 = vmatpush.bf16.msrb.mxu2 %v7363_v19  ;;  %v7706_v15 = vld [vmem:[%s16540_s26 + $0x5f0] sm:$0xf]  ;;  %v10495_v16 = vld [vmem:[%s16540_s26 + $0x5f4] sm:$0xf0]  ;;  %v7579_v19 = vor.u32 %v10463_v10, %v7578_v8  ;;  %v10445_v25 = vld [vmem:[%s16540_s26 + $0x464] sm:$0xf0] }
  0x3f   :  { %1737 = vmatpush.bf16.msrb.mxu3 %v7427_v23  ;;  %v7643_v23 = vor.u32 %v10479_v12, %v7642_v11  ;;  %v7570_v27 = vld [vmem:[%s16540_s26 + $0x4e0] sm:$0xf]  ;;  %v7707_v28 = vor.u32 %v10495_v16, %v7706_v15  ;;  %v10493_v33 = vld [vmem:[%s16540_s26 + $0x5e4] sm:$0xf0]  ;;  %v7507_v34 = vor.u32 %v10445_v25, %v7506_v24  ;;  %v7498_v37 = vld [vmem:[%s16540_s26 + $0x450] sm:$0xf] }
  0x40   :  { %1699 = vmatpush.bf16.msrb.mxu0 %v7227_v29  ;;  %v10461_v29 = vld [vmem:[%s16540_s26 + $0x4e4] sm:$0xf0]  ;;  %v7698_v32 = vld [vmem:[%s16540_s26 + $0x5e0] sm:$0xf]  ;;  %v10443_v38 = vld [vmem:[%s16540_s26 + $0x454] sm:$0xf0] }
  0x41   :  { %1712 = vmatpush.bf16.msrb.mxu1 %v7291_v30  ;;  %v7634_v30 = vld [vmem:[%s16540_s26 + $0x560] sm:$0xf]  ;;  %v7562_v39 = vld [vmem:[%s16540_s26 + $0x4d0] sm:$0xf]  ;;  %v7699_v40 = vor.u32 %v10493_v33, %v7698_v32  ;;  %v10475_v43 = vld [vmem:[%s16540_s26 + $0x554] sm:$0xf0]  ;;  %v7499_v46 = vor.u32 %v10443_v38, %v7498_v37 }
  0x42   :  { %1725 = vmatpush.bf16.msrb.mxu2 %v7355_v31  ;;  %v10477_v31 = vld [vmem:[%s16540_s26 + $0x564] sm:$0xf0]  ;;  %v7626_v42 = vld [vmem:[%s16540_s26 + $0x550] sm:$0xf]  ;;  %v7554_v51 = vld [vmem:[%s16540_s26 + $0x4c0] sm:$0xf] }
  0x43   :  { %1738 = vmatpush.bf16.msrb.mxu3 %v7419_v35  ;;  %v7571_v35 = vor.u32 %v10461_v29, %v7570_v27  ;;  %v7635_v36 = vor.u32 %v10477_v31, %v7634_v30  ;;  %v7627_v48 = vor.u32 %v10475_v43, %v7626_v42  ;;  %v10441_v50 = vld [vmem:[%s16540_s26 + $0x444] sm:$0xf0]  ;;  %v7618_v54 = vld [vmem:[%s16540_s26 + $0x540] sm:$0xf]  ;;  %v10455_v5 = vld [vmem:[%s16540_s26 + $0x4b4] sm:$0xf0] }
  0x44   :  { %1700 = vmatpush.bf16.msrb.mxu0 %v7219_v41  ;;  %v10459_v41 = vld [vmem:[%s16540_s26 + $0x4d4] sm:$0xf0]  ;;  %v10457_v53 = vld [vmem:[%s16540_s26 + $0x4c4] sm:$0xf0]  ;;  %v7610_v6 = vld [vmem:[%s16540_s26 + $0x530] sm:$0xf] }
  0x45   :  { %1713 = vmatpush.bf16.msrb.mxu1 %v7283_v44  ;;  %v7690_v44 = vld [vmem:[%s16540_s26 + $0x5d0] sm:$0xf]  ;;  %v7563_v47 = vor.u32 %v10459_v41, %v7562_v39  ;;  %v10473_v55 = vld [vmem:[%s16540_s26 + $0x544] sm:$0xf0]  ;;  %v7555_v59 = vor.u32 %v10457_v53, %v7554_v51  ;;  %v10471_v7 = vld [vmem:[%s16540_s26 + $0x534] sm:$0xf0] }
  0x46   :  { %1726 = vmatpush.bf16.msrb.mxu2 %v7347_v45  ;;  %v10491_v45 = vld [vmem:[%s16540_s26 + $0x5d4] sm:$0xf0]  ;;  %v10489_v57 = vld [vmem:[%s16540_s26 + $0x5c4] sm:$0xf0]  ;;  %v7619_v60 = vor.u32 %v10473_v55, %v7618_v54  ;;  %v7674_v8 = vld [vmem:[%s16540_s26 + $0x5b0] sm:$0xf]  ;;  %v7611_v12 = vor.u32 %v10471_v7, %v7610_v6 }
  0x47   :  { %1739 = vmatpush.bf16.msrb.mxu3 %v7411_v49  ;;  %v7490_v49 = vld [vmem:[%s16540_s26 + $0x440] sm:$0xf]  ;;  %v7691_v52 = vor.u32 %v10491_v45, %v7690_v44  ;;  %v10485_v24 = vld [vmem:[%s16540_s26 + $0x5a4] sm:$0xf0]  ;;  %v7466_v29 = vld [vmem:[%s16540_s26 + $0x410] sm:$0xf] }
  0x48   :  { %1701 = vmatpush.bf16.msrb.mxu0 %v7211_v56  ;;  %v7682_v56 = vld [vmem:[%s16540_s26 + $0x5c0] sm:$0xf]  ;;  %v7491_v58 = vor.u32 %v10441_v50, %v7490_v49  ;;  %v10435_v30 = vld [vmem:[%s16540_s26 + $0x414] sm:$0xf0]  ;;  %v7530_v31 = vld [vmem:[%s16540_s26 + $0x490] sm:$0xf] }
  0x49   :  { %1714 = vmatpush.bf16.msrb.mxu1 %v7275_v62  ;;  %v7482_v62 = vld [vmem:[%s16540_s26 + $0x430] sm:$0xf]  ;;  %v7683_v4 = vor.u32 %v10489_v57, %v7682_v56  ;;  %v7538_v15 = vld [vmem:[%s16540_s26 + $0x4a0] sm:$0xf]  ;;  %v10451_v33 = vld [vmem:[%s16540_s26 + $0x494] sm:$0xf0]  ;;  %v7467_v38 = vor.u32 %v10435_v30, %v7466_v29 }
  0x4a   :  { %1727 = vmatpush.bf16.msrb.mxu2 %v7339_v63  ;;  %v10439_v63 = vld [vmem:[%s16540_s26 + $0x434] sm:$0xf0]  ;;  %v7458_v39 = vld [vmem:[%s16540_s26 + $0x400] sm:$0xf]  ;;  %v7531_v41 = vor.u32 %v10451_v33, %v7530_v31  ;;  %v10449_v44 = vld [vmem:[%s16540_s26 + $0x484] sm:$0xf0] }
  0x4b   :  { %1740 = vmatpush.bf16.msrb.mxu3 %v7403_v3  ;;  %v7546_v3 = vld [vmem:[%s16540_s26 + $0x4b0] sm:$0xf]  ;;  %v7483_v10 = vor.u32 %v10439_v63, %v7482_v62  ;;  %v10483_v37 = vld [vmem:[%s16540_s26 + $0x594] sm:$0xf0]  ;;  %v7522_v43 = vld [vmem:[%s16540_s26 + $0x480] sm:$0xf] }
  0x4c   :  { %1702 = vmatpush.bf16.msrb.mxu0 %v7203_v9  ;;  %v10487_v9 = vld [vmem:[%s16540_s26 + $0x5b4] sm:$0xf0]  ;;  %v7547_v11 = vor.u32 %v10455_v5, %v7546_v3  ;;  %v7586_v45 = vld [vmem:[%s16540_s26 + $0x500] sm:$0xf]  ;;  %v10481_v49 = vld [vmem:[%s16540_s26 + $0x584] sm:$0xf0]  ;;  %v7523_v57 = vor.u32 %v10449_v44, %v7522_v43 }
  0x4d   :  { %1715 = vmatpush.bf16.msrb.mxu1 %v7267_v13  ;;  %v7474_v13 = vld [vmem:[%s16540_s26 + $0x420] sm:$0xf]  ;;  %v7675_v16 = vor.u32 %v10487_v9, %v7674_v8  ;;  %v7770_v50 = vld [vmem:[%s16540_s26 + $0x670] sm:$0xf]  ;;  %v10511_v51 = vld [vmem:[%s16540_s26 + $0x674] sm:$0xf0] }
  0x4e   :  { %1728 = vmatpush.bf16.msrb.mxu2 %v7331_v14  ;;  %v10437_v14 = vld [vmem:[%s16540_s26 + $0x424] sm:$0xf0]  ;;  %v10527_v54 = vld [vmem:[%s16540_s26 + $0x6f4] sm:$0xf0]  ;;  %v7898_v55 = vld [vmem:[%s16540_s26 + $0x770] sm:$0xf]  ;;  %v7771_v63 = vor.u32 %v10511_v51, %v7770_v50 }
  0x4f   :  { %1741 = vmatpush.bf16.msrb.mxu3 %v7395_v17  ;;  %1703 = vmatmul.bf16.vlgmr.msrb.gmra.mxu0 %v11666_v0  ;;  %v10453_v17 = vld [vmem:[%s16540_s26 + $0x4a4] sm:$0xf0]  ;;  %v7475_v25 = vor.u32 %v10437_v14, %v7474_v13  ;;  %v10543_v56 = vld [vmem:[%s16540_s26 + $0x774] sm:$0xf0]  ;;  %v7762_v5 = vld [vmem:[%s16540_s26 + $0x660] sm:$0xf] }
  0x50   :  { %1747 = vmatpush.bf16.msra.mxu0 %v7515_v18  ;;  %1716 = vmatmul.bf16.vlgmr.msrb.gmra.mxu1 %v11670_v2  ;;  %v7602_v18 = vld [vmem:[%s16540_s26 + $0x520] sm:$0xf]  ;;  %v7539_v27 = vor.u32 %v10453_v17, %v7538_v15  ;;  %v10509_v6 = vld [vmem:[%s16540_s26 + $0x664] sm:$0xf0]  ;;  %v341_v15 = vld [vmem:[#allocation1 + $0x12] sm:$0xff] }
  0x51   :  { %1760 = vmatpush.bf16.msra.mxu1 %v7579_v19  ;;  %1729 = vmatmul.bf16.vlgmr.msrb.gmra.mxu2 %v11664_v61  ;;  %v10469_v19 = vld [vmem:[%s16540_s26 + $0x524] sm:$0xf0]  ;;  %v7826_v7 = vld [vmem:[%s16540_s26 + $0x6e0] sm:$0xf]  ;;  %v10523_v29 = vld [vmem:[%s16540_s26 + $0x6d4] sm:$0xf0] }
  0x52   :  { %1773 = vmatpush.bf16.msra.mxu2 %v7643_v23  ;;  %1742 = vmatmul.bf16.vlgmr.msrb.gmra.mxu3 %v11668_v1  ;;  %v7666_v23 = vld [vmem:[%s16540_s26 + $0x5a0] sm:$0xf]  ;;  %v10525_v9 = vld [vmem:[%s16540_s26 + $0x6e4] sm:$0xf0]  ;;  %v7882_v30 = vld [vmem:[%s16540_s26 + $0x750] sm:$0xf] }
  0x53   :  { %1786 = vmatpush.bf16.msra.mxu3 %v7707_v28  ;;  %v7603_v28 = vor.u32 %v10469_v19, %v7602_v18  ;;  %v7667_v32 = vor.u32 %v10485_v24, %v7666_v23  ;;  %v7954_v13 = vld [vmem:[%s16540_s26 + $0x7e0] sm:$0xf]  ;;  %v10557_v14 = vld [vmem:[%s16540_s26 + $0x7e4] sm:$0xf0]  ;;  %v7763_v18 = vor.u32 %v10509_v6, %v7762_v5  ;;  %v7827_v19 = vor.u32 %v10525_v9, %v7826_v7  ;;  %v7754_v24 = vld [vmem:[%s16540_s26 + $0x650] sm:$0xf] }
  0x54   :  { %1748 = vmatpush.bf16.msra.mxu0 %v7507_v34  ;;  %v7594_v34 = vld [vmem:[%s16540_s26 + $0x510] sm:$0xf]  ;;  %v342_v17 = vld [vmem:[#allocation1 + $0x1b] sm:$0xff]  ;;  %v10537_v43 = vld [vmem:[%s16540_s26 + $0x744] sm:$0xf0] }
  0x55   :  { %1761 = vmatpush.bf16.msra.mxu1 %v7571_v35  ;;  %v10467_v35 = vld [vmem:[%s16540_s26 + $0x514] sm:$0xf0]  ;;  %v7938_v44 = vld [vmem:[%s16540_s26 + $0x7c0] sm:$0xf]  ;;  %v7802_v51 = vld [vmem:[%s16540_s26 + $0x6b0] sm:$0xf] }
  0x56   :  { %1774 = vmatpush.bf16.msra.mxu2 %v7635_v36  ;;  %v7658_v36 = vld [vmem:[%s16540_s26 + $0x590] sm:$0xf]  ;;  %v7595_v42 = vor.u32 %v10467_v35, %v7594_v34  ;;  %v10539_v31 = vld [vmem:[%s16540_s26 + $0x754] sm:$0xf0]  ;;  %v10517_v5 = vld [vmem:[%s16540_s26 + $0x6a4] sm:$0xf0] }
  0x57   :  { %1787 = vmatpush.bf16.msra.mxu3 %v7699_v40  ;;  %v10433_v40 = vld [vmem:[%s16540_s26 + $0x404] sm:$0xf0]  ;;  %v10555_v33 = vld [vmem:[%s16540_s26 + $0x7d4] sm:$0xf0]  ;;  %v7858_v6 = vld [vmem:[%s16540_s26 + $0x720] sm:$0xf] }
  0x58   :  { %1749 = vmatpush.bf16.msra.mxu0 %v7499_v46  ;;  %v7659_v46 = vor.u32 %v10483_v37, %v7658_v36  ;;  %v7459_v53 = vor.u32 %v10433_v40, %v7458_v39  ;;  %v7883_v36 = vor.u32 %v10539_v31, %v7882_v30  ;;  %v7746_v37 = vld [vmem:[%s16540_s26 + $0x640] sm:$0xf]  ;;  %v10503_v50 = vld [vmem:[%s16540_s26 + $0x634] sm:$0xf0]  ;;  %v10533_v7 = vld [vmem:[%s16540_s26 + $0x724] sm:$0xf0] }
  0x59   :  { %1762 = vmatpush.bf16.msra.mxu1 %v7563_v47  ;;  %v10465_v47 = vld [vmem:[%s16540_s26 + $0x504] sm:$0xf0]  ;;  %v7810_v39 = vld [vmem:[%s16540_s26 + $0x6c0] sm:$0xf] }
  0x5a   :  { %1775 = vmatpush.bf16.msra.mxu2 %v7627_v48  ;;  %v7650_v48 = vld [vmem:[%s16540_s26 + $0x580] sm:$0xf]  ;;  %v10549_v9 = vld [vmem:[%s16540_s26 + $0x7a4] sm:$0xf0] }
  0x5b   :  { %1788 = vmatpush.bf16.msra.mxu3 %v7691_v52  ;;  %v7834_v52 = vld [vmem:[%s16540_s26 + $0x6f0] sm:$0xf]  ;;  %v7651_v62 = vor.u32 %v10481_v49, %v7650_v48  ;;  %v7778_v31 = vld [vmem:[%s16540_s26 + $0x680] sm:$0xf] }
  0x5c   :  { %1750 = vmatpush.bf16.msra.mxu0 %v7491_v58  ;;  %v7587_v58 = vor.u32 %v10465_v47, %v7586_v45  ;;  %v7835_v3 = vor.u32 %v10527_v54, %v7834_v52  ;;  %v10553_v45 = vld [vmem:[%s16540_s26 + $0x7c4] sm:$0xf0]  ;;  %v7738_v49 = vld [vmem:[%s16540_s26 + $0x630] sm:$0xf] }
  0x5d   :  { %1763 = vmatpush.bf16.msra.mxu1 %v7555_v59  ;;  %v7962_v59 = vld [vmem:[%s16540_s26 + $0x7f0] sm:$0xf]  ;;  %v7939_v52 = vor.u32 %v10553_v45, %v7938_v44  ;;  %v7132_v44 = vld [vmem:[%s16540_s26 + $0x178] sm:$0xf0] }
  0x5e   :  { %1776 = vmatpush.bf16.msra.mxu2 %v7619_v60  ;;  %v10559_v60 = vld [vmem:[%s16540_s26 + $0x7f4] sm:$0xf0]  ;;  %v7866_v54 = vld [vmem:[%s16540_s26 + $0x730] sm:$0xf] }
  0x5f   :  { %1789 = vmatpush.bf16.msra.mxu3 %v7683_v4  ;;  %v7899_v4 = vor.u32 %v10543_v56, %v7898_v55  ;;  %v7963_v8 = vor.u32 %v10559_v60, %v7962_v59  ;;  %v10535_v55 = vld [vmem:[%s16540_s26 + $0x734] sm:$0xf0]  ;;  %v7930_v56 = vld [vmem:[%s16540_s26 + $0x7b0] sm:$0xf] }
  0x60   :  { %1751 = vmatpush.bf16.msra.mxu0 %v7483_v10  ;;  %v7890_v10 = vld [vmem:[%s16540_s26 + $0x760] sm:$0xf]  ;;  %v7867_v60 = vor.u32 %v10535_v55, %v7866_v54  ;;  %v6996_v54 = vld [vmem:[%s16540_s26 + $0x68] sm:$0xf0]  ;;  %v10332_v55 = vld [vmem:[%s16540_s26 + $0xe4] sm:$0xf] }
  0x61   :  { %1764 = vmatpush.bf16.msra.mxu1 %v7547_v11  ;;  %v10541_v11 = vld [vmem:[%s16540_s26 + $0x764] sm:$0xf0] }
  0x62   :  { %1777 = vmatpush.bf16.msra.mxu2 %v7611_v12  ;;  %v339_v12 = vld [vmem:[#allocation1] sm:$0xff]  ;;  %v7891_v23 = vor.u32 %v10541_v11, %v7890_v10 }
  0x63   :  { %1790 = vmatpush.bf16.msra.mxu3 %v7675_v16  ;;  %v340_v16 = vld [vmem:[#allocation1 + $0x9] sm:$0xff] }
  0x64   :  { %1752 = vmatpush.bf16.msra.mxu0 %v7475_v25  ;;  %v10507_v25 = vld [vmem:[%s16540_s26 + $0x654] sm:$0xf0] }
  0x65   :  { %1765 = vmatpush.bf16.msra.mxu1 %v7539_v27  ;;  %v7818_v27 = vld [vmem:[%s16540_s26 + $0x6d0] sm:$0xf]  ;;  %v7755_v34 = vor.u32 %v10507_v25, %v7754_v24  ;;  %v10547_v24 = vld [vmem:[%s16540_s26 + $0x794] sm:$0xf0] }
  0x66   :  { %1778 = vmatpush.bf16.msra.mxu2 %v7603_v28  ;;  %v7955_v28 = vor.u32 %v10557_v14, %v7954_v13  ;;  %v7819_v35 = vor.u32 %v10523_v29, %v7818_v27  ;;  %v7722_v13 = vld [vmem:[%s16540_s26 + $0x610] sm:$0xf]  ;;  %v10499_v14 = vld [vmem:[%s16540_s26 + $0x614] sm:$0xf0]  ;;  %v7714_v27 = vld [vmem:[%s16540_s26 + $0x600] sm:$0xf] }
  0x67   :  { %1791 = vmatpush.bf16.msra.mxu3 %v7667_v32  ;;  %v7946_v32 = vld [vmem:[%s16540_s26 + $0x7d0] sm:$0xf]  ;;  %v7723_v25 = vor.u32 %v10499_v14, %v7722_v13  ;;  %v7052_v13 = vld [vmem:[%s16540_s26 + $0xd8] sm:$0xf0]  ;;  %v10346_v14 = vld [vmem:[%s16540_s26 + $0x154] sm:$0xf] }
  0x68   :  { %1753 = vmatpush.bf16.msra.mxu0 %v7467_v38  ;;  %v10505_v38 = vld [vmem:[%s16540_s26 + $0x644] sm:$0xf0]  ;;  %v7947_v40 = vor.u32 %v10555_v33, %v7946_v32  ;;  %v7842_v33 = vld [vmem:[%s16540_s26 + $0x700] sm:$0xf] }
  0x69   :  { %1766 = vmatpush.bf16.msra.mxu1 %v7531_v41  ;;  %v10521_v41 = vld [vmem:[%s16540_s26 + $0x6c4] sm:$0xf0] }
  0x6a   :  { %1779 = vmatpush.bf16.msra.mxu2 %v7595_v42  ;;  %v7874_v42 = vld [vmem:[%s16540_s26 + $0x740] sm:$0xf]  ;;  %v7811_v47 = vor.u32 %v10521_v41, %v7810_v39  ;;  %v10513_v32 = vld [vmem:[%s16540_s26 + $0x684] sm:$0xf0]  ;;  %v7004_v39 = vld [vmem:[%s16540_s26 + $0x78] sm:$0xf0] }
  0x6b   :  { %1792 = vmatpush.bf16.msra.mxu3 %v7659_v46  ;;  %v7747_v46 = vor.u32 %v10505_v38, %v7746_v37  ;;  %v7875_v48 = vor.u32 %v10537_v43, %v7874_v42  ;;  %v10545_v37 = vld [vmem:[%s16540_s26 + $0x784] sm:$0xf0]  ;;  %v10318_v38 = vld [vmem:[%s16540_s26 + $0x74] sm:$0xf]  ;;  %v7068_v42 = vld [vmem:[%s16540_s26 + $0xf8] sm:$0xf0]  ;;  %v7779_v45 = vor.u32 %v10513_v32, %v7778_v31 }
  0x6c   :  { %1754 = vmatpush.bf16.msra.mxu0 %v7459_v53  ;;  %v10519_v53 = vld [vmem:[%s16540_s26 + $0x6b4] sm:$0xf0]  ;;  %v10350_v43 = vld [vmem:[%s16540_s26 + $0x174] sm:$0xf]  ;;  %v7108_v31 = vld [vmem:[%s16540_s26 + $0x148] sm:$0xf0] }
  0x6d   :  { %1767 = vmatpush.bf16.msra.mxu1 %v7523_v57  ;;  %v10551_v57 = vld [vmem:[%s16540_s26 + $0x7b4] sm:$0xf0]  ;;  %v7803_v59 = vor.u32 %v10519_v53, %v7802_v51  ;;  %v10316_v53 = vld [vmem:[%s16540_s26 + $0x64] sm:$0xf] }
  0x6e   :  { %1780 = vmatpush.bf16.msra.mxu2 %v7587_v58  ;;  %v7739_v58 = vor.u32 %v10503_v50, %v7738_v49  ;;  %v7007_v50 = vor.u32 %v10318_v38, %v7004_v39  ;;  %v10360_v32 = vld [vmem:[%s16540_s26 + $0x1c4] sm:$0xf]  ;;  %v6972_v38 = vld [vmem:[%s16540_s26 + $0x38] sm:$0xf0]  ;;  %v10326_v39 = vld [vmem:[%s16540_s26 + $0xb4] sm:$0xf] }
  0x6f   :  { %1793 = vmatpush.bf16.msra.mxu3 %v7651_v62  ;;  %1755 = vmatmul.bf16.vlgmr.msra.gmra.mxu0 %v339_v12  ;;  %v7730_v62 = vld [vmem:[%s16540_s26 + $0x620] sm:$0xf]  ;;  %v7859_v12 = vor.u32 %v10533_v7, %v7858_v6  ;;  %v6999_v6 = vor.u32 %v10316_v53, %v6996_v54  ;;  %v7028_v53 = vld [vmem:[%s16540_s26 + $0xa8] sm:$0xf0]  ;;  %v10340_v54 = vld [vmem:[%s16540_s26 + $0x124] sm:$0xf] }
  0x70   :  { %1799 = vmatpush.bf16.msrb.mxu0 %v7771_v63  ;;  %1768 = vmatmul.bf16.vlgmr.msra.gmra.mxu1 %v340_v16  ;;  %v10501_v63 = vld [vmem:[%s16540_s26 + $0x624] sm:$0xf0] }
  0x71   :  { %1812 = vmatpush.bf16.msrb.mxu1 %v7835_v3  ;;  %1781 = vmatmul.bf16.vlgmr.msra.gmra.mxu2 %v341_v15  ;;  %v7794_v3 = vld [vmem:[%s16540_s26 + $0x6a0] sm:$0xf]  ;;  %v7731_v10 = vor.u32 %v10501_v63, %v7730_v62  ;;  %v7786_v15 = vld [vmem:[%s16540_s26 + $0x690] sm:$0xf]  ;;  %v10364_v62 = vld [vmem:[%s16540_s26 + $0x1e4] sm:$0xf] }
  0x72   :  { %1825 = vmatpush.bf16.msrb.mxu2 %v7899_v4  ;;  %1794 = vmatmul.bf16.vlgmr.msra.gmra.mxu3 %v342_v17  ;;  %v7931_v4 = vor.u32 %v10551_v57, %v7930_v56  ;;  %v7795_v11 = vor.u32 %v10517_v5, %v7794_v3  ;;  %v10515_v17 = vld [vmem:[%s16540_s26 + $0x694] sm:$0xf0]  ;;  %v7060_v57 = vld [vmem:[%s16540_s26 + $0xe8] sm:$0xf0]  ;;  %v346_v5 = vld [vmem:[#allocation1 + $0x3f] sm:$0xff] }
  0x73   :  { %1838 = vmatpush.bf16.msrb.mxu3 %v7963_v8  ;;  %v7922_v8 = vld [vmem:[%s16540_s26 + $0x7a0] sm:$0xf]  ;;  %v7787_v29 = vor.u32 %v10515_v17, %v7786_v15  ;;  %v7188_v63 = vld [vmem:[%s16540_s26 + $0x1e8] sm:$0xf0]  ;;  %v345_v3 = vld [vmem:[#allocation1 + $0x36] sm:$0xff]  ;;  %v7063_v7 = vor.u32 %v10332_v55, %v7060_v57 }
  0x74   :  { %1800 = vmatpush.bf16.msrb.mxu0 %v7763_v18  ;;  %v7923_v16 = vor.u32 %v10549_v9, %v7922_v8  ;;  %v7850_v18 = vld [vmem:[%s16540_s26 + $0x710] sm:$0xf]  ;;  %v10314_v9 = vld [vmem:[%s16540_s26 + $0x54] sm:$0xf]  ;;  %v7116_v15 = vld [vmem:[%s16540_s26 + $0x158] sm:$0xf0] }
  0x75   :  { %1813 = vmatpush.bf16.msrb.mxu1 %v7827_v19  ;;  %v10531_v19 = vld [vmem:[%s16540_s26 + $0x714] sm:$0xf0]  ;;  %v7180_v17 = vld [vmem:[%s16540_s26 + $0x1d8] sm:$0xf0]  ;;  %v7092_v55 = vld [vmem:[%s16540_s26 + $0x128] sm:$0xf0] }
  0x76   :  { %1826 = vmatpush.bf16.msrb.mxu2 %v7891_v23  ;;  %v7914_v23 = vld [vmem:[%s16540_s26 + $0x790] sm:$0xf]  ;;  %v7851_v30 = vor.u32 %v10531_v19, %v7850_v18  ;;  %v7156_v57 = vld [vmem:[%s16540_s26 + $0x1a8] sm:$0xf0] }
  0x77   :  { %1839 = vmatpush.bf16.msrb.mxu3 %v7955_v28  ;;  %v10497_v28 = vld [vmem:[%s16540_s26 + $0x604] sm:$0xf0] }
  0x78   :  { %1801 = vmatpush.bf16.msrb.mxu0 %v7755_v34  ;;  %v7915_v34 = vor.u32 %v10547_v24, %v7914_v23  ;;  %v7715_v41 = vor.u32 %v10497_v28, %v7714_v27  ;;  %v7119_v23 = vor.u32 %v10346_v14, %v7116_v15  ;;  %v10312_v24 = vld [vmem:[%s16540_s26 + $0x44] sm:$0xf] }
  0x79   :  { %1814 = vmatpush.bf16.msrb.mxu1 %v7819_v35  ;;  %v10529_v35 = vld [vmem:[%s16540_s26 + $0x704] sm:$0xf0]  ;;  %v10328_v27 = vld [vmem:[%s16540_s26 + $0xc4] sm:$0xf] }
  0x7a   :  { %1827 = vmatpush.bf16.msrb.mxu2 %v7883_v36  ;;  %v7906_v36 = vld [vmem:[%s16540_s26 + $0x780] sm:$0xf]  ;;  %v10320_v15 = vld [vmem:[%s16540_s26 + $0x84] sm:$0xf] }
  0x7b   :  { %1840 = vmatpush.bf16.msrb.mxu3 %v7947_v40  ;;  %v10334_v40 = vld [vmem:[%s16540_s26 + $0xf4] sm:$0xf]  ;;  %v7907_v49 = vor.u32 %v10545_v37, %v7906_v36 }
  0x7c   :  { %1802 = vmatpush.bf16.msrb.mxu0 %v7747_v46  ;;  %v7843_v46 = vor.u32 %v10529_v35, %v7842_v33  ;;  %v7071_v51 = vor.u32 %v10334_v40, %v7068_v42  ;;  %v7172_v33 = vld [vmem:[%s16540_s26 + $0x1c8] sm:$0xf0]  ;;  %v10310_v37 = vld [vmem:[%s16540_s26 + $0x34] sm:$0xf] }
  0x7d   :  { %1815 = vmatpush.bf16.msrb.mxu1 %v7811_v47  ;;  %v10366_v47 = vld [vmem:[%s16540_s26 + $0x1f4] sm:$0xf]  ;;  %v7175_v40 = vor.u32 %v10360_v32, %v7172_v33  ;;  %v7388_v32 = vld [vmem:[%s16540_s26 + $0x378] sm:$0xf0] }
  0x7e   :  { %1828 = vmatpush.bf16.msrb.mxu2 %v7875_v48  ;;  %v7196_v48 = vld [vmem:[%s16540_s26 + $0x1f8] sm:$0xf0]  ;;  %v10342_v42 = vld [vmem:[%s16540_s26 + $0x134] sm:$0xf] }
  0x7f   :  { %1841 = vmatpush.bf16.msrb.mxu3 %v7939_v52  ;;  %v7135_v52 = vor.u32 %v10350_v43, %v7132_v44  ;;  %v7199_v56 = vor.u32 %v10366_v47, %v7196_v48  ;;  %v7100_v43 = vld [vmem:[%s16540_s26 + $0x138] sm:$0xf0]  ;;  %v10358_v44 = vld [vmem:[%s16540_s26 + $0x1b4] sm:$0xf] }
  0x80   :  { %1803 = vmatpush.bf16.msrb.mxu0 %v7739_v58  ;;  %v10348_v58 = vld [vmem:[%s16540_s26 + $0x164] sm:$0xf]  ;;  %v7103_v48 = vor.u32 %v10342_v42, %v7100_v43  ;;  %v7252_v42 = vld [vmem:[%s16540_s26 + $0x268] sm:$0xf0] }
  0x81   :  { %1816 = vmatpush.bf16.msrb.mxu1 %v7803_v59  ;;  %v7124_v59 = vld [vmem:[%s16540_s26 + $0x168] sm:$0xf0]  ;;  %v10396_v43 = vld [vmem:[%s16540_s26 + $0x2e4] sm:$0xf] }
  0x82   :  { %1829 = vmatpush.bf16.msrb.mxu2 %v7867_v60  ;;  %v343_v60 = vld [vmem:[#allocation1 + $0x24] sm:$0xff]  ;;  %v7127_v8 = vor.u32 %v10348_v58, %v7124_v59 }
  0x83   :  { %1842 = vmatpush.bf16.msrb.mxu3 %v7931_v4  ;;  %v344_v4 = vld [vmem:[#allocation1 + $0x2d] sm:$0xff] }
  0x84   :  { %1804 = vmatpush.bf16.msrb.mxu0 %v7731_v10  ;;  %v6988_v10 = vld [vmem:[%s16540_s26 + $0x58] sm:$0xf0] }
  0x85   :  { %1817 = vmatpush.bf16.msrb.mxu1 %v7795_v11  ;;  %v10330_v11 = vld [vmem:[%s16540_s26 + $0xd4] sm:$0xf]  ;;  %v6991_v18 = vor.u32 %v10314_v9, %v6988_v10  ;;  %v7148_v9 = vld [vmem:[%s16540_s26 + $0x198] sm:$0xf0] }
  0x86   :  { %1830 = vmatpush.bf16.msrb.mxu2 %v7859_v12  ;;  %v7191_v12 = vor.u32 %v10364_v62, %v7188_v63  ;;  %v7055_v19 = vor.u32 %v10330_v11, %v7052_v13  ;;  %v10306_v62 = vld [vmem:[%s16540_s26 + $0x14] sm:$0xf]  ;;  %v6956_v63 = vld [vmem:[%s16540_s26 + $0x18] sm:$0xf0]  ;;  %v10304_v11 = vld [vmem:[%s16540_s26 + $0x4] sm:$0xf] }
  0x87   :  { %1843 = vmatpush.bf16.msrb.mxu3 %v7923_v16  ;;  %v10362_v16 = vld [vmem:[%s16540_s26 + $0x1d4] sm:$0xf]  ;;  %v6959_v10 = vor.u32 %v10306_v62, %v6956_v63  ;;  %v7436_v62 = vld [vmem:[%s16540_s26 + $0x3d8] sm:$0xf0] }
  0x88   :  { %1805 = vmatpush.bf16.msrb.mxu0 %v7723_v25  ;;  %v6980_v25 = vld [vmem:[%s16540_s26 + $0x48] sm:$0xf0]  ;;  %v7183_v28 = vor.u32 %v10362_v16, %v7180_v17  ;;  %v10336_v17 = vld [vmem:[%s16540_s26 + $0x104] sm:$0xf] }
  0x89   :  { %1818 = vmatpush.bf16.msrb.mxu1 %v7787_v29  ;;  %v7044_v29 = vld [vmem:[%s16540_s26 + $0xc8] sm:$0xf0] }
  0x8a   :  { %1831 = vmatpush.bf16.msrb.mxu2 %v7851_v30  ;;  %v10344_v30 = vld [vmem:[%s16540_s26 + $0x144] sm:$0xf]  ;;  %v7047_v35 = vor.u32 %v10328_v27, %v7044_v29  ;;  %v7012_v16 = vld [vmem:[%s16540_s26 + $0x88] sm:$0xf0]  ;;  %v7260_v27 = vld [vmem:[%s16540_s26 + $0x278] sm:$0xf0] }
  0x8b   :  { %1844 = vmatpush.bf16.msrb.mxu3 %v7915_v34  ;;  %v6983_v34 = vor.u32 %v10312_v24, %v6980_v25  ;;  %v7111_v36 = vor.u32 %v10344_v30, %v7108_v31  ;;  %v7140_v24 = vld [vmem:[%s16540_s26 + $0x188] sm:$0xf0]  ;;  %v10382_v25 = vld [vmem:[%s16540_s26 + $0x274] sm:$0xf]  ;;  %v7324_v30 = vld [vmem:[%s16540_s26 + $0x2f8] sm:$0xf0]  ;;  %v7015_v33 = vor.u32 %v10320_v15, %v7012_v16 }
  0x8c   :  { %1806 = vmatpush.bf16.msrb.mxu0 %v7715_v41  ;;  %v7036_v41 = vld [vmem:[%s16540_s26 + $0xb8] sm:$0xf0]  ;;  %v10414_v31 = vld [vmem:[%s16540_s26 + $0x374] sm:$0xf] }
  0x8d   :  { %1819 = vmatpush.bf16.msrb.mxu1 %v7779_v45  ;;  %v7164_v45 = vld [vmem:[%s16540_s26 + $0x1b8] sm:$0xf0]  ;;  %v7039_v47 = vor.u32 %v10326_v39, %v7036_v41  ;;  %v10380_v41 = vld [vmem:[%s16540_s26 + $0x264] sm:$0xf]  ;;  %v10390_v15 = vld [vmem:[%s16540_s26 + $0x2b4] sm:$0xf] }
  0x8e   :  { %1832 = vmatpush.bf16.msrb.mxu2 %v7843_v46  ;;  %v6975_v46 = vor.u32 %v10310_v37, %v6972_v38  ;;  %v7263_v38 = vor.u32 %v10382_v25, %v7260_v27 }
  0x8f   :  { %1845 = vmatpush.bf16.msrb.mxu3 %v7907_v49  ;;  %1807 = vmatmul.bf16.vlgmr.msrb.gmra.mxu0 %v343_v60  ;;  %v10308_v49 = vld [vmem:[%s16540_s26 + $0x24] sm:$0xf]  ;;  %v7095_v60 = vor.u32 %v10340_v54, %v7092_v55  ;;  %v7244_v54 = vld [vmem:[%s16540_s26 + $0x258] sm:$0xf0]  ;;  %v10394_v55 = vld [vmem:[%s16540_s26 + $0x2d4] sm:$0xf] }
  0x90   :  { %1851 = vmatpush.bf16.msra.mxu0 %v7007_v50  ;;  %1820 = vmatmul.bf16.vlgmr.msrb.gmra.mxu1 %v344_v4  ;;  %v6964_v50 = vld [vmem:[%s16540_s26 + $0x28] sm:$0xf0] }
  0x91   :  { %1864 = vmatpush.bf16.msra.mxu1 %v7071_v51  ;;  %1833 = vmatmul.bf16.vlgmr.msrb.gmra.mxu2 %v345_v3  ;;  %v10324_v51 = vld [vmem:[%s16540_s26 + $0xa4] sm:$0xf]  ;;  %v6967_v58 = vor.u32 %v10308_v49, %v6964_v50  ;;  %v10322_v3 = vld [vmem:[%s16540_s26 + $0x94] sm:$0xf]  ;;  %v7444_v49 = vld [vmem:[%s16540_s26 + $0x3e8] sm:$0xf0]  ;;  %v7255_v50 = vor.u32 %v10380_v41, %v7252_v42 }
  0x92   :  { %1877 = vmatpush.bf16.msra.mxu2 %v7135_v52  ;;  %1846 = vmatmul.bf16.vlgmr.msrb.gmra.mxu3 %v346_v5  ;;  %v7167_v52 = vor.u32 %v10358_v44, %v7164_v45  ;;  %v7031_v59 = vor.u32 %v10324_v51, %v7028_v53  ;;  %v7020_v5 = vld [vmem:[%s16540_s26 + $0x98] sm:$0xf0]  ;;  %v7316_v45 = vld [vmem:[%s16540_s26 + $0x2e8] sm:$0xf0]  ;;  %v10378_v53 = vld [vmem:[%s16540_s26 + $0x254] sm:$0xf] }
  0x93   :  { %1890 = vmatpush.bf16.msra.mxu3 %v7199_v56  ;;  %v10356_v56 = vld [vmem:[%s16540_s26 + $0x1a4] sm:$0xf]  ;;  %v7023_v13 = vor.u32 %v10322_v3, %v7020_v5  ;;  %v7319_v51 = vor.u32 %v10396_v43, %v7316_v45  ;;  %v7247_v63 = vor.u32 %v10378_v53, %v7244_v54  ;;  %v7236_v5 = vld [vmem:[%s16540_s26 + $0x248] sm:$0xf0]  ;;  %v10370_v42 = vld [vmem:[%s16540_s26 + $0x214] sm:$0xf] }
  0x94   :  { %1852 = vmatpush.bf16.msra.mxu0 %v6999_v6  ;;  %v7159_v4 = vor.u32 %v10356_v56, %v7156_v57  ;;  %v10338_v6 = vld [vmem:[%s16540_s26 + $0x114] sm:$0xf]  ;;  %v7308_v57 = vld [vmem:[%s16540_s26 + $0x2d8] sm:$0xf0]  ;;  %v10368_v54 = vld [vmem:[%s16540_s26 + $0x204] sm:$0xf] }
  0x95   :  { %1865 = vmatpush.bf16.msra.mxu1 %v7063_v7  ;;  %v7084_v7 = vld [vmem:[%s16540_s26 + $0x118] sm:$0xf0]  ;;  %v7311_v3 = vor.u32 %v10394_v55, %v7308_v57  ;;  %v7204_v55 = vld [vmem:[%s16540_s26 + $0x208] sm:$0xf0] }
  0x96   :  { %1878 = vmatpush.bf16.msra.mxu2 %v7127_v8  ;;  %v10354_v8 = vld [vmem:[%s16540_s26 + $0x194] sm:$0xf]  ;;  %v7087_v14 = vor.u32 %v10338_v6, %v7084_v7  ;;  %v10408_v6 = vld [vmem:[%s16540_s26 + $0x344] sm:$0xf]  ;;  %v7364_v7 = vld [vmem:[%s16540_s26 + $0x348] sm:$0xf0] }
  0x97   :  { %1891 = vmatpush.bf16.msra.mxu3 %v7191_v12  ;;  %v6948_v12 = vld [vmem:[%s16540_s26 + $0x8] sm:$0xf0]  ;;  %v7212_v43 = vld [vmem:[%s16540_s26 + $0x218] sm:$0xf0] }
  0x98   :  { %1853 = vmatpush.bf16.msra.mxu0 %v6991_v18  ;;  %v7151_v18 = vor.u32 %v10354_v8, %v7148_v9  ;;  %v6951_v29 = vor.u32 %v10304_v11, %v6948_v12  ;;  %v10424_v8 = vld [vmem:[%s16540_s26 + $0x3c4] sm:$0xf]  ;;  %v7428_v9 = vld [vmem:[%s16540_s26 + $0x3c8] sm:$0xf0]  ;;  %v7367_v12 = vor.u32 %v10408_v6, %v7364_v7  ;;  %v7215_v53 = vor.u32 %v10370_v42, %v7212_v43  ;;  %v7580_v7 = vld [vmem:[%s16540_s26 + $0x4f8] sm:$0xf0] }
  0x99   :  { %1866 = vmatpush.bf16.msra.mxu1 %v7055_v19  ;;  %v7076_v19 = vld [vmem:[%s16540_s26 + $0x108] sm:$0xf0]  ;;  %v7431_v16 = vor.u32 %v10424_v8, %v7428_v9  ;;  %v7207_v6 = vor.u32 %v10368_v54, %v7204_v55  ;;  %v10478_v8 = vld [vmem:[%s16540_s26 + $0x574] sm:$0xf]  ;;  %v7644_v9 = vld [vmem:[%s16540_s26 + $0x578] sm:$0xf0] }
  0x9a   :  { %1879 = vmatpush.bf16.msra.mxu2 %v7119_v23  ;;  %v10352_v23 = vld [vmem:[%s16540_s26 + $0x184] sm:$0xf]  ;;  %v7564_v42 = vld [vmem:[%s16540_s26 + $0x4d8] sm:$0xf0]  ;;  %v10474_v43 = vld [vmem:[%s16540_s26 + $0x554] sm:$0xf] }
  0x9b   :  { %1892 = vmatpush.bf16.msra.mxu3 %v7183_v28  ;;  %v10398_v28 = vld [vmem:[%s16540_s26 + $0x2f4] sm:$0xf]  ;;  %v7143_v37 = vor.u32 %v10352_v23, %v7140_v24  ;;  %v7420_v24 = vld [vmem:[%s16540_s26 + $0x3b8] sm:$0xf0]  ;;  %v10488_v54 = vld [vmem:[%s16540_s26 + $0x5c4] sm:$0xf] }
  0x9c   :  { %1854 = vmatpush.bf16.msra.mxu0 %v6983_v34  ;;  %v7079_v34 = vor.u32 %v10336_v17, %v7076_v19  ;;  %v7327_v39 = vor.u32 %v10398_v28, %v7324_v30  ;;  %v7292_v17 = vld [vmem:[%s16540_s26 + $0x2b8] sm:$0xf0]  ;;  %v10422_v23 = vld [vmem:[%s16540_s26 + $0x3b4] sm:$0xf]  ;;  %v7220_v30 = vld [vmem:[%s16540_s26 + $0x228] sm:$0xf0] }
  0x9d   :  { %1867 = vmatpush.bf16.msra.mxu1 %v7047_v35  ;;  %v10430_v35 = vld [vmem:[%s16540_s26 + $0x3f4] sm:$0xf]  ;;  %v7356_v19 = vld [vmem:[%s16540_s26 + $0x338] sm:$0xf0]  ;;  %v7295_v27 = vor.u32 %v10390_v15, %v7292_v17  ;;  %v7684_v55 = vld [vmem:[%s16540_s26 + $0x5c8] sm:$0xf0] }
  0x9e   :  { %1880 = vmatpush.bf16.msra.mxu2 %v7111_v36  ;;  %v7452_v36 = vld [vmem:[%s16540_s26 + $0x3f8] sm:$0xf0] }
  0x9f   :  { %1893 = vmatpush.bf16.msra.mxu3 %v7175_v40  ;;  %v7391_v40 = vor.u32 %v10414_v31, %v7388_v32  ;;  %v7455_v44 = vor.u32 %v10430_v35, %v7452_v36  ;;  %v10388_v31 = vld [vmem:[%s16540_s26 + $0x2a4] sm:$0xf]  ;;  %v7423_v32 = vor.u32 %v10422_v23, %v7420_v24  ;;  %v7348_v35 = vld [vmem:[%s16540_s26 + $0x328] sm:$0xf0] }
  0xa0   :  { %1855 = vmatpush.bf16.msra.mxu0 %v6975_v46  ;;  %v10412_v46 = vld [vmem:[%s16540_s26 + $0x364] sm:$0xf]  ;;  %v7508_v24 = vld [vmem:[%s16540_s26 + $0x468] sm:$0xf0] }
  0xa1   :  { %1868 = vmatpush.bf16.msra.mxu1 %v7039_v47  ;;  %v7380_v47 = vld [vmem:[%s16540_s26 + $0x368] sm:$0xf0]  ;;  %v10420_v36 = vld [vmem:[%s16540_s26 + $0x3a4] sm:$0xf] }
  0xa2   :  { %1881 = vmatpush.bf16.msra.mxu2 %v7103_v48  ;;  %v10428_v48 = vld [vmem:[%s16540_s26 + $0x3e4] sm:$0xf] }
  0xa3   :  { %1894 = vmatpush.bf16.msra.mxu3 %v7167_v52  ;;  %v7383_v52 = vor.u32 %v10412_v46, %v7380_v47  ;;  %v7447_v56 = vor.u32 %v10428_v48, %v7444_v49  ;;  %v7276_v47 = vld [vmem:[%s16540_s26 + $0x298] sm:$0xf0]  ;;  %v10402_v48 = vld [vmem:[%s16540_s26 + $0x314] sm:$0xf]  ;;  %v10444_v23 = vld [vmem:[%s16540_s26 + $0x464] sm:$0xf] }
  0xa4   :  { %1856 = vmatpush.bf16.msra.mxu0 %v6967_v58  ;;  %v10410_v58 = vld [vmem:[%s16540_s26 + $0x354] sm:$0xf]  ;;  %v7340_v49 = vld [vmem:[%s16540_s26 + $0x318] sm:$0xf0] }
  0xa5   :  { %1869 = vmatpush.bf16.msra.mxu1 %v7031_v59  ;;  %v7372_v59 = vld [vmem:[%s16540_s26 + $0x358] sm:$0xf0]  ;;  %v7343_v57 = vor.u32 %v10402_v48, %v7340_v49  ;;  %v10456_v49 = vld [vmem:[%s16540_s26 + $0x4c4] sm:$0xf] }
  0xa6   :  { %1882 = vmatpush.bf16.msra.mxu2 %v7095_v60  ;;  %v10426_v60 = vld [vmem:[%s16540_s26 + $0x3d4] sm:$0xf] }
  0xa7   :  { %1895 = vmatpush.bf16.msra.mxu3 %v7159_v4  ;;  %v10376_v4 = vld [vmem:[%s16540_s26 + $0x244] sm:$0xf] }
  0xa8   :  { %1857 = vmatpush.bf16.msra.mxu0 %v6959_v10  ;;  %v7239_v10 = vor.u32 %v10376_v4, %v7236_v5  ;;  %v7396_v4 = vld [vmem:[%s16540_s26 + $0x388] sm:$0xf0] }
  0xa9   :  { %1870 = vmatpush.bf16.msra.mxu1 %v7023_v13  ;;  %v10374_v13 = vld [vmem:[%s16540_s26 + $0x234] sm:$0xf] }
  0xaa   :  { %1883 = vmatpush.bf16.msra.mxu2 %v7087_v14  ;;  %v7228_v14 = vld [vmem:[%s16540_s26 + $0x238] sm:$0xf0] }
  0xab   :  { %1896 = vmatpush.bf16.msra.mxu3 %v7151_v18  ;;  %v10406_v18 = vld [vmem:[%s16540_s26 + $0x334] sm:$0xf]  ;;  %v7231_v25 = vor.u32 %v10374_v13, %v7228_v14  ;;  %v7708_v14 = vld [vmem:[%s16540_s26 + $0x5f8] sm:$0xf0] }
  0xac   :  { %1858 = vmatpush.bf16.msra.mxu0 %v6951_v29  ;;  %v7359_v28 = vor.u32 %v10406_v18, %v7356_v19  ;;  %v10372_v29 = vld [vmem:[%s16540_s26 + $0x224] sm:$0xf]  ;;  %v10494_v13 = vld [vmem:[%s16540_s26 + $0x5f4] sm:$0xf]  ;;  %v7647_v19 = vor.u32 %v10478_v8, %v7644_v9 }
  0xad   :  { %1871 = vmatpush.bf16.msra.mxu1 %v7015_v33  ;;  %v7284_v33 = vld [vmem:[%s16540_s26 + $0x2a8] sm:$0xf0] }
  0xae   :  { %1884 = vmatpush.bf16.msra.mxu2 %v7079_v34  ;;  %v10404_v34 = vld [vmem:[%s16540_s26 + $0x324] sm:$0xf] }
  0xaf   :  { %1897 = vmatpush.bf16.msra.mxu3 %v7143_v37  ;;  %1859 = vmatmul.bf16.vlgmr.msra.gmra.mxu0 %v11573_v21  ;;  %v10392_v21 = vld [vmem:[%s16540_s26 + $0x2c4] sm:$0xf]  ;;  %v7412_v37 = vld [vmem:[%s16540_s26 + $0x3a8] sm:$0xf0]  ;;  %v7351_v41 = vor.u32 %v10404_v34, %v7348_v35  ;;  %v7511_v34 = vor.u32 %v10444_v23, %v7508_v24 }
  0xb0   :  { %1903 = vmatpush.bf16.msrb.mxu0 %v7263_v38  ;;  %1872 = vmatmul.bf16.vlgmr.msra.gmra.mxu1 %v11584_v26  ;;  %v7300_v26 = vld [vmem:[%s16540_s26 + $0x2c8] sm:$0xf0]  ;;  %v7223_v38 = vor.u32 %v10372_v29, %v7220_v30  ;;  %v7415_v46 = vor.u32 %v10420_v36, %v7412_v37  ;;  %v10476_v29 = vld [vmem:[%s16540_s26 + $0x564] sm:$0xf] }
  0xb1   :  { %1916 = vmatpush.bf16.msrb.mxu1 %v7327_v39  ;;  %1885 = vmatmul.bf16.vlgmr.msra.gmra.mxu2 %v11571_v20  ;;  %v7375_v20 = vor.u32 %v10410_v58, %v7372_v59  ;;  %v7303_v11 = vor.u32 %v10392_v21, %v7300_v26  ;;  %v1652_v39 = vpop.f32.mrf.mxu0  ;;  %v10384_v58 = vld [vmem:[%s16540_s26 + $0x284] sm:$0xf]  ;;  %v7268_v59 = vld [vmem:[%s16540_s26 + $0x288] sm:$0xf0]  ;;  %v10446_v21 = vld [vmem:[%s16540_s26 + $0x474] sm:$0xf] }
  0xb2   :  { %1929 = vmatpush.bf16.msrb.mxu2 %v7391_v40  ;;  %1898 = vmatmul.bf16.vlgmr.msra.gmra.mxu3 %v11575_v22  ;;  %v7439_v22 = vor.u32 %v10426_v60, %v7436_v62  ;;  %v7287_v40 = vor.u32 %v10388_v31, %v7284_v33  ;;  %v10400_v60 = vld [vmem:[%s16540_s26 + $0x304] sm:$0xf]  ;;  %v10462_v26 = vld [vmem:[%s16540_s26 + $0x4f4] sm:$0xf]  ;;  %v7636_v30 = vld [vmem:[%s16540_s26 + $0x568] sm:$0xf0] }
  0xb3   :  { %1942 = vmatpush.bf16.msrb.mxu3 %v7455_v44  ;;  %v10386_v44 = vld [vmem:[%s16540_s26 + $0x294] sm:$0xf]  ;;  %v1665_v45 = vpop.f32.mrf.mxu1  ;;  %v7583_v18 = vor.u32 %v10462_v26, %v7580_v7  ;;  %v10492_v31 = vld [vmem:[%s16540_s26 + $0x5e4] sm:$0xf]  ;;  %v7639_v37 = vor.u32 %v10476_v29, %v7636_v30  ;;  %v7612_v26 = vld [vmem:[%s16540_s26 + $0x538] sm:$0xf0] }
  0xb4   :  { %1904 = vmatpush.bf16.msrb.mxu0 %v7255_v50  ;;  %v12424_v50 = vadd.f32 %v1665_v45, %v1652_v39  ;;  %v7500_v39 = vld [vmem:[%s16540_s26 + $0x458] sm:$0xf0]  ;;  %v10484_v23 = vld [vmem:[%s16540_s26 + $0x5a4] sm:$0xf]  ;;  %v7668_v24 = vld [vmem:[%s16540_s26 + $0x5a8] sm:$0xf0] }
  0xb5   :  { %1917 = vmatpush.bf16.msrb.mxu1 %v7319_v51  ;;  %v10418_v51 = vld [vmem:[%s16540_s26 + $0x394] sm:$0xf]  ;;  %v7692_v45 = vld [vmem:[%s16540_s26 + $0x5d8] sm:$0xf0] }
  0xb6   :  { %1930 = vmatpush.bf16.msrb.mxu2 %v7383_v52  ;;  %v7404_v52 = vld [vmem:[%s16540_s26 + $0x398] sm:$0xf0]  ;;  %v12447_v62 = vpop.f32.mrf.mxu2  ;;  %v10434_v30 = vld [vmem:[%s16540_s26 + $0x414] sm:$0xf] }
  0xb7   :  { %1943 = vmatpush.bf16.msrb.mxu3 %v7447_v56  ;;  %v7279_v56 = vor.u32 %v10386_v44, %v7276_v47  ;;  %v12458_v5 = vpop.f32.mrf.mxu3  ;;  %v7628_v44 = vld [vmem:[%s16540_s26 + $0x558] sm:$0xf0] }
  0xb8   :  { %1905 = vmatpush.bf16.msrb.mxu0 %v7247_v63  ;;  %v7407_v63 = vor.u32 %v10418_v51, %v7404_v52  ;;  %v7631_v48 = vor.u32 %v10474_v43, %v7628_v44  ;;  %v10472_v52 = vld [vmem:[%s16540_s26 + $0x544] sm:$0xf]  ;;  %v7676_v7 = vld [vmem:[%s16540_s26 + $0x5b8] sm:$0xf0] }
  0xb9   :  { %1918 = vmatpush.bf16.msrb.mxu1 %v7311_v3  ;;  %v7332_v3 = vld [vmem:[%s16540_s26 + $0x308] sm:$0xf0] }
  0xba   :  { %1931 = vmatpush.bf16.msrb.mxu2 %v7375_v20  ;;  %v10416_v20 = vld [vmem:[%s16540_s26 + $0x384] sm:$0xf] }
  0xbb   :  { %1944 = vmatpush.bf16.msrb.mxu3 %v7439_v22  ;;  %v7516_v22 = vld [vmem:[%s16540_s26 + $0x478] sm:$0xf0]  ;;  %v1667_v15 = vpop.f32.mrf.mxu1 }
  0xbc   :  { %1906 = vmatpush.bf16.msrb.mxu0 %v7239_v10  ;;  %v1654_v10 = vpop.f32.mrf.mxu0  ;;  %v7519_v17 = vor.u32 %v10446_v21, %v7516_v22  ;;  %v7548_v21 = vld [vmem:[%s16540_s26 + $0x4b8] sm:$0xf0]  ;;  %v10470_v22 = vld [vmem:[%s16540_s26 + $0x534] sm:$0xf] }
  0xbd   :  { %1919 = vmatpush.bf16.msrb.mxu1 %v7303_v11  ;;  %v7271_v11 = vor.u32 %v10384_v58, %v7268_v59  ;;  %v7615_v10 = vor.u32 %v10470_v22, %v7612_v26 }
  0xbe   :  { %1932 = vmatpush.bf16.msrb.mxu2 %v7367_v12  ;;  %v7335_v12 = vor.u32 %v10400_v60, %v7332_v3  ;;  %v1680_v33 = vpop.f32.mrf.mxu2  ;;  %v10438_v60 = vld [vmem:[%s16540_s26 + $0x434] sm:$0xf] }
  0xbf   :  { %1945 = vmatpush.bf16.msrb.mxu3 %v7431_v16  ;;  %v7399_v16 = vor.u32 %v10416_v20, %v7396_v4  ;;  %v1693_v35 = vpop.f32.mrf.mxu3  ;;  %v10454_v3 = vld [vmem:[%s16540_s26 + $0x4b4] sm:$0xf]  ;;  %v7687_v4 = vor.u32 %v10488_v54, %v7684_v55  ;;  %v7836_v55 = vld [vmem:[%s16540_s26 + $0x6f8] sm:$0xf0] }
  0xc0   :  { %1907 = vmatpush.bf16.msrb.mxu0 %v7231_v25  ;;  %v10460_v25 = vld [vmem:[%s16540_s26 + $0x4e4] sm:$0xf]  ;;  %v7551_v9 = vor.u32 %v10454_v3, %v7548_v21  ;;  %v7532_v35 = vld [vmem:[%s16540_s26 + $0x498] sm:$0xf0] }
  0xc1   :  { %1920 = vmatpush.bf16.msrb.mxu1 %v7295_v27  ;;  %v7711_v27 = vor.u32 %v10494_v13, %v7708_v14  ;;  %v10452_v13 = vld [vmem:[%s16540_s26 + $0x4a4] sm:$0xf]  ;;  %v7964_v3 = vld [vmem:[%s16540_s26 + $0x7f8] sm:$0xf0] }
  0xc2   :  { %1933 = vmatpush.bf16.msrb.mxu2 %v7359_v28  ;;  %v7572_v28 = vld [vmem:[%s16540_s26 + $0x4e8] sm:$0xf0] }
  0xc3   :  { %1946 = vmatpush.bf16.msrb.mxu3 %v7423_v32  ;;  %v7700_v32 = vld [vmem:[%s16540_s26 + $0x5e8] sm:$0xf0]  ;;  %v7575_v36 = vor.u32 %v10460_v25, %v7572_v28 }
  0xc4   :  { %1908 = vmatpush.bf16.msrb.mxu0 %v7223_v38  ;;  %v10442_v38 = vld [vmem:[%s16540_s26 + $0x454] sm:$0xf] }
  0xc5   :  { %1921 = vmatpush.bf16.msrb.mxu1 %v7287_v40  ;;  %v10458_v40 = vld [vmem:[%s16540_s26 + $0x4d4] sm:$0xf] }
  0xc6   :  { %1934 = vmatpush.bf16.msrb.mxu2 %v7351_v41  ;;  %v7703_v41 = vor.u32 %v10492_v31, %v7700_v32  ;;  %v7567_v47 = vor.u32 %v10458_v40, %v7564_v42  ;;  %v7468_v31 = vld [vmem:[%s16540_s26 + $0x418] sm:$0xf0]  ;;  %v10450_v32 = vld [vmem:[%s16540_s26 + $0x494] sm:$0xf]  ;;  %v7460_v42 = vld [vmem:[%s16540_s26 + $0x408] sm:$0xf0] }
  0xc7   :  { %1947 = vmatpush.bf16.msrb.mxu3 %v7415_v46  ;;  %v7503_v46 = vor.u32 %v10442_v38, %v7500_v39  ;;  %v10482_v38 = vld [vmem:[%s16540_s26 + $0x594] sm:$0xf]  ;;  %v7660_v39 = vld [vmem:[%s16540_s26 + $0x598] sm:$0xf0]  ;;  %v7471_v40 = vor.u32 %v10434_v30, %v7468_v31  ;;  %v7535_v43 = vor.u32 %v10450_v32, %v7532_v35 }
  0xc8   :  { %1909 = vmatpush.bf16.msrb.mxu0 %v7215_v53  ;;  %v7620_v53 = vld [vmem:[%s16540_s26 + $0x548] sm:$0xf0]  ;;  %v10538_v30 = vld [vmem:[%s16540_s26 + $0x754] sm:$0xf]  ;;  %v7884_v31 = vld [vmem:[%s16540_s26 + $0x758] sm:$0xf0] }
  0xc9   :  { %1922 = vmatpush.bf16.msrb.mxu1 %v7279_v56  ;;  %v7623_v59 = vor.u32 %v10472_v52, %v7620_v53  ;;  %v7772_v52 = vld [vmem:[%s16540_s26 + $0x678] sm:$0xf0]  ;;  %v10526_v53 = vld [vmem:[%s16540_s26 + $0x6f4] sm:$0xf] }
  0xca   :  { %1935 = vmatpush.bf16.msrb.mxu2 %v7343_v57  ;;  %v7839_v22 = vor.u32 %v10526_v53, %v7836_v55  ;;  %v11151_v32 = vld [vmem:[#allocation1 + $0x12] sm:$0xff]  ;;  %v7948_v35 = vld [vmem:[%s16540_s26 + $0x7d8] sm:$0xf0] }
  0xcb   :  { %1948 = vmatpush.bf16.msrb.mxu3 %v7407_v63  ;;  %v7484_v63 = vld [vmem:[%s16540_s26 + $0x438] sm:$0xf0]  ;;  %v10518_v53 = vld [vmem:[%s16540_s26 + $0x6b4] sm:$0xf] }
  0xcc   :  { %1910 = vmatpush.bf16.msrb.mxu0 %v7207_v6  ;;  %v12560_v57 = vpop.f32.mrf.mxu0  ;;  %v10486_v6 = vld [vmem:[%s16540_s26 + $0x5b4] sm:$0xf]  ;;  %v7487_v8 = vor.u32 %v10438_v60, %v7484_v63 }
  0xcd   :  { %1923 = vmatpush.bf16.msrb.mxu1 %v7271_v11  ;;  %v12571_v20 = vpop.f32.mrf.mxu1  ;;  %v10436_v11 = vld [vmem:[%s16540_s26 + $0x424] sm:$0xf]  ;;  %v7679_v15 = vor.u32 %v10486_v6, %v7676_v7  ;;  %v10558_v63 = vld [vmem:[%s16540_s26 + $0x7f4] sm:$0xf]  ;;  %v7764_v7 = vld [vmem:[%s16540_s26 + $0x668] sm:$0xf0] }
  0xce   :  { %1936 = vmatpush.bf16.msrb.mxu2 %v7335_v12  ;;  %v7476_v12 = vld [vmem:[%s16540_s26 + $0x428] sm:$0xf0]  ;;  %v10508_v6 = vld [vmem:[%s16540_s26 + $0x664] sm:$0xf]  ;;  %v10534_v55 = vld [vmem:[%s16540_s26 + $0x734] sm:$0xf] }
  0xcf   :  { %1949 = vmatpush.bf16.msrb.mxu3 %v7399_v16  ;;  %1911 = vmatmul.bf16.vlgmr.msrb.gmra.mxu0 %v11666_v0  ;;  %v10440_v0 = vld [vmem:[%s16540_s26 + $0x444] sm:$0xf]  ;;  %v7540_v16 = vld [vmem:[%s16540_s26 + $0x4a8] sm:$0xf0]  ;;  %v7479_v25 = vor.u32 %v10436_v11, %v7476_v12 }
  0xd0   :  { %1955 = vmatpush.bf16.msra.mxu0 %v7519_v17  ;;  %1924 = vmatmul.bf16.vlgmr.msrb.gmra.mxu1 %v11670_v2  ;;  %v7556_v2 = vld [vmem:[%s16540_s26 + $0x4c8] sm:$0xf0]  ;;  %v10468_v17 = vld [vmem:[%s16540_s26 + $0x524] sm:$0xf]  ;;  %v7543_v28 = vor.u32 %v10452_v13, %v7540_v16  ;;  %v7767_v16 = vor.u32 %v10508_v6, %v7764_v7 }
  0xd1   :  { %1968 = vmatpush.bf16.msra.mxu1 %v7583_v18  ;;  %1937 = vmatmul.bf16.vlgmr.msrb.gmra.mxu2 %v11664_v61  ;;  %v10490_v61 = vld [vmem:[%s16540_s26 + $0x5d4] sm:$0xf]  ;;  %v7559_v58 = vor.u32 %v10456_v49, %v7556_v2  ;;  %v7604_v18 = vld [vmem:[%s16540_s26 + $0x528] sm:$0xf0]  ;;  %v10540_v11 = vld [vmem:[%s16540_s26 + $0x764] sm:$0xf] }
  0xd2   :  { %1981 = vmatpush.bf16.msra.mxu2 %v7647_v19  ;;  %1950 = vmatmul.bf16.vlgmr.msrb.gmra.mxu3 %v11668_v1  ;;  %v7492_v1 = vld [vmem:[%s16540_s26 + $0x448] sm:$0xf0]  ;;  %v7695_v51 = vor.u32 %v10490_v61, %v7692_v45  ;;  %v7607_v29 = vor.u32 %v10468_v17, %v7604_v18  ;;  %v10448_v61 = vld [vmem:[%s16540_s26 + $0x484] sm:$0xf]  ;;  %v10510_v2 = vld [vmem:[%s16540_s26 + $0x674] sm:$0xf] }
  0xd3   :  { %1994 = vmatpush.bf16.msra.mxu3 %v7711_v27  ;;  %v7495_v56 = vor.u32 %v10440_v0, %v7492_v1  ;;  %v7524_v45 = vld [vmem:[%s16540_s26 + $0x488] sm:$0xf0]  ;;  %v10480_v1 = vld [vmem:[%s16540_s26 + $0x584] sm:$0xf]  ;;  %v7775_v21 = vor.u32 %v10510_v2, %v7772_v52  ;;  %v10502_v2 = vld [vmem:[%s16540_s26 + $0x634] sm:$0xf] }
  0xd4   :  { %1956 = vmatpush.bf16.msra.mxu0 %v7511_v34  ;;  %v12597_v14 = vpop.f32.mrf.mxu2  ;;  %v1706_v27 = vpop.f32.mrf.mxu0  ;;  %v7671_v34 = vor.u32 %v10484_v23, %v7668_v24  ;;  %v7588_v0 = vld [vmem:[%s16540_s26 + $0x508] sm:$0xf0]  ;;  %v10556_v13 = vld [vmem:[%s16540_s26 + $0x7e4] sm:$0xf]  ;;  %v10506_v23 = vld [vmem:[%s16540_s26 + $0x654] sm:$0xf] }
  0xd5   :  { %1969 = vmatpush.bf16.msra.mxu1 %v7575_v36  ;;  %v12608_v19 = vpop.f32.mrf.mxu3  ;;  %v1719_v33 = vpop.f32.mrf.mxu1  ;;  %v10466_v36 = vld [vmem:[%s16540_s26 + $0x514] sm:$0xf]  ;;  %v7652_v49 = vld [vmem:[%s16540_s26 + $0x588] sm:$0xf0]  ;;  %v7756_v24 = vld [vmem:[%s16540_s26 + $0x658] sm:$0xf0] }
  0xd6   :  { %1982 = vmatpush.bf16.msra.mxu2 %v7639_v37  ;;  %v7596_v37 = vld [vmem:[%s16540_s26 + $0x518] sm:$0xf0]  ;;  %v7892_v12 = vld [vmem:[%s16540_s26 + $0x768] sm:$0xf0]  ;;  %v11150_v27 = vld [vmem:[#allocation1] sm:$0xff] }
  0xd7   :  { %1995 = vmatpush.bf16.msra.mxu3 %v7703_v41  ;;  %v10432_v41 = vld [vmem:[%s16540_s26 + $0x404] sm:$0xf]  ;;  %v7599_v44 = vor.u32 %v10466_v36, %v7596_v37  ;;  %v7895_v18 = vor.u32 %v10540_v11, %v7892_v12  ;;  %v11152_v33 = vld [vmem:[#allocation1 + $0x9] sm:$0xff]  ;;  %v11153_v36 = vld [vmem:[#allocation1 + $0x1b] sm:$0xff]  ;;  %v7759_v37 = vor.u32 %v10506_v23, %v7756_v24 }
  0xd8   :  { %1957 = vmatpush.bf16.msra.mxu0 %v7503_v46  ;;  %v10464_v46 = vld [vmem:[%s16540_s26 + $0x504] sm:$0xf]  ;;  %v7463_v54 = vor.u32 %v10432_v41, %v7460_v42  ;;  %v7748_v42 = vld [vmem:[%s16540_s26 + $0x648] sm:$0xf0]  ;;  %v7740_v52 = vld [vmem:[%s16540_s26 + $0x638] sm:$0xf0] }
  0xd9   :  { %1970 = vmatpush.bf16.msra.mxu1 %v7567_v47  ;;  %v7591_v60 = vor.u32 %v10464_v46, %v7588_v0  ;;  %v10504_v41 = vld [vmem:[%s16540_s26 + $0x644] sm:$0xf]  ;;  %v7924_v12 = vld [vmem:[%s16540_s26 + $0x7a8] sm:$0xf0]  ;;  %v10498_v24 = vld [vmem:[%s16540_s26 + $0x614] sm:$0xf] }
  0xda   :  { %1983 = vmatpush.bf16.msra.mxu2 %v7631_v48  ;;  %v7663_v48 = vor.u32 %v10482_v38, %v7660_v39  ;;  %v1679_v38 = vadd.f32 %v12447_v62, %v12424_v50  ;;  %v7812_v50 = vld [vmem:[%s16540_s26 + $0x6c8] sm:$0xf0]  ;;  %v10536_v62 = vld [vmem:[%s16540_s26 + $0x744] sm:$0xf] }
  0xdb   :  { %1996 = vmatpush.bf16.msra.mxu3 %v7695_v51  ;;  %v10552_v46 = vld [vmem:[%s16540_s26 + $0x7c4] sm:$0xf] }
  0xdc   :  { %1958 = vmatpush.bf16.msra.mxu0 %v7495_v56  ;;  %v1732_v47 = vpop.f32.mrf.mxu2  ;;  %v10542_v56 = vld [vmem:[%s16540_s26 + $0x774] sm:$0xf]  ;;  %v10548_v11 = vld [vmem:[%s16540_s26 + $0x7a4] sm:$0xf] }
  0xdd   :  { %1971 = vmatpush.bf16.msra.mxu1 %v7559_v58  ;;  %v1745_v51 = vpop.f32.mrf.mxu3  ;;  %v7900_v58 = vld [vmem:[%s16540_s26 + $0x778] sm:$0xf0]  ;;  %v7940_v47 = vld [vmem:[%s16540_s26 + $0x7c8] sm:$0xf0] }
  0xde   :  { %1984 = vmatpush.bf16.msra.mxu2 %v7623_v59  ;;  %v7527_v59 = vor.u32 %v10448_v61, %v7524_v45  ;;  %v7903_v26 = vor.u32 %v10542_v56, %v7900_v58  ;;  %v7876_v61 = vld [vmem:[%s16540_s26 + $0x748] sm:$0xf0]  ;;  %v7868_v56 = vld [vmem:[%s16540_s26 + $0x738] sm:$0xf0]  ;;  %v10550_v58 = vld [vmem:[%s16540_s26 + $0x7b4] sm:$0xf] }
  0xdf   :  { %1997 = vmatpush.bf16.msra.mxu3 %v7687_v4  ;;  %v7655_v4 = vor.u32 %v10480_v1, %v7652_v49  ;;  %v1692_v1 = vadd.f32 %v12458_v5, %v1679_v38  ;;  %v7879_v51 = vor.u32 %v10536_v62, %v7876_v61  ;;  %v7804_v5 = vld [vmem:[%s16540_s26 + $0x6b8] sm:$0xf0]  ;;  %v7716_v38 = vld [vmem:[%s16540_s26 + $0x608] sm:$0xf0]  ;;  %v8026_v62 = vld [vmem:[%s16542_s24 + $0x70] sm:$0xf] }
  0xe0   :  { %1959 = vmatpush.bf16.msra.mxu0 %v7487_v8  ;;  %v10524_v8 = vld [vmem:[%s16540_s26 + $0x6e4] sm:$0xf]  ;;  %v10575_v61 = vld [vmem:[%s16542_s24 + $0x74] sm:$0xf0] }
  0xe1   :  { %1972 = vmatpush.bf16.msra.mxu1 %v7551_v9  ;;  %v7967_v9 = vor.u32 %v10558_v63, %v7964_v3  ;;  %v1705_v63 = vadd.f32 %v12560_v57, %v1692_v1  ;;  %v7807_v3 = vor.u32 %v10518_v53, %v7804_v5  ;;  %v7796_v57 = vld [vmem:[%s16540_s26 + $0x6a8] sm:$0xf0]  ;;  %v8028_v1 = vld [vmem:[%s16542_s24 + $0x78] sm:$0xf0]  ;;  %v8027_v53 = vor.u32 %v10575_v61, %v8026_v62  ;;  %v7978_v62 = vld [vmem:[%s16542_s24 + $0x10] sm:$0xf] }
  0xe2   :  { %1985 = vmatpush.bf16.msra.mxu2 %v7615_v10  ;;  %v7828_v10 = vld [vmem:[%s16540_s26 + $0x6e8] sm:$0xf0]  ;;  %v10563_v61 = vld [vmem:[%s16542_s24 + $0x14] sm:$0xf0] }
  0xe3   :  { %1998 = vmatpush.bf16.msra.mxu3 %v7679_v15  ;;  %v7956_v15 = vld [vmem:[%s16540_s26 + $0x7e8] sm:$0xf0]  ;;  %v7831_v17 = vor.u32 %v10524_v8, %v7828_v10  ;;  %v10532_v8 = vld [vmem:[%s16540_s26 + $0x724] sm:$0xf] }
  0xe4   :  { %1960 = vmatpush.bf16.msra.mxu0 %v7479_v25  ;;  %v10522_v25 = vld [vmem:[%s16540_s26 + $0x6d4] sm:$0xf] }
  0xe5   :  { %1973 = vmatpush.bf16.msra.mxu1 %v7543_v28  ;;  %v7959_v28 = vor.u32 %v10556_v13, %v7956_v15 }
  0xe6   :  { %1986 = vmatpush.bf16.msra.mxu2 %v7607_v29  ;;  %v7820_v29 = vld [vmem:[%s16540_s26 + $0x6d8] sm:$0xf0] }
  0xe7   :  { %1999 = vmatpush.bf16.msra.mxu3 %v7671_v34  ;;  %v10554_v34 = vld [vmem:[%s16540_s26 + $0x7d4] sm:$0xf]  ;;  %v7823_v39 = vor.u32 %v10522_v25, %v7820_v29  ;;  %v7724_v25 = vld [vmem:[%s16540_s26 + $0x618] sm:$0xf0] }
  0xe8   :  { %1961 = vmatpush.bf16.msra.mxu0 %v7471_v40  ;;  %v7887_v40 = vor.u32 %v10538_v30, %v7884_v31  ;;  %v10530_v29 = vld [vmem:[%s16540_s26 + $0x714] sm:$0xf]  ;;  %v7852_v30 = vld [vmem:[%s16540_s26 + $0x718] sm:$0xf0] }
  0xe9   :  { %1974 = vmatpush.bf16.msra.mxu1 %v7535_v43  ;;  %v10520_v43 = vld [vmem:[%s16540_s26 + $0x6c4] sm:$0xf]  ;;  %v10546_v31 = vld [vmem:[%s16540_s26 + $0x794] sm:$0xf] }
  0xea   :  { %1987 = vmatpush.bf16.msra.mxu2 %v7599_v44  ;;  %v7951_v44 = vor.u32 %v10554_v34, %v7948_v35  ;;  %v7815_v49 = vor.u32 %v10520_v43, %v7812_v50  ;;  %v10496_v34 = vld [vmem:[%s16540_s26 + $0x604] sm:$0xf]  ;;  %v7908_v50 = vld [vmem:[%s16540_s26 + $0x788] sm:$0xf0] }
  0xeb   :  { %2000 = vmatpush.bf16.msra.mxu3 %v7663_v48  ;;  %v7751_v48 = vor.u32 %v10504_v41, %v7748_v42  ;;  %v7844_v42 = vld [vmem:[%s16540_s26 + $0x708] sm:$0xf0]  ;;  %v10544_v43 = vld [vmem:[%s16540_s26 + $0x784] sm:$0xf] }
  0xec   :  { %1962 = vmatpush.bf16.msra.mxu0 %v7463_v54  ;;  %v12756_v45 = vpop.f32.mrf.mxu0  ;;  %v7943_v54 = vor.u32 %v10552_v46, %v7940_v47  ;;  %v7719_v47 = vor.u32 %v10496_v34, %v7716_v38 }
  0xed   :  { %1975 = vmatpush.bf16.msra.mxu1 %v7527_v59  ;;  %v12764_v0 = vpop.f32.mrf.mxu1  ;;  %v7932_v59 = vld [vmem:[%s16540_s26 + $0x7b8] sm:$0xf0] }
  0xee   :  { %1988 = vmatpush.bf16.msra.mxu2 %v7591_v60  ;;  %v7743_v60 = vor.u32 %v10502_v2, %v7740_v52  ;;  %v7935_v6 = vor.u32 %v10550_v58, %v7932_v59  ;;  %v7911_v52 = vor.u32 %v10544_v43, %v7908_v50  ;;  %v8020_v58 = vld [vmem:[%s16542_s24 + $0x68] sm:$0xf0] }
  0xef   :  { %2001 = vmatpush.bf16.msra.mxu3 %v7655_v4  ;;  %1963 = vmatmul.bf16.vlgmr.msra.gmra.mxu0 %v11150_v27  ;;  %v7871_v4 = vor.u32 %v10534_v55, %v7868_v56  ;;  %v10514_v27 = vld [vmem:[%s16540_s26 + $0x694] sm:$0xf]  ;;  %v8018_v55 = vld [vmem:[%s16542_s24 + $0x60] sm:$0xf]  ;;  %v10573_v56 = vld [vmem:[%s16542_s24 + $0x64] sm:$0xf0] }
  0xf0   :  { %2007 = vmatpush.bf16.msrb.mxu0 %v7775_v21  ;;  %1976 = vmatmul.bf16.vlgmr.msra.gmra.mxu1 %v11152_v33  ;;  %v10500_v21 = vld [vmem:[%s16540_s26 + $0x624] sm:$0xf]  ;;  %v7727_v33 = vor.u32 %v10498_v24, %v7724_v25  ;;  %v7994_v25 = vld [vmem:[%s16542_s24 + $0x30] sm:$0xf] }
  0xf1   :  { %2020 = vmatpush.bf16.msrb.mxu1 %v7839_v22  ;;  %1989 = vmatmul.bf16.vlgmr.msra.gmra.mxu2 %v11151_v32  ;;  %v7732_v22 = vld [vmem:[%s16540_s26 + $0x628] sm:$0xf0]  ;;  %v7916_v32 = vld [vmem:[%s16540_s26 + $0x798] sm:$0xf0] }
  0xf2   :  { %2033 = vmatpush.bf16.msrb.mxu2 %v7903_v26  ;;  %2002 = vmatmul.bf16.vlgmr.msra.gmra.mxu3 %v11153_v36  ;;  %v10516_v26 = vld [vmem:[%s16540_s26 + $0x6a4] sm:$0xf]  ;;  %v7735_v15 = vor.u32 %v10500_v21, %v7732_v22  ;;  %v7919_v41 = vor.u32 %v10546_v31, %v7916_v32  ;;  %v11155_v21 = vld [vmem:[#allocation1 + $0x2d] sm:$0xff]  ;;  %v11156_v22 = vld [vmem:[#allocation1 + $0x36] sm:$0xff] }
  0xf3   :  { %2046 = vmatpush.bf16.msrb.mxu3 %v7967_v9  ;;  %v7860_v9 = vld [vmem:[%s16540_s26 + $0x728] sm:$0xf0]  ;;  %v7986_v32 = vld [vmem:[%s16542_s24 + $0x20] sm:$0xf] }
  0xf4   :  { %2008 = vmatpush.bf16.msrb.mxu0 %v7767_v16  ;;  %v12801_v7 = vpop.f32.mrf.mxu2  ;;  %v1758_v13 = vpop.f32.mrf.mxu0  ;;  %v7863_v23 = vor.u32 %v10532_v8, %v7860_v9 }
  0xf5   :  { %2021 = vmatpush.bf16.msrb.mxu1 %v7831_v17  ;;  %v12812_v10 = vpop.f32.mrf.mxu3  ;;  %v1771_v16 = vpop.f32.mrf.mxu1  ;;  %v1718_v17 = vadd.f32 %v12571_v20, %v1705_v63  ;;  %v7788_v20 = vld [vmem:[%s16540_s26 + $0x698] sm:$0xf0]  ;;  %v10568_v13 = vld [vmem:[%s16542_s24 + $0x44] sm:$0xf] }
  0xf6   :  { %2034 = vmatpush.bf16.msrb.mxu2 %v7895_v18  ;;  %v7799_v18 = vor.u32 %v10516_v26, %v7796_v57  ;;  %v7791_v36 = vor.u32 %v10514_v27, %v7788_v20  ;;  %v8012_v26 = vld [vmem:[%s16542_s24 + $0x58] sm:$0xf0]  ;;  %v10567_v27 = vld [vmem:[%s16542_s24 + $0x34] sm:$0xf0] }
  0xf7   :  { %2047 = vmatpush.bf16.msrb.mxu3 %v7959_v28  ;;  %v7927_v28 = vor.u32 %v10548_v11, %v7924_v12  ;;  %v1731_v35 = vadd.f32 %v12597_v14, %v1718_v17  ;;  %v10528_v14 = vld [vmem:[%s16540_s26 + $0x704] sm:$0xf]  ;;  %v8002_v11 = vld [vmem:[%s16542_s24 + $0x40] sm:$0xf]  ;;  %v10569_v12 = vld [vmem:[%s16542_s24 + $0x44] sm:$0xf0]  ;;  %v7995_v20 = vor.u32 %v10567_v27, %v7994_v25 }
  0xf8   :  { %2009 = vmatpush.bf16.msrb.mxu0 %v7759_v37  ;;  %v7855_v37 = vor.u32 %v10530_v29, %v7852_v30  ;;  %v7847_v2 = vor.u32 %v10528_v14, %v7844_v42  ;;  %v11157_v57 = vld [vmem:[#allocation1 + $0x3f] sm:$0xff]  ;;  %v8003_v17 = vor.u32 %v10569_v12, %v8002_v11 }
  0xf9   :  { %2022 = vmatpush.bf16.msrb.mxu1 %v7823_v39  ;;  %v10512_v39 = vld [vmem:[%s16540_s26 + $0x684] sm:$0xf]  ;;  %v12938_v29 = vld [vmem:[%s16543_s23] sm:$0x3] }
  0xfa   :  { %2035 = vmatpush.bf16.msrb.mxu2 %v7887_v40  ;;  %v7780_v40 = vld [vmem:[%s16540_s26 + $0x688] sm:$0xf0] }
  0xfb   :  { %2048 = vmatpush.bf16.msrb.mxu3 %v7951_v44 }
  0xfc   :  { %2010 = vmatpush.bf16.msrb.mxu0 %v7751_v48  ;;  %v1784_v44 = vpop.f32.mrf.mxu2  ;;  %v10574_v48 = vld [vmem:[%s16542_s24 + $0x74] sm:$0xf] }
  0xfd   :  { %2023 = vmatpush.bf16.msrb.mxu1 %v7815_v49  ;;  %v1797_v46 = vpop.f32.mrf.mxu3  ;;  %v1744_v49 = vadd.f32 %v12608_v19, %v1731_v35  ;;  %v8031_v5 = vor.u32 %v10574_v48, %v8028_v1  ;;  %v10572_v19 = vld [vmem:[%s16542_s24 + $0x64] sm:$0xf]  ;;  %v12949_v35 = vld [vmem:[%s16544_s27] sm:$0x3]  ;;  %v7979_v1 = vor.u32 %v10563_v61, %v7978_v62  ;;  %v8058_v61 = vld [vmem:[%s16542_s24 + $0xb0] sm:$0xf] }
  0xfe   :  { %2036 = vmatpush.bf16.msrb.mxu2 %v7879_v51  ;;  %v7783_v51 = vor.u32 %v10512_v39, %v7780_v40  ;;  %v8023_v63 = vor.u32 %v10572_v19, %v8020_v58  ;;  %v2061_v40 = vperm.slane %v12938_v29, 0  ;;  %v2069_v44 = vperm.slane %v12949_v35, 0  ;;  %v10562_v46 = vld [vmem:[%s16542_s24 + $0x14] sm:$0xf] }
  0xff   :  { %2049 = vmatpush.bf16.msrb.mxu3 %v7943_v54  ;;  %v1757_v54 = vadd.f32 %v12756_v45, %v1744_v49  ;;  %v8019_v45 = vor.u32 %v10573_v56, %v8018_v55 }
 0x100   :  { %2011 = vmatpush.bf16.msrb.mxu0 %v7743_v60  ;;  %v11154_v60 = vld [vmem:[#allocation1 + $0x24] sm:$0xff] }
 0x101   :  { %2024 = vmatpush.bf16.msrb.mxu1 %v7807_v3  ;;  %v1770_v59 = vadd.f32 %v12764_v0, %v1757_v54  ;;  %v8010_v3 = vld [vmem:[%s16542_s24 + $0x50] sm:$0xf]  ;;  %v10570_v0 = vld [vmem:[%s16542_s24 + $0x54] sm:$0xf]  ;;  %v7972_v54 = vld [vmem:[%s16542_s24 + $0x8] sm:$0xf0] }
 0x102   :  { %2037 = vmatpush.bf16.msrb.mxu2 %v7871_v4  ;;  %v10571_v4 = vld [vmem:[%s16542_s24 + $0x54] sm:$0xf0]  ;;  %v8015_v9 = vor.u32 %v10570_v0, %v8012_v26 }
 0x103   :  { %2050 = vmatpush.bf16.msrb.mxu3 %v7935_v6  ;;  %v1783_v6 = vadd.f32 %v12801_v7, %v1770_v59  ;;  %v8011_v8 = vor.u32 %v10571_v4, %v8010_v3  ;;  %v8004_v7 = vld [vmem:[%s16542_s24 + $0x48] sm:$0xf0] }
 0x104   :  { %2012 = vmatpush.bf16.msrb.mxu0 %v7735_v15  ;;  %v8007_v24 = vor.u32 %v10568_v13, %v8004_v7  ;;  %v8090_v7 = vld [vmem:[%s16542_s24 + $0xf0] sm:$0xf] }
 0x105   :  { %2025 = vmatpush.bf16.msrb.mxu1 %v7799_v18  ;;  %v1796_v15 = vadd.f32 %v12812_v10, %v1783_v6  ;;  %v7996_v10 = vld [vmem:[%s16542_s24 + $0x38] sm:$0xf0] }
 0x106   :  { %2038 = vmatpush.bf16.msrb.mxu2 %v7863_v23 }
 0x107   :  { %2051 = vmatpush.bf16.msrb.mxu3 %v7927_v28  ;;  %v10566_v28 = vld [vmem:[%s16542_s24 + $0x34] sm:$0xf] }
 0x108   :  { %2013 = vmatpush.bf16.msrb.mxu0 %v7727_v33  ;;  %v7999_v31 = vor.u32 %v10566_v28, %v7996_v10  ;;  %v10565_v33 = vld [vmem:[%s16542_s24 + $0x24] sm:$0xf0]  ;;  %v8082_v28 = vld [vmem:[%s16542_s24 + $0xe0] sm:$0xf] }
 0x109   :  { %2026 = vmatpush.bf16.msrb.mxu1 %v7791_v36  ;;  %v10564_v36 = vld [vmem:[%s16542_s24 + $0x24] sm:$0xf]  ;;  %v7987_v14 = vor.u32 %v10565_v33, %v7986_v32  ;;  %v10589_v10 = vld [vmem:[%s16542_s24 + $0xe4] sm:$0xf0]  ;;  %v8084_v32 = vld [vmem:[%s16542_s24 + $0xe8] sm:$0xf0] }
 0x10a   :  { %2039 = vmatpush.bf16.msrb.mxu2 %v7855_v37  ;;  %v7988_v37 = vld [vmem:[%s16542_s24 + $0x28] sm:$0xf0]  ;;  %v8074_v33 = vld [vmem:[%s16542_s24 + $0xd0] sm:$0xf] }
 0x10b   :  { %2052 = vmatpush.bf16.msrb.mxu3 %v7919_v41  ;;  %v7991_v50 = vor.u32 %v10564_v36, %v7988_v37  ;;  %v10586_v37 = vld [vmem:[%s16542_s24 + $0xd4] sm:$0xf] }
 0x10c   :  { %2014 = vmatpush.bf16.msrb.mxu0 %v7719_v47  ;;  %v1808_v16 = vpop.f32.mrf.mxu0  ;;  %v7980_v47 = vld [vmem:[%s16542_s24 + $0x18] sm:$0xf0] }
 0x10d   :  { %2027 = vmatpush.bf16.msrb.mxu1 %v7783_v51  ;;  %v1821_v18 = vpop.f32.mrf.mxu1  ;;  %v1809_v23 = vadd.f32 %v1808_v16, %v1796_v15  ;;  %v7983_v51 = vor.u32 %v10562_v46, %v7980_v47  ;;  %v10591_v15 = vld [vmem:[%s16542_s24 + $0xf4] sm:$0xf0]  ;;  %v10590_v16 = vld [vmem:[%s16542_s24 + $0xf4] sm:$0xf] }
 0x10e   :  { %2040 = vmatpush.bf16.msrb.mxu2 %v7847_v2  ;;  %v7970_v2 = vld [vmem:[%s16542_s24] sm:$0xf]  ;;  %v10583_v46 = vld [vmem:[%s16542_s24 + $0xb4] sm:$0xf0]  ;;  %v10582_v47 = vld [vmem:[%s16542_s24 + $0xb4] sm:$0xf] }
 0x10f   :  { %2053 = vmatpush.bf16.msrb.mxu3 %v7911_v52  ;;  %2015 = vmatmul.bf16.vlgmr.msrb.gmra.mxu0 %v11154_v60  ;;  %v1822_v30 = vadd.f32 %v1821_v18, %v1809_v23  ;;  %v10561_v52 = vld [vmem:[%s16542_s24 + $0x4] sm:$0xf0]  ;;  %v8091_v18 = vor.u32 %v10591_v15, %v8090_v7  ;;  %v8092_v23 = vld [vmem:[%s16542_s24 + $0xf8] sm:$0xf0] }
 0x110   :  { %2275 = vmatpush.bf16.msra.mxu0 %v8027_v53  ;;  %2028 = vmatmul.bf16.vlgmr.msrb.gmra.mxu1 %v11155_v21  ;;  %v10560_v53 = vld [vmem:[%s16542_s24 + $0x4] sm:$0xf]  ;;  %v7971_v19 = vor.u32 %v10561_v52, %v7970_v2  ;;  %v8095_v25 = vor.u32 %v10590_v16, %v8092_v23  ;;  %v8050_v52 = vld [vmem:[%s16542_s24 + $0xa0] sm:$0xf] }
 0x111   :  { %2041 = vmatmul.bf16.vlgmr.msrb.gmra.mxu2 %v11156_v22  ;;  %v7975_v58 = vor.u32 %v10560_v53, %v7972_v54  ;;  %2288 = vmatpush.bf16.msra.mxu1 %v8091_v18  ;;  %v10581_v53 = vld [vmem:[%s16542_s24 + $0xa4] sm:$0xf0]  ;;  %v10580_v54 = vld [vmem:[%s16542_s24 + $0xa4] sm:$0xf] }
 0x112   :  { %2301 = vmatpush.bf16.msra.mxu2 %v8031_v5  ;;  %2054 = vmatmul.bf16.vlgmr.msrb.gmra.mxu3 %v11157_v57 }
 0x113   :  { %2314 = vmatpush.bf16.msra.mxu3 %v8095_v25 }
 0x114   :  { %2276 = vmatpush.bf16.msra.mxu0 %v8019_v45  ;;  %v1834_v34 = vpop.f32.mrf.mxu2  ;;  %v1810_v41 = vpop.f32.mrf.mxu0 }
 0x115   :  { %v1835_v38 = vadd.f32 %v1834_v34, %v1822_v30  ;;  %v1847_v39 = vpop.f32.mrf.mxu3  ;;  %v1823_v42 = vpop.f32.mrf.mxu1  ;;  %v10587_v34 = vld [vmem:[%s16542_s24 + $0xd4] sm:$0xf0]  ;;  %v8066_v41 = vld [vmem:[%s16542_s24 + $0xc0] sm:$0xf] }
 0x116   :  { %2302 = vmatpush.bf16.msra.mxu2 %v8023_v63  ;;  %v10584_v42 = vld [vmem:[%s16542_s24 + $0xc4] sm:$0xf] }
 0x117   :  { %v1848_v43 = vadd.f32 %v1847_v39, %v1835_v38  ;;  %v8076_v38 = vld [vmem:[%s16542_s24 + $0xd8] sm:$0xf0]  ;;  %v8075_v39 = vor.u32 %v10587_v34, %v8074_v33 }
 0x118   :  { %2277 = vmatpush.bf16.msra.mxu0 %v8011_v8 }
 0x119   :  { %v2065_v48 = vmul.f32 %v2061_v40, %v1848_v43  ;;  %v8079_v40 = vor.u32 %v10586_v37, %v8076_v38  ;;  %v2070_v37 = vperm.slane %v12949_v35, 1  ;;  %v10599_v38 = vld [vmem:[%s16545_s1 + $0x38] sm:$0xff]  ;;  %v10606_v35 = vld [vmem:[%s16545_s1 + $0x70] sm:$0xff] }
 0x11a   :  { %2303 = vmatpush.bf16.msra.mxu2 %v8015_v9 }
 0x11b   :  { %v2073_v49 = vadd.f32 %v2069_v44, %v2065_v48  ;;  %v8068_v44 = vld [vmem:[%s16542_s24 + $0xc8] sm:$0xf0] }
 0x11c   :  { %2278 = vmatpush.bf16.msra.mxu0 %v8003_v17  ;;  %v1836_v5 = vpop.f32.mrf.mxu2 }
 0x11d   :  { %vm2075_vm0 = vcmp.ge.f32.partialorder %v2073_v49, 0.0  ;;  %v2077_v55 = vmul.f32 0.1, %v2073_v49  ;;  %v1849_v56 = vpop.f32.mrf.mxu3  ;;  %v8051_v5 = vor.u32 %v10581_v53, %v8050_v52  ;;  %v10603_v52 = vld [vmem:[%s16545_s1 + $0x58] sm:$0xff]  ;;  %v10593_v53 = vld [vmem:[%s16545_s1 + $0x8] sm:$0xff] }
 0x11e   :  { %2304 = vmatpush.bf16.msra.mxu2 %v8007_v24 }
 0x11f   :  { %v2079_v45 = vsel %vm2075_vm0, %v2073_v49, %v2077_v55  ;;  %v8060_v49 = vld [vmem:[%s16542_s24 + $0xb8] sm:$0xf0]  ;;  %v8052_v55 = vld [vmem:[%s16542_s24 + $0xa8] sm:$0xf0]  ;;  %vm6917_vm0 = vcmask 1041408  }
 0x120   :  { %2279 = vmatpush.bf16.msra.mxu0 %v7995_v20  ;;  %v2081_v59 = vpack.c.bf16 %v2079_v45, %v2079_v45  ;;  %v10588_v20 = vld [vmem:[%s16542_s24 + $0xe4] sm:$0xf] }
 0x121   :  { %v8087_v36 = vor.u32 %v10588_v20, %v8084_v32  ;;  %v2062_v32 = vperm.slane %v12938_v29, 1  ;;  %v10598_v29 = vld [vmem:[%s16545_s1 + $0x30] sm:$0xff] }
 0x122   :  { %2305 = vmatpush.bf16.msra.mxu2 %v7999_v31  ;;  %v8083_v31 = vor.u32 %v10589_v10, %v8082_v28 }
 0x123   :  { %2315 = vmatpush.bf16.msra.mxu3 %v8087_v36 }
 0x124   :  { %2280 = vmatpush.bf16.msra.mxu0 %v7987_v14  ;;  %2289 = vmatpush.bf16.msra.mxu1 %v8083_v31  ;;  %v10585_v14 = vld [vmem:[%s16542_s24 + $0xc4] sm:$0xf0] }
 0x125   :  { %v8067_v43 = vor.u32 %v10585_v14, %v8066_v41 }
 0x126   :  { %2306 = vmatpush.bf16.msra.mxu2 %v7991_v50  ;;  %v8071_v50 = vor.u32 %v10584_v42, %v8068_v44 }
 0x127   :  { %2316 = vmatpush.bf16.msra.mxu3 %v8079_v40 }
 0x128   :  { %2281 = vmatpush.bf16.msra.mxu0 %v7979_v1  ;;  %2290 = vmatpush.bf16.msra.mxu1 %v8075_v39  ;;  %v8059_v1 = vor.u32 %v10583_v46, %v8058_v61  ;;  %v10607_v39 = vld [vmem:[%s16545_s1 + $0x78] sm:$0xff]  ;;  %v10596_v61 = vld [vmem:[%s16545_s1 + $0x20] sm:$0xff] }
 0x129   :  { %v10604_v46 = vld [vmem:[%s16545_s1 + $0x60] sm:$0xff] }
 0x12a   :  { %2307 = vmatpush.bf16.msra.mxu2 %v7983_v51  ;;  %v8063_v51 = vor.u32 %v10582_v47, %v8060_v49  ;;  %v10595_v47 = vld [vmem:[%s16545_s1 + $0x18] sm:$0xff] }
 0x12b   :  { %2317 = vmatpush.bf16.msra.mxu3 %v8071_v50  ;;  %v10597_v50 = vld [vmem:[%s16545_s1 + $0x28] sm:$0xff] }
 0x12c   :  { %2282 = vmatpush.bf16.msra.mxu0 %v7971_v19  ;;  %v1860_v60 = vpop.f32.mrf.mxu0  ;;  %2291 = vmatpush.bf16.msra.mxu1 %v8067_v43  ;;  %v8055_v19 = vor.u32 %v10580_v54, %v8052_v55  ;;  %v10602_v54 = vld [vmem:[%s16545_s1 + $0x50] sm:$0xff]  ;;  %v10601_v55 = vld [vmem:[%s16545_s1 + $0x48] sm:$0xff] }
 0x12d   :  { %v1873_v63 = vpop.f32.mrf.mxu1 }
 0x12e   :  { %2308 = vmatpush.bf16.msra.mxu2 %v7975_v58  ;;  %v1874_v3 = vadd.f32 %v1873_v63, %v1860_v60  ;;  %v8042_v63 = vld [vmem:[%s16542_s24 + $0x90] sm:$0xf] }
 0x12f   :  { %2283 = vmatmul.bf16.vlgmr.msra.gmra.mxu0 %v2081_v59  ;;  %2318 = vmatpush.bf16.msra.mxu3 %v8063_v51 }
 0x130   :  { %2292 = vmatpush.bf16.msra.mxu1 %v8059_v1  ;;  %2479 = vmatpush.bf16.msrb.mxu0 %v10599_v38  ;;  %v11138_v38 = vld [vmem:[%s16518_s11] ss:$0 sm:$0xff] }
 0x131   :  { %2309 = vmatmul.bf16.vlgmr.msra.gmra.mxu2 %v2081_v59 }
 0x133   :  { %2319 = vmatpush.bf16.msra.mxu3 %v8055_v19  ;;  %v2327_v19 = vld [vmem:[%s16514_s5] sm:$0x3] }
 0x134   :  { %v1886_v4 = vpop.f32.mrf.mxu2  ;;  %v1862_v26 = vpop.f32.mrf.mxu0  ;;  %2293 = vmatpush.bf16.msra.mxu1 %v8051_v5  ;;  %2480 = vmatpush.bf16.msrb.mxu0 %v10598_v29  ;;  %v10592_v5 = vld [vmem:[%s16545_s1] sm:$0xff] }
 0x135   :  { %v1887_v21 = vadd.f32 %v1886_v4, %v1874_v3  ;;  %v1899_v22 = vpop.f32.mrf.mxu3  ;;  %v1875_v6 = vpop.f32.mrf.mxu1  ;;  %v10579_v3 = vld [vmem:[%s16542_s24 + $0x94] sm:$0xf0] }
 0x136   :  { %v8043_v4 = vor.u32 %v10579_v3, %v8042_v63  ;;  %v8034_v6 = vld [vmem:[%s16542_s24 + $0x80] sm:$0xf] }
 0x137   :  { %v1900_v0 = vadd.f32 %v1899_v22, %v1887_v21  ;;  %v10578_v21 = vld [vmem:[%s16542_s24 + $0x94] sm:$0xf]  ;;  %v8044_v22 = vld [vmem:[%s16542_s24 + $0x98] sm:$0xf0] }
 0x138   :  { %2294 = vmatpush.bf16.msra.mxu1 %v8043_v4  ;;  %2481 = vmatpush.bf16.msrb.mxu0 %v10597_v50  ;;  %v10612_v50 = vld [vmem:[%s16523_s13 + $0x10] sm:$0xff] }
 0x13c   :  { %v1888_v57 = vpop.f32.mrf.mxu2  ;;  %2482 = vmatpush.bf16.msrb.mxu0 %v10596_v61  ;;  %v11141_v61 = vld [vmem:[%s16522_s15] ss:$0 sm:$0xff] }
 0x13d   :  { %v1901_v8 = vpop.f32.mrf.mxu3  ;;  %v10577_v57 = vld [vmem:[%s16542_s24 + $0x84] sm:$0xf0] }
 0x13e   :  { %v10576_v8 = vld [vmem:[%s16542_s24 + $0x84] sm:$0xf] }
 0x140   :  { %2483 = vmatpush.bf16.msrb.mxu0 %v10595_v47 }
 0x14c   :  { %v1912_v9 = vpop.f32.mrf.mxu0 }
 0x14d   :  { %v1925_v11 = vpop.f32.mrf.mxu1  ;;  %v1913_v2 = vadd.f32 %v1912_v9, %v1900_v0  ;;  %v8047_v0 = vor.u32 %v10578_v21, %v8044_v22  ;;  %v8035_v9 = vor.u32 %v10577_v57, %v8034_v6  ;;  %v2330_v21 = vperm.slane %v2327_v19, 1 }
 0x14f   :  { %v1926_v59 = vadd.f32 %v1925_v11, %v1913_v2  ;;  %2320 = vmatpush.bf16.msra.mxu3 %v8047_v0  ;;  %v8036_v11 = vld [vmem:[%s16542_s24 + $0x88] sm:$0xf0]  ;;  %2295 = vmatpush.bf16.msra.mxu1 %v8035_v9  ;;  %v10594_v2 = vld [vmem:[%s16545_s1 + $0x10] sm:$0xff] }
 0x150   :  { %2484 = vmatpush.bf16.msrb.mxu0 %v10594_v2 }
 0x153   :  { %2492 = vmatpush.bf16.msrb.mxu1 %v10607_v39  ;;  %v11139_v39 = vld [vmem:[%s16519_s12] ss:$0 sm:$0xff] }
 0x154   :  { %v12983_v12 = vpop.f32.mrf.mxu2  ;;  %v1914_v17 = vpop.f32.mrf.mxu0  ;;  %2485 = vmatpush.bf16.msrb.mxu0 %v10593_v53 }
 0x155   :  { %v12985_v13 = vpop.f32.mrf.mxu3  ;;  %v1927_v24 = vpop.f32.mrf.mxu1  ;;  %v1939_v26 = vadd.f32 %v12983_v12, %v1926_v59  ;;  %v8039_v12 = vor.u32 %v10576_v8, %v8036_v11 }
 0x157   :  { %v1952_v16 = vadd.f32 %v12985_v13, %v1939_v26  ;;  %2321 = vmatpush.bf16.msra.mxu3 %v8039_v12  ;;  %2493 = vmatpush.bf16.msrb.mxu1 %v10606_v35 }
 0x158   :  { %2486 = vmatpush.bf16.msrb.mxu0 %v10592_v5  ;;  %v10614_v5 = vld [vmem:[%s16523_s13 + $0x20] sm:$0xff] }
 0x15c   :  { %v1940_v27 = vpop.f32.mrf.mxu2 }
 0x15d   :  { %v1953_v30 = vpop.f32.mrf.mxu3 }
 0x16c   :  { %v1964_v62 = vpop.f32.mrf.mxu0 }
 0x16d   :  { %v1977_v48 = vpop.f32.mrf.mxu1  ;;  %v1965_v17 = vadd.f32 %v1964_v62, %v1952_v16  ;;  %v10605_v62 = vld [vmem:[%s16545_s1 + $0x68] sm:$0xff] }
 0x16e   :  { %2494 = vmatpush.bf16.msrb.mxu1 %v10605_v62  ;;  %v11140_v62 = vld [vmem:[%s16521_s14] ss:$0 sm:$0xff] }
 0x16f   :  { %v1978_v18 = vadd.f32 %v1977_v48, %v1965_v17 }
 0x172   :  { %2495 = vmatpush.bf16.msrb.mxu1 %v10604_v46 }
 0x174   :  { %v1990_v56 = vpop.f32.mrf.mxu2  ;;  %v1966_v45 = vpop.f32.mrf.mxu0 }
 0x175   :  { %v2003_v58 = vpop.f32.mrf.mxu3  ;;  %v1979_v60 = vpop.f32.mrf.mxu1  ;;  %v1991_v23 = vadd.f32 %v1990_v56, %v1978_v18  ;;  %v10600_v56 = vld [vmem:[%s16545_s1 + $0x40] sm:$0xff]  ;;  %v2329_v45 = vperm.slane %v2327_v19, 0  ;;  %v10609_v18 = vld [vmem:[%s16520_s10 + $0x8] sm:$0xff] }
 0x176   :  { %2496 = vmatpush.bf16.msrb.mxu1 %v10603_v52  ;;  %2545 = vmatpush.bf16.msrb.mxu2 %v10609_v18 }
 0x177   :  { %v2004_v24 = vadd.f32 %v2003_v58, %v1991_v23  ;;  %v2335_v58 = vld [vmem:[%s16515_s6] sm:$0x3] }
 0x178   :  { %v2337_v63 = vperm.slane %v2335_v58, 0  ;;  %v2338_v6 = vperm.slane %v2335_v58, 1  ;;  %v10608_v23 = vld [vmem:[%s16520_s10] sm:$0xff] }
 0x17a   :  { %2497 = vmatpush.bf16.msrb.mxu1 %v10602_v54  ;;  %2546 = vmatpush.bf16.msrb.mxu2 %v10608_v23  ;;  %v10615_v54 = vld [vmem:[%s16523_s13 + $0x28] sm:$0xff] }
 0x17c   :  { %v1992_v7 = vpop.f32.mrf.mxu2 }
 0x17d   :  { %v2005_v15 = vpop.f32.mrf.mxu3 }
 0x17e   :  { %2498 = vmatpush.bf16.msrb.mxu1 %v10601_v55  ;;  %v11142_v55 = vld [vmem:[%s16521_s14 + $0x1] ss:$0 sm:$0xff] }
 0x182   :  { %2499 = vmatpush.bf16.msrb.mxu1 %v10600_v56  ;;  %v11143_v56 = vld [vmem:[%s16522_s15 + $0x1] ss:$0 sm:$0xff] }
 0x18c   :  { %v2016_v25 = vpop.f32.mrf.mxu0 }
 0x18d   :  { %v2029_v27 = vpop.f32.mrf.mxu1  ;;  %v2017_v28 = vadd.f32 %v2016_v25, %v2004_v24  ;;  %v11136_v25 = vld [vmem:[%s16516_s8] ss:$0 sm:$0xff] }
 0x18f   :  { %v2030_v10 = vadd.f32 %v2029_v27, %v2017_v28 }
 0x194   :  { %v2042_v20 = vpop.f32.mrf.mxu2  ;;  %v2018_v33 = vpop.f32.mrf.mxu0 }
 0x195   :  { %v2043_v30 = vadd.f32 %v2042_v20, %v2030_v10  ;;  %v2055_v31 = vpop.f32.mrf.mxu3  ;;  %v2031_v34 = vpop.f32.mrf.mxu1  ;;  %v11137_v10 = vld [vmem:[%s16517_s9] ss:$0 sm:$0xff] }
 0x197   :  { %v2056_v36 = vadd.f32 %v2055_v31, %v2043_v30 }
 0x199   :  { %v2066_v13 = vmul.f32 %v2062_v32, %v2056_v36 }
 0x19b   :  { %v2074_v40 = vadd.f32 %v2070_v37, %v2066_v13  ;;  %v10611_v37 = vld [vmem:[%s16523_s13 + $0x8] sm:$0xff]  ;;  %v10610_v13 = vld [vmem:[%s16523_s13] sm:$0xff] }
 0x19c   :  { %v2044_v41 = vpop.f32.mrf.mxu2  ;;  %2591 = vmatpush.bf16.msrb.mxu3 %v10611_v37 }
 0x19d   :  { %vm2076_vm1 = vcmp.ge.f32.partialorder %v2074_v40, 0.0  ;;  %v2078_v14 = vmul.f32 0.1, %v2074_v40  ;;  %v2057_v42 = vpop.f32.mrf.mxu3 }
 0x19f   :  { %v2080_v43 = vsel %vm2076_vm1, %v2074_v40, %v2078_v14  ;;  %vm6919_vm1 = vcmask 1045508  }
 0x1a0   :  { %v2082_v44 = vpack.c.bf16 %v2080_v43, %v2080_v43  ;;  %2592 = vmatpush.bf16.msrb.mxu3 %v10610_v13  ;;  %v8248_v13 = vld [vmem:[%s16524_s16 + $0x10] sm:$0xf] }
 0x1a2   :  { %2296 = vmatmul.bf16.vlgmr.msra.gmra.mxu1 %v2082_v44  ;;  %2322 = vmatmul.bf16.vlgmr.msra.gmra.mxu3 %v2082_v44  ;;  %v10613_v44 = vld [vmem:[%s16523_s13 + $0x18] sm:$0xff] }
 0x1a3   :  { %2640 = vmatpush.bf16.msra.mxu2 %v10613_v44  ;;  %v8242_v44 = vld [vmem:[%s16524_s16 + $0x8] sm:$0xf0] }
 0x1a4   :  { %2691 = vmatpush.bf16.msra.mxu3 %v10615_v54  ;;  %v8642_v54 = vld [vmem:[%s16525_s19 + $0x300] sm:$0xf] }
 0x1a7   :  { %2641 = vmatpush.bf16.msra.mxu2 %v10612_v50 }
 0x1a8   :  { %2692 = vmatpush.bf16.msra.mxu3 %v10614_v5 }
 0x1ac   :  { %v2284_v48 = vpop.f32.mrf.mxu0 }
 0x1b4   :  { %v2310_v1 = vpop.f32.mrf.mxu2  ;;  %v2286_v49 = vpop.f32.mrf.mxu0 }
 0x1bc   :  { %v2312_v51 = vpop.f32.mrf.mxu2 }
 0x21f   :  { %v2297_v59 = vpop.f32.mrf.mxu1 }
 0x220   :  { %v2298_v60 = vadd.f32 %v2297_v59, %v2284_v48 }
 0x222   :  { %v2333_v3 = vmul.f32 %v2329_v45, %v2298_v60 }
 0x224   :  { %v2341_v4 = vadd.f32 %v2337_v63, %v2333_v3 }
 0x225   :  { %v2323_v22 = vpop.f32.mrf.mxu3 }
 0x226   :  { %vm2343_vm2 = vcmp.ge.f32.partialorder %v2341_v4, 0.0  ;;  %v2345_v0 = vmul.f32 0.1, %v2341_v4  ;;  %v2324_v26 = vadd.f32 %v2323_v22, %v2310_v1  ;;  %v10617_v22 = vld [vmem:[%s16523_s13 + $0x38] sm:$0xff] }
 0x227   :  { %v2299_v57 = vpop.f32.mrf.mxu1  ;;  %2742 = vmatpush.bf16.msra.mxu0 %v10617_v22  ;;  %v10968_v22 = vld [vmem:[%s16525_s19 + $0x2bc] sm:$0xf0] }
 0x228   :  { %v2347_v8 = vsel %vm2343_vm2, %v2341_v4, %v2345_v0  ;;  %v2334_v9 = vmul.f32 %v2330_v21, %v2324_v26  ;;  %v10616_v0 = vld [vmem:[%s16523_s13 + $0x30] sm:$0xff]  ;;  %v11144_v26 = vld [vmem:[%s16521_s14 + $0x2] ss:$0 sm:$0xff] }
 0x229   :  { %v13141_v11 = vpack.c.bf16 %v2347_v8, %v2347_v8 }
 0x22a   :  { %v2342_v7 = vadd.f32 %v2338_v6, %v2334_v9  ;;  %v11145_v6 = vld [vmem:[%s16522_s15 + $0x2] ss:$0 sm:$0xff] }
 0x22b   :  { %2487 = vmatmul.bf16.vlgmr.msrb.gmra.mxu0 %v13141_v11 }
 0x22c   :  { %vm2344_vm3 = vcmp.ge.f32.partialorder %v2342_v7, 0.0  ;;  %v2346_v12 = vmul.f32 0.1, %v2342_v7  ;;  %2743 = vmatpush.bf16.msra.mxu0 %v10616_v0 }
 0x22d   :  { %v2325_v15 = vpop.f32.mrf.mxu3 }
 0x22e   :  { %v2348_v16 = vsel %vm2344_vm3, %v2342_v7, %v2346_v12  ;;  %vm6921_vm3 = vcmask 1043456  }
 0x22f   :  { %v13144_v17 = vpack.c.bf16 %v2348_v16, %v2348_v16 }
 0x231   :  { %2500 = vmatmul.bf16.vlgmr.msrb.gmra.mxu1 %v13144_v17 }
 0x2a8   :  { %v2488_v24 = vpop.f32.mrf.mxu0 }
 0x2ae   :  { %v2501_v27 = vpop.f32.mrf.mxu1 }
 0x2af   :  { %v2502_v28 = vadd.f32 %v2501_v27, %v2488_v24  ;;  %v10619_v24 = vld [vmem:[%s16523_s13 + $0x48] sm:$0xff]  ;;  %v11146_v27 = vld [vmem:[%s16521_s14 + $0x3] ss:$0 sm:$0xff] }
 0x2b0   :  { %v2490_v20 = vpop.f32.mrf.mxu0  ;;  %2793 = vmatpush.bf16.msra.mxu1 %v10619_v24  ;;  %v9026_v24 = vld [vmem:[%s16525_s19 + $0x600] sm:$0xf] }
 0x2b1   :  { %v2509_v30 = vmul.f32 %v11136_v25, %v2502_v28  ;;  %v10618_v25 = vld [vmem:[%s16523_s13 + $0x40] sm:$0xff] }
 0x2b2   :  { %v11147_v28 = vld [vmem:[%s16522_s15 + $0x3] ss:$0 sm:$0xff] }
 0x2b3   :  { %v2514_v31 = vadd.f32 %v11137_v10, %v2509_v30 }
 0x2b4   :  { %2794 = vmatpush.bf16.msra.mxu1 %v10618_v25 }
 0x2b5   :  { %vm2515_vm4 = vcmp.ge.f32.partialorder %v2514_v31, 0.0  ;;  %v2516_v32 = vmul.f32 0.1, %v2514_v31 }
 0x2b6   :  { %v2503_v33 = vpop.f32.mrf.mxu1 }
 0x2b7   :  { %v2517_v34 = vsel %vm2515_vm4, %v2514_v31, %v2516_v32 }
 0x2b8   :  { %v2518_v36 = vpack.c.bf16 %v2517_v34, %v2517_v34 }
 0x2ba   :  { %8168 = vmatmul.msk.bf16.vlgmr.msrb.gmra.mxu2 %vm2535_vm5, %v2518_v36 }
 0x33d   :  { %v2548_v40 = vpop.f32.mrf.mxu2 }
 0x33e   :  { %v2556_v41 = vmul.f32 %v11138_v38, %v2548_v40  ;;  %v10623_v38 = vld [vmem:[%s16524_s16 + $0x14] sm:$0xf0] }
 0x33f   :  { %v8249_v40 = vor.u32 %v10623_v38, %v8248_v13  ;;  %v8962_v13 = vld [vmem:[%s16525_s19 + $0x580] sm:$0xf] }
 0x340   :  { %v2561_v29 = vadd.f32 %v11139_v39, %v2556_v41  ;;  %v10622_v39 = vld [vmem:[%s16524_s16 + $0x14] sm:$0xf]  ;;  %v8250_v41 = vld [vmem:[%s16524_s16 + $0x18] sm:$0xf0] }
 0x341   :  { %2857 = vmatpush.bf16.msrb.mxu2 %v8249_v40  ;;  %v10928_v40 = vld [vmem:[%s16525_s19 + $0x184] sm:$0xf] }
 0x342   :  { %vm2562_vm6 = vcmp.ge.f32.partialorder %v2561_v29, 0.0  ;;  %v2563_v35 = vmul.f32 0.1, %v2561_v29 }
 0x344   :  { %v2564_v14 = vsel %vm2562_vm6, %v2561_v29, %v2563_v35  ;;  %v8253_v29 = vor.u32 %v10622_v39, %v8250_v41  ;;  %v8240_v35 = vld [vmem:[%s16524_s16] sm:$0xf]  ;;  %v8452_v41 = vld [vmem:[%s16525_s19 + $0x1c0] sm:$0xf0] }
 0x345   :  { %v2565_v42 = vpack.c.bf16 %v2564_v14, %v2564_v14  ;;  %v2550_v43 = vpop.f32.mrf.mxu2  ;;  %v11064_v39 = vld [vmem:[%s16525_s19 + $0x5bc] sm:$0xf0] }
 0x347   :  { %8177 = vmatmul.msk.bf16.vlgmr.msrb.gmra.mxu3 %vm2535_vm5, %v2565_v42  ;;  %v10620_v42 = vld [vmem:[%s16524_s16 + $0x4] sm:$0xf] }
 0x348   :  { %2870 = vmatpush.bf16.msrb.mxu3 %v8253_v29  ;;  %v8245_v50 = vor.u32 %v10620_v42, %v8242_v44  ;;  %v11056_v29 = vld [vmem:[%s16525_s19 + $0x584] sm:$0xf]  ;;  %v8963_v44 = vor.u32 %v11064_v39, %v8962_v13  ;;  %v11121_v13 = vld [vmem:[%s16525_s19 + $0x78c] sm:$0xf] }
 0x349   :  { %v11149_v42 = vld [vmem:[%s16522_s15 + $0x4] ss:$0 sm:$0xff] }
 0x34c   :  { %2871 = vmatpush.bf16.msrb.mxu3 %v8245_v50  ;;  %v8455_v50 = vor.u32 %v10928_v40, %v8452_v41 }
 0x3ca   :  { %v2594_v46 = vpop.f32.mrf.mxu3 }
 0x3cb   :  { %v2602_v47 = vmul.f32 %v11140_v62, %v2594_v46  ;;  %v8706_v62 = vld [vmem:[%s16525_s19 + $0x380] sm:$0xf] }
 0x3cc   :  { %v9218_v46 = vld [vmem:[%s16525_s19 + $0x780] sm:$0xf] }
 0x3cd   :  { %v2607_v48 = vadd.f32 %v11141_v61, %v2602_v47  ;;  %v11000_v61 = vld [vmem:[%s16525_s19 + $0x3bc] sm:$0xf0] }
 0x3ce   :  { %v8707_v47 = vor.u32 %v11000_v61, %v8706_v62  ;;  %v8386_v62 = vld [vmem:[%s16525_s19 + $0x100] sm:$0xf] }
 0x3cf   :  { %vm2608_vm7 = vcmp.ge.f32.partialorder %v2607_v48, 0.0  ;;  %v2609_v1 = vmul.f32 0.1, %v2607_v48  ;;  %v10920_v61 = vld [vmem:[%s16525_s19 + $0x13c] sm:$0xf0] }
 0x3d0   :  { %4677 = vmatpush.bf16.msrb.mxu0 %v8707_v47 }
 0x3d1   :  { %v2610_v49 = vsel %vm2608_vm7, %v2607_v48, %v2609_v1  ;;  %v11128_v48 = vld [vmem:[%s16525_s19 + $0x7bc] sm:$0xf0]  ;;  %v10992_v1 = vld [vmem:[%s16525_s19 + $0x384] sm:$0xf] }
 0x3d2   :  { %v2611_v51 = vadd.f32 %v2610_v49, %v2564_v14  ;;  %v2596_v2 = vpop.f32.mrf.mxu3  ;;  %v10621_v14 = vld [vmem:[%s16524_s16 + $0x4] sm:$0xf0]  ;;  %v8708_v49 = vld [vmem:[%s16525_s19 + $0x3c0] sm:$0xf0] }
 0x3d3   :  { %v8241_v43 = vor.u32 %v10621_v14, %v8240_v35  ;;  %v8711_v2 = vor.u32 %v10992_v1, %v8708_v49  ;;  %v8964_v35 = vld [vmem:[%s16525_s19 + $0x5c0] sm:$0xf0] }
 0x3d4   :  { %v2612_v52 = vmax.f32 %v2611_v51, 0.0  ;;  %v9219_v51 = vor.u32 %v11128_v48, %v9218_v46  ;;  %v11148_v14 = vld [vmem:[%s16521_s14 + $0x4] ss:$0 sm:$0xff]  ;;  %v8898_v46 = vld [vmem:[%s16525_s19 + $0x500] sm:$0xf]  ;;  %v8967_v47 = vor.u32 %v11056_v29, %v8964_v35 }
 0x3d5   :  { %2858 = vmatpush.bf16.msrb.mxu2 %v8241_v43  ;;  %v11048_v48 = vld [vmem:[%s16525_s19 + $0x53c] sm:$0xf0]  ;;  %v10912_v1 = vld [vmem:[%s16525_s19 + $0x104] sm:$0xf] }
 0x3d6   :  { %v2613_v53 = vpack.c.bf16 %v2612_v52, %v2612_v52  ;;  %4690 = vmatpush.bf16.msrb.mxu1 %v9219_v51  ;;  %v8388_v49 = vld [vmem:[%s16525_s19 + $0x140] sm:$0xf0] }
 0x3d8   :  { %8190 = vmatmul.msk.bf16.vlgmr.msra.gmra.mxu2 %vm2535_vm5, %v2613_v53  ;;  %v9220_v53 = vld [vmem:[%s16525_s19 + $0x7c0] sm:$0xf0] }
 0x3d9   :  { %4703 = vmatpush.bf16.msra.mxu2 %v8711_v2  ;;  %v11040_v2 = vld [vmem:[%s16525_s19 + $0x504] sm:$0xf] }
 0x45b   :  { %v2643_v19 = vpop.f32.mrf.mxu2 }
 0x45c   :  { %v2652_v58 = vmul.f32 %v11142_v55, %v2643_v19  ;;  %v10984_v55 = vld [vmem:[%s16525_s19 + $0x33c] sm:$0xf0] }
 0x45d   :  { %v11112_v19 = vld [vmem:[%s16525_s19 + $0x73c] sm:$0xf0] }
 0x45e   :  { %v2658_v45 = vadd.f32 %v11143_v56, %v2652_v58  ;;  %v9154_v56 = vld [vmem:[%s16525_s19 + $0x700] sm:$0xf]  ;;  %v8643_v58 = vor.u32 %v10984_v55, %v8642_v54  ;;  %v8387_v54 = vor.u32 %v10920_v61, %v8386_v62  ;;  %v8391_v55 = vor.u32 %v10912_v1, %v8388_v49  ;;  %v10977_v62 = vld [vmem:[%s16525_s19 + $0x30c] sm:$0xf] }
 0x45f   :  { %v8652_v61 = vld [vmem:[%s16525_s19 + $0x348] sm:$0xf0] }
 0x460   :  { %vm2659_vm8 = vcmp.ge.f32.partialorder %v2658_v45, 0.0  ;;  %v2660_v59 = vmul.f32 0.1, %v2658_v45  ;;  %4678 = vmatpush.bf16.msrb.mxu0 %v8643_v58  ;;  %v8834_v58 = vld [vmem:[%s16525_s19 + $0x480] sm:$0xf]  ;;  %v8655_v49 = vor.u32 %v10977_v62, %v8652_v61 }
 0x461   :  { %v8332_v62 = vld [vmem:[%s16525_s19 + $0xc8] sm:$0xf0] }
 0x462   :  { %v2661_v60 = vsel %vm2659_vm8, %v2658_v45, %v2660_v59  ;;  %v9155_v45 = vor.u32 %v11112_v19, %v9154_v56  ;;  %v10976_v59 = vld [vmem:[%s16525_s19 + $0x304] sm:$0xf]  ;;  %v8322_v56 = vld [vmem:[%s16525_s19 + $0x80] sm:$0xf] }
 0x463   :  { %v2662_v63 = vadd.f32 %v2661_v60, %v2612_v52  ;;  %v2645_v3 = vpop.f32.mrf.mxu2  ;;  %v11120_v52 = vld [vmem:[%s16525_s19 + $0x784] sm:$0xf]  ;;  %v10904_v19 = vld [vmem:[%s16525_s19 + $0xbc] sm:$0xf0] }
 0x464   :  { %v9223_v5 = vor.u32 %v11120_v52, %v9220_v53  ;;  %v8644_v60 = vld [vmem:[%s16525_s19 + $0x340] sm:$0xf0]  ;;  %4691 = vmatpush.bf16.msrb.mxu1 %v9155_v45 }
 0x465   :  { %v2663_v4 = vmax.f32 %v2662_v63, 0.0  ;;  %v11104_v63 = vld [vmem:[%s16525_s19 + $0x704] sm:$0xf]  ;;  %v8647_v3 = vor.u32 %v10976_v59, %v8644_v60  ;;  %v11032_v60 = vld [vmem:[%s16525_s19 + $0x4bc] sm:$0xf0] }
 0x466   :  { %v8900_v52 = vld [vmem:[%s16525_s19 + $0x540] sm:$0xf0] }
 0x467   :  { %v2664_v21 = vpack.c.bf16 %v2663_v4, %v2663_v4  ;;  %4704 = vmatpush.bf16.msra.mxu2 %v8647_v3  ;;  %v8903_v59 = vor.u32 %v11040_v2, %v8900_v52  ;;  %v8324_v3 = vld [vmem:[%s16525_s19 + $0xc0] sm:$0xf0]  ;;  %v10969_v2 = vld [vmem:[%s16525_s19 + $0x2c4] sm:$0xf0] }
 0x468   :  { %v9098_v52 = vld [vmem:[%s16525_s19 + $0x688] sm:$0xf] }
 0x469   :  { %8205 = vmatmul.msk.bf16.vlgmr.msra.gmra.mxu3 %vm2535_vm5, %v2664_v21  ;;  %v8578_v21 = vld [vmem:[%s16525_s19 + $0x280] sm:$0xf] }
 0x46a   :  { %4716 = vmatpush.bf16.msra.mxu3 %v9223_v5  ;;  %v8899_v5 = vor.u32 %v11048_v48, %v8898_v46  ;;  %v11105_v46 = vld [vmem:[%s16525_s19 + $0x70c] sm:$0xf] }
 0x4ec   :  { %v2694_v57 = vpop.f32.mrf.mxu3 }
 0x4ed   :  { %v2703_v8 = vmul.f32 %v11144_v26, %v2694_v57  ;;  %v9090_v26 = vld [vmem:[%s16525_s19 + $0x680] sm:$0xf]  ;;  %v10960_v57 = vld [vmem:[%s16525_s19 + $0x284] sm:$0xf] }
 0x4ef   :  { %v2709_v9 = vadd.f32 %v11145_v6, %v2703_v8  ;;  %v11096_v6 = vld [vmem:[%s16525_s19 + $0x6bc] sm:$0xf0]  ;;  %v8579_v8 = vor.u32 %v10968_v22, %v8578_v21  ;;  %v8836_v21 = vld [vmem:[%s16525_s19 + $0x4c0] sm:$0xf0] }
 0x4f1   :  { %vm2710_vm9 = vcmp.ge.f32.partialorder %v2709_v9, 0.0  ;;  %v2711_v7 = vmul.f32 0.1, %v2709_v9  ;;  %4679 = vmatpush.bf16.msrb.mxu0 %v8579_v8  ;;  %v10888_v8 = vld [vmem:[%s16525_s19 + $0x3c] sm:$0xf0] }
 0x4f3   :  { %v2712_v12 = vsel %vm2710_vm9, %v2709_v9, %v2711_v7  ;;  %v8580_v9 = vld [vmem:[%s16525_s19 + $0x2c0] sm:$0xf0] }
 0x4f4   :  { %v2713_v15 = vadd.f32 %v2712_v12, %v2663_v4  ;;  %v2696_v16 = vpop.f32.mrf.mxu3  ;;  %v9156_v4 = vld [vmem:[%s16525_s19 + $0x740] sm:$0xf0] }
 0x4f5   :  { %v9159_v0 = vor.u32 %v11104_v63, %v9156_v4  ;;  %v11088_v7 = vld [vmem:[%s16525_s19 + $0x684] sm:$0xf]  ;;  %v8583_v16 = vor.u32 %v10960_v57, %v8580_v9  ;;  %v8258_v57 = vld [vmem:[%s16525_s19] sm:$0xf] }
 0x4f6   :  { %v2714_v18 = vmax.f32 %v2713_v15, 0.0  ;;  %v9092_v12 = vld [vmem:[%s16525_s19 + $0x6c0] sm:$0xf0]  ;;  %v9091_v15 = vor.u32 %v11096_v6, %v9090_v26  ;;  %v8835_v26 = vor.u32 %v11032_v60, %v8834_v58  ;;  %v8770_v9 = vld [vmem:[%s16525_s19 + $0x400] sm:$0xf] }
 0x4f7   :  { %4717 = vmatpush.bf16.msra.mxu3 %v9159_v0  ;;  %v9095_v25 = vor.u32 %v11088_v7, %v9092_v12  ;;  %4705 = vmatpush.bf16.msra.mxu2 %v8583_v16  ;;  %v10896_v63 = vld [vmem:[%s16525_s19 + $0x84] sm:$0xf]  ;;  %v8323_v0 = vor.u32 %v10904_v19, %v8322_v56  ;;  %v11089_v56 = vld [vmem:[%s16525_s19 + $0x68c] sm:$0xf]  ;;  %v8522_v60 = vld [vmem:[%s16525_s19 + $0x208] sm:$0xf] }
 0x4f8   :  { %v2715_v23 = vpack.c.bf16 %v2714_v18, %v2714_v18  ;;  %4692 = vmatpush.bf16.msrb.mxu1 %v9091_v15  ;;  %v11024_v4 = vld [vmem:[%s16525_s19 + $0x484] sm:$0xf]  ;;  %v8327_v6 = vor.u32 %v10896_v63, %v8324_v3  ;;  %v11016_v15 = vld [vmem:[%s16525_s19 + $0x43c] sm:$0xf0]  ;;  %v9100_v19 = vld [vmem:[%s16525_s19 + $0x6c8] sm:$0xf0] }
 0x4f9   :  { %v8839_v12 = vor.u32 %v11024_v4, %v8836_v21  ;;  %v10880_v16 = vld [vmem:[%s16525_s19 + $0x4] sm:$0xf]  ;;  %v10953_v63 = vld [vmem:[%s16525_s19 + $0x244] sm:$0xf0]  ;;  %v9103_v4 = vor.u32 %v11089_v56, %v9100_v19  ;;  %v11009_v19 = vld [vmem:[%s16525_s19 + $0x40c] sm:$0xf] }
 0x4fa   :  { %8220 = vmatmul.msk.bf16.vlgmr.msra.gmra.mxu0 %vm2535_vm5, %v2715_v23  ;;  %v10952_v23 = vld [vmem:[%s16525_s19 + $0x23c] sm:$0xf0]  ;;  %v9034_v3 = vld [vmem:[%s16525_s19 + $0x608] sm:$0xf] }
 0x4fb   :  { %4718 = vmatpush.bf16.msra.mxu3 %v9095_v25  ;;  %v11008_v25 = vld [vmem:[%s16525_s19 + $0x404] sm:$0xf]  ;;  %v11081_v21 = vld [vmem:[%s16525_s19 + $0x644] sm:$0xf0] }
 0x577   :  { %v2745_v10 = vpop.f32.mrf.mxu0 }
 0x578   :  { %v2754_v20 = vmul.f32 %v11146_v27, %v2745_v10  ;;  %v11080_v27 = vld [vmem:[%s16525_s19 + $0x63c] sm:$0xf0]  ;;  %v8516_v10 = vld [vmem:[%s16525_s19 + $0x240] sm:$0xf0] }
 0x57a   :  { %v2760_v30 = vadd.f32 %v11147_v28, %v2754_v20  ;;  %v10944_v28 = vld [vmem:[%s16525_s19 + $0x204] sm:$0xf] }
 0x57b   :  { %v11072_v20 = vld [vmem:[%s16525_s19 + $0x604] sm:$0xf] }
 0x57c   :  { %vm2761_vm10 = vcmp.ge.f32.partialorder %v2760_v30, 0.0  ;;  %v2762_v31 = vmul.f32 0.1, %v2760_v30 }
 0x57e   :  { %v2763_v32 = vsel %vm2761_vm10, %v2760_v30, %v2762_v31  ;;  %v9028_v30 = vld [vmem:[%s16525_s19 + $0x640] sm:$0xf0] }
 0x57f   :  { %v2764_v33 = vadd.f32 %v2763_v32, %v2714_v18  ;;  %v2747_v34 = vpop.f32.mrf.mxu0  ;;  %v8514_v18 = vld [vmem:[%s16525_s19 + $0x200] sm:$0xf]  ;;  %v9027_v32 = vor.u32 %v11080_v27, %v9026_v24  ;;  %v9031_v38 = vor.u32 %v11072_v20, %v9028_v30  ;;  %v8772_v27 = vld [vmem:[%s16525_s19 + $0x440] sm:$0xf0]  ;;  %v11001_v20 = vld [vmem:[%s16525_s19 + $0x3c4] sm:$0xf0] }
 0x580   :  { %v8515_v31 = vor.u32 %v10952_v23, %v8514_v18  ;;  %v8450_v34 = vld [vmem:[%s16525_s19 + $0x180] sm:$0xf]  ;;  %v8260_v18 = vld [vmem:[%s16525_s19 + $0x40] sm:$0xf0]  ;;  %v11129_v30 = vld [vmem:[%s16525_s19 + $0x7c4] sm:$0xf0]  ;;  %v8775_v40 = vor.u32 %v11008_v25, %v8772_v27 }
 0x581   :  { %v13224_v36 = vmax.f32 %v2764_v33, 0.0  ;;  %v8519_v33 = vor.u32 %v10944_v28, %v8516_v10  ;;  %4693 = vmatpush.bf16.msrb.mxu1 %v9027_v32  ;;  %4719 = vmatpush.bf16.msra.mxu3 %v9031_v38  ;;  %v8714_v28 = vld [vmem:[%s16525_s19 + $0x388] sm:$0xf]  ;;  %v8259_v10 = vor.u32 %v10888_v8, %v8258_v57  ;;  %v10993_v32 = vld [vmem:[%s16525_s19 + $0x38c] sm:$0xf]  ;;  %v8523_v57 = vor.u32 %v10953_v63, %v8522_v60 }
 0x582   :  { %4680 = vmatpush.bf16.msrb.mxu0 %v8515_v31  ;;  %v9228_v38 = vld [vmem:[%s16525_s19 + $0x7c8] sm:$0xf0]  ;;  %v8715_v41 = vor.u32 %v11001_v20, %v8714_v28  ;;  %v9035_v8 = vor.u32 %v11081_v21, %v9034_v3 }
 0x583   :  { %v2766_v37 = vpack.c.bf16 %v13224_v36, %v13224_v36  ;;  %4706 = vmatpush.bf16.msra.mxu2 %v8519_v33  ;;  %v8716_v33 = vld [vmem:[%s16525_s19 + $0x3c8] sm:$0xf0] }
 0x584   :  { %v8719_v35 = vor.u32 %v10993_v32, %v8716_v33  ;;  %v11057_v25 = vld [vmem:[%s16525_s19 + $0x58c] sm:$0xf]  ;;  %v11049_v33 = vld [vmem:[%s16525_s19 + $0x544] sm:$0xf0] }
 0x585   :  { %8235 = vmatmul.msk.bf16.vlgmr.msra.gmra.mxu1 %vm2535_vm5, %v2766_v37  ;;  %v10936_v37 = vld [vmem:[%s16525_s19 + $0x1bc] sm:$0xf0]  ;;  %4720 = vmatpush.bf16.msra.mxu3 %v8967_v47  ;;  %v9164_v47 = vld [vmem:[%s16525_s19 + $0x748] sm:$0xf0] }
 0x586   :  { %v8451_v43 = vor.u32 %v10936_v37, %v8450_v34  ;;  %4694 = vmatpush.bf16.msrb.mxu1 %v8963_v44  ;;  %v8771_v34 = vor.u32 %v11016_v15, %v8770_v9  ;;  %v8263_v37 = vor.u32 %v10880_v16, %v8260_v18  ;;  %v9231_v44 = vor.u32 %v11121_v13, %v9228_v38  ;;  %v8970_v15 = vld [vmem:[%s16525_s19 + $0x588] sm:$0xf]  ;;  %v8972_v27 = vld [vmem:[%s16525_s19 + $0x5c8] sm:$0xf0] }
 0x587   :  { %4707 = vmatpush.bf16.msra.mxu2 %v8455_v50  ;;  %v11113_v50 = vld [vmem:[%s16525_s19 + $0x744] sm:$0xf0]  ;;  %v8975_v32 = vor.u32 %v11057_v25, %v8972_v27  ;;  %v11041_v13 = vld [vmem:[%s16525_s19 + $0x50c] sm:$0xf] }
 0x588   :  { %4681 = vmatpush.bf16.msrb.mxu0 %v8451_v43  ;;  %v9162_v43 = vld [vmem:[%s16525_s19 + $0x708] sm:$0xf]  ;;  %v8908_v38 = vld [vmem:[%s16525_s19 + $0x548] sm:$0xf0] }
 0x589   :  { %4721 = vmatpush.bf16.msra.mxu3 %v8903_v59  ;;  %v9163_v1 = vor.u32 %v11113_v50, %v9162_v43  ;;  %v11065_v18 = vld [vmem:[%s16525_s19 + $0x5c4] sm:$0xf0]  ;;  %v10897_v50 = vld [vmem:[%s16525_s19 + $0x8c] sm:$0xf] }
 0x58a   :  { %4695 = vmatpush.bf16.msrb.mxu1 %v8899_v5  ;;  %v10961_v5 = vld [vmem:[%s16525_s19 + $0x28c] sm:$0xf] }
 0x58b   :  { %4708 = vmatpush.bf16.msra.mxu2 %v8391_v55  ;;  %v8588_v55 = vld [vmem:[%s16525_s19 + $0x2c8] sm:$0xf0] }
 0x58c   :  { %4682 = vmatpush.bf16.msrb.mxu0 %v8387_v54  ;;  %v11097_v54 = vld [vmem:[%s16525_s19 + $0x6c4] sm:$0xf0]  ;;  %v8591_v59 = vor.u32 %v10961_v5, %v8588_v55  ;;  %v8268_v5 = vld [vmem:[%s16525_s19 + $0x48] sm:$0xf0] }
 0x58d   :  { %4722 = vmatpush.bf16.msra.mxu3 %v8839_v12  ;;  %v10937_v12 = vld [vmem:[%s16525_s19 + $0x1c4] sm:$0xf0] }
 0x58e   :  { %4696 = vmatpush.bf16.msrb.mxu1 %v8835_v26  ;;  %v11073_v26 = vld [vmem:[%s16525_s19 + $0x60c] sm:$0xf] }
 0x58f   :  { %4709 = vmatpush.bf16.msra.mxu2 %v8327_v6  ;;  %v9036_v6 = vld [vmem:[%s16525_s19 + $0x648] sm:$0xf0] }
 0x590   :  { %4683 = vmatpush.bf16.msrb.mxu0 %v8323_v0  ;;  %v8524_v0 = vld [vmem:[%s16525_s19 + $0x248] sm:$0xf0]  ;;  %v9039_v16 = vor.u32 %v11073_v26, %v9036_v6  ;;  %v11002_v26 = vld [vmem:[%s16525_s19 + $0x3cc] sm:$0xf0] }
 0x591   :  { %4723 = vmatpush.bf16.msra.mxu3 %v8775_v40  ;;  %v9234_v6 = vld [vmem:[%s16525_s19 + $0x790] sm:$0xf] }
 0x592   :  { %4697 = vmatpush.bf16.msrb.mxu1 %v8771_v34  ;;  %v10913_v34 = vld [vmem:[%s16525_s19 + $0x10c] sm:$0xf] }
 0x593   :  { %4710 = vmatpush.bf16.msra.mxu2 %v8263_v37  ;;  %v8396_v37 = vld [vmem:[%s16525_s19 + $0x148] sm:$0xf0] }
 0x594   :  { %4684 = vmatpush.bf16.msrb.mxu0 %v8259_v10  ;;  %v8971_v10 = vor.u32 %v11065_v18, %v8970_v15  ;;  %v11122_v15 = vld [vmem:[%s16525_s19 + $0x794] sm:$0xf] }
 0x598   :  { %4729 = vmatpush.bf16.msra.mxu0 %v8715_v41  ;;  %v8399_v41 = vor.u32 %v10913_v34, %v8396_v37 }
 0x602   :  { %v2796_v51 = vpop.f32.mrf.mxu1 }
 0x603   :  { %v2805_v53 = vmul.f32 %v11148_v14, %v2796_v51  ;;  %v8650_v14 = vld [vmem:[%s16525_s19 + $0x308] sm:$0xf] }
 0x604   :  { %v8586_v51 = vld [vmem:[%s16525_s19 + $0x288] sm:$0xf] }
 0x605   :  { %v2811_v45 = vadd.f32 %v11149_v42, %v2805_v53  ;;  %v10985_v42 = vld [vmem:[%s16525_s19 + $0x344] sm:$0xf0]  ;;  %v9167_v53 = vor.u32 %v11105_v46, %v9164_v47  ;;  %v8587_v58 = vor.u32 %v10969_v2, %v8586_v51  ;;  %v8335_v46 = vor.u32 %v10897_v50, %v8332_v62  ;;  %v11025_v47 = vld [vmem:[%s16525_s19 + $0x48c] sm:$0xf]  ;;  %v10962_v50 = vld [vmem:[%s16525_s19 + $0x294] sm:$0xf] }
 0x606   :  { %v8651_v48 = vor.u32 %v10985_v42, %v8650_v14  ;;  %v10905_v14 = vld [vmem:[%s16525_s19 + $0xc4] sm:$0xf0]  ;;  %v8596_v62 = vld [vmem:[%s16525_s19 + $0x2d0] sm:$0xf0] }
 0x607   :  { %vm2812_vm11 = vcmp.ge.f32.partialorder %v2811_v45, 0.0  ;;  %v2813_v22 = vmul.f32 0.1, %v2811_v45  ;;  %v8842_v42 = vld [vmem:[%s16525_s19 + $0x488] sm:$0xf] }
 0x608   :  { %4730 = vmatpush.bf16.msra.mxu0 %v8651_v48  ;;  %v8844_v48 = vld [vmem:[%s16525_s19 + $0x4c8] sm:$0xf0]  ;;  %v10889_v51 = vld [vmem:[%s16525_s19 + $0x44] sm:$0xf0] }
 0x609   :  { %v2814_v7 = vsel %vm2812_vm11, %v2811_v45, %v2813_v22  ;;  %v9099_v45 = vor.u32 %v11097_v54, %v9098_v52  ;;  %v10945_v22 = vld [vmem:[%s16525_s19 + $0x20c] sm:$0xf]  ;;  %v8778_v2 = vld [vmem:[%s16525_s19 + $0x408] sm:$0xf] }
 0x60a   :  { %v2815_v23 = vadd.f32 %v2814_v7, %v13224_v36  ;;  %v2798_v24 = vpop.f32.mrf.mxu1  ;;  %v9226_v36 = vld [vmem:[%s16525_s19 + $0x788] sm:$0xf]  ;;  %v8527_v9 = vor.u32 %v10945_v22, %v8524_v0  ;;  %v10881_v54 = vld [vmem:[%s16525_s19 + $0xc] sm:$0xf]  ;;  %v8722_v0 = vld [vmem:[%s16525_s19 + $0x390] sm:$0xf] }
 0x60b   :  { %v9227_v29 = vor.u32 %v11129_v30, %v9226_v36  ;;  %v8458_v7 = vld [vmem:[%s16525_s19 + $0x188] sm:$0xf]  ;;  %v8460_v24 = vld [vmem:[%s16525_s19 + $0x1c8] sm:$0xf0]  ;;  %v8271_v56 = vor.u32 %v10881_v54, %v8268_v5  ;;  %v8723_v27 = vor.u32 %v11002_v26, %v8722_v0  ;;  %v10946_v54 = vld [vmem:[%s16525_s19 + $0x214] sm:$0xf] }
 0x60c   :  { %v2816_v31 = vmax.f32 %v2815_v23, 0.0  ;;  %4731 = vmatpush.bf16.msra.mxu0 %v8587_v58  ;;  %v10929_v23 = vld [vmem:[%s16525_s19 + $0x18c] sm:$0xf]  ;;  %v8459_v28 = vor.u32 %v10937_v12, %v8458_v7  ;;  %v8394_v36 = vld [vmem:[%s16525_s19 + $0x108] sm:$0xf] }
 0x60d   :  { %4742 = vmatpush.bf16.msra.mxu1 %v9227_v29  ;;  %v8463_v20 = vor.u32 %v10929_v23, %v8460_v24  ;;  %v10921_v30 = vld [vmem:[%s16525_s19 + $0x144] sm:$0xf0]  ;;  %v8911_v29 = vor.u32 %v11041_v13, %v8908_v38  ;;  %v8780_v58 = vld [vmem:[%s16525_s19 + $0x448] sm:$0xf0]  ;;  %v8724_v12 = vld [vmem:[%s16525_s19 + $0x3d0] sm:$0xf0] }
 0x60e   :  { %v2817_v39 = vpack.c.bf16 %v2816_v31, %v2816_v31  ;;  %v8906_v31 = vld [vmem:[%s16525_s19 + $0x508] sm:$0xf]  ;;  %v8660_v13 = vld [vmem:[%s16525_s19 + $0x350] sm:$0xf0] }
 0x60f   :  { %v8907_v40 = vor.u32 %v11049_v33, %v8906_v31  ;;  %v9170_v31 = vld [vmem:[%s16525_s19 + $0x710] sm:$0xf]  ;;  %v10978_v33 = vld [vmem:[%s16525_s19 + $0x314] sm:$0xf] }
 0x610   :  { %8254 = vmatmul.msk.bf16.vlgmr.msrb.gmra.mxu2 %vm2535_vm5, %v2817_v39  ;;  %8255 = vmatmul.msk.bf16.vlgmr.msrb.gmra.mxu3 %vm2535_vm5, %v2817_v39  ;;  %v8395_v39 = vor.u32 %v10921_v30, %v8394_v36  ;;  %v11106_v38 = vld [vmem:[%s16525_s19 + $0x714] sm:$0xf] }
 0x611   :  { %4755 = vmatpush.bf16.msrb.mxu2 %v8719_v35  ;;  %4768 = vmatpush.bf16.msrb.mxu3 %v9231_v44  ;;  %v8330_v35 = vld [vmem:[%s16525_s19 + $0x88] sm:$0xf]  ;;  %v8532_v5 = vld [vmem:[%s16525_s19 + $0x250] sm:$0xf0] }
 0x612   :  { %4743 = vmatpush.bf16.msra.mxu1 %v9163_v1  ;;  %4732 = vmatpush.bf16.msra.mxu0 %v8523_v57  ;;  %v8331_v43 = vor.u32 %v10905_v14, %v8330_v35  ;;  %v11033_v44 = vld [vmem:[%s16525_s19 + $0x4c4] sm:$0xf0]  ;;  %v8847_v1 = vor.u32 %v11025_v47, %v8844_v48  ;;  %v11130_v57 = vld [vmem:[%s16525_s19 + $0x7cc] sm:$0xf0]  ;;  %v8663_v14 = vor.u32 %v10978_v33, %v8660_v13  ;;  %v11058_v0 = vld [vmem:[%s16525_s19 + $0x594] sm:$0xf] }
 0x613   :  { %v8843_v61 = vor.u32 %v11033_v44, %v8842_v42  ;;  %v10970_v35 = vld [vmem:[%s16525_s19 + $0x2cc] sm:$0xf0]  ;;  %v8980_v26 = vld [vmem:[%s16525_s19 + $0x5d0] sm:$0xf0] }
 0x614   :  { %v11098_v44 = vld [vmem:[%s16525_s19 + $0x6cc] sm:$0xf0]  ;;  %v8340_v13 = vld [vmem:[%s16525_s19 + $0xd0] sm:$0xf0] }
 0x615   :  { %4756 = vmatpush.bf16.msrb.mxu2 %v8655_v49  ;;  %4769 = vmatpush.bf16.msrb.mxu3 %v9167_v53  ;;  %v8266_v49 = vld [vmem:[%s16525_s19 + $0x8] sm:$0xf]  ;;  %v8850_v33 = vld [vmem:[%s16525_s19 + $0x490] sm:$0xf] }
 0x616   :  { %4744 = vmatpush.bf16.msra.mxu1 %v9099_v45  ;;  %4733 = vmatpush.bf16.msra.mxu0 %v8459_v28  ;;  %v8267_v52 = vor.u32 %v10889_v51, %v8266_v49  ;;  %v11017_v53 = vld [vmem:[%s16525_s19 + $0x444] sm:$0xf0]  ;;  %v8783_v45 = vor.u32 %v11009_v19, %v8780_v58  ;;  %v9235_v28 = vor.u32 %v11130_v57, %v9234_v6  ;;  %v10954_v49 = vld [vmem:[%s16525_s19 + $0x24c] sm:$0xf0] }
 0x617   :  { %v8779_v55 = vor.u32 %v11017_v53, %v8778_v2  ;;  %v8599_v51 = vor.u32 %v10962_v50, %v8596_v62  ;;  %v11082_v53 = vld [vmem:[%s16525_s19 + $0x64c] sm:$0xf0]  ;;  %v10882_v50 = vld [vmem:[%s16525_s19 + $0x14] sm:$0xf] }
 0x618   :  { %v8276_v62 = vld [vmem:[%s16525_s19 + $0x50] sm:$0xf0] }
 0x619   :  { %4757 = vmatpush.bf16.msrb.mxu2 %v8591_v59  ;;  %4770 = vmatpush.bf16.msrb.mxu3 %v9103_v4  ;;  %v2822_v59 = vld [vmem:[%s16526_s17] sm:$0x3] }
 0x61a   :  { %4745 = vmatpush.bf16.msra.mxu1 %v9035_v8  ;;  %4734 = vmatpush.bf16.msra.mxu0 %v8395_v39  ;;  %v2824_v60 = vperm.slane %v2822_v59, 0  ;;  %v2825_v63 = vperm.slane %v2822_v59, 1  ;;  %v10994_v8 = vld [vmem:[%s16525_s19 + $0x394] sm:$0xf]  ;;  %v10938_v59 = vld [vmem:[%s16525_s19 + $0x1cc] sm:$0xf0] }
 0x61b   :  { %v8727_v36 = vor.u32 %v10994_v8, %v8724_v12  ;;  %v9172_v39 = vld [vmem:[%s16525_s19 + $0x750] sm:$0xf0]  ;;  %v8402_v8 = vld [vmem:[%s16525_s19 + $0x110] sm:$0xf]  ;;  %v8983_v12 = vor.u32 %v11058_v0, %v8980_v26  ;;  %v11107_v0 = vld [vmem:[%s16525_s19 + $0x71c] sm:$0xf] }
 0x61c   :  { %v9175_v42 = vor.u32 %v11106_v38, %v9172_v39  ;;  %v11026_v38 = vld [vmem:[%s16525_s19 + $0x494] sm:$0xf]  ;;  %v9180_v26 = vld [vmem:[%s16525_s19 + $0x758] sm:$0xf0] }
 0x61d   :  { %4758 = vmatpush.bf16.msrb.mxu2 %v8527_v9  ;;  %4771 = vmatpush.bf16.msrb.mxu3 %v9039_v16  ;;  %v9236_v16 = vld [vmem:[%s16525_s19 + $0x7d0] sm:$0xf0] }
 0x61e   :  { %4746 = vmatpush.bf16.msra.mxu1 %v8971_v10  ;;  %4735 = vmatpush.bf16.msra.mxu0 %v8331_v43  ;;  %v8658_v10 = vld [vmem:[%s16525_s19 + $0x310] sm:$0xf]  ;;  %v9239_v30 = vor.u32 %v11122_v15, %v9236_v16  ;;  %v8852_v39 = vld [vmem:[%s16525_s19 + $0x4d0] sm:$0xf0] }
 0x61f   :  { %v9106_v43 = vld [vmem:[%s16525_s19 + $0x690] sm:$0xf] }
 0x620   :  { %v9107_v48 = vor.u32 %v11098_v44, %v9106_v43  ;;  %v8914_v15 = vld [vmem:[%s16525_s19 + $0x510] sm:$0xf]  ;;  %v8855_v44 = vor.u32 %v11026_v38, %v8852_v39  ;;  %v11075_v38 = vld [vmem:[%s16525_s19 + $0x61c] sm:$0xf] }
 0x621   :  { %4759 = vmatpush.bf16.msrb.mxu2 %v8463_v20  ;;  %4772 = vmatpush.bf16.msrb.mxu3 %v8975_v32  ;;  %v10986_v20 = vld [vmem:[%s16525_s19 + $0x34c] sm:$0xf0]  ;;  %v9052_v39 = vld [vmem:[%s16525_s19 + $0x658] sm:$0xf0] }
 0x622   :  { %4747 = vmatpush.bf16.msra.mxu1 %v8907_v40  ;;  %4736 = vmatpush.bf16.msra.mxu0 %v8267_v52  ;;  %v11114_v32 = vld [vmem:[%s16525_s19 + $0x74c] sm:$0xf0]  ;;  %v8659_v40 = vor.u32 %v10986_v20, %v8658_v10 }
 0x623   :  { %v9042_v52 = vld [vmem:[%s16525_s19 + $0x610] sm:$0xf] }
 0x624   :  { %v9043_v58 = vor.u32 %v11082_v53, %v9042_v52  ;;  %v11050_v16 = vld [vmem:[%s16525_s19 + $0x54c] sm:$0xf0]  ;;  %v8732_v53 = vld [vmem:[%s16525_s19 + $0x3d8] sm:$0xf0] }
 0x625   :  { %4760 = vmatpush.bf16.msrb.mxu2 %v8399_v41  ;;  %4773 = vmatpush.bf16.msrb.mxu3 %v8911_v29  ;;  %v9171_v41 = vor.u32 %v11114_v32, %v9170_v31  ;;  %v8594_v29 = vld [vmem:[%s16525_s19 + $0x290] sm:$0xf]  ;;  %v8915_v20 = vor.u32 %v11050_v16, %v8914_v15  ;;  %v9114_v15 = vld [vmem:[%s16525_s19 + $0x698] sm:$0xf] }
 0x626   :  { %4748 = vmatpush.bf16.msra.mxu1 %v8843_v61  ;;  %v11090_v61 = vld [vmem:[%s16525_s19 + $0x694] sm:$0xf]  ;;  %v8595_v47 = vor.u32 %v10970_v35, %v8594_v29  ;;  %v10890_v35 = vld [vmem:[%s16525_s19 + $0x4c] sm:$0xf0]  ;;  %v11099_v16 = vld [vmem:[%s16525_s19 + $0x6d4] sm:$0xf0] }
 0x629   :  { %4761 = vmatpush.bf16.msrb.mxu2 %v8335_v46  ;;  %4774 = vmatpush.bf16.msrb.mxu3 %v8847_v1  ;;  %v9108_v46 = vld [vmem:[%s16525_s19 + $0x6d0] sm:$0xf0]  ;;  %v8530_v1 = vld [vmem:[%s16525_s19 + $0x210] sm:$0xf] }
 0x62a   :  { %4749 = vmatpush.bf16.msra.mxu1 %v8779_v55  ;;  %v9111_v2 = vor.u32 %v11090_v61, %v9108_v46  ;;  %v11074_v55 = vld [vmem:[%s16525_s19 + $0x614] sm:$0xf]  ;;  %v8531_v19 = vor.u32 %v10954_v49, %v8530_v1  ;;  %v9242_v1 = vld [vmem:[%s16525_s19 + $0x798] sm:$0xf] }
 0x62b   :  { %v11010_v61 = vld [vmem:[%s16525_s19 + $0x414] sm:$0xf]  ;;  %v11131_v49 = vld [vmem:[%s16525_s19 + $0x7d4] sm:$0xf0] }
 0x62c   :  { %v8788_v46 = vld [vmem:[%s16525_s19 + $0x450] sm:$0xf0] }
 0x62d   :  { %4762 = vmatpush.bf16.msrb.mxu2 %v8271_v56  ;;  %4775 = vmatpush.bf16.msrb.mxu3 %v8783_v45  ;;  %v9044_v56 = vld [vmem:[%s16525_s19 + $0x650] sm:$0xf0]  ;;  %v8466_v45 = vld [vmem:[%s16525_s19 + $0x190] sm:$0xf] }
 0x62e   :  { %v8467_v6 = vor.u32 %v10938_v59, %v8466_v45  ;;  %v8666_v45 = vld [vmem:[%s16525_s19 + $0x318] sm:$0xf] }
 0x62f   :  { %v10987_v59 = vld [vmem:[%s16525_s19 + $0x354] sm:$0xf0] }
 0x693   :  { %v2860_v3 = vpop.f32.mrf.mxu2  ;;  %v2873_v4 = vpop.f32.mrf.mxu3 }
 0x694   :  { %v2861_v21 = vadd.f32 %v2860_v3, %v2824_v60  ;;  %v2874_v22 = vadd.f32 %v2873_v4, %v2825_v63  ;;  %v8535_v60 = vor.u32 %v10946_v54, %v8532_v5  ;;  %v9047_v63 = vor.u32 %v11074_v55, %v9044_v56  ;;  %v8978_v3 = vld [vmem:[%s16525_s19 + $0x590] sm:$0xf]  ;;  %v11123_v54 = vld [vmem:[%s16525_s19 + $0x79c] sm:$0xf] }
 0x695   :  { %v11066_v4 = vld [vmem:[%s16525_s19 + $0x5cc] sm:$0xf0]  ;;  %v9244_v5 = vld [vmem:[%s16525_s19 + $0x7d8] sm:$0xf0]  ;;  %v8279_v55 = vor.u32 %v10882_v50, %v8276_v62  ;;  %v8791_v56 = vor.u32 %v11010_v61, %v8788_v46 }
 0x696   :  { %vm2877_vm12 = vcmp.ge.f32.partialorder %v2861_v21, 0.0  ;;  %v2879_v9 = vmul.f32 0.1, %v2861_v21  ;;  %vm2878_vm13 = vcmp.ge.f32.partialorder %v2874_v22, 0.0  ;;  %v2880_v7 = vmul.f32 0.1, %v2874_v22 }
 0x697   :  { %v8979_v57 = vor.u32 %v11066_v4, %v8978_v3  ;;  %v9178_v3 = vld [vmem:[%s16525_s19 + $0x718] sm:$0xf]  ;;  %v10931_v50 = vld [vmem:[%s16525_s19 + $0x19c] sm:$0xf] }
 0x698   :  { %v2881_v18 = vsel %vm2877_vm12, %v2861_v21, %v2879_v9  ;;  %v2882_v23 = vsel %vm2878_vm13, %v2874_v22, %v2880_v7  ;;  %v10930_v21 = vld [vmem:[%s16525_s19 + $0x194] sm:$0xf]  ;;  %v10922_v9 = vld [vmem:[%s16525_s19 + $0x14c] sm:$0xf0]  ;;  %v11115_v4 = vld [vmem:[%s16525_s19 + $0x754] sm:$0xf0] }
 0x699   :  { %v13673_v24 = vpack.c.bf16 %v2881_v18, %v2881_v18  ;;  %v13675_v25 = vpack.c.bf16 %v2882_v23, %v2882_v23  ;;  %v8468_v22 = vld [vmem:[%s16525_s19 + $0x1d0] sm:$0xf0]  ;;  %v8403_v10 = vor.u32 %v10922_v9, %v8402_v8  ;;  %v8602_v8 = vld [vmem:[%s16525_s19 + $0x298] sm:$0xf]  ;;  %v8476_v62 = vld [vmem:[%s16525_s19 + $0x1d8] sm:$0xf0] }
 0x69a   :  { %v8471_v7 = vor.u32 %v10930_v21, %v8468_v22  ;;  %v10914_v18 = vld [vmem:[%s16525_s19 + $0x114] sm:$0xf]  ;;  %v10979_v21 = vld [vmem:[%s16525_s19 + $0x31c] sm:$0xf]  ;;  %v10971_v9 = vld [vmem:[%s16525_s19 + $0x2d4] sm:$0xf0] }
 0x69b   :  { %v2862_v34 = vpop.f32.mrf.mxu2  ;;  %v2875_v37 = vpop.f32.mrf.mxu3  ;;  %4685 = vmatmul.bf16.vlgmr.msrb.gmra.mxu0 %v13673_v24  ;;  %4698 = vmatmul.bf16.vlgmr.msrb.gmra.mxu1 %v13675_v25  ;;  %v8404_v23 = vld [vmem:[%s16525_s19 + $0x150] sm:$0xf0]  ;;  %v8668_v22 = vld [vmem:[%s16525_s19 + $0x358] sm:$0xf0] }
 0x69c   :  { %4711 = vmatmul.bf16.vlgmr.msra.gmra.mxu2 %v13673_v24  ;;  %4724 = vmatmul.bf16.vlgmr.msra.gmra.mxu3 %v13675_v25  ;;  %v8407_v31 = vor.u32 %v10914_v18, %v8404_v23  ;;  %v11034_v34 = vld [vmem:[%s16525_s19 + $0x4cc] sm:$0xf0]  ;;  %v10898_v37 = vld [vmem:[%s16525_s19 + $0x94] sm:$0xf]  ;;  %v10963_v18 = vld [vmem:[%s16525_s19 + $0x29c] sm:$0xf] }
 0x69d   :  { %4781 = vmatpush.bf16.msrb.mxu0 %v8723_v27  ;;  %4794 = vmatpush.bf16.msrb.mxu1 %v9235_v28  ;;  %v11042_v27 = vld [vmem:[%s16525_s19 + $0x514] sm:$0xf]  ;;  %v8851_v29 = vor.u32 %v11034_v34, %v8850_v33  ;;  %v8343_v43 = vor.u32 %v10898_v37, %v8340_v13  ;;  %v8604_v23 = vld [vmem:[%s16525_s19 + $0x2d8] sm:$0xf0]  ;;  %v9050_v33 = vld [vmem:[%s16525_s19 + $0x618] sm:$0xf] }
 0x69e   :  { %4807 = vmatpush.bf16.msra.mxu2 %v8727_v36  ;;  %4820 = vmatpush.bf16.msra.mxu3 %v9239_v30  ;;  %v8916_v28 = vld [vmem:[%s16525_s19 + $0x550] sm:$0xf0]  ;;  %v8338_v36 = vld [vmem:[%s16525_s19 + $0x90] sm:$0xf]  ;;  %v11083_v34 = vld [vmem:[%s16525_s19 + $0x654] sm:$0xf0] }
 0x69f   :  { %v10906_v30 = vld [vmem:[%s16525_s19 + $0xcc] sm:$0xf0]  ;;  %v8919_v32 = vor.u32 %v11042_v27, %v8916_v28  ;;  %v11091_v27 = vld [vmem:[%s16525_s19 + $0x69c] sm:$0xf] }
 0x6a0   :  { %v9116_v28 = vld [vmem:[%s16525_s19 + $0x6d8] sm:$0xf0] }
 0x6a1   :  { %4782 = vmatpush.bf16.msrb.mxu0 %v8659_v40  ;;  %4795 = vmatpush.bf16.msrb.mxu1 %v9171_v41  ;;  %v8274_v40 = vld [vmem:[%s16525_s19 + $0x10] sm:$0xf]  ;;  %v8339_v41 = vor.u32 %v10906_v30, %v8338_v36  ;;  %v8538_v36 = vld [vmem:[%s16525_s19 + $0x218] sm:$0xf]  ;;  %v10947_v37 = vld [vmem:[%s16525_s19 + $0x21c] sm:$0xf] }
 0x6a2   :  { %4808 = vmatpush.bf16.msra.mxu2 %v8663_v14  ;;  %4821 = vmatpush.bf16.msra.mxu3 %v9175_v42  ;;  %v8786_v14 = vld [vmem:[%s16525_s19 + $0x410] sm:$0xf]  ;;  %v10955_v30 = vld [vmem:[%s16525_s19 + $0x254] sm:$0xf0]  ;;  %v8540_v13 = vld [vmem:[%s16525_s19 + $0x258] sm:$0xf0] }
 0x6a3   :  { %v11018_v42 = vld [vmem:[%s16525_s19 + $0x44c] sm:$0xf0]  ;;  %v11059_v61 = vld [vmem:[%s16525_s19 + $0x59c] sm:$0xf] }
 0x6a4   :  { %v8787_v52 = vor.u32 %v11018_v42, %v8786_v14  ;;  %v8543_v14 = vor.u32 %v10947_v37, %v8540_v13  ;;  %v9055_v42 = vor.u32 %v11075_v38, %v9052_v39  ;;  %v8988_v46 = vld [vmem:[%s16525_s19 + $0x5d8] sm:$0xf0]  ;;  %v11124_v37 = vld [vmem:[%s16525_s19 + $0x7a4] sm:$0xf] }
 0x6a5   :  { %4783 = vmatpush.bf16.msrb.mxu0 %v8595_v47  ;;  %4796 = vmatpush.bf16.msrb.mxu1 %v9107_v48  ;;  %v8730_v47 = vld [vmem:[%s16525_s19 + $0x398] sm:$0xf]  ;;  %v9252_v13 = vld [vmem:[%s16525_s19 + $0x7e0] sm:$0xf0] }
 0x6a6   :  { %4809 = vmatpush.bf16.msra.mxu2 %v8599_v51  ;;  %4822 = vmatpush.bf16.msra.mxu3 %v9111_v2  ;;  %v11003_v48 = vld [vmem:[%s16525_s19 + $0x3d4] sm:$0xf0]  ;;  %v10995_v51 = vld [vmem:[%s16525_s19 + $0x39c] sm:$0xf]  ;;  %v8275_v2 = vor.u32 %v10890_v35, %v8274_v40  ;;  %v8539_v40 = vor.u32 %v10955_v30, %v8538_v36  ;;  %v9250_v36 = vld [vmem:[%s16525_s19 + $0x7a0] sm:$0xf] }
 0x6a7   :  { %v10939_v35 = vld [vmem:[%s16525_s19 + $0x1d4] sm:$0xf0]  ;;  %v11132_v30 = vld [vmem:[%s16525_s19 + $0x7dc] sm:$0xf0] }
 0x6a9   :  { %4784 = vmatpush.bf16.msrb.mxu0 %v8531_v19  ;;  %4797 = vmatpush.bf16.msrb.mxu1 %v9043_v58  ;;  %v8731_v19 = vor.u32 %v11003_v48, %v8730_v47  ;;  %v9243_v58 = vor.u32 %v11131_v49, %v9242_v1  ;;  %v8410_v1 = vld [vmem:[%s16525_s19 + $0x118] sm:$0xf] }
 0x6aa   :  { %4810 = vmatpush.bf16.msra.mxu2 %v8535_v60  ;;  %4823 = vmatpush.bf16.msra.mxu3 %v9047_v63  ;;  %v8735_v60 = vor.u32 %v10995_v51, %v8732_v53  ;;  %v9247_v63 = vor.u32 %v11123_v54, %v9244_v5  ;;  %v10923_v49 = vld [vmem:[%s16525_s19 + $0x154] sm:$0xf0]  ;;  %v8479_v51 = vor.u32 %v10931_v50, %v8476_v62  ;;  %v10915_v54 = vld [vmem:[%s16525_s19 + $0x11c] sm:$0xf]  ;;  %v10980_v50 = vld [vmem:[%s16525_s19 + $0x324] sm:$0xf] }
 0x6ab   :  { %4737 = vmatmul.bf16.vlgmr.msra.gmra.mxu0 %v13673_v24  ;;  %4750 = vmatmul.bf16.vlgmr.msra.gmra.mxu1 %v13675_v25  ;;  %v11051_v53 = vld [vmem:[%s16525_s19 + $0x554] sm:$0xf0]  ;;  %v8412_v5 = vld [vmem:[%s16525_s19 + $0x158] sm:$0xf0]  ;;  %v8676_v62 = vld [vmem:[%s16525_s19 + $0x360] sm:$0xf0] }
 0x6ac   :  { %4763 = vmatmul.bf16.vlgmr.msrb.gmra.mxu2 %v13673_v24  ;;  %4776 = vmatmul.bf16.vlgmr.msrb.gmra.mxu3 %v13675_v25 }
 0x6ad   :  { %4785 = vmatpush.bf16.msrb.mxu0 %v8467_v6  ;;  %4798 = vmatpush.bf16.msrb.mxu1 %v8979_v57  ;;  %v8667_v6 = vor.u32 %v10987_v59, %v8666_v45  ;;  %v9179_v57 = vor.u32 %v11115_v4, %v9178_v3  ;;  %v8346_v45 = vld [vmem:[%s16525_s19 + $0x98] sm:$0xf] }
 0x6ae   :  { %4811 = vmatpush.bf16.msra.mxu2 %v8471_v7  ;;  %4824 = vmatpush.bf16.msra.mxu3 %v8983_v12  ;;  %v8671_v7 = vor.u32 %v10979_v21, %v8668_v22  ;;  %v9183_v12 = vor.u32 %v11107_v0, %v9180_v26  ;;  %v10907_v59 = vld [vmem:[%s16525_s19 + $0xd4] sm:$0xf0]  ;;  %v10899_v21 = vld [vmem:[%s16525_s19 + $0x9c] sm:$0xf] }
 0x6af   :  { %v8858_v3 = vld [vmem:[%s16525_s19 + $0x498] sm:$0xf]  ;;  %v8348_v22 = vld [vmem:[%s16525_s19 + $0xd8] sm:$0xf0] }
 0x6b0   :  { %v11035_v4 = vld [vmem:[%s16525_s19 + $0x4d4] sm:$0xf0]  ;;  %v11027_v0 = vld [vmem:[%s16525_s19 + $0x49c] sm:$0xf] }
 0x6b1   :  { %4786 = vmatpush.bf16.msrb.mxu0 %v8403_v10  ;;  %4799 = vmatpush.bf16.msrb.mxu1 %v8915_v20  ;;  %v8603_v10 = vor.u32 %v10971_v9, %v8602_v8  ;;  %v9115_v20 = vor.u32 %v11099_v16, %v9114_v15  ;;  %v8860_v26 = vld [vmem:[%s16525_s19 + $0x4d8] sm:$0xf0]  ;;  %v8859_v8 = vor.u32 %v11035_v4, %v8858_v3  ;;  %v10891_v9 = vld [vmem:[%s16525_s19 + $0x54] sm:$0xf0]  ;;  %v9058_v3 = vld [vmem:[%s16525_s19 + $0x620] sm:$0xf] }
 0x6b2   :  { %4812 = vmatpush.bf16.msra.mxu2 %v8407_v31  ;;  %4825 = vmatpush.bf16.msra.mxu3 %v8919_v32  ;;  %v8607_v31 = vor.u32 %v10963_v18, %v8604_v23  ;;  %v9119_v32 = vor.u32 %v11091_v27, %v9116_v28  ;;  %v8351_v15 = vor.u32 %v10899_v21, %v8348_v22  ;;  %v10883_v18 = vld [vmem:[%s16525_s19 + $0x1c] sm:$0xf]  ;;  %v11084_v4 = vld [vmem:[%s16525_s19 + $0x65c] sm:$0xf0]  ;;  %v10948_v21 = vld [vmem:[%s16525_s19 + $0x224] sm:$0xf] }
 0x6b3   :  { %v8863_v16 = vor.u32 %v11027_v0, %v8860_v26  ;;  %v8284_v23 = vld [vmem:[%s16525_s19 + $0x58] sm:$0xf0]  ;;  %v8548_v22 = vld [vmem:[%s16525_s19 + $0x260] sm:$0xf0] }
 0x6b4   :  { %v11011_v27 = vld [vmem:[%s16525_s19 + $0x41c] sm:$0xf]  ;;  %v8287_v38 = vor.u32 %v10883_v18, %v8284_v23  ;;  %v11076_v0 = vld [vmem:[%s16525_s19 + $0x624] sm:$0xf] }
 0x6b5   :  { %4787 = vmatpush.bf16.msrb.mxu0 %v8339_v41  ;;  %4800 = vmatpush.bf16.msrb.mxu1 %v8851_v29  ;;  %v9051_v41 = vor.u32 %v11083_v34, %v9050_v33  ;;  %v8474_v29 = vld [vmem:[%s16525_s19 + $0x198] sm:$0xf]  ;;  %v8796_v28 = vld [vmem:[%s16525_s19 + $0x458] sm:$0xf0]  ;;  %v8740_v34 = vld [vmem:[%s16525_s19 + $0x3e0] sm:$0xf0] }
 0x6b6   :  { %4813 = vmatpush.bf16.msra.mxu2 %v8343_v43  ;;  %4826 = vmatpush.bf16.msra.mxu3 %v8855_v44  ;;  %v8986_v43 = vld [vmem:[%s16525_s19 + $0x598] sm:$0xf]  ;;  %v8475_v47 = vor.u32 %v10939_v35, %v8474_v29  ;;  %v8799_v39 = vor.u32 %v11011_v27, %v8796_v28  ;;  %v8674_v29 = vld [vmem:[%s16525_s19 + $0x320] sm:$0xf]  ;;  %v9060_v26 = vld [vmem:[%s16525_s19 + $0x660] sm:$0xf0] }
 0x6b7   :  { %v11067_v44 = vld [vmem:[%s16525_s19 + $0x5d4] sm:$0xf0]  ;;  %v10988_v35 = vld [vmem:[%s16525_s19 + $0x35c] sm:$0xf0]  ;;  %v10932_v18 = vld [vmem:[%s16525_s19 + $0x1a4] sm:$0xf] }
 0x6b8   :  { %v8987_v48 = vor.u32 %v11067_v44, %v8986_v43  ;;  %v9186_v43 = vld [vmem:[%s16525_s19 + $0x720] sm:$0xf]  ;;  %v8484_v23 = vld [vmem:[%s16525_s19 + $0x1e0] sm:$0xf0] }
 0x6b9   :  { %4788 = vmatpush.bf16.msrb.mxu0 %v8275_v2  ;;  %4801 = vmatpush.bf16.msrb.mxu1 %v8787_v52  ;;  %v8991_v2 = vor.u32 %v11059_v61, %v8988_v46  ;;  %v8922_v52 = vld [vmem:[%s16525_s19 + $0x518] sm:$0xf]  ;;  %v11116_v44 = vld [vmem:[%s16525_s19 + $0x75c] sm:$0xf0]  ;;  %v11108_v61 = vld [vmem:[%s16525_s19 + $0x724] sm:$0xf] }
 0x6ba   :  { %4814 = vmatpush.bf16.msra.mxu2 %v8279_v55  ;;  %4827 = vmatpush.bf16.msra.mxu3 %v8791_v56  ;;  %v11043_v55 = vld [vmem:[%s16525_s19 + $0x51c] sm:$0xf]  ;;  %v9188_v46 = vld [vmem:[%s16525_s19 + $0x760] sm:$0xf0] }
 0x6bb   :  { %v8924_v56 = vld [vmem:[%s16525_s19 + $0x558] sm:$0xf0]  ;;  %v11060_v27 = vld [vmem:[%s16525_s19 + $0x5a4] sm:$0xf] }
 0x6bc   :  { %4789 = vmatmul.bf16.vlgmr.msrb.gmra.mxu0 %v13673_v24  ;;  %4802 = vmatmul.bf16.vlgmr.msrb.gmra.mxu1 %v13675_v25  ;;  %v8996_v28 = vld [vmem:[%s16525_s19 + $0x5e0] sm:$0xf0] }
 0x6bd   :  { %4833 = vmatpush.bf16.msra.mxu0 %v8731_v19  ;;  %4846 = vmatpush.bf16.msra.mxu1 %v9243_v58  ;;  %v8411_v19 = vor.u32 %v10923_v49, %v8410_v1  ;;  %v8923_v58 = vor.u32 %v11051_v53, %v8922_v52  ;;  %v8610_v1 = vld [vmem:[%s16525_s19 + $0x2a0] sm:$0xf] }
 0x6be   :  { %4859 = vmatpush.bf16.msrb.mxu2 %v8735_v60  ;;  %4872 = vmatpush.bf16.msrb.mxu3 %v9247_v63  ;;  %v8415_v60 = vor.u32 %v10915_v54, %v8412_v5  ;;  %v8927_v63 = vor.u32 %v11043_v55, %v8924_v56  ;;  %v10972_v49 = vld [vmem:[%s16525_s19 + $0x2dc] sm:$0xf0]  ;;  %v10964_v54 = vld [vmem:[%s16525_s19 + $0x2a4] sm:$0xf] }
 0x6bf   :  { %4815 = vmatmul.bf16.vlgmr.msra.gmra.mxu2 %v13673_v24  ;;  %4828 = vmatmul.bf16.vlgmr.msra.gmra.mxu3 %v13675_v25  ;;  %v9122_v52 = vld [vmem:[%s16525_s19 + $0x6a0] sm:$0xf]  ;;  %v8612_v5 = vld [vmem:[%s16525_s19 + $0x2e0] sm:$0xf0] }
 0x6c0   :  { %v11100_v53 = vld [vmem:[%s16525_s19 + $0x6dc] sm:$0xf0]  ;;  %v11092_v55 = vld [vmem:[%s16525_s19 + $0x6a4] sm:$0xf] }
 0x6c1   :  { %4834 = vmatpush.bf16.msra.mxu0 %v8667_v6  ;;  %4847 = vmatpush.bf16.msra.mxu1 %v9179_v57  ;;  %v8282_v6 = vld [vmem:[%s16525_s19 + $0x18] sm:$0xf]  ;;  %v8347_v57 = vor.u32 %v10907_v59, %v8346_v45  ;;  %v9124_v56 = vld [vmem:[%s16525_s19 + $0x6e0] sm:$0xf0]  ;;  %v8546_v45 = vld [vmem:[%s16525_s19 + $0x220] sm:$0xf] }
 0x6c2   :  { %4860 = vmatpush.bf16.msrb.mxu2 %v8671_v7  ;;  %4873 = vmatpush.bf16.msrb.mxu3 %v9183_v12  ;;  %v8794_v7 = vld [vmem:[%s16525_s19 + $0x418] sm:$0xf]  ;;  %v10956_v59 = vld [vmem:[%s16525_s19 + $0x25c] sm:$0xf0] }
 0x6c3   :  { %v11019_v12 = vld [vmem:[%s16525_s19 + $0x454] sm:$0xf0] }
 0x6c4   :  { %v8795_v33 = vor.u32 %v11019_v12, %v8794_v7  ;;  %v8551_v7 = vor.u32 %v10948_v21, %v8548_v22  ;;  %v9063_v12 = vor.u32 %v11076_v0, %v9060_v26  ;;  %v11125_v21 = vld [vmem:[%s16525_s19 + $0x7ac] sm:$0xf] }
 0x6c5   :  { %4835 = vmatpush.bf16.msra.mxu0 %v8603_v10  ;;  %4848 = vmatpush.bf16.msra.mxu1 %v9115_v20  ;;  %v8738_v10 = vld [vmem:[%s16525_s19 + $0x3a0] sm:$0xf]  ;;  %v9260_v22 = vld [vmem:[%s16525_s19 + $0x7e8] sm:$0xf0] }
 0x6c6   :  { %4861 = vmatpush.bf16.msrb.mxu2 %v8607_v31  ;;  %4874 = vmatpush.bf16.msrb.mxu3 %v9119_v32  ;;  %v11004_v20 = vld [vmem:[%s16525_s19 + $0x3dc] sm:$0xf0]  ;;  %v10996_v31 = vld [vmem:[%s16525_s19 + $0x3a4] sm:$0xf]  ;;  %v8283_v32 = vor.u32 %v10891_v9, %v8282_v6  ;;  %v8547_v6 = vor.u32 %v10956_v59, %v8546_v45  ;;  %v9258_v45 = vld [vmem:[%s16525_s19 + $0x7a8] sm:$0xf] }
 0x6c7   :  { %v10940_v9 = vld [vmem:[%s16525_s19 + $0x1dc] sm:$0xf0]  ;;  %v11133_v59 = vld [vmem:[%s16525_s19 + $0x7e4] sm:$0xf0] }
 0x6c9   :  { %4836 = vmatpush.bf16.msra.mxu0 %v8539_v40  ;;  %4849 = vmatpush.bf16.msra.mxu1 %v9051_v41  ;;  %v8739_v40 = vor.u32 %v11004_v20, %v8738_v10  ;;  %v9251_v41 = vor.u32 %v11132_v30, %v9250_v36  ;;  %v8418_v36 = vld [vmem:[%s16525_s19 + $0x120] sm:$0xf] }
 0x6ca   :  { %4862 = vmatpush.bf16.msrb.mxu2 %v8543_v14  ;;  %4875 = vmatpush.bf16.msrb.mxu3 %v9055_v42  ;;  %v8743_v14 = vor.u32 %v10996_v31, %v8740_v34  ;;  %v9255_v42 = vor.u32 %v11124_v37, %v9252_v13  ;;  %v10924_v30 = vld [vmem:[%s16525_s19 + $0x15c] sm:$0xf0]  ;;  %v8487_v31 = vor.u32 %v10932_v18, %v8484_v23  ;;  %v10916_v37 = vld [vmem:[%s16525_s19 + $0x124] sm:$0xf]  ;;  %v10981_v18 = vld [vmem:[%s16525_s19 + $0x32c] sm:$0xf] }
 0x6cb   :  { %v11052_v34 = vld [vmem:[%s16525_s19 + $0x55c] sm:$0xf0]  ;;  %v8420_v13 = vld [vmem:[%s16525_s19 + $0x160] sm:$0xf0]  ;;  %v8684_v23 = vld [vmem:[%s16525_s19 + $0x368] sm:$0xf0] }
 0x6cd   :  { %4837 = vmatpush.bf16.msra.mxu0 %v8475_v47  ;;  %4850 = vmatpush.bf16.msra.mxu1 %v8987_v48  ;;  %v8675_v47 = vor.u32 %v10988_v35, %v8674_v29  ;;  %v9187_v48 = vor.u32 %v11116_v44, %v9186_v43  ;;  %v8354_v29 = vld [vmem:[%s16525_s19 + $0xa0] sm:$0xf] }
 0x6ce   :  { %4863 = vmatpush.bf16.msrb.mxu2 %v8479_v51  ;;  %4876 = vmatpush.bf16.msrb.mxu3 %v8991_v2  ;;  %v8679_v51 = vor.u32 %v10980_v50, %v8676_v62  ;;  %v9191_v2 = vor.u32 %v11108_v61, %v9188_v46  ;;  %v10908_v35 = vld [vmem:[%s16525_s19 + $0xdc] sm:$0xf0]  ;;  %v10900_v50 = vld [vmem:[%s16525_s19 + $0xa4] sm:$0xf] }
 0x6cf   :  { %v8866_v43 = vld [vmem:[%s16525_s19 + $0x4a0] sm:$0xf]  ;;  %v8356_v62 = vld [vmem:[%s16525_s19 + $0xe0] sm:$0xf0] }
 0x6d0   :  { %v11036_v44 = vld [vmem:[%s16525_s19 + $0x4dc] sm:$0xf0]  ;;  %v11028_v61 = vld [vmem:[%s16525_s19 + $0x4a4] sm:$0xf] }
 0x6d1   :  { %4838 = vmatpush.bf16.msra.mxu0 %v8411_v19  ;;  %4851 = vmatpush.bf16.msra.mxu1 %v8923_v58  ;;  %v8611_v19 = vor.u32 %v10972_v49, %v8610_v1  ;;  %v9123_v58 = vor.u32 %v11100_v53, %v9122_v52  ;;  %v8868_v46 = vld [vmem:[%s16525_s19 + $0x4e0] sm:$0xf0]  ;;  %v8867_v1 = vor.u32 %v11036_v44, %v8866_v43  ;;  %v10892_v49 = vld [vmem:[%s16525_s19 + $0x5c] sm:$0xf0]  ;;  %v9066_v43 = vld [vmem:[%s16525_s19 + $0x628] sm:$0xf] }
 0x6d2   :  { %4864 = vmatpush.bf16.msrb.mxu2 %v8415_v60  ;;  %4877 = vmatpush.bf16.msrb.mxu3 %v8927_v63  ;;  %v8615_v60 = vor.u32 %v10964_v54, %v8612_v5  ;;  %v9127_v63 = vor.u32 %v11092_v55, %v9124_v56  ;;  %v8359_v52 = vor.u32 %v10900_v50, %v8356_v62  ;;  %v10884_v54 = vld [vmem:[%s16525_s19 + $0x24] sm:$0xf]  ;;  %v11085_v44 = vld [vmem:[%s16525_s19 + $0x664] sm:$0xf0]  ;;  %v10949_v50 = vld [vmem:[%s16525_s19 + $0x22c] sm:$0xf] }
 0x6d3   :  { %v8871_v53 = vor.u32 %v11028_v61, %v8868_v46  ;;  %v8292_v5 = vld [vmem:[%s16525_s19 + $0x60] sm:$0xf0]  ;;  %v8556_v62 = vld [vmem:[%s16525_s19 + $0x268] sm:$0xf0] }
 0x6d4   :  { %v11012_v55 = vld [vmem:[%s16525_s19 + $0x424] sm:$0xf]  ;;  %v8295_v0 = vor.u32 %v10884_v54, %v8292_v5  ;;  %v11077_v61 = vld [vmem:[%s16525_s19 + $0x62c] sm:$0xf] }
 0x6d5   :  { %4839 = vmatpush.bf16.msra.mxu0 %v8347_v57  ;;  %4852 = vmatpush.bf16.msra.mxu1 %v8859_v8  ;;  %v9059_v57 = vor.u32 %v11084_v4, %v9058_v3  ;;  %v8482_v8 = vld [vmem:[%s16525_s19 + $0x1a0] sm:$0xf]  ;;  %v8804_v56 = vld [vmem:[%s16525_s19 + $0x460] sm:$0xf0]  ;;  %v8748_v4 = vld [vmem:[%s16525_s19 + $0x3e8] sm:$0xf0] }
 0x6d6   :  { %4865 = vmatpush.bf16.msrb.mxu2 %v8351_v15  ;;  %4878 = vmatpush.bf16.msrb.mxu3 %v8863_v16  ;;  %v8994_v15 = vld [vmem:[%s16525_s19 + $0x5a0] sm:$0xf]  ;;  %v8483_v10 = vor.u32 %v10940_v9, %v8482_v8  ;;  %v8807_v26 = vor.u32 %v11012_v55, %v8804_v56  ;;  %v8682_v8 = vld [vmem:[%s16525_s19 + $0x328] sm:$0xf]  ;;  %v9068_v46 = vld [vmem:[%s16525_s19 + $0x668] sm:$0xf0] }
 0x6d7   :  { %v11068_v16 = vld [vmem:[%s16525_s19 + $0x5dc] sm:$0xf0]  ;;  %v10989_v9 = vld [vmem:[%s16525_s19 + $0x364] sm:$0xf0]  ;;  %v10933_v54 = vld [vmem:[%s16525_s19 + $0x1ac] sm:$0xf] }
 0x6d8   :  { %v8995_v20 = vor.u32 %v11068_v16, %v8994_v15  ;;  %v9194_v15 = vld [vmem:[%s16525_s19 + $0x728] sm:$0xf]  ;;  %v8492_v5 = vld [vmem:[%s16525_s19 + $0x1e8] sm:$0xf0] }
 0x6d9   :  { %4840 = vmatpush.bf16.msra.mxu0 %v8283_v32  ;;  %4853 = vmatpush.bf16.msra.mxu1 %v8795_v33  ;;  %v8999_v32 = vor.u32 %v11060_v27, %v8996_v28  ;;  %v8930_v33 = vld [vmem:[%s16525_s19 + $0x520] sm:$0xf]  ;;  %v11117_v16 = vld [vmem:[%s16525_s19 + $0x764] sm:$0xf0]  ;;  %v11109_v27 = vld [vmem:[%s16525_s19 + $0x72c] sm:$0xf] }
 0x6da   :  { %4866 = vmatpush.bf16.msrb.mxu2 %v8287_v38  ;;  %4879 = vmatpush.bf16.msrb.mxu3 %v8799_v39  ;;  %v11044_v38 = vld [vmem:[%s16525_s19 + $0x524] sm:$0xf]  ;;  %v9196_v28 = vld [vmem:[%s16525_s19 + $0x768] sm:$0xf0] }
 0x6db   :  { %v8932_v39 = vld [vmem:[%s16525_s19 + $0x560] sm:$0xf0]  ;;  %v11061_v55 = vld [vmem:[%s16525_s19 + $0x5ac] sm:$0xf] }
 0x6dc   :  { %4841 = vmatmul.bf16.vlgmr.msra.gmra.mxu0 %v13673_v24  ;;  %4854 = vmatmul.bf16.vlgmr.msra.gmra.mxu1 %v13675_v25  ;;  %v9004_v56 = vld [vmem:[%s16525_s19 + $0x5e8] sm:$0xf0] }
 0x6dd   :  { %4885 = vmatpush.bf16.msrb.mxu0 %v8739_v40  ;;  %4898 = vmatpush.bf16.msrb.mxu1 %v9251_v41  ;;  %v8419_v40 = vor.u32 %v10924_v30, %v8418_v36  ;;  %v8931_v41 = vor.u32 %v11052_v34, %v8930_v33  ;;  %v8618_v36 = vld [vmem:[%s16525_s19 + $0x2a8] sm:$0xf] }
 0x6de   :  { %4911 = vmatpush.bf16.msra.mxu2 %v8743_v14  ;;  %4924 = vmatpush.bf16.msra.mxu3 %v9255_v42  ;;  %v8423_v14 = vor.u32 %v10916_v37, %v8420_v13  ;;  %v8935_v42 = vor.u32 %v11044_v38, %v8932_v39  ;;  %v10973_v30 = vld [vmem:[%s16525_s19 + $0x2e4] sm:$0xf0]  ;;  %v10965_v37 = vld [vmem:[%s16525_s19 + $0x2ac] sm:$0xf] }
 0x6df   :  { %4867 = vmatmul.bf16.vlgmr.msrb.gmra.mxu2 %v13673_v24  ;;  %4880 = vmatmul.bf16.vlgmr.msrb.gmra.mxu3 %v13675_v25  ;;  %v9130_v33 = vld [vmem:[%s16525_s19 + $0x6a8] sm:$0xf]  ;;  %v8620_v13 = vld [vmem:[%s16525_s19 + $0x2e8] sm:$0xf0] }
 0x6e0   :  { %v11101_v34 = vld [vmem:[%s16525_s19 + $0x6e4] sm:$0xf0]  ;;  %v11093_v38 = vld [vmem:[%s16525_s19 + $0x6ac] sm:$0xf] }
 0x6e1   :  { %4886 = vmatpush.bf16.msrb.mxu0 %v8675_v47  ;;  %4899 = vmatpush.bf16.msrb.mxu1 %v9187_v48  ;;  %v8290_v47 = vld [vmem:[%s16525_s19 + $0x20] sm:$0xf]  ;;  %v8355_v48 = vor.u32 %v10908_v35, %v8354_v29  ;;  %v9132_v39 = vld [vmem:[%s16525_s19 + $0x6e8] sm:$0xf0]  ;;  %v8554_v29 = vld [vmem:[%s16525_s19 + $0x228] sm:$0xf] }
 0x6e2   :  { %4912 = vmatpush.bf16.msra.mxu2 %v8679_v51  ;;  %4925 = vmatpush.bf16.msra.mxu3 %v9191_v2  ;;  %v8802_v51 = vld [vmem:[%s16525_s19 + $0x420] sm:$0xf]  ;;  %v10957_v35 = vld [vmem:[%s16525_s19 + $0x264] sm:$0xf0] }
 0x6e3   :  { %v11020_v2 = vld [vmem:[%s16525_s19 + $0x45c] sm:$0xf0] }
 0x6e4   :  { %v8803_v3 = vor.u32 %v11020_v2, %v8802_v51  ;;  %v8559_v51 = vor.u32 %v10949_v50, %v8556_v62  ;;  %v9071_v2 = vor.u32 %v11077_v61, %v9068_v46  ;;  %v11126_v50 = vld [vmem:[%s16525_s19 + $0x7b4] sm:$0xf] }
 0x6e5   :  { %4887 = vmatpush.bf16.msrb.mxu0 %v8611_v19  ;;  %4900 = vmatpush.bf16.msrb.mxu1 %v9123_v58  ;;  %v8746_v19 = vld [vmem:[%s16525_s19 + $0x3a8] sm:$0xf]  ;;  %v9268_v62 = vld [vmem:[%s16525_s19 + $0x7f0] sm:$0xf0] }
 0x6e6   :  { %4913 = vmatpush.bf16.msra.mxu2 %v8615_v60  ;;  %4926 = vmatpush.bf16.msra.mxu3 %v9127_v63  ;;  %v11005_v58 = vld [vmem:[%s16525_s19 + $0x3e4] sm:$0xf0]  ;;  %v10997_v60 = vld [vmem:[%s16525_s19 + $0x3ac] sm:$0xf]  ;;  %v8291_v63 = vor.u32 %v10892_v49, %v8290_v47  ;;  %v8555_v47 = vor.u32 %v10957_v35, %v8554_v29  ;;  %v9266_v29 = vld [vmem:[%s16525_s19 + $0x7b0] sm:$0xf] }
 0x6e7   :  { %v10941_v49 = vld [vmem:[%s16525_s19 + $0x1e4] sm:$0xf0]  ;;  %v11134_v35 = vld [vmem:[%s16525_s19 + $0x7ec] sm:$0xf0] }
 0x6e9   :  { %4888 = vmatpush.bf16.msrb.mxu0 %v8547_v6  ;;  %4901 = vmatpush.bf16.msrb.mxu1 %v9059_v57  ;;  %v8747_v6 = vor.u32 %v11005_v58, %v8746_v19  ;;  %v9259_v57 = vor.u32 %v11133_v59, %v9258_v45  ;;  %v8426_v45 = vld [vmem:[%s16525_s19 + $0x128] sm:$0xf] }
 0x6ea   :  { %4914 = vmatpush.bf16.msra.mxu2 %v8551_v7  ;;  %4927 = vmatpush.bf16.msra.mxu3 %v9063_v12  ;;  %v8751_v7 = vor.u32 %v10997_v60, %v8748_v4  ;;  %v9263_v12 = vor.u32 %v11125_v21, %v9260_v22  ;;  %v10925_v59 = vld [vmem:[%s16525_s19 + $0x164] sm:$0xf0]  ;;  %v8495_v60 = vor.u32 %v10933_v54, %v8492_v5  ;;  %v10917_v21 = vld [vmem:[%s16525_s19 + $0x12c] sm:$0xf]  ;;  %v10982_v54 = vld [vmem:[%s16525_s19 + $0x334] sm:$0xf] }
 0x6eb   :  { %v11053_v4 = vld [vmem:[%s16525_s19 + $0x564] sm:$0xf0]  ;;  %v8428_v22 = vld [vmem:[%s16525_s19 + $0x168] sm:$0xf0]  ;;  %v8692_v5 = vld [vmem:[%s16525_s19 + $0x370] sm:$0xf0] }
 0x6ed   :  { %4889 = vmatpush.bf16.msrb.mxu0 %v8483_v10  ;;  %4902 = vmatpush.bf16.msrb.mxu1 %v8995_v20  ;;  %v8683_v10 = vor.u32 %v10989_v9, %v8682_v8  ;;  %v9195_v20 = vor.u32 %v11117_v16, %v9194_v15  ;;  %v8362_v8 = vld [vmem:[%s16525_s19 + $0xa8] sm:$0xf] }
 0x6ee   :  { %4915 = vmatpush.bf16.msra.mxu2 %v8487_v31  ;;  %4928 = vmatpush.bf16.msra.mxu3 %v8999_v32  ;;  %v8687_v31 = vor.u32 %v10981_v18, %v8684_v23  ;;  %v9199_v32 = vor.u32 %v11109_v27, %v9196_v28  ;;  %v10909_v9 = vld [vmem:[%s16525_s19 + $0xe4] sm:$0xf0]  ;;  %v10901_v18 = vld [vmem:[%s16525_s19 + $0xac] sm:$0xf] }
 0x6ef   :  { %v8874_v15 = vld [vmem:[%s16525_s19 + $0x4a8] sm:$0xf]  ;;  %v8364_v23 = vld [vmem:[%s16525_s19 + $0xe8] sm:$0xf0] }
 0x6f0   :  { %v11037_v16 = vld [vmem:[%s16525_s19 + $0x4e4] sm:$0xf0]  ;;  %v11029_v27 = vld [vmem:[%s16525_s19 + $0x4ac] sm:$0xf] }
 0x6f1   :  { %4890 = vmatpush.bf16.msrb.mxu0 %v8419_v40  ;;  %4903 = vmatpush.bf16.msrb.mxu1 %v8931_v41  ;;  %v8619_v40 = vor.u32 %v10973_v30, %v8618_v36  ;;  %v9131_v41 = vor.u32 %v11101_v34, %v9130_v33  ;;  %v8876_v28 = vld [vmem:[%s16525_s19 + $0x4e8] sm:$0xf0]  ;;  %v8875_v36 = vor.u32 %v11037_v16, %v8874_v15  ;;  %v10893_v30 = vld [vmem:[%s16525_s19 + $0x64] sm:$0xf0]  ;;  %v10958_v15 = vld [vmem:[%s16525_s19 + $0x26c] sm:$0xf0] }
 0x6f2   :  { %4916 = vmatpush.bf16.msra.mxu2 %v8423_v14  ;;  %4929 = vmatpush.bf16.msra.mxu3 %v8935_v42  ;;  %v8623_v14 = vor.u32 %v10965_v37, %v8620_v13  ;;  %v9135_v42 = vor.u32 %v11093_v38, %v9132_v39  ;;  %v8367_v33 = vor.u32 %v10901_v18, %v8364_v23  ;;  %v10885_v37 = vld [vmem:[%s16525_s19 + $0x2c] sm:$0xf]  ;;  %v9074_v23 = vld [vmem:[%s16525_s19 + $0x630] sm:$0xf] }
 0x6f3   :  { %v8879_v34 = vor.u32 %v11029_v27, %v8876_v28  ;;  %v8300_v13 = vld [vmem:[%s16525_s19 + $0x68] sm:$0xf0]  ;;  %v11086_v27 = vld [vmem:[%s16525_s19 + $0x66c] sm:$0xf0]  ;;  %v10950_v28 = vld [vmem:[%s16525_s19 + $0x234] sm:$0xf] }
 0x6f4   :  { %v11013_v38 = vld [vmem:[%s16525_s19 + $0x42c] sm:$0xf]  ;;  %v8303_v61 = vor.u32 %v10885_v37, %v8300_v13  ;;  %v9010_v13 = vld [vmem:[%s16525_s19 + $0x5b0] sm:$0xf] }
 0x6f5   :  { %4891 = vmatpush.bf16.msrb.mxu0 %v8355_v48  ;;  %4904 = vmatpush.bf16.msrb.mxu1 %v8867_v1  ;;  %v9067_v48 = vor.u32 %v11085_v44, %v9066_v43  ;;  %v8490_v1 = vld [vmem:[%s16525_s19 + $0x1a8] sm:$0xf]  ;;  %v8812_v39 = vld [vmem:[%s16525_s19 + $0x468] sm:$0xf0]  ;;  %v8756_v44 = vld [vmem:[%s16525_s19 + $0x3f0] sm:$0xf0] }
 0x6f6   :  { %4917 = vmatpush.bf16.msra.mxu2 %v8359_v52  ;;  %4930 = vmatpush.bf16.msra.mxu3 %v8871_v53  ;;  %v9002_v52 = vld [vmem:[%s16525_s19 + $0x5a8] sm:$0xf]  ;;  %v8491_v19 = vor.u32 %v10941_v49, %v8490_v1  ;;  %v8815_v46 = vor.u32 %v11013_v38, %v8812_v39  ;;  %v8690_v1 = vld [vmem:[%s16525_s19 + $0x330] sm:$0xf]  ;;  %v10934_v39 = vld [vmem:[%s16525_s19 + $0x1b4] sm:$0xf] }
 0x6f7   :  { %v11069_v53 = vld [vmem:[%s16525_s19 + $0x5e4] sm:$0xf0]  ;;  %v10990_v49 = vld [vmem:[%s16525_s19 + $0x36c] sm:$0xf0] }
 0x6f8   :  { %v9003_v58 = vor.u32 %v11069_v53, %v9002_v52  ;;  %v9202_v52 = vld [vmem:[%s16525_s19 + $0x730] sm:$0xf] }
 0x6f9   :  { %4892 = vmatpush.bf16.msrb.mxu0 %v8291_v63  ;;  %4905 = vmatpush.bf16.msrb.mxu1 %v8803_v3  ;;  %v9007_v63 = vor.u32 %v11061_v55, %v9004_v56  ;;  %v8938_v3 = vld [vmem:[%s16525_s19 + $0x528] sm:$0xf]  ;;  %v11118_v53 = vld [vmem:[%s16525_s19 + $0x76c] sm:$0xf0]  ;;  %v11110_v55 = vld [vmem:[%s16525_s19 + $0x734] sm:$0xf] }
 0x6fa   :  { %4918 = vmatpush.bf16.msra.mxu2 %v8295_v0  ;;  %4931 = vmatpush.bf16.msra.mxu3 %v8807_v26  ;;  %v11045_v0 = vld [vmem:[%s16525_s19 + $0x52c] sm:$0xf]  ;;  %v9204_v56 = vld [vmem:[%s16525_s19 + $0x770] sm:$0xf0]  ;;  %v11070_v38 = vld [vmem:[%s16525_s19 + $0x5ec] sm:$0xf0] }
 0x6fb   :  { %v8940_v26 = vld [vmem:[%s16525_s19 + $0x568] sm:$0xf0] }
 0x6fc   :  { %4893 = vmatmul.bf16.vlgmr.msrb.gmra.mxu0 %v13673_v24  ;;  %4906 = vmatmul.bf16.vlgmr.msrb.gmra.mxu1 %v13675_v25 }
 0x6fd   :  { %4937 = vmatpush.bf16.msra.mxu0 %v8747_v6  ;;  %4950 = vmatpush.bf16.msra.mxu1 %v9259_v57  ;;  %v8427_v6 = vor.u32 %v10925_v59, %v8426_v45  ;;  %v8939_v57 = vor.u32 %v11053_v4, %v8938_v3  ;;  %v8626_v45 = vld [vmem:[%s16525_s19 + $0x2b0] sm:$0xf] }
 0x6fe   :  { %4963 = vmatpush.bf16.msrb.mxu2 %v8751_v7  ;;  %4976 = vmatpush.bf16.msrb.mxu3 %v9263_v12  ;;  %v8431_v7 = vor.u32 %v10917_v21, %v8428_v22  ;;  %v8943_v12 = vor.u32 %v11045_v0, %v8940_v26  ;;  %v10974_v59 = vld [vmem:[%s16525_s19 + $0x2ec] sm:$0xf0]  ;;  %v10966_v21 = vld [vmem:[%s16525_s19 + $0x2b4] sm:$0xf] }
 0x6ff   :  { %4919 = vmatmul.bf16.vlgmr.msra.gmra.mxu2 %v13673_v24  ;;  %4932 = vmatmul.bf16.vlgmr.msra.gmra.mxu3 %v13675_v25  ;;  %v9138_v3 = vld [vmem:[%s16525_s19 + $0x6b0] sm:$0xf]  ;;  %v8628_v22 = vld [vmem:[%s16525_s19 + $0x2f0] sm:$0xf0] }
 0x700   :  { %v11102_v4 = vld [vmem:[%s16525_s19 + $0x6ec] sm:$0xf0]  ;;  %v11094_v0 = vld [vmem:[%s16525_s19 + $0x6b4] sm:$0xf]  ;;  %v8631_v16 = vor.u32 %v10966_v21, %v8628_v22 }
 0x701   :  { %4938 = vmatpush.bf16.msra.mxu0 %v8683_v10  ;;  %4951 = vmatpush.bf16.msra.mxu1 %v9195_v20  ;;  %v8298_v10 = vld [vmem:[%s16525_s19 + $0x28] sm:$0xf]  ;;  %v8363_v20 = vor.u32 %v10909_v9, %v8362_v8  ;;  %v9140_v26 = vld [vmem:[%s16525_s19 + $0x6f0] sm:$0xf0]  ;;  %v8627_v8 = vor.u32 %v10974_v59, %v8626_v45  ;;  %v9139_v9 = vor.u32 %v11102_v4, %v9138_v3  ;;  %v8882_v45 = vld [vmem:[%s16525_s19 + $0x4b0] sm:$0xf] }
 0x702   :  { %4964 = vmatpush.bf16.msrb.mxu2 %v8687_v31  ;;  %4977 = vmatpush.bf16.msrb.mxu3 %v9199_v32  ;;  %v8810_v31 = vld [vmem:[%s16525_s19 + $0x428] sm:$0xf]  ;;  %v9143_v18 = vor.u32 %v11094_v0, %v9140_v26  ;;  %v11038_v59 = vld [vmem:[%s16525_s19 + $0x4ec] sm:$0xf0]  ;;  %v8372_v4 = vld [vmem:[%s16525_s19 + $0xf0] sm:$0xf0] }
 0x703   :  { %v11021_v32 = vld [vmem:[%s16525_s19 + $0x464] sm:$0xf0]  ;;  %v11030_v21 = vld [vmem:[%s16525_s19 + $0x4b4] sm:$0xf] }
 0x704   :  { %v8811_v43 = vor.u32 %v11021_v32, %v8810_v31  ;;  %v9075_v31 = vor.u32 %v11086_v27, %v9074_v23  ;;  %v8498_v32 = vld [vmem:[%s16525_s19 + $0x1b0] sm:$0xf]  ;;  %v8884_v22 = vld [vmem:[%s16525_s19 + $0x4f0] sm:$0xf0] }
 0x705   :  { %4939 = vmatpush.bf16.msra.mxu0 %v8619_v40  ;;  %4952 = vmatpush.bf16.msra.mxu1 %v9131_v41  ;;  %v8754_v40 = vld [vmem:[%s16525_s19 + $0x3b0] sm:$0xf]  ;;  %v8887_v23 = vor.u32 %v11030_v21, %v8884_v22  ;;  %v10886_v27 = vld [vmem:[%s16525_s19 + $0x34] sm:$0xf] }
 0x706   :  { %4965 = vmatpush.bf16.msrb.mxu2 %v8623_v14  ;;  %4978 = vmatpush.bf16.msrb.mxu3 %v9135_v42  ;;  %v11006_v41 = vld [vmem:[%s16525_s19 + $0x3ec] sm:$0xf0]  ;;  %v10998_v14 = vld [vmem:[%s16525_s19 + $0x3b4] sm:$0xf]  ;;  %v8299_v42 = vor.u32 %v10893_v30, %v8298_v10 }
 0x707   :  { %v8564_v10 = vld [vmem:[%s16525_s19 + $0x270] sm:$0xf0] }
 0x709   :  { %4940 = vmatpush.bf16.msra.mxu0 %v8555_v47  ;;  %4953 = vmatpush.bf16.msra.mxu1 %v9067_v48  ;;  %v8755_v47 = vor.u32 %v11006_v41, %v8754_v40  ;;  %v9267_v48 = vor.u32 %v11134_v35, %v9266_v29  ;;  %v8500_v29 = vld [vmem:[%s16525_s19 + $0x1f0] sm:$0xf0] }
 0x70a   :  { %4966 = vmatpush.bf16.msrb.mxu2 %v8559_v51  ;;  %4979 = vmatpush.bf16.msrb.mxu3 %v9071_v2  ;;  %v8759_v51 = vor.u32 %v10998_v14, %v8756_v44  ;;  %v9271_v2 = vor.u32 %v11126_v50, %v9268_v62  ;;  %v11062_v35 = vld [vmem:[%s16525_s19 + $0x5b4] sm:$0xf]  ;;  %v9011_v62 = vor.u32 %v11070_v38, %v9010_v13  ;;  %v8764_v13 = vld [vmem:[%s16525_s19 + $0x3f8] sm:$0xf0] }
 0x70b   :  { %v9012_v14 = vld [vmem:[%s16525_s19 + $0x5f0] sm:$0xf0]  ;;  %v11127_v38 = vld [vmem:[%s16525_s19 + $0x7bc] sm:$0xf] }
 0x70d   :  { %4941 = vmatpush.bf16.msra.mxu0 %v8491_v19  ;;  %4954 = vmatpush.bf16.msra.mxu1 %v9003_v58  ;;  %v8691_v19 = vor.u32 %v10990_v49, %v8690_v1  ;;  %v9203_v58 = vor.u32 %v11118_v53, %v9202_v52  ;;  %v8946_v1 = vld [vmem:[%s16525_s19 + $0x530] sm:$0xf]  ;;  %v11046_v52 = vld [vmem:[%s16525_s19 + $0x534] sm:$0xf] }
 0x70e   :  { %4967 = vmatpush.bf16.msrb.mxu2 %v8495_v60  ;;  %4980 = vmatpush.bf16.msrb.mxu3 %v9007_v63  ;;  %v8695_v60 = vor.u32 %v10982_v54, %v8692_v5  ;;  %v9207_v63 = vor.u32 %v11110_v55, %v9204_v56  ;;  %v11054_v49 = vld [vmem:[%s16525_s19 + $0x56c] sm:$0xf0]  ;;  %v8948_v53 = vld [vmem:[%s16525_s19 + $0x570] sm:$0xf0] }
 0x70f   :  { %v8947_v5 = vor.u32 %v11054_v49, %v8946_v1  ;;  %v8370_v55 = vld [vmem:[%s16525_s19 + $0xb0] sm:$0xf]  ;;  %v9210_v1 = vld [vmem:[%s16525_s19 + $0x738] sm:$0xf] }
 0x710   :  { %v10910_v56 = vld [vmem:[%s16525_s19 + $0xec] sm:$0xf0]  ;;  %v11119_v49 = vld [vmem:[%s16525_s19 + $0x774] sm:$0xf0] }
 0x711   :  { %4942 = vmatpush.bf16.msra.mxu0 %v8427_v6  ;;  %4955 = vmatpush.bf16.msra.mxu1 %v8939_v57 }
 0x712   :  { %4968 = vmatpush.bf16.msrb.mxu2 %v8431_v7  ;;  %4981 = vmatpush.bf16.msrb.mxu3 %v8943_v12  ;;  %v8562_v12 = vld [vmem:[%s16525_s19 + $0x230] sm:$0xf] }
 0x713   :  { %v8563_v30 = vor.u32 %v10958_v15, %v8562_v12  ;;  %v10894_v12 = vld [vmem:[%s16525_s19 + $0x6c] sm:$0xf0] }
 0x714   :  { %v8818_v15 = vld [vmem:[%s16525_s19 + $0x430] sm:$0xf] }
 0x715   :  { %4943 = vmatpush.bf16.msra.mxu0 %v8363_v20  ;;  %4956 = vmatpush.bf16.msra.mxu1 %v8875_v36  ;;  %v11078_v20 = vld [vmem:[%s16525_s19 + $0x634] sm:$0xf] }
 0x716   :  { %4969 = vmatpush.bf16.msrb.mxu2 %v8367_v33  ;;  %4982 = vmatpush.bf16.msrb.mxu3 %v8879_v34  ;;  %v9076_v36 = vld [vmem:[%s16525_s19 + $0x670] sm:$0xf0]  ;;  %v10942_v33 = vld [vmem:[%s16525_s19 + $0x1ec] sm:$0xf0]  ;;  %v8567_v34 = vor.u32 %v10950_v28, %v8564_v10 }
 0x717   :  { %v9079_v37 = vor.u32 %v11078_v20, %v9076_v36  ;;  %v8499_v50 = vor.u32 %v10942_v33, %v8498_v32  ;;  %v8308_v28 = vld [vmem:[%s16525_s19 + $0x70] sm:$0xf0]  ;;  %v8762_v36 = vld [vmem:[%s16525_s19 + $0x3b8] sm:$0xf]  ;;  %v10999_v33 = vld [vmem:[%s16525_s19 + $0x3bc] sm:$0xf] }
 0x718   :  { %v4686_v6 = vpop.f32.mrf.mxu0  ;;  %v4699_v57 = vpop.f32.mrf.mxu1  ;;  %v11014_v10 = vld [vmem:[%s16525_s19 + $0x434] sm:$0xf]  ;;  %v11135_v32 = vld [vmem:[%s16525_s19 + $0x7f4] sm:$0xf0] }
 0x719   :  { %4944 = vmatpush.bf16.msra.mxu0 %v8299_v42  ;;  %4957 = vmatpush.bf16.msra.mxu1 %v8811_v43  ;;  %v14517_v7 = vadd.f32 %v4699_v57, %v4686_v6  ;;  %v8306_v6 = vld [vmem:[%s16525_s19 + $0x30] sm:$0xf]  ;;  %v8371_v57 = vor.u32 %v10910_v56, %v8370_v55  ;;  %v8820_v20 = vld [vmem:[%s16525_s19 + $0x470] sm:$0xf0]  ;;  %v8634_v55 = vld [vmem:[%s16525_s19 + $0x2b8] sm:$0xf] }
 0x71a   :  { %4970 = vmatpush.bf16.msrb.mxu2 %v8303_v61  ;;  %4983 = vmatpush.bf16.msrb.mxu3 %v8815_v46  ;;  %v8434_v61 = vld [vmem:[%s16525_s19 + $0x130] sm:$0xf]  ;;  %v10975_v56 = vld [vmem:[%s16525_s19 + $0x2f4] sm:$0xf0] }
 0x71b   :  { %v10926_v46 = vld [vmem:[%s16525_s19 + $0x16c] sm:$0xf0]  ;;  %v8635_v21 = vor.u32 %v10975_v56, %v8634_v55 }
 0x71c   :  { %4945 = vmatmul.bf16.vlgmr.msra.gmra.mxu0 %v13673_v24  ;;  %4958 = vmatmul.bf16.vlgmr.msra.gmra.mxu1 %v13675_v25  ;;  %v8435_v54 = vor.u32 %v10926_v46, %v8434_v61 }
 0x71d   :  { %4989 = vmatpush.bf16.msrb.mxu0 %v8755_v47  ;;  %5002 = vmatpush.bf16.msrb.mxu1 %v9267_v48  ;;  %v8503_v47 = vor.u32 %v10934_v39, %v8500_v29  ;;  %v9015_v48 = vor.u32 %v11062_v35, %v9012_v14  ;;  %v9276_v39 = vld [vmem:[%s16525_s19 + $0x7f8] sm:$0xf0] }
 0x71e   :  { %5015 = vmatpush.bf16.msra.mxu2 %v8759_v51  ;;  %5028 = vmatpush.bf16.msra.mxu3 %v9271_v2  ;;  %v10918_v51 = vld [vmem:[%s16525_s19 + $0x134] sm:$0xf]  ;;  %v9279_v61 = vor.u32 %v11127_v38, %v9276_v39  ;;  %v11071_v38 = vld [vmem:[%s16525_s19 + $0x5f4] sm:$0xf0]  ;;  %v10935_v39 = vld [vmem:[%s16525_s19 + $0x1bc] sm:$0xf] }
 0x71f   :  { %4971 = vmatmul.bf16.vlgmr.msrb.gmra.mxu2 %v13673_v24  ;;  %4984 = vmatmul.bf16.vlgmr.msrb.gmra.mxu3 %v13675_v25  ;;  %v4712_v40 = vpop.f32.mrf.mxu2  ;;  %v4725_v41 = vpop.f32.mrf.mxu3  ;;  %v8436_v2 = vld [vmem:[%s16525_s19 + $0x170] sm:$0xf0] }
 0x720   :  { %v14567_v42 = vadd.f32 %v4725_v41, %v4712_v40  ;;  %v4688_v43 = vpop.f32.mrf.mxu0  ;;  %v4701_v44 = vpop.f32.mrf.mxu1  ;;  %v8311_v40 = vor.u32 %v10886_v27, %v8308_v28  ;;  %v8823_v41 = vor.u32 %v11014_v10, %v8820_v20  ;;  %v11079_v27 = vld [vmem:[%s16525_s19 + $0x63c] sm:$0xf] }
 0x721   :  { %4990 = vmatpush.bf16.msrb.mxu0 %v8691_v19  ;;  %5003 = vmatpush.bf16.msrb.mxu1 %v9203_v58  ;;  %v8439_v19 = vor.u32 %v10918_v51, %v8436_v2  ;;  %v8951_v58 = vor.u32 %v11046_v52, %v8948_v53  ;;  %v8698_v44 = vld [vmem:[%s16525_s19 + $0x338] sm:$0xf]  ;;  %v10983_v51 = vld [vmem:[%s16525_s19 + $0x33c] sm:$0xf] }
 0x722   :  { %5016 = vmatpush.bf16.msra.mxu2 %v8695_v60  ;;  %5029 = vmatpush.bf16.msra.mxu3 %v9207_v63  ;;  %v10902_v60 = vld [vmem:[%s16525_s19 + $0xb4] sm:$0xf]  ;;  %v8700_v2 = vld [vmem:[%s16525_s19 + $0x378] sm:$0xf0] }
 0x723   :  { %v11111_v52 = vld [vmem:[%s16525_s19 + $0x73c] sm:$0xf] }
 0x724   :  { %v9212_v53 = vld [vmem:[%s16525_s19 + $0x778] sm:$0xf0] }
 0x725   :  { %4991 = vmatpush.bf16.msrb.mxu0 %v8627_v8  ;;  %5004 = vmatpush.bf16.msrb.mxu1 %v9139_v9  ;;  %v8883_v8 = vor.u32 %v11038_v59, %v8882_v45  ;;  %v9146_v45 = vld [vmem:[%s16525_s19 + $0x6b8] sm:$0xf]  ;;  %v9084_v28 = vld [vmem:[%s16525_s19 + $0x678] sm:$0xf0] }
 0x726   :  { %5017 = vmatpush.bf16.msra.mxu2 %v8631_v16  ;;  %5030 = vmatpush.bf16.msra.mxu3 %v9143_v18  ;;  %v11022_v16 = vld [vmem:[%s16525_s19 + $0x46c] sm:$0xf0]  ;;  %v8375_v18 = vor.u32 %v10902_v60, %v8372_v4  ;;  %v11103_v59 = vld [vmem:[%s16525_s19 + $0x6f4] sm:$0xf0]  ;;  %v10967_v60 = vld [vmem:[%s16525_s19 + $0x2bc] sm:$0xf] }
 0x727   :  { %v4714_v63 = vpop.f32.mrf.mxu2  ;;  %v4727_v3 = vpop.f32.mrf.mxu3  ;;  %v9148_v4 = vld [vmem:[%s16525_s19 + $0x6f8] sm:$0xf0]  ;;  %v9147_v22 = vor.u32 %v11103_v59, %v9146_v45 }
 0x728   :  { %v4738_v0 = vpop.f32.mrf.mxu0  ;;  %v4751_v26 = vpop.f32.mrf.mxu1  ;;  %v8636_v63 = vld [vmem:[%s16525_s19 + $0x2f8] sm:$0xf0] }
 0x729   :  { %4992 = vmatpush.bf16.msrb.mxu0 %v8563_v30  ;;  %5005 = vmatpush.bf16.msrb.mxu1 %v9075_v31  ;;  %v14620_v9 = vadd.f32 %v4751_v26, %v4738_v0  ;;  %v11007_v30 = vld [vmem:[%s16525_s19 + $0x3f4] sm:$0xf0]  ;;  %v11095_v3 = vld [vmem:[%s16525_s19 + $0x6bc] sm:$0xf] }
 0x72a   :  { %5018 = vmatpush.bf16.msra.mxu2 %v8567_v34  ;;  %5031 = vmatpush.bf16.msra.mxu3 %v9079_v37  ;;  %v9274_v31 = vld [vmem:[%s16525_s19 + $0x7b8] sm:$0xf]  ;;  %v8307_v34 = vor.u32 %v10894_v12, %v8306_v6  ;;  %v8819_v37 = vor.u32 %v11022_v16, %v8818_v15  ;;  %v8763_v29 = vor.u32 %v11007_v30, %v8762_v36 }
 0x72b   :  { %v9275_v35 = vor.u32 %v11135_v32, %v9274_v31  ;;  %v8570_v6 = vld [vmem:[%s16525_s19 + $0x238] sm:$0xf]  ;;  %v9151_v12 = vor.u32 %v11095_v3, %v9148_v4  ;;  %v10903_v3 = vld [vmem:[%s16525_s19 + $0xbc] sm:$0xf] }
 0x72c   :  { %v9082_v15 = vld [vmem:[%s16525_s19 + $0x638] sm:$0xf]  ;;  %v8380_v4 = vld [vmem:[%s16525_s19 + $0xf8] sm:$0xf0] }
 0x72d   :  { %4993 = vmatpush.bf16.msrb.mxu0 %v8499_v50  ;;  %5006 = vmatpush.bf16.msrb.mxu1 %v9011_v62  ;;  %v10991_v50 = vld [vmem:[%s16525_s19 + $0x374] sm:$0xf0]  ;;  %v8767_v62 = vor.u32 %v10999_v33, %v8764_v13 }
 0x72e   :  { %5019 = vmatpush.bf16.msra.mxu2 %v8503_v47  ;;  %5032 = vmatpush.bf16.msra.mxu3 %v9015_v48  ;;  %v11087_v16 = vld [vmem:[%s16525_s19 + $0x674] sm:$0xf0] }
 0x72f   :  { %v4764_v14 = vpop.f32.mrf.mxu2  ;;  %v4777_v43 = vpop.f32.mrf.mxu3  ;;  %v9083_v31 = vor.u32 %v11087_v16, %v9082_v15  ;;  %v8506_v32 = vld [vmem:[%s16525_s19 + $0x1b8] sm:$0xf]  ;;  %v8383_v15 = vor.u32 %v10903_v3, %v8380_v4 }
 0x730   :  { %v14673_v46 = vadd.f32 %v4777_v43, %v4764_v14  ;;  %v4740_v47 = vpop.f32.mrf.mxu0  ;;  %v4753_v48 = vpop.f32.mrf.mxu1  ;;  %v10943_v33 = vld [vmem:[%s16525_s19 + $0x1f4] sm:$0xf0] }
 0x731   :  { %4994 = vmatpush.bf16.msrb.mxu0 %v8435_v54  ;;  %5007 = vmatpush.bf16.msrb.mxu1 %v8947_v5  ;;  %v8699_v54 = vor.u32 %v10991_v50, %v8698_v44  ;;  %v9211_v5 = vor.u32 %v11119_v49, %v9210_v1  ;;  %v9018_v13 = vld [vmem:[%s16525_s19 + $0x5b8] sm:$0xf]  ;;  %v10919_v48 = vld [vmem:[%s16525_s19 + $0x13c] sm:$0xf] }
 0x732   :  { %5020 = vmatpush.bf16.msra.mxu2 %v8439_v19  ;;  %5033 = vmatpush.bf16.msra.mxu3 %v8951_v58  ;;  %v8703_v19 = vor.u32 %v10983_v51, %v8700_v2  ;;  %v9215_v58 = vor.u32 %v11111_v52, %v9212_v53  ;;  %v9019_v14 = vor.u32 %v11071_v38, %v9018_v13  ;;  %v8442_v43 = vld [vmem:[%s16525_s19 + $0x138] sm:$0xf]  ;;  %v8444_v51 = vld [vmem:[%s16525_s19 + $0x178] sm:$0xf0]  ;;  %v9732_v38 = vld [vmem:[%s16527_s18 + $0x3c0] sm:$0xf0] }
 0x733   :  { %v10927_v44 = vld [vmem:[%s16525_s19 + $0x174] sm:$0xf0]  ;;  %v11047_v2 = vld [vmem:[%s16525_s19 + $0x53c] sm:$0xf]  ;;  %v8447_v45 = vor.u32 %v10919_v48, %v8444_v51  ;;  %v10720_v48 = vld [vmem:[%s16527_s18 + $0x304] sm:$0xf] }
 0x734   :  { %v11055_v47 = vld [vmem:[%s16525_s19 + $0x574] sm:$0xf0]  ;;  %v8956_v52 = vld [vmem:[%s16525_s19 + $0x578] sm:$0xf0]  ;;  %v8443_v55 = vor.u32 %v10927_v44, %v8442_v43  ;;  %v9666_v43 = vld [vmem:[%s16527_s18 + $0x300] sm:$0xf] }
 0x735   :  { %4995 = vmatpush.bf16.msrb.mxu0 %v8371_v57  ;;  %5008 = vmatpush.bf16.msrb.mxu1 %v8883_v8  ;;  %v10959_v57 = vld [vmem:[%s16525_s19 + $0x274] sm:$0xf0]  ;;  %v8639_v8 = vor.u32 %v10967_v60, %v8636_v63  ;;  %v8959_v59 = vor.u32 %v11047_v2, %v8956_v52  ;;  %v10728_v44 = vld [vmem:[%s16527_s18 + $0x33c] sm:$0xf0]  ;;  %v10180_v51 = vld [vmem:[%s16527_s18 + $0x740] sm:$0xf0] }
 0x736   :  { %5021 = vmatpush.bf16.msra.mxu2 %v8375_v18  ;;  %5034 = vmatpush.bf16.msra.mxu3 %v8887_v23  ;;  %v10951_v18 = vld [vmem:[%s16525_s19 + $0x23c] sm:$0xf]  ;;  %v8571_v30 = vor.u32 %v10959_v57, %v8570_v6  ;;  %v8890_v60 = vld [vmem:[%s16525_s19 + $0x4b8] sm:$0xf]  ;;  %v9667_v2 = vor.u32 %v10728_v44, %v9666_v43  ;;  %v10792_v43 = vld [vmem:[%s16527_s18 + $0x53c] sm:$0xf0] }
 0x737   :  { %v4766_v0 = vpop.f32.mrf.mxu2  ;;  %v4779_v26 = vpop.f32.mrf.mxu3  ;;  %v8572_v23 = vld [vmem:[%s16525_s19 + $0x278] sm:$0xf0]  ;;  %v11039_v63 = vld [vmem:[%s16525_s19 + $0x4f4] sm:$0xf0]  ;;  %v10656_v44 = vld [vmem:[%s16527_s18 + $0x104] sm:$0xf] }
 0x738   :  { %v8314_v0 = vld [vmem:[%s16525_s19 + $0x38] sm:$0xf]  ;;  %v8891_v6 = vor.u32 %v11039_v63, %v8890_v60  ;;  %v10832_v60 = vld [vmem:[%s16527_s18 + $0x684] sm:$0xf] }
 0x739   :  { %4996 = vmatpush.bf16.msrb.mxu0 %v8307_v34  ;;  %5009 = vmatpush.bf16.msrb.mxu1 %v8819_v37  ;;  %v4790_v10 = vpop.f32.mrf.mxu0  ;;  %v4803_v20 = vpop.f32.mrf.mxu1  ;;  %v8575_v34 = vor.u32 %v10951_v18, %v8572_v23  ;;  %v9087_v37 = vor.u32 %v11079_v27, %v9084_v28  ;;  %v10895_v57 = vld [vmem:[%s16525_s19 + $0x74] sm:$0xf0]  ;;  %v10887_v18 = vld [vmem:[%s16525_s19 + $0x3c] sm:$0xf]  ;;  %v10116_v63 = vld [vmem:[%s16527_s18 + $0x6c0] sm:$0xf0] }
 0x73a   :  { %5022 = vmatpush.bf16.msra.mxu2 %v8311_v40  ;;  %5035 = vmatpush.bf16.msra.mxu3 %v8823_v41  ;;  %v14745_v36 = vadd.f32 %v4803_v20, %v4790_v10  ;;  %v8508_v40 = vld [vmem:[%s16525_s19 + $0x1f8] sm:$0xf0] }
 0x73b   :  { %v11063_v41 = vld [vmem:[%s16525_s19 + $0x5bc] sm:$0xf]  ;;  %v8511_v50 = vor.u32 %v10935_v39, %v8508_v40  ;;  %v10864_v39 = vld [vmem:[%s16527_s18 + $0x784] sm:$0xf] }
 0x73c   :  { %4997 = vmatmul.bf16.vlgmr.msrb.gmra.mxu0 %v13673_v24  ;;  %5010 = vmatmul.bf16.vlgmr.msrb.gmra.mxu1 %v13675_v25  ;;  %v8316_v23 = vld [vmem:[%s16525_s19 + $0x78] sm:$0xf0]  ;;  %v10244_v40 = vld [vmem:[%s16527_s18 + $0x7c0] sm:$0xf0] }
 0x73d   :  { %5041 = vmatpush.bf16.msra.mxu0 %v8763_v29  ;;  %5054 = vmatpush.bf16.msra.mxu1 %v9275_v35  ;;  %v9020_v29 = vld [vmem:[%s16525_s19 + $0x5f8] sm:$0xf0]  ;;  %v8507_v35 = vor.u32 %v10943_v33, %v8506_v32  ;;  %v10242_v32 = vld [vmem:[%s16527_s18 + $0x780] sm:$0xf] }
 0x73e   :  { %5067 = vmatpush.bf16.msrb.mxu2 %v8767_v62  ;;  %5080 = vmatpush.bf16.msrb.mxu3 %v9279_v61  ;;  %v9023_v62 = vor.u32 %v11063_v41, %v9020_v29  ;;  %v8954_v61 = vld [vmem:[%s16525_s19 + $0x538] sm:$0xf]  ;;  %v11015_v27 = vld [vmem:[%s16525_s19 + $0x43c] sm:$0xf]  ;;  %v10872_v33 = vld [vmem:[%s16527_s18 + $0x7bc] sm:$0xf0]  ;;  %v8319_v41 = vor.u32 %v10887_v18, %v8316_v23 }
 0x73f   :  { %5023 = vmatmul.bf16.vlgmr.msra.gmra.mxu2 %v13673_v24  ;;  %5036 = vmatmul.bf16.vlgmr.msra.gmra.mxu3 %v13675_v25  ;;  %v8955_v56 = vor.u32 %v11055_v47, %v8954_v61  ;;  %v8828_v20 = vld [vmem:[%s16525_s19 + $0x478] sm:$0xf0]  ;;  %v10178_v61 = vld [vmem:[%s16527_s18 + $0x700] sm:$0xf] }
 0x740   :  { %v8831_v29 = vor.u32 %v11015_v27, %v8828_v20  ;;  %v10856_v47 = vld [vmem:[%s16527_s18 + $0x73c] sm:$0xf0] }
 0x741   :  { %5042 = vmatpush.bf16.msra.mxu0 %v8699_v54  ;;  %5055 = vmatpush.bf16.msra.mxu1 %v9211_v5  ;;  %v4792_v54 = vpop.f32.mrf.mxu0  ;;  %v4805_v5 = vpop.f32.mrf.mxu1  ;;  %v10179_v52 = vor.u32 %v10856_v47, %v10178_v61  ;;  %v9412_v61 = vld [vmem:[%s16527_s18 + $0x140] sm:$0xf0] }
 0x742   :  { %5068 = vmatpush.bf16.msrb.mxu2 %v8703_v19  ;;  %5081 = vmatpush.bf16.msrb.mxu3 %v9215_v58  ;;  %v4816_v1 = vpop.f32.mrf.mxu2  ;;  %v4829_v49 = vpop.f32.mrf.mxu3  ;;  %v8378_v19 = vld [vmem:[%s16525_s19 + $0xb8] sm:$0xf]  ;;  %v9602_v54 = vld [vmem:[%s16527_s18 + $0x280] sm:$0xf]  ;;  %v10784_v47 = vld [vmem:[%s16527_s18 + $0x504] sm:$0xf] }
 0x743   :  { %v14795_v53 = vadd.f32 %v4829_v49, %v4816_v1  ;;  %v10911_v58 = vld [vmem:[%s16525_s19 + $0xf4] sm:$0xf0]  ;;  %v9668_v1 = vld [vmem:[%s16527_s18 + $0x340] sm:$0xf0]  ;;  %v10712_v5 = vld [vmem:[%s16527_s18 + $0x2bc] sm:$0xf0] }
 0x744   :  { %v8379_v26 = vor.u32 %v10911_v58, %v8378_v19  ;;  %v10848_v49 = vld [vmem:[%s16527_s18 + $0x704] sm:$0xf]  ;;  %v10114_v19 = vld [vmem:[%s16527_s18 + $0x680] sm:$0xf]  ;;  %v9603_v3 = vor.u32 %v10712_v5, %v9602_v54 }
 0x745   :  { %5043 = vmatpush.bf16.msra.mxu0 %v8635_v21  ;;  %5056 = vmatpush.bf16.msra.mxu1 %v9147_v22  ;;  %v11031_v21 = vld [vmem:[%s16525_s19 + $0x4bc] sm:$0xf]  ;;  %v10840_v58 = vld [vmem:[%s16527_s18 + $0x6bc] sm:$0xf0] }
 0x746   :  { %5069 = vmatpush.bf16.msrb.mxu2 %v8639_v8  ;;  %5082 = vmatpush.bf16.msrb.mxu3 %v9151_v12  ;;  %v8892_v22 = vld [vmem:[%s16525_s19 + $0x4f8] sm:$0xf0]  ;;  %v8826_v8 = vld [vmem:[%s16525_s19 + $0x438] sm:$0xf]  ;;  %v10115_v4 = vor.u32 %v10840_v58, %v10114_v19  ;;  %v9346_v54 = vld [vmem:[%s16527_s18 + $0x80] sm:$0xf] }
 0x747   :  { %v11023_v12 = vld [vmem:[%s16525_s19 + $0x474] sm:$0xf0]  ;;  %v8895_v16 = vor.u32 %v11031_v21, %v8892_v22  ;;  %v9538_v21 = vld [vmem:[%s16527_s18 + $0x200] sm:$0xf] }
 0x748   :  { %v8827_v13 = vor.u32 %v11023_v12, %v8826_v8  ;;  %v10696_v22 = vld [vmem:[%s16527_s18 + $0x23c] sm:$0xf0]  ;;  %v10816_v8 = vld [vmem:[%s16527_s18 + $0x604] sm:$0xf] }
 0x749   :  { %5044 = vmatpush.bf16.msra.mxu0 %v8571_v30  ;;  %5057 = vmatpush.bf16.msra.mxu1 %v9083_v31  ;;  %v9730_v30 = vld [vmem:[%s16527_s18 + $0x380] sm:$0xf]  ;;  %v10052_v12 = vld [vmem:[%s16527_s18 + $0x640] sm:$0xf0]  ;;  %v9539_v23 = vor.u32 %v10696_v22, %v9538_v21 }
 0x74a   :  { %5070 = vmatpush.bf16.msrb.mxu2 %v8575_v34  ;;  %5083 = vmatpush.bf16.msrb.mxu3 %v9087_v37  ;;  %v4818_v28 = vpop.f32.mrf.mxu2  ;;  %v4831_v10 = vpop.f32.mrf.mxu3  ;;  %v10744_v31 = vld [vmem:[%s16527_s18 + $0x3bc] sm:$0xf0]  ;;  %v10736_v34 = vld [vmem:[%s16527_s18 + $0x384] sm:$0xf]  ;;  %v8315_v37 = vor.u32 %v10895_v57, %v8314_v0 }
 0x74b   :  { %v9540_v57 = vld [vmem:[%s16527_s18 + $0x240] sm:$0xf0]  ;;  %v9474_v28 = vld [vmem:[%s16527_s18 + $0x180] sm:$0xf] }
 0x74c   :  { %v10680_v10 = vld [vmem:[%s16527_s18 + $0x1bc] sm:$0xf0] }
 0x74d   :  { %5045 = vmatpush.bf16.msra.mxu0 %v8507_v35  ;;  %5058 = vmatpush.bf16.msra.mxu1 %v9019_v14  ;;  %v9731_v35 = vor.u32 %v10744_v31, %v9730_v30  ;;  %v10243_v14 = vor.u32 %v10872_v33, %v10242_v32  ;;  %v10055_v30 = vor.u32 %v10816_v8, %v10052_v12  ;;  %v9986_v31 = vld [vmem:[%s16527_s18 + $0x580] sm:$0xf]  ;;  %v10672_v33 = vld [vmem:[%s16527_s18 + $0x184] sm:$0xf] }
 0x74e   :  { %5071 = vmatpush.bf16.msrb.mxu2 %v8511_v50  ;;  %5084 = vmatpush.bf16.msrb.mxu3 %v9023_v62  ;;  %v9735_v50 = vor.u32 %v10736_v34, %v9732_v38  ;;  %v10247_v62 = vor.u32 %v10864_v39, %v10244_v40  ;;  %v10808_v32 = vld [vmem:[%s16527_s18 + $0x5bc] sm:$0xf0]  ;;  %v9476_v34 = vld [vmem:[%s16527_s18 + $0x1c0] sm:$0xf0]  ;;  %v9475_v38 = vor.u32 %v10680_v10, %v9474_v28  ;;  %v10250_v28 = vld [vmem:[%s16527_s18 + $0x788] sm:$0xf] }
 0x74f   :  { %v9987_v39 = vor.u32 %v10808_v32, %v9986_v31  ;;  %v9410_v40 = vld [vmem:[%s16527_s18 + $0x100] sm:$0xf]  ;;  %v10752_v8 = vld [vmem:[%s16527_s18 + $0x404] sm:$0xf]  ;;  %v10873_v10 = vld [vmem:[%s16527_s18 + $0x7c4] sm:$0xf0] }
 0x750   :  { %v10648_v5 = vld [vmem:[%s16527_s18 + $0xbc] sm:$0xf0]  ;;  %v9740_v32 = vld [vmem:[%s16527_s18 + $0x3c8] sm:$0xf0] }
 0x751   :  { %5046 = vmatpush.bf16.msra.mxu0 %v8443_v55  ;;  %5059 = vmatpush.bf16.msra.mxu1 %v8955_v56  ;;  %v9671_v55 = vor.u32 %v10720_v48, %v9668_v1  ;;  %v10183_v56 = vor.u32 %v10848_v49, %v10180_v51  ;;  %v9924_v48 = vld [vmem:[%s16527_s18 + $0x540] sm:$0xf0]  ;;  %v9858_v19 = vld [vmem:[%s16527_s18 + $0x480] sm:$0xf] }
 0x752   :  { %5072 = vmatpush.bf16.msrb.mxu2 %v8447_v45  ;;  %5085 = vmatpush.bf16.msrb.mxu3 %v8959_v59  ;;  %v10704_v45 = vld [vmem:[%s16527_s18 + $0x284] sm:$0xf]  ;;  %v10776_v58 = vld [vmem:[%s16527_s18 + $0x4bc] sm:$0xf0] }
 0x753   :  { %v9604_v59 = vld [vmem:[%s16527_s18 + $0x2c0] sm:$0xf0]  ;;  %v9859_v21 = vor.u32 %v10776_v58, %v9858_v19  ;;  %v10632_v22 = vld [vmem:[%s16527_s18 + $0x3c] sm:$0xf0]  ;;  %v10833_v19 = vld [vmem:[%s16527_s18 + $0x68c] sm:$0xf] }
 0x754   :  { %v9607_v0 = vor.u32 %v10704_v45, %v9604_v59  ;;  %v10640_v45 = vld [vmem:[%s16527_s18 + $0x84] sm:$0xf]  ;;  %v10124_v58 = vld [vmem:[%s16527_s18 + $0x6c8] sm:$0xf0] }
 0x755   :  { %5047 = vmatpush.bf16.msra.mxu0 %v8379_v26  ;;  %5060 = vmatpush.bf16.msra.mxu1 %v8891_v6  ;;  %v10119_v26 = vor.u32 %v10832_v60, %v10116_v63  ;;  %v10688_v6 = vld [vmem:[%s16527_s18 + $0x204] sm:$0xf] }
 0x756   :  { %5073 = vmatpush.bf16.msrb.mxu2 %v8383_v15  ;;  %5086 = vmatpush.bf16.msrb.mxu3 %v8895_v16  ;;  %v9543_v20 = vor.u32 %v10688_v6, %v9540_v57  ;;  %v9348_v59 = vld [vmem:[%s16527_s18 + $0xc0] sm:$0xf0] }
 0x757   :  { %v10768_v60 = vld [vmem:[%s16527_s18 + $0x484] sm:$0xf] }
 0x758   :  { %v9860_v63 = vld [vmem:[%s16527_s18 + $0x4c0] sm:$0xf0] }
 0x759   :  { %5048 = vmatpush.bf16.msra.mxu0 %v8315_v37  ;;  %5061 = vmatpush.bf16.msra.mxu1 %v8827_v13  ;;  %v4842_v15 = vpop.f32.mrf.mxu0  ;;  %v4855_v16 = vpop.f32.mrf.mxu1  ;;  %v10800_v37 = vld [vmem:[%s16527_s18 + $0x584] sm:$0xf] }
 0x75a   :  { %5074 = vmatpush.bf16.msrb.mxu2 %v8319_v41  ;;  %5087 = vmatpush.bf16.msrb.mxu3 %v8831_v29  ;;  %v14945_v18 = vadd.f32 %v4855_v16, %v4842_v15  ;;  %v9988_v13 = vld [vmem:[%s16527_s18 + $0x5c0] sm:$0xf0]  ;;  %v10664_v41 = vld [vmem:[%s16527_s18 + $0x13c] sm:$0xf0]  ;;  %v9479_v29 = vor.u32 %v10672_v33, %v9476_v34  ;;  %v10865_v33 = vld [vmem:[%s16527_s18 + $0x78c] sm:$0xf] }
 0x75b   :  { %v10624_v6 = vld [vmem:[%s16527_s18 + $0x4] sm:$0xf]  ;;  %v10252_v34 = vld [vmem:[%s16527_s18 + $0x7c8] sm:$0xf0] }
 0x75c   :  { %5049 = vmatmul.bf16.vlgmr.msra.gmra.mxu0 %v13673_v24  ;;  %5062 = vmatmul.bf16.vlgmr.msra.gmra.mxu1 %v13675_v25  ;;  %v9284_v57 = vld [vmem:[%s16527_s18 + $0x40] sm:$0xf0] }
 0x75d   :  { %6373 = vmatpush.bf16.msrb.mxu0 %v9731_v35  ;;  %6386 = vmatpush.bf16.msrb.mxu1 %v10243_v14  ;;  %v9991_v35 = vor.u32 %v10800_v37, %v9988_v13  ;;  %v9922_v14 = vld [vmem:[%s16527_s18 + $0x500] sm:$0xf]  ;;  %v9796_v16 = vld [vmem:[%s16527_s18 + $0x440] sm:$0xf0]  ;;  %v9287_v37 = vor.u32 %v10624_v6, %v9284_v57 }
 0x75e   :  { %6399 = vmatpush.bf16.msra.mxu2 %v9735_v50  ;;  %6412 = vmatpush.bf16.msra.mxu3 %v10247_v62  ;;  %v9799_v13 = vor.u32 %v10752_v8, %v9796_v16  ;;  %v9482_v16 = vld [vmem:[%s16527_s18 + $0x188] sm:$0xf] }
 0x75f   :  { %5075 = vmatmul.bf16.vlgmr.msrb.gmra.mxu2 %v13673_v24  ;;  %5088 = vmatmul.bf16.vlgmr.msrb.gmra.mxu3 %v13675_v25  ;;  %v10050_v24 = vld [vmem:[%s16527_s18 + $0x600] sm:$0xf] }
 0x760   :  { %v10824_v25 = vld [vmem:[%s16527_s18 + $0x63c] sm:$0xf0] }
 0x761   :  { %6374 = vmatpush.bf16.msrb.mxu0 %v9667_v2  ;;  %6387 = vmatpush.bf16.msrb.mxu1 %v10179_v52  ;;  %v10051_v27 = vor.u32 %v10824_v25, %v10050_v24  ;;  %v4844_v49 = vpop.f32.mrf.mxu0  ;;  %v4857_v51 = vpop.f32.mrf.mxu1  ;;  %v9411_v2 = vor.u32 %v10664_v41, %v9410_v40  ;;  %v9923_v52 = vor.u32 %v10792_v43, %v9922_v14  ;;  %v9674_v40 = vld [vmem:[%s16527_s18 + $0x308] sm:$0xf] }
 0x762   :  { %6400 = vmatpush.bf16.msra.mxu2 %v9671_v55  ;;  %6413 = vmatpush.bf16.msra.mxu3 %v10183_v56  ;;  %v4868_v50 = vpop.f32.mrf.mxu2  ;;  %v4881_v62 = vpop.f32.mrf.mxu3  ;;  %v9415_v55 = vor.u32 %v10656_v44, %v9412_v61  ;;  %v9927_v56 = vor.u32 %v10784_v47, %v9924_v48  ;;  %v9351_v24 = vor.u32 %v10640_v45, %v9348_v59  ;;  %v10729_v41 = vld [vmem:[%s16527_s18 + $0x344] sm:$0xf0]  ;;  %v10721_v44 = vld [vmem:[%s16527_s18 + $0x30c] sm:$0xf] }
 0x763   :  { %v14995_v1 = vadd.f32 %v4881_v62, %v4868_v50  ;;  %v9863_v25 = vor.u32 %v10768_v60, %v9860_v63  ;;  %v10186_v14 = vld [vmem:[%s16527_s18 + $0x708] sm:$0xf]  ;;  %v9676_v50 = vld [vmem:[%s16527_s18 + $0x348] sm:$0xf0]  ;;  %v9675_v47 = vor.u32 %v10729_v41, %v9674_v40 }
 0x764   :  { %v10857_v43 = vld [vmem:[%s16527_s18 + $0x744] sm:$0xf0]  ;;  %v10849_v62 = vld [vmem:[%s16527_s18 + $0x70c] sm:$0xf] }
 0x765   :  { %6375 = vmatpush.bf16.msrb.mxu0 %v9603_v3  ;;  %6388 = vmatpush.bf16.msrb.mxu1 %v10115_v4  ;;  %v9282_v3 = vld [vmem:[%s16527_s18] sm:$0xf]  ;;  %v9347_v4 = vor.u32 %v10648_v5, %v9346_v54  ;;  %v10188_v61 = vld [vmem:[%s16527_s18 + $0x748] sm:$0xf0]  ;;  %v10187_v48 = vor.u32 %v10857_v43, %v10186_v14  ;;  %v9610_v49 = vld [vmem:[%s16527_s18 + $0x288] sm:$0xf] }
 0x766   :  { %6401 = vmatpush.bf16.msra.mxu2 %v9607_v0  ;;  %6414 = vmatpush.bf16.msra.mxu3 %v10119_v26  ;;  %v9794_v0 = vld [vmem:[%s16527_s18 + $0x400] sm:$0xf]  ;;  %v10713_v51 = vld [vmem:[%s16527_s18 + $0x2c4] sm:$0xf0] }
 0x767   :  { %v10760_v26 = vld [vmem:[%s16527_s18 + $0x43c] sm:$0xf0]  ;;  %v10122_v54 = vld [vmem:[%s16527_s18 + $0x688] sm:$0xf]  ;;  %v9611_v45 = vor.u32 %v10713_v51, %v9610_v49 }
 0x768   :  { %v9795_v31 = vor.u32 %v10760_v26, %v9794_v0  ;;  %v10841_v5 = vld [vmem:[%s16527_s18 + $0x6c4] sm:$0xf0]  ;;  %v10689_v0 = vld [vmem:[%s16527_s18 + $0x20c] sm:$0xf] }
 0x769   :  { %6376 = vmatpush.bf16.msrb.mxu0 %v9539_v23  ;;  %6389 = vmatpush.bf16.msrb.mxu1 %v10051_v27  ;;  %v9738_v23 = vld [vmem:[%s16527_s18 + $0x388] sm:$0xf]  ;;  %v10123_v59 = vor.u32 %v10841_v5, %v10122_v54  ;;  %v9548_v26 = vld [vmem:[%s16527_s18 + $0x248] sm:$0xf0] }
 0x76a   :  { %6402 = vmatpush.bf16.msra.mxu2 %v9543_v20  ;;  %6415 = vmatpush.bf16.msra.mxu3 %v10055_v30  ;;  %v4870_v12 = vpop.f32.mrf.mxu2  ;;  %v4883_v15 = vpop.f32.mrf.mxu3  ;;  %v10745_v27 = vld [vmem:[%s16527_s18 + $0x3c4] sm:$0xf0]  ;;  %v10737_v20 = vld [vmem:[%s16527_s18 + $0x38c] sm:$0xf]  ;;  %v9283_v30 = vor.u32 %v10632_v22, %v9282_v3 }
 0x76b   :  { %v9546_v60 = vld [vmem:[%s16527_s18 + $0x208] sm:$0xf] }
 0x76c   :  { %v10697_v63 = vld [vmem:[%s16527_s18 + $0x244] sm:$0xf0] }
 0x76d   :  { %6377 = vmatpush.bf16.msrb.mxu0 %v9475_v38  ;;  %6390 = vmatpush.bf16.msrb.mxu1 %v9987_v39  ;;  %v9739_v38 = vor.u32 %v10745_v27, %v9738_v23  ;;  %v10251_v39 = vor.u32 %v10873_v10, %v10250_v28  ;;  %v10825_v22 = vld [vmem:[%s16527_s18 + $0x644] sm:$0xf0]  ;;  %v9547_v12 = vor.u32 %v10697_v63, %v9546_v60 }
 0x76e   :  { %6403 = vmatpush.bf16.msra.mxu2 %v9479_v29  ;;  %6416 = vmatpush.bf16.msra.mxu3 %v9991_v35  ;;  %v9743_v29 = vor.u32 %v10737_v20, %v9740_v32  ;;  %v10255_v35 = vor.u32 %v10865_v33, %v10252_v34  ;;  %v10681_v23 = vld [vmem:[%s16527_s18 + $0x1c4] sm:$0xf0]  ;;  %v9551_v27 = vor.u32 %v10689_v0, %v9548_v26  ;;  %v10801_v32 = vld [vmem:[%s16527_s18 + $0x58c] sm:$0xf] }
 0x76f   :  { %v9994_v10 = vld [vmem:[%s16527_s18 + $0x588] sm:$0xf]  ;;  %v9996_v33 = vld [vmem:[%s16527_s18 + $0x5c8] sm:$0xf0]  ;;  %v9483_v34 = vor.u32 %v10681_v23, %v9482_v16  ;;  %v9746_v16 = vld [vmem:[%s16527_s18 + $0x390] sm:$0xf] }
 0x770   :  { %v10809_v20 = vld [vmem:[%s16527_s18 + $0x5c4] sm:$0xf0]  ;;  %v9999_v40 = vor.u32 %v10801_v32, %v9996_v33  ;;  %v10746_v23 = vld [vmem:[%s16527_s18 + $0x3cc] sm:$0xf0]  ;;  %v10866_v32 = vld [vmem:[%s16527_s18 + $0x794] sm:$0xf] }
 0x771   :  { %6378 = vmatpush.bf16.msrb.mxu0 %v9411_v2  ;;  %6391 = vmatpush.bf16.msrb.mxu1 %v9923_v52  ;;  %v9679_v2 = vor.u32 %v10721_v44, %v9676_v50  ;;  %v10191_v52 = vor.u32 %v10849_v62, %v10188_v61  ;;  %v9930_v41 = vld [vmem:[%s16527_s18 + $0x508] sm:$0xf]  ;;  %v9420_v44 = vld [vmem:[%s16527_s18 + $0x148] sm:$0xf0]  ;;  %v10260_v33 = vld [vmem:[%s16527_s18 + $0x7d0] sm:$0xf0] }
 0x772   :  { %6404 = vmatpush.bf16.msra.mxu2 %v9415_v55  ;;  %6417 = vmatpush.bf16.msra.mxu3 %v9927_v56  ;;  %v10705_v55 = vld [vmem:[%s16527_s18 + $0x28c] sm:$0xf]  ;;  %v9290_v60 = vld [vmem:[%s16527_s18 + $0x8] sm:$0xf] }
 0x773   :  { %v9612_v56 = vld [vmem:[%s16527_s18 + $0x2c8] sm:$0xf0] }
 0x774   :  { %v9615_v3 = vor.u32 %v10705_v55, %v9612_v56  ;;  %v10785_v50 = vld [vmem:[%s16527_s18 + $0x50c] sm:$0xf]  ;;  %v9866_v55 = vld [vmem:[%s16527_s18 + $0x488] sm:$0xf] }
 0x775   :  { %6379 = vmatpush.bf16.msrb.mxu0 %v9347_v4  ;;  %6392 = vmatpush.bf16.msrb.mxu1 %v9859_v21  ;;  %v10127_v4 = vor.u32 %v10833_v19, %v10124_v58  ;;  %v10058_v21 = vld [vmem:[%s16527_s18 + $0x608] sm:$0xf]  ;;  %v9932_v62 = vld [vmem:[%s16527_s18 + $0x548] sm:$0xf0] }
 0x776   :  { %6405 = vmatpush.bf16.msra.mxu2 %v9351_v24  ;;  %6418 = vmatpush.bf16.msra.mxu3 %v9863_v25  ;;  %v10817_v24 = vld [vmem:[%s16527_s18 + $0x60c] sm:$0xf]  ;;  %v10059_v15 = vor.u32 %v10825_v22, %v10058_v21  ;;  %v9935_v5 = vor.u32 %v10785_v50, %v9932_v62  ;;  %v10777_v56 = vld [vmem:[%s16527_s18 + $0x4c4] sm:$0xf0]  ;;  %v10850_v50 = vld [vmem:[%s16527_s18 + $0x714] sm:$0xf] }
 0x777   :  { %v10060_v25 = vld [vmem:[%s16527_s18 + $0x648] sm:$0xf0]  ;;  %v9802_v21 = vld [vmem:[%s16527_s18 + $0x408] sm:$0xf]  ;;  %v10196_v62 = vld [vmem:[%s16527_s18 + $0x750] sm:$0xf0] }
 0x778   :  { %v10063_v28 = vor.u32 %v10817_v24, %v10060_v25  ;;  %v10641_v19 = vld [vmem:[%s16527_s18 + $0x8c] sm:$0xf]  ;;  %v10761_v22 = vld [vmem:[%s16527_s18 + $0x444] sm:$0xf0] }
 0x779   :  { %6380 = vmatpush.bf16.msrb.mxu0 %v9283_v30  ;;  %6393 = vmatpush.bf16.msrb.mxu1 %v9795_v31  ;;  %v4894_v6 = vpop.f32.mrf.mxu0  ;;  %v4907_v57 = vpop.f32.mrf.mxu1  ;;  %v10673_v30 = vld [vmem:[%s16527_s18 + $0x18c] sm:$0xf] }
 0x77a   :  { %6406 = vmatpush.bf16.msra.mxu2 %v9287_v37  ;;  %6419 = vmatpush.bf16.msra.mxu3 %v9799_v13  ;;  %v15145_v8 = vadd.f32 %v4907_v57, %v4894_v6  ;;  %v9484_v31 = vld [vmem:[%s16527_s18 + $0x1c8] sm:$0xf0]  ;;  %v9995_v37 = vor.u32 %v10809_v20, %v9994_v10  ;;  %v9418_v13 = vld [vmem:[%s16527_s18 + $0x108] sm:$0xf]  ;;  %v10738_v10 = vld [vmem:[%s16527_s18 + $0x394] sm:$0xf] }
 0x77b   :  { %v9356_v58 = vld [vmem:[%s16527_s18 + $0xc8] sm:$0xf0] }
 0x77c   :  { %6381 = vmatmul.bf16.vlgmr.msrb.gmra.mxu0 %v13141_v11  ;;  %6394 = vmatmul.bf16.vlgmr.msrb.gmra.mxu1 %v13144_v17  ;;  %v9359_v0 = vor.u32 %v10641_v19, %v9356_v58  ;;  %v10625_v24 = vld [vmem:[%s16527_s18 + $0xc] sm:$0xf]  ;;  %v10834_v19 = vld [vmem:[%s16527_s18 + $0x694] sm:$0xf] }
 0x77d   :  { %6425 = vmatpush.bf16.msra.mxu0 %v9739_v38  ;;  %6438 = vmatpush.bf16.msra.mxu1 %v10251_v39  ;;  %v10665_v38 = vld [vmem:[%s16527_s18 + $0x144] sm:$0xf0]  ;;  %v9487_v39 = vor.u32 %v10673_v30, %v9484_v31  ;;  %v9292_v25 = vld [vmem:[%s16527_s18 + $0x48] sm:$0xf0]  ;;  %v9803_v30 = vor.u32 %v10761_v22, %v9802_v21  ;;  %v9748_v31 = vld [vmem:[%s16527_s18 + $0x3d0] sm:$0xf0] }
 0x77e   :  { %6451 = vmatpush.bf16.msrb.mxu2 %v9743_v29  ;;  %6464 = vmatpush.bf16.msrb.mxu3 %v10255_v35  ;;  %v10793_v29 = vld [vmem:[%s16527_s18 + $0x544] sm:$0xf0]  ;;  %v10657_v35 = vld [vmem:[%s16527_s18 + $0x10c] sm:$0xf]  ;;  %v9419_v49 = vor.u32 %v10665_v38, %v9418_v13  ;;  %v9747_v13 = vor.u32 %v10746_v23, %v9746_v16  ;;  %v10132_v58 = vld [vmem:[%s16527_s18 + $0x6d0] sm:$0xf0] }
 0x77f   :  { %6407 = vmatmul.bf16.vlgmr.msra.gmra.mxu2 %v13141_v11  ;;  %6420 = vmatmul.bf16.vlgmr.msra.gmra.mxu3 %v13144_v17  ;;  %v9931_v51 = vor.u32 %v10793_v29, %v9930_v41  ;;  %v9423_v54 = vor.u32 %v10657_v35, %v9420_v44  ;;  %v10753_v6 = vld [vmem:[%s16527_s18 + $0x40c] sm:$0xf]  ;;  %v9751_v41 = vor.u32 %v10738_v10, %v9748_v31  ;;  %v10194_v35 = vld [vmem:[%s16527_s18 + $0x710] sm:$0xf]  ;;  %v9684_v44 = vld [vmem:[%s16527_s18 + $0x350] sm:$0xf0] }
 0x780   :  { %v10263_v29 = vor.u32 %v10866_v32, %v10260_v33  ;;  %v10066_v21 = vld [vmem:[%s16527_s18 + $0x610] sm:$0xf]  ;;  %v10674_v31 = vld [vmem:[%s16527_s18 + $0x194] sm:$0xf] }
 0x781   :  { %6426 = vmatpush.bf16.msra.mxu0 %v9675_v47  ;;  %6439 = vmatpush.bf16.msra.mxu1 %v10187_v48  ;;  %v4896_v47 = vpop.f32.mrf.mxu0  ;;  %v4909_v48 = vpop.f32.mrf.mxu1  ;;  %v10826_v22 = vld [vmem:[%s16527_s18 + $0x64c] sm:$0xf0]  ;;  %v9492_v32 = vld [vmem:[%s16527_s18 + $0x1d0] sm:$0xf0] }
 0x782   :  { %6452 = vmatpush.bf16.msrb.mxu2 %v9679_v2  ;;  %6465 = vmatpush.bf16.msrb.mxu3 %v10191_v52  ;;  %v4920_v14 = vpop.f32.mrf.mxu2  ;;  %v4933_v43 = vpop.f32.mrf.mxu3  ;;  %v9354_v2 = vld [vmem:[%s16527_s18 + $0x88] sm:$0xf]  ;;  %v10067_v16 = vor.u32 %v10826_v22, %v10066_v21  ;;  %v9490_v23 = vld [vmem:[%s16527_s18 + $0x190] sm:$0xf]  ;;  %v10802_v33 = vld [vmem:[%s16527_s18 + $0x594] sm:$0xf] }
 0x783   :  { %v15195_v61 = vadd.f32 %v4933_v43, %v4920_v14  ;;  %v10649_v52 = vld [vmem:[%s16527_s18 + $0xc4] sm:$0xf0]  ;;  %v10858_v14 = vld [vmem:[%s16527_s18 + $0x74c] sm:$0xf0]  ;;  %v10722_v43 = vld [vmem:[%s16527_s18 + $0x314] sm:$0xf] }
 0x784   :  { %v9355_v63 = vor.u32 %v10649_v52, %v9354_v2  ;;  %v10195_v48 = vor.u32 %v10858_v14, %v10194_v35  ;;  %v9687_v2 = vor.u32 %v10722_v43, %v9684_v44  ;;  %v10199_v52 = vor.u32 %v10850_v50, %v10196_v62  ;;  %v10794_v35 = vld [vmem:[%s16527_s18 + $0x54c] sm:$0xf0]  ;;  %v10658_v14 = vld [vmem:[%s16527_s18 + $0x114] sm:$0xf] }
 0x785   :  { %6427 = vmatpush.bf16.msra.mxu0 %v9611_v45  ;;  %6440 = vmatpush.bf16.msra.mxu1 %v10123_v59  ;;  %v10769_v45 = vld [vmem:[%s16527_s18 + $0x48c] sm:$0xf]  ;;  %v9428_v50 = vld [vmem:[%s16527_s18 + $0x150] sm:$0xf0]  ;;  %v10634_v22 = vld [vmem:[%s16527_s18 + $0x4c] sm:$0xf0] }
 0x786   :  { %6453 = vmatpush.bf16.msrb.mxu2 %v9615_v3  ;;  %6466 = vmatpush.bf16.msrb.mxu3 %v10127_v4  ;;  %v9868_v59 = vld [vmem:[%s16527_s18 + $0x4c8] sm:$0xf0]  ;;  %v9867_v3 = vor.u32 %v10777_v56, %v9866_v55  ;;  %v10633_v4 = vld [vmem:[%s16527_s18 + $0x44] sm:$0xf0]  ;;  %v10706_v55 = vld [vmem:[%s16527_s18 + $0x294] sm:$0xf] }
 0x787   :  { %v9871_v26 = vor.u32 %v10769_v45, %v9868_v59  ;;  %v9291_v20 = vor.u32 %v10633_v4, %v9290_v60  ;;  %v9620_v56 = vld [vmem:[%s16527_s18 + $0x2d0] sm:$0xf0]  ;;  %v9554_v60 = vld [vmem:[%s16527_s18 + $0x210] sm:$0xf]  ;;  %v10135_v4 = vor.u32 %v10834_v19, %v10132_v58 }
 0x788   :  { %v10786_v62 = vld [vmem:[%s16527_s18 + $0x514] sm:$0xf]  ;;  %v9874_v19 = vld [vmem:[%s16527_s18 + $0x490] sm:$0xf] }
 0x789   :  { %6428 = vmatpush.bf16.msra.mxu0 %v9547_v12  ;;  %6441 = vmatpush.bf16.msra.mxu1 %v10059_v15  ;;  %v9804_v15 = vld [vmem:[%s16527_s18 + $0x448] sm:$0xf0]  ;;  %v10778_v58 = vld [vmem:[%s16527_s18 + $0x4cc] sm:$0xf0] }
 0x78a   :  { %6454 = vmatpush.bf16.msrb.mxu2 %v9551_v27  ;;  %6467 = vmatpush.bf16.msrb.mxu3 %v10063_v28  ;;  %v4922_v57 = vpop.f32.mrf.mxu2  ;;  %v4935_v12 = vpop.f32.mrf.mxu3  ;;  %v10258_v27 = vld [vmem:[%s16527_s18 + $0x790] sm:$0xf]  ;;  %v9875_v21 = vor.u32 %v10778_v58, %v9874_v19  ;;  %v10138_v19 = vld [vmem:[%s16527_s18 + $0x698] sm:$0xf] }
 0x78b   :  { %v10874_v28 = vld [vmem:[%s16527_s18 + $0x7cc] sm:$0xf0]  ;;  %v10843_v58 = vld [vmem:[%s16527_s18 + $0x6d4] sm:$0xf0] }
 0x78c   :  { %v10259_v38 = vor.u32 %v10874_v28, %v10258_v27  ;;  %v10682_v27 = vld [vmem:[%s16527_s18 + $0x1cc] sm:$0xf0] }
 0x78d   :  { %6429 = vmatpush.bf16.msra.mxu0 %v9483_v34  ;;  %6442 = vmatpush.bf16.msra.mxu1 %v9995_v37  ;;  %v9295_v34 = vor.u32 %v10625_v24, %v9292_v25  ;;  %v9807_v37 = vor.u32 %v10753_v6, %v9804_v15  ;;  %v10818_v24 = vld [vmem:[%s16527_s18 + $0x614] sm:$0xf] }
 0x78e   :  { %6455 = vmatpush.bf16.msrb.mxu2 %v9487_v39  ;;  %6468 = vmatpush.bf16.msrb.mxu3 %v9999_v40  ;;  %v9682_v39 = vld [vmem:[%s16527_s18 + $0x310] sm:$0xf]  ;;  %v10068_v25 = vld [vmem:[%s16527_s18 + $0x650] sm:$0xf0] }
 0x78f   :  { %v10730_v40 = vld [vmem:[%s16527_s18 + $0x34c] sm:$0xf0]  ;;  %v10071_v10 = vor.u32 %v10818_v24, %v10068_v25 }
 0x790   :  { %v9683_v47 = vor.u32 %v10730_v40, %v9682_v39  ;;  %v10666_v39 = vld [vmem:[%s16527_s18 + $0x14c] sm:$0xf0]  ;;  %v9495_v40 = vor.u32 %v10674_v31, %v9492_v32  ;;  %v10739_v31 = vld [vmem:[%s16527_s18 + $0x39c] sm:$0xf] }
 0x791   :  { %6430 = vmatpush.bf16.msra.mxu0 %v9419_v49  ;;  %6443 = vmatpush.bf16.msra.mxu1 %v9931_v51  ;;  %v9618_v49 = vld [vmem:[%s16527_s18 + $0x290] sm:$0xf] }
 0x792   :  { %6456 = vmatpush.bf16.msrb.mxu2 %v9423_v54  ;;  %6469 = vmatpush.bf16.msrb.mxu3 %v9935_v5  ;;  %v10714_v51 = vld [vmem:[%s16527_s18 + $0x2cc] sm:$0xf0] }
 0x793   :  { %v10130_v54 = vld [vmem:[%s16527_s18 + $0x690] sm:$0xf]  ;;  %v9619_v45 = vor.u32 %v10714_v51, %v9618_v49 }
 0x794   :  { %v10842_v5 = vld [vmem:[%s16527_s18 + $0x6cc] sm:$0xf0] }
 0x795   :  { %6431 = vmatpush.bf16.msra.mxu0 %v9355_v63  ;;  %6444 = vmatpush.bf16.msra.mxu1 %v9867_v3  ;;  %v10131_v59 = vor.u32 %v10842_v5, %v10130_v54  ;;  %v10698_v63 = vld [vmem:[%s16527_s18 + $0x24c] sm:$0xf0]  ;;  %v9623_v3 = vor.u32 %v10706_v55, %v9620_v56  ;;  %v9431_v55 = vor.u32 %v10658_v14, %v9428_v50  ;;  %v10859_v50 = vld [vmem:[%s16527_s18 + $0x754] sm:$0xf0] }
 0x796   :  { %6457 = vmatpush.bf16.msrb.mxu2 %v9359_v0  ;;  %6470 = vmatpush.bf16.msrb.mxu3 %v9871_v26  ;;  %v10690_v0 = vld [vmem:[%s16527_s18 + $0x214] sm:$0xf]  ;;  %v9555_v15 = vor.u32 %v10698_v63, %v9554_v60  ;;  %v9362_v54 = vld [vmem:[%s16527_s18 + $0x90] sm:$0xf] }
 0x797   :  { %v9556_v26 = vld [vmem:[%s16527_s18 + $0x250] sm:$0xf0]  ;;  %v10650_v5 = vld [vmem:[%s16527_s18 + $0xcc] sm:$0xf0] }
 0x798   :  { %v9559_v28 = vor.u32 %v10690_v0, %v9556_v26  ;;  %v10770_v60 = vld [vmem:[%s16527_s18 + $0x494] sm:$0xf]  ;;  %v9810_v0 = vld [vmem:[%s16527_s18 + $0x410] sm:$0xf] }
 0x799   :  { %6432 = vmatpush.bf16.msra.mxu0 %v9291_v20  ;;  %6445 = vmatpush.bf16.msra.mxu1 %v9803_v30  ;;  %v4946_v6 = vpop.f32.mrf.mxu0  ;;  %v4959_v57 = vpop.f32.mrf.mxu1  ;;  %v10002_v20 = vld [vmem:[%s16527_s18 + $0x590] sm:$0xf]  ;;  %v9876_v63 = vld [vmem:[%s16527_s18 + $0x4d0] sm:$0xf0] }
 0x79a   :  { %6458 = vmatpush.bf16.msrb.mxu2 %v9295_v34  ;;  %6471 = vmatpush.bf16.msrb.mxu3 %v9807_v37  ;;  %v15345_v12 = vadd.f32 %v4959_v57, %v4946_v6  ;;  %v10810_v30 = vld [vmem:[%s16527_s18 + $0x5cc] sm:$0xf0]  ;;  %v10004_v34 = vld [vmem:[%s16527_s18 + $0x5d0] sm:$0xf0]  ;;  %v9491_v37 = vor.u32 %v10682_v27, %v9490_v23  ;;  %v9879_v25 = vor.u32 %v10770_v60, %v9876_v63  ;;  %v10835_v60 = vld [vmem:[%s16527_s18 + $0x69c] sm:$0xf] }
 0x79b   :  { %v10762_v26 = vld [vmem:[%s16527_s18 + $0x44c] sm:$0xf0]  ;;  %v10626_v6 = vld [vmem:[%s16527_s18 + $0x14] sm:$0xf]  ;;  %v10140_v63 = vld [vmem:[%s16527_s18 + $0x6d8] sm:$0xf0] }
 0x79c   :  { %6433 = vmatmul.bf16.vlgmr.msra.gmra.mxu0 %v13141_v11  ;;  %6446 = vmatmul.bf16.vlgmr.msra.gmra.mxu1 %v13144_v17  ;;  %v9300_v57 = vld [vmem:[%s16527_s18 + $0x50] sm:$0xf0] }
 0x79d   :  { %6477 = vmatpush.bf16.msrb.mxu0 %v9747_v13  ;;  %6490 = vmatpush.bf16.msrb.mxu1 %v10259_v38  ;;  %v10003_v13 = vor.u32 %v10810_v30, %v10002_v20  ;;  %v9426_v38 = vld [vmem:[%s16527_s18 + $0x110] sm:$0xf]  ;;  %v9812_v27 = vld [vmem:[%s16527_s18 + $0x450] sm:$0xf0]  ;;  %v10266_v20 = vld [vmem:[%s16527_s18 + $0x798] sm:$0xf] }
 0x79e   :  { %6503 = vmatpush.bf16.msra.mxu2 %v9751_v41  ;;  %6516 = vmatpush.bf16.msra.mxu3 %v10263_v29  ;;  %v10007_v41 = vor.u32 %v10802_v33, %v10004_v34  ;;  %v9938_v29 = vld [vmem:[%s16527_s18 + $0x510] sm:$0xf]  ;;  %v10875_v30 = vld [vmem:[%s16527_s18 + $0x7d4] sm:$0xf0]  ;;  %v9811_v33 = vor.u32 %v10762_v26, %v9810_v0  ;;  %v9756_v34 = vld [vmem:[%s16527_s18 + $0x3d8] sm:$0xf0]  ;;  %v10143_v26 = vor.u32 %v10835_v60, %v10140_v63 }
 0x79f   :  { %6459 = vmatmul.bf16.vlgmr.msrb.gmra.mxu2 %v13141_v11  ;;  %6472 = vmatmul.bf16.vlgmr.msrb.gmra.mxu3 %v13144_v17  ;;  %v9759_v14 = vor.u32 %v10739_v31, %v9756_v34  ;;  %v10683_v31 = vld [vmem:[%s16527_s18 + $0x1d4] sm:$0xf0] }
 0x7a0   :  { %v10010_v34 = vld [vmem:[%s16527_s18 + $0x598] sm:$0xf] }
 0x7a1   :  { %6478 = vmatpush.bf16.msrb.mxu0 %v9683_v47  ;;  %6491 = vmatpush.bf16.msrb.mxu1 %v10195_v48  ;;  %v9940_v47 = vld [vmem:[%s16527_s18 + $0x550] sm:$0xf0]  ;;  %v4948_v49 = vpop.f32.mrf.mxu0  ;;  %v4961_v51 = vpop.f32.mrf.mxu1 }
 0x7a2   :  { %6504 = vmatpush.bf16.msra.mxu2 %v9687_v2  ;;  %6517 = vmatpush.bf16.msra.mxu3 %v10199_v52  ;;  %v4972_v43 = vpop.f32.mrf.mxu2  ;;  %v4985_v44 = vpop.f32.mrf.mxu3  ;;  %v9427_v2 = vor.u32 %v10666_v39, %v9426_v38  ;;  %v9939_v52 = vor.u32 %v10794_v35, %v9938_v29  ;;  %v9943_v56 = vor.u32 %v10786_v62, %v9940_v47  ;;  %v9690_v29 = vld [vmem:[%s16527_s18 + $0x318] sm:$0xf]  ;;  %v10723_v62 = vld [vmem:[%s16527_s18 + $0x31c] sm:$0xf] }
 0x7a3   :  { %v15395_v48 = vadd.f32 %v4985_v44, %v4972_v43  ;;  %v9303_v38 = vor.u32 %v10626_v6, %v9300_v57  ;;  %v10731_v35 = vld [vmem:[%s16527_s18 + $0x354] sm:$0xf0]  ;;  %v9692_v47 = vld [vmem:[%s16527_s18 + $0x358] sm:$0xf0] }
 0x7a4   :  { %v10202_v44 = vld [vmem:[%s16527_s18 + $0x718] sm:$0xf]  ;;  %v10851_v49 = vld [vmem:[%s16527_s18 + $0x71c] sm:$0xf] }
 0x7a5   :  { %6479 = vmatpush.bf16.msrb.mxu0 %v9619_v45  ;;  %6492 = vmatpush.bf16.msrb.mxu1 %v10131_v59  ;;  %v10642_v45 = vld [vmem:[%s16527_s18 + $0x94] sm:$0xf]  ;;  %v10204_v51 = vld [vmem:[%s16527_s18 + $0x758] sm:$0xf0] }
 0x7a6   :  { %6505 = vmatpush.bf16.msra.mxu2 %v9623_v3  ;;  %6518 = vmatpush.bf16.msra.mxu3 %v10135_v4  ;;  %v9364_v59 = vld [vmem:[%s16527_s18 + $0xd0] sm:$0xf0]  ;;  %v9298_v3 = vld [vmem:[%s16527_s18 + $0x10] sm:$0xf]  ;;  %v9363_v4 = vor.u32 %v10650_v5, %v9362_v54  ;;  %v9626_v54 = vld [vmem:[%s16527_s18 + $0x298] sm:$0xf] }
 0x7a7   :  { %v9367_v24 = vor.u32 %v10642_v45, %v9364_v59  ;;  %v9299_v32 = vor.u32 %v10634_v22, %v9298_v3  ;;  %v10715_v5 = vld [vmem:[%s16527_s18 + $0x2d4] sm:$0xf0]  ;;  %v10707_v45 = vld [vmem:[%s16527_s18 + $0x29c] sm:$0xf] }
 0x7a8   :  { %v9628_v59 = vld [vmem:[%s16527_s18 + $0x2d8] sm:$0xf0]  ;;  %v9627_v3 = vor.u32 %v10715_v5, %v9626_v54  ;;  %v10699_v22 = vld [vmem:[%s16527_s18 + $0x254] sm:$0xf0] }
 0x7a9   :  { %6480 = vmatpush.bf16.msrb.mxu0 %v9555_v15  ;;  %6493 = vmatpush.bf16.msrb.mxu1 %v10067_v16  ;;  %v10754_v15 = vld [vmem:[%s16527_s18 + $0x414] sm:$0xf]  ;;  %v9631_v0 = vor.u32 %v10707_v45, %v9628_v59  ;;  %v10691_v6 = vld [vmem:[%s16527_s18 + $0x21c] sm:$0xf]  ;;  %v9370_v45 = vld [vmem:[%s16527_s18 + $0x98] sm:$0xf] }
 0x7aa   :  { %6506 = vmatpush.bf16.msra.mxu2 %v9559_v28  ;;  %6519 = vmatpush.bf16.msra.mxu3 %v10071_v10  ;;  %v4974_v16 = vpop.f32.mrf.mxu2  ;;  %v4987_v23 = vpop.f32.mrf.mxu3  ;;  %v9754_v28 = vld [vmem:[%s16527_s18 + $0x398] sm:$0xf]  ;;  %v9815_v39 = vor.u32 %v10754_v15, %v9812_v27  ;;  %v9564_v57 = vld [vmem:[%s16527_s18 + $0x258] sm:$0xf0] }
 0x7ab   :  { %v10747_v10 = vld [vmem:[%s16527_s18 + $0x3d4] sm:$0xf0]  ;;  %v10819_v15 = vld [vmem:[%s16527_s18 + $0x61c] sm:$0xf] }
 0x7ac   :  { %v10076_v16 = vld [vmem:[%s16527_s18 + $0x658] sm:$0xf0]  ;;  %v10651_v59 = vld [vmem:[%s16527_s18 + $0xd4] sm:$0xf0] }
 0x7ad   :  { %6481 = vmatpush.bf16.msrb.mxu0 %v9491_v37  ;;  %6494 = vmatpush.bf16.msrb.mxu1 %v10003_v13  ;;  %v10867_v37 = vld [vmem:[%s16527_s18 + $0x79c] sm:$0xf] }
 0x7ae   :  { %6507 = vmatpush.bf16.msra.mxu2 %v9495_v40  ;;  %6520 = vmatpush.bf16.msra.mxu3 %v10007_v41  ;;  %v10268_v13 = vld [vmem:[%s16527_s18 + $0x7d8] sm:$0xf0]  ;;  %v9755_v40 = vor.u32 %v10747_v10, %v9754_v28  ;;  %v10267_v41 = vor.u32 %v10875_v30, %v10266_v20  ;;  %v9498_v30 = vld [vmem:[%s16527_s18 + $0x198] sm:$0xf] }
 0x7af   :  { %v10271_v43 = vor.u32 %v10867_v37, %v10268_v13  ;;  %v10811_v37 = vld [vmem:[%s16527_s18 + $0x5d4] sm:$0xf0]  ;;  %v10675_v13 = vld [vmem:[%s16527_s18 + $0x19c] sm:$0xf] }
 0x7b0   :  { %v9948_v54 = vld [vmem:[%s16527_s18 + $0x558] sm:$0xf0] }
 0x7b1   :  { %6482 = vmatpush.bf16.msrb.mxu0 %v9427_v2  ;;  %6495 = vmatpush.bf16.msrb.mxu1 %v9939_v52  ;;  %v9691_v2 = vor.u32 %v10731_v35, %v9690_v29  ;;  %v10203_v52 = vor.u32 %v10859_v50, %v10202_v44  ;;  %v10011_v29 = vor.u32 %v10811_v37, %v10010_v34  ;;  %v9434_v35 = vld [vmem:[%s16527_s18 + $0x118] sm:$0xf]  ;;  %v9762_v34 = vld [vmem:[%s16527_s18 + $0x3a0] sm:$0xf] }
 0x7b2   :  { %6508 = vmatpush.bf16.msra.mxu2 %v9431_v55  ;;  %6521 = vmatpush.bf16.msra.mxu3 %v9943_v56  ;;  %v9695_v55 = vor.u32 %v10723_v62, %v9692_v47  ;;  %v10207_v56 = vor.u32 %v10851_v49, %v10204_v51  ;;  %v9946_v50 = vld [vmem:[%s16527_s18 + $0x518] sm:$0xf]  ;;  %v10659_v47 = vld [vmem:[%s16527_s18 + $0x11c] sm:$0xf]  ;;  %v10748_v37 = vld [vmem:[%s16527_s18 + $0x3dc] sm:$0xf0] }
 0x7b3   :  { %v10795_v62 = vld [vmem:[%s16527_s18 + $0x554] sm:$0xf0] }
 0x7b5   :  { %6483 = vmatpush.bf16.msrb.mxu0 %v9363_v4  ;;  %6496 = vmatpush.bf16.msrb.mxu1 %v9875_v21  ;;  %v10139_v4 = vor.u32 %v10843_v58, %v10138_v19  ;;  %v9562_v21 = vld [vmem:[%s16527_s18 + $0x218] sm:$0xf]  ;;  %v9947_v58 = vor.u32 %v10795_v62, %v9946_v50  ;;  %v9763_v50 = vor.u32 %v10748_v37, %v9762_v34 }
 0x7b6   :  { %6509 = vmatpush.bf16.msra.mxu2 %v9367_v24  ;;  %6522 = vmatpush.bf16.msra.mxu3 %v9879_v25  ;;  %v10074_v24 = vld [vmem:[%s16527_s18 + $0x618] sm:$0xf]  ;;  %v9563_v10 = vor.u32 %v10699_v22, %v9562_v21  ;;  %v10643_v21 = vld [vmem:[%s16527_s18 + $0x9c] sm:$0xf] }
 0x7b7   :  { %v10827_v25 = vld [vmem:[%s16527_s18 + $0x654] sm:$0xf0]  ;;  %v9372_v22 = vld [vmem:[%s16527_s18 + $0xd8] sm:$0xf0] }
 0x7b8   :  { %v10075_v20 = vor.u32 %v10827_v25, %v10074_v24  ;;  %v9306_v24 = vld [vmem:[%s16527_s18 + $0x18] sm:$0xf]  ;;  %v9371_v25 = vor.u32 %v10651_v59, %v9370_v45 }
 0x7b9   :  { %6484 = vmatpush.bf16.msrb.mxu0 %v9299_v32  ;;  %6497 = vmatpush.bf16.msrb.mxu1 %v9811_v33  ;;  %v4998_v23 = vpop.f32.mrf.mxu0  ;;  %v5011_v27 = vpop.f32.mrf.mxu1  ;;  %v9567_v32 = vor.u32 %v10691_v6, %v9564_v57  ;;  %v10079_v33 = vor.u32 %v10819_v15, %v10076_v16  ;;  %v10635_v57 = vld [vmem:[%s16527_s18 + $0x54] sm:$0xf0] }
 0x7ba   :  { %6510 = vmatpush.bf16.msra.mxu2 %v9303_v38  ;;  %6523 = vmatpush.bf16.msra.mxu3 %v9815_v39  ;;  %v15545_v28 = vadd.f32 %v5011_v27, %v4998_v23  ;;  %v9500_v38 = vld [vmem:[%s16527_s18 + $0x1d8] sm:$0xf0]  ;;  %v9818_v15 = vld [vmem:[%s16527_s18 + $0x418] sm:$0xf]  ;;  %v9375_v23 = vor.u32 %v10643_v21, %v9372_v22  ;;  %v10146_v21 = vld [vmem:[%s16527_s18 + $0x6a0] sm:$0xf] }
 0x7bb   :  { %v10803_v39 = vld [vmem:[%s16527_s18 + $0x59c] sm:$0xf]  ;;  %v10763_v16 = vld [vmem:[%s16527_s18 + $0x454] sm:$0xf0]  ;;  %v10844_v22 = vld [vmem:[%s16527_s18 + $0x6dc] sm:$0xf0] }
 0x7bc   :  { %6485 = vmatmul.bf16.vlgmr.msrb.gmra.mxu0 %v13141_v11  ;;  %6498 = vmatmul.bf16.vlgmr.msrb.gmra.mxu1 %v13144_v17 }
 0x7bd   :  { %6529 = vmatpush.bf16.msra.mxu0 %v9755_v40  ;;  %6542 = vmatpush.bf16.msra.mxu1 %v10267_v41  ;;  %v10012_v40 = vld [vmem:[%s16527_s18 + $0x5d8] sm:$0xf0]  ;;  %v9499_v41 = vor.u32 %v10683_v31, %v9498_v30 }
 0x7be   :  { %6555 = vmatpush.bf16.msrb.mxu2 %v9759_v14  ;;  %6568 = vmatpush.bf16.msrb.mxu3 %v10271_v43  ;;  %v10667_v14 = vld [vmem:[%s16527_s18 + $0x154] sm:$0xf0]  ;;  %v9503_v43 = vor.u32 %v10675_v13, %v9500_v38  ;;  %v10015_v44 = vor.u32 %v10803_v39, %v10012_v40  ;;  %v10755_v30 = vld [vmem:[%s16527_s18 + $0x41c] sm:$0xf]  ;;  %v10274_v13 = vld [vmem:[%s16527_s18 + $0x7a0] sm:$0xf]  ;;  %v9307_v40 = vor.u32 %v10635_v57, %v9306_v24 }
 0x7bf   :  { %6511 = vmatmul.bf16.vlgmr.msra.gmra.mxu2 %v13141_v11  ;;  %6524 = vmatmul.bf16.vlgmr.msra.gmra.mxu3 %v13144_v17  ;;  %v9435_v19 = vor.u32 %v10667_v14, %v9434_v35  ;;  %v10876_v38 = vld [vmem:[%s16527_s18 + $0x7dc] sm:$0xf0]  ;;  %v10740_v39 = vld [vmem:[%s16527_s18 + $0x3a4] sm:$0xf]  ;;  %v10147_v57 = vor.u32 %v10844_v22, %v10146_v21 }
 0x7c0   :  { %v10868_v35 = vld [vmem:[%s16527_s18 + $0x7a4] sm:$0xf]  ;;  %v10275_v62 = vor.u32 %v10876_v38, %v10274_v13 }
 0x7c1   :  { %6530 = vmatpush.bf16.msra.mxu0 %v9691_v2  ;;  %6543 = vmatpush.bf16.msra.mxu1 %v10203_v52  ;;  %v9436_v2 = vld [vmem:[%s16527_s18 + $0x158] sm:$0xf0]  ;;  %v10276_v14 = vld [vmem:[%s16527_s18 + $0x7e0] sm:$0xf0] }
 0x7c2   :  { %6556 = vmatpush.bf16.msrb.mxu2 %v9695_v55  ;;  %6569 = vmatpush.bf16.msrb.mxu3 %v10207_v56  ;;  %v5024_v49 = vpop.f32.mrf.mxu2  ;;  %v5037_v51 = vpop.f32.mrf.mxu3  ;;  %v10787_v52 = vld [vmem:[%s16527_s18 + $0x51c] sm:$0xf]  ;;  %v9439_v60 = vor.u32 %v10659_v47, %v9436_v2  ;;  %v9698_v47 = vld [vmem:[%s16527_s18 + $0x320] sm:$0xf]  ;;  %v10279_v2 = vor.u32 %v10868_v35, %v10276_v14  ;;  %v10836_v24 = vld [vmem:[%s16527_s18 + $0x6a4] sm:$0xf] }
 0x7c3   :  { %v15595_v5 = vadd.f32 %v5037_v51, %v5024_v49  ;;  %v5000_v55 = vpop.f32.mrf.mxu0  ;;  %v5013_v56 = vpop.f32.mrf.mxu1  ;;  %v9951_v63 = vor.u32 %v10787_v52, %v9948_v54  ;;  %v10732_v49 = vld [vmem:[%s16527_s18 + $0x35c] sm:$0xf0] }
 0x7c4   :  { %v10210_v52 = vld [vmem:[%s16527_s18 + $0x720] sm:$0xf]  ;;  %v10724_v55 = vld [vmem:[%s16527_s18 + $0x324] sm:$0xf]  ;;  %v9699_v45 = vor.u32 %v10732_v49, %v9698_v47 }
 0x7c5   :  { %6531 = vmatpush.bf16.msra.mxu0 %v9627_v3  ;;  %6544 = vmatpush.bf16.msra.mxu1 %v10139_v4  ;;  %v9882_v3 = vld [vmem:[%s16527_s18 + $0x498] sm:$0xf]  ;;  %v10860_v54 = vld [vmem:[%s16527_s18 + $0x75c] sm:$0xf0]  ;;  %v9700_v56 = vld [vmem:[%s16527_s18 + $0x360] sm:$0xf0] }
 0x7c6   :  { %6557 = vmatpush.bf16.msrb.mxu2 %v9631_v0  ;;  %6570 = vmatpush.bf16.msrb.mxu3 %v10143_v26  ;;  %v10779_v4 = vld [vmem:[%s16527_s18 + $0x4d4] sm:$0xf0]  ;;  %v10771_v0 = vld [vmem:[%s16527_s18 + $0x49c] sm:$0xf]  ;;  %v10211_v59 = vor.u32 %v10860_v54, %v10210_v52  ;;  %v10018_v14 = vld [vmem:[%s16527_s18 + $0x5a0] sm:$0xf] }
 0x7c7   :  { %v9884_v26 = vld [vmem:[%s16527_s18 + $0x4d8] sm:$0xf0]  ;;  %v9883_v6 = vor.u32 %v10779_v4, %v9882_v3  ;;  %v9703_v3 = vor.u32 %v10724_v55, %v9700_v56  ;;  %v10020_v47 = vld [vmem:[%s16527_s18 + $0x5e0] sm:$0xf0]  ;;  %v10668_v52 = vld [vmem:[%s16527_s18 + $0x15c] sm:$0xf0] }
 0x7c8   :  { %v9887_v27 = vor.u32 %v10771_v0, %v9884_v26  ;;  %v10708_v0 = vld [vmem:[%s16527_s18 + $0x2a4] sm:$0xf]  ;;  %v9954_v56 = vld [vmem:[%s16527_s18 + $0x520] sm:$0xf] }
 0x7c9   :  { %6532 = vmatpush.bf16.msra.mxu0 %v9563_v10  ;;  %6545 = vmatpush.bf16.msra.mxu1 %v10075_v20  ;;  %v10627_v10 = vld [vmem:[%s16527_s18 + $0x1c] sm:$0xf]  ;;  %v9636_v26 = vld [vmem:[%s16527_s18 + $0x2e0] sm:$0xf0] }
 0x7ca   :  { %6558 = vmatpush.bf16.msrb.mxu2 %v9567_v32  ;;  %6571 = vmatpush.bf16.msrb.mxu3 %v10079_v33  ;;  %v9308_v20 = vld [vmem:[%s16527_s18 + $0x58] sm:$0xf0]  ;;  %v5026_v31 = vpop.f32.mrf.mxu2  ;;  %v5039_v32 = vpop.f32.mrf.mxu3 }
 0x7cb   :  { %v9820_v33 = vld [vmem:[%s16527_s18 + $0x458] sm:$0xf0]  ;;  %v9572_v31 = vld [vmem:[%s16527_s18 + $0x260] sm:$0xf0] }
 0x7cc   :  { %v10820_v32 = vld [vmem:[%s16527_s18 + $0x624] sm:$0xf] }
 0x7cd   :  { %6533 = vmatpush.bf16.msra.mxu0 %v9499_v41  ;;  %6546 = vmatpush.bf16.msra.mxu1 %v10011_v29  ;;  %v9819_v41 = vor.u32 %v10763_v16, %v9818_v15  ;;  %v9764_v29 = vld [vmem:[%s16527_s18 + $0x3e0] sm:$0xf0]  ;;  %v9570_v15 = vld [vmem:[%s16527_s18 + $0x220] sm:$0xf] }
 0x7ce   :  { %6559 = vmatpush.bf16.msrb.mxu2 %v9503_v43  ;;  %6572 = vmatpush.bf16.msrb.mxu3 %v10015_v44  ;;  %v9311_v43 = vor.u32 %v10627_v10, %v9308_v20  ;;  %v9823_v44 = vor.u32 %v10755_v30, %v9820_v33  ;;  %v9767_v51 = vor.u32 %v10740_v39, %v9764_v29  ;;  %v10700_v16 = vld [vmem:[%s16527_s18 + $0x25c] sm:$0xf0]  ;;  %v10692_v30 = vld [vmem:[%s16527_s18 + $0x224] sm:$0xf] }
 0x7cf   :  { %v10082_v10 = vld [vmem:[%s16527_s18 + $0x620] sm:$0xf]  ;;  %v10084_v33 = vld [vmem:[%s16527_s18 + $0x660] sm:$0xf0]  ;;  %v9571_v38 = vor.u32 %v10700_v16, %v9570_v15  ;;  %v9575_v29 = vor.u32 %v10692_v30, %v9572_v31 }
 0x7d0   :  { %v10828_v20 = vld [vmem:[%s16527_s18 + $0x65c] sm:$0xf0]  ;;  %v10087_v35 = vor.u32 %v10820_v32, %v10084_v33 }
 0x7d1   :  { %6534 = vmatpush.bf16.msra.mxu0 %v9435_v19  ;;  %6547 = vmatpush.bf16.msra.mxu1 %v9947_v58  ;;  %v10852_v19 = vld [vmem:[%s16527_s18 + $0x724] sm:$0xf]  ;;  %v10083_v39 = vor.u32 %v10828_v20, %v10082_v10  ;;  %v9890_v15 = vld [vmem:[%s16527_s18 + $0x4a0] sm:$0xf] }
 0x7d2   :  { %6560 = vmatpush.bf16.msrb.mxu2 %v9439_v60  ;;  %6573 = vmatpush.bf16.msrb.mxu3 %v9951_v63  ;;  %v10212_v58 = vld [vmem:[%s16527_s18 + $0x760] sm:$0xf0]  ;;  %v9634_v60 = vld [vmem:[%s16527_s18 + $0x2a0] sm:$0xf] }
 0x7d3   :  { %v10716_v63 = vld [vmem:[%s16527_s18 + $0x2dc] sm:$0xf0]  ;;  %v10215_v4 = vor.u32 %v10852_v19, %v10212_v58  ;;  %v10660_v58 = vld [vmem:[%s16527_s18 + $0x124] sm:$0xf] }
 0x7d4   :  { %v10796_v19 = vld [vmem:[%s16527_s18 + $0x55c] sm:$0xf0]  ;;  %v10772_v10 = vld [vmem:[%s16527_s18 + $0x4a4] sm:$0xf] }
 0x7d5   :  { %6535 = vmatpush.bf16.msra.mxu0 %v9371_v25  ;;  %6548 = vmatpush.bf16.msra.mxu1 %v9883_v6  ;;  %v10148_v25 = vld [vmem:[%s16527_s18 + $0x6e0] sm:$0xf0]  ;;  %v9635_v6 = vor.u32 %v10716_v63, %v9634_v60  ;;  %v10780_v16 = vld [vmem:[%s16527_s18 + $0x4dc] sm:$0xf0] }
 0x7d6   :  { %6561 = vmatpush.bf16.msrb.mxu2 %v9375_v23  ;;  %6574 = vmatpush.bf16.msrb.mxu3 %v9887_v27  ;;  %v9639_v23 = vor.u32 %v10708_v0, %v9636_v26  ;;  %v10151_v27 = vor.u32 %v10836_v24, %v10148_v25  ;;  %v9444_v60 = vld [vmem:[%s16527_s18 + $0x160] sm:$0xf0]  ;;  %v9955_v26 = vor.u32 %v10796_v19, %v9954_v56  ;;  %v9378_v24 = vld [vmem:[%s16527_s18 + $0xa0] sm:$0xf] }
 0x7d7   :  { %v10788_v63 = vld [vmem:[%s16527_s18 + $0x524] sm:$0xf]  ;;  %v10652_v25 = vld [vmem:[%s16527_s18 + $0xdc] sm:$0xf0]  ;;  %v9891_v32 = vor.u32 %v10780_v16, %v9890_v15  ;;  %v9642_v15 = vld [vmem:[%s16527_s18 + $0x2a8] sm:$0xf] }
 0x7d8   :  { %v9892_v20 = vld [vmem:[%s16527_s18 + $0x4e0] sm:$0xf0]  ;;  %v9314_v30 = vld [vmem:[%s16527_s18 + $0x20] sm:$0xf]  ;;  %v9379_v31 = vor.u32 %v10652_v25, %v9378_v24  ;;  %v10853_v24 = vld [vmem:[%s16527_s18 + $0x72c] sm:$0xf] }
 0x7d9   :  { %6536 = vmatpush.bf16.msra.mxu0 %v9307_v40  ;;  %6549 = vmatpush.bf16.msra.mxu1 %v9819_v41  ;;  %v5050_v34 = vpop.f32.mrf.mxu0  ;;  %v5063_v37 = vpop.f32.mrf.mxu1  ;;  %v9506_v40 = vld [vmem:[%s16527_s18 + $0x1a0] sm:$0xf]  ;;  %v10220_v25 = vld [vmem:[%s16527_s18 + $0x768] sm:$0xf0]  ;;  %v10717_v16 = vld [vmem:[%s16527_s18 + $0x2e4] sm:$0xf0] }
 0x7da   :  { %6562 = vmatpush.bf16.msrb.mxu2 %v9311_v43  ;;  %6575 = vmatpush.bf16.msrb.mxu3 %v9823_v44  ;;  %v15745_v13 = vadd.f32 %v5063_v37, %v5050_v34  ;;  %v10684_v41 = vld [vmem:[%s16527_s18 + $0x1dc] sm:$0xf0]  ;;  %v10676_v44 = vld [vmem:[%s16527_s18 + $0x1a4] sm:$0xf] }
 0x7db   :  { %v10812_v43 = vld [vmem:[%s16527_s18 + $0x5dc] sm:$0xf0]  ;;  %v9507_v49 = vor.u32 %v10684_v41, %v9506_v40  ;;  %v10628_v40 = vld [vmem:[%s16527_s18 + $0x24] sm:$0xf] }
 0x7dc   :  { %6537 = vmatmul.bf16.vlgmr.msra.gmra.mxu0 %v13141_v11  ;;  %6550 = vmatmul.bf16.vlgmr.msra.gmra.mxu1 %v13144_v17  ;;  %v10636_v33 = vld [vmem:[%s16527_s18 + $0x5c] sm:$0xf0]  ;;  %v9316_v41 = vld [vmem:[%s16527_s18 + $0x60] sm:$0xf0] }
 0x7dd   :  { %6581 = vmatpush.bf16.msrb.mxu0 %v9763_v50  ;;  %6594 = vmatpush.bf16.msrb.mxu1 %v10275_v62  ;;  %v9508_v50 = vld [vmem:[%s16527_s18 + $0x1e0] sm:$0xf0]  ;;  %v9826_v34 = vld [vmem:[%s16527_s18 + $0x420] sm:$0xf]  ;;  %v9319_v56 = vor.u32 %v10628_v40, %v9316_v41 }
 0x7de   :  { %6607 = vmatpush.bf16.msra.mxu2 %v9767_v51  ;;  %6620 = vmatpush.bf16.msra.mxu3 %v10279_v2  ;;  %v10804_v62 = vld [vmem:[%s16527_s18 + $0x5a4] sm:$0xf]  ;;  %v10019_v51 = vor.u32 %v10812_v43, %v10018_v14  ;;  %v9442_v2 = vld [vmem:[%s16527_s18 + $0x120] sm:$0xf]  ;;  %v9511_v54 = vor.u32 %v10676_v44, %v9508_v50  ;;  %v9770_v44 = vld [vmem:[%s16527_s18 + $0x3a8] sm:$0xf] }
 0x7df   :  { %6563 = vmatmul.bf16.vlgmr.msrb.gmra.mxu2 %v13141_v11  ;;  %6576 = vmatmul.bf16.vlgmr.msrb.gmra.mxu3 %v13144_v17  ;;  %v10023_v55 = vor.u32 %v10804_v62, %v10020_v47  ;;  %v9443_v0 = vor.u32 %v10668_v52, %v9442_v2  ;;  %v10764_v37 = vld [vmem:[%s16527_s18 + $0x45c] sm:$0xf0]  ;;  %v9828_v43 = vld [vmem:[%s16527_s18 + $0x460] sm:$0xf0]  ;;  %v10749_v50 = vld [vmem:[%s16527_s18 + $0x3e4] sm:$0xf0] }
 0x7e0   :  { %v10282_v62 = vld [vmem:[%s16527_s18 + $0x7a8] sm:$0xf]  ;;  %v9827_v2 = vor.u32 %v10764_v37, %v9826_v34  ;;  %v9772_v52 = vld [vmem:[%s16527_s18 + $0x3e8] sm:$0xf0]  ;;  %v9643_v34 = vor.u32 %v10717_v16, %v9642_v15 }
 0x7e1   :  { %6582 = vmatpush.bf16.msrb.mxu0 %v9699_v45  ;;  %6595 = vmatpush.bf16.msrb.mxu1 %v10211_v59  ;;  %v5052_v21 = vpop.f32.mrf.mxu0  ;;  %v5065_v22 = vpop.f32.mrf.mxu1  ;;  %v10877_v47 = vld [vmem:[%s16527_s18 + $0x7e4] sm:$0xf0]  ;;  %v10661_v16 = vld [vmem:[%s16527_s18 + $0x12c] sm:$0xf] }
 0x7e2   :  { %6608 = vmatpush.bf16.msra.mxu2 %v9703_v3  ;;  %6621 = vmatpush.bf16.msra.mxu3 %v10215_v4  ;;  %v5076_v45 = vpop.f32.mrf.mxu2  ;;  %v5089_v59 = vpop.f32.mrf.mxu3  ;;  %v9956_v3 = vld [vmem:[%s16527_s18 + $0x560] sm:$0xf0]  ;;  %v10218_v21 = vld [vmem:[%s16527_s18 + $0x728] sm:$0xf] }
 0x7e3   :  { %v15795_v4 = vadd.f32 %v5089_v59, %v5076_v45  ;;  %v10283_v45 = vor.u32 %v10877_v47, %v10282_v62  ;;  %v9706_v59 = vld [vmem:[%s16527_s18 + $0x328] sm:$0xf] }
 0x7e4   :  { %v10861_v22 = vld [vmem:[%s16527_s18 + $0x764] sm:$0xf0] }
 0x7e5   :  { %6583 = vmatpush.bf16.msrb.mxu0 %v9635_v6  ;;  %6596 = vmatpush.bf16.msrb.mxu1 %v10147_v57  ;;  %v9447_v6 = vor.u32 %v10660_v58, %v9444_v60  ;;  %v9959_v57 = vor.u32 %v10788_v63, %v9956_v3  ;;  %v9771_v58 = vor.u32 %v10749_v50, %v9770_v44  ;;  %v10733_v60 = vld [vmem:[%s16527_s18 + $0x364] sm:$0xf0]  ;;  %v10821_v44 = vld [vmem:[%s16527_s18 + $0x62c] sm:$0xf] }
 0x7e6   :  { %6609 = vmatpush.bf16.msra.mxu2 %v9639_v23  ;;  %6622 = vmatpush.bf16.msra.mxu3 %v10151_v27  ;;  %v10644_v23 = vld [vmem:[%s16527_s18 + $0xa4] sm:$0xf]  ;;  %v10092_v50 = vld [vmem:[%s16527_s18 + $0x668] sm:$0xf0]  ;;  %v10797_v15 = vld [vmem:[%s16527_s18 + $0x564] sm:$0xf0] }
 0x7e7   :  { %v9380_v27 = vld [vmem:[%s16527_s18 + $0xe0] sm:$0xf0] }
 0x7e9   :  { %6584 = vmatpush.bf16.msrb.mxu0 %v9571_v38  ;;  %6597 = vmatpush.bf16.msrb.mxu1 %v10083_v39  ;;  %v9383_v38 = vor.u32 %v10644_v23, %v9380_v27  ;;  %v9895_v39 = vor.u32 %v10772_v10, %v9892_v20  ;;  %v10223_v27 = vor.u32 %v10853_v24, %v10220_v25  ;;  %v10154_v10 = vld [vmem:[%s16527_s18 + $0x6a8] sm:$0xf] }
 0x7ea   :  { %6610 = vmatpush.bf16.msra.mxu2 %v9575_v29  ;;  %6623 = vmatpush.bf16.msra.mxu3 %v10087_v35  ;;  %v10756_v29 = vld [vmem:[%s16527_s18 + $0x424] sm:$0xf]  ;;  %v5078_v35 = vpop.f32.mrf.mxu2  ;;  %v5091_v14 = vpop.f32.mrf.mxu3  ;;  %v10845_v20 = vld [vmem:[%s16527_s18 + $0x6e4] sm:$0xf0] }
 0x7eb   :  { %v9831_v19 = vor.u32 %v10756_v29, %v9828_v43  ;;  %v10155_v37 = vor.u32 %v10845_v20, %v10154_v10  ;;  %v10090_v29 = vld [vmem:[%s16527_s18 + $0x628] sm:$0xf]  ;;  %v10693_v14 = vld [vmem:[%s16527_s18 + $0x22c] sm:$0xf] }
 0x7ec   :  { %v10829_v35 = vld [vmem:[%s16527_s18 + $0x664] sm:$0xf0]  ;;  %v9580_v43 = vld [vmem:[%s16527_s18 + $0x268] sm:$0xf0] }
 0x7ed   :  { %6585 = vmatpush.bf16.msrb.mxu0 %v9507_v49  ;;  %6598 = vmatpush.bf16.msrb.mxu1 %v10019_v51  ;;  %v10741_v49 = vld [vmem:[%s16527_s18 + $0x3ac] sm:$0xf]  ;;  %v9315_v51 = vor.u32 %v10636_v33, %v9314_v30  ;;  %v9962_v24 = vld [vmem:[%s16527_s18 + $0x528] sm:$0xf] }
 0x7ee   :  { %6611 = vmatpush.bf16.msra.mxu2 %v9511_v54  ;;  %6624 = vmatpush.bf16.msra.mxu3 %v10023_v55  ;;  %v10869_v54 = vld [vmem:[%s16527_s18 + $0x7ac] sm:$0xf]  ;;  %v9775_v63 = vor.u32 %v10741_v49, %v9772_v52  ;;  %v15948_v49 = vld [vmem:[%s16528_s20] sm:$0xff]  ;;  %v9514_v52 = vld [vmem:[%s16527_s18 + $0x1a8] sm:$0xf] }
 0x7ef   :  { %v10284_v55 = vld [vmem:[%s16527_s18 + $0x7e8] sm:$0xf0] }
 0x7f0   :  { %v10287_v3 = vor.u32 %v10869_v54, %v10284_v55  ;;  %v10709_v30 = vld [vmem:[%s16527_s18 + $0x2ac] sm:$0xf]  ;;  %v10685_v54 = vld [vmem:[%s16527_s18 + $0x1e4] sm:$0xf0] }
 0x7f1   :  { %6586 = vmatpush.bf16.msrb.mxu0 %v9443_v0  ;;  %6599 = vmatpush.bf16.msrb.mxu1 %v9955_v26  ;;  %v10725_v0 = vld [vmem:[%s16527_s18 + $0x32c] sm:$0xf] }
 0x7f2   :  { %6612 = vmatpush.bf16.msra.mxu2 %v9447_v6  ;;  %6625 = vmatpush.bf16.msra.mxu3 %v9959_v57  ;;  %v9708_v26 = vld [vmem:[%s16527_s18 + $0x368] sm:$0xf0]  ;;  %v9707_v6 = vor.u32 %v10733_v60, %v9706_v59  ;;  %v10219_v57 = vor.u32 %v10861_v22, %v10218_v21  ;;  %v9515_v21 = vor.u32 %v10685_v54, %v9514_v52  ;;  %v10637_v52 = vld [vmem:[%s16527_s18 + $0x64] sm:$0xf0] }
 0x7f3   :  { %v9711_v23 = vor.u32 %v10725_v0, %v9708_v26  ;;  %v10156_v33 = vld [vmem:[%s16527_s18 + $0x6e8] sm:$0xf0]  ;;  %v9450_v0 = vld [vmem:[%s16527_s18 + $0x128] sm:$0xf] }
 0x7f4   :  { %v10677_v59 = vld [vmem:[%s16527_s18 + $0x1ac] sm:$0xf]  ;;  %v10669_v26 = vld [vmem:[%s16527_s18 + $0x164] sm:$0xf0] }
 0x7f5   :  { %6587 = vmatpush.bf16.msrb.mxu0 %v9379_v31  ;;  %6600 = vmatpush.bf16.msrb.mxu1 %v9891_v32  ;;  %v9644_v31 = vld [vmem:[%s16527_s18 + $0x2e8] sm:$0xf0]  ;;  %v9834_v54 = vld [vmem:[%s16527_s18 + $0x428] sm:$0xf] }
 0x7f6   :  { %6613 = vmatpush.bf16.msra.mxu2 %v9383_v38  ;;  %6626 = vmatpush.bf16.msra.mxu3 %v9895_v39  ;;  %v10837_v32 = vld [vmem:[%s16527_s18 + $0x6ac] sm:$0xf]  ;;  %v9578_v38 = vld [vmem:[%s16527_s18 + $0x228] sm:$0xf]  ;;  %v9647_v40 = vor.u32 %v10709_v30, %v9644_v31 }
 0x7f7   :  { %v10701_v39 = vld [vmem:[%s16527_s18 + $0x264] sm:$0xf0]  ;;  %v10159_v41 = vor.u32 %v10837_v32, %v10156_v33  ;;  %v9516_v60 = vld [vmem:[%s16527_s18 + $0x1e8] sm:$0xf0]  ;;  %v6794_v32 = vperm.slane %v15948_v49, 1 }
 0x7f8   :  { %v10789_v20 = vld [vmem:[%s16527_s18 + $0x52c] sm:$0xf] }
 0x7f9   :  { %6588 = vmatpush.bf16.msrb.mxu0 %v9315_v51  ;;  %6601 = vmatpush.bf16.msrb.mxu1 %v9827_v2  ;;  %v6382_v62 = vpop.f32.mrf.mxu0  ;;  %v6395_v47 = vpop.f32.mrf.mxu1  ;;  %v9579_v51 = vor.u32 %v10701_v39, %v9578_v38  ;;  %v10091_v2 = vor.u32 %v10829_v35, %v10090_v29  ;;  %v9964_v30 = vld [vmem:[%s16527_s18 + $0x568] sm:$0xf0]  ;;  %v9963_v38 = vor.u32 %v10797_v15, %v9962_v24  ;;  %v10750_v24 = vld [vmem:[%s16527_s18 + $0x3ec] sm:$0xf0]  ;;  %v10742_v15 = vld [vmem:[%s16527_s18 + $0x3b4] sm:$0xf] }
 0x7fa   :  { %6614 = vmatpush.bf16.msra.mxu2 %v9319_v56  ;;  %6627 = vmatpush.bf16.msra.mxu3 %v9831_v19  ;;  %v6383_v55 = vadd.f32 %v6382_v62, %v14517_v7  ;;  %v9583_v56 = vor.u32 %v10693_v14, %v9580_v43  ;;  %v10095_v19 = vor.u32 %v10821_v44, %v10092_v50  ;;  %v10805_v7 = vld [vmem:[%s16527_s18 + $0x5ac] sm:$0xf]  ;;  %v10781_v43 = vld [vmem:[%s16527_s18 + $0x4e4] sm:$0xf0] }
 0x7fb   :  { %v9967_v14 = vor.u32 %v10789_v20, %v9964_v30  ;;  %v10645_v44 = vld [vmem:[%s16527_s18 + $0xac] sm:$0xf]  ;;  %v10870_v20 = vld [vmem:[%s16527_s18 + $0x7b4] sm:$0xf] }
 0x7fc   :  { %6589 = vmatmul.bf16.vlgmr.msrb.gmra.mxu0 %v13141_v11  ;;  %6602 = vmatmul.bf16.vlgmr.msrb.gmra.mxu1 %v13144_v17  ;;  %v6396_v25 = vadd.f32 %v6395_v47, %v6383_v55  ;;  %v9388_v50 = vld [vmem:[%s16527_s18 + $0xe8] sm:$0xf0]  ;;  %v10765_v55 = vld [vmem:[%s16527_s18 + $0x464] sm:$0xf0]  ;;  %v10292_v30 = vld [vmem:[%s16527_s18 + $0x7f0] sm:$0xf0] }
 0x7fd   :  { %6633 = vmatpush.bf16.msra.mxu0 %v9771_v58  ;;  %6646 = vmatpush.bf16.msra.mxu1 %v10283_v45  ;;  %v10026_v58 = vld [vmem:[%s16527_s18 + $0x5a8] sm:$0xf]  ;;  %v10773_v62 = vld [vmem:[%s16527_s18 + $0x4ac] sm:$0xf] }
 0x7fe   :  { %6659 = vmatpush.bf16.msrb.mxu2 %v9775_v63  ;;  %6672 = vmatpush.bf16.msrb.mxu3 %v10287_v3  ;;  %v10813_v45 = vld [vmem:[%s16527_s18 + $0x5e4] sm:$0xf0]  ;;  %v10028_v63 = vld [vmem:[%s16527_s18 + $0x5e8] sm:$0xf0]  ;;  %v6793_v3 = vperm.slane %v15948_v49, 0 }
 0x7ff   :  { %6615 = vmatmul.bf16.vlgmr.msra.gmra.mxu2 %v13141_v11  ;;  %6628 = vmatmul.bf16.vlgmr.msra.gmra.mxu3 %v13144_v17  ;;  %v10027_v22 = vor.u32 %v10813_v45, %v10026_v58  ;;  %v9900_v47 = vld [vmem:[%s16527_s18 + $0x4e8] sm:$0xf0]  ;;  %v9391_v58 = vor.u32 %v10645_v44, %v9388_v50  ;;  %v10854_v44 = vld [vmem:[%s16527_s18 + $0x734] sm:$0xf] }
 0x800   :  { %v6825_v29 = vadd.f32 %v6793_v3, %v6396_v25  ;;  %v10629_v45 = vld [vmem:[%s16527_s18 + $0x2c] sm:$0xf]  ;;  %v10290_v25 = vld [vmem:[%s16527_s18 + $0x7b0] sm:$0xf]  ;;  %v10228_v50 = vld [vmem:[%s16527_s18 + $0x770] sm:$0xf0] }
 0x801   :  { %6634 = vmatpush.bf16.msra.mxu0 %v9707_v6  ;;  %6647 = vmatpush.bf16.msra.mxu1 %v10219_v57  ;;  %v9519_v6 = vor.u32 %v10677_v59, %v9516_v60  ;;  %v10031_v57 = vor.u32 %v10805_v7, %v10028_v63  ;;  %v6384_v33 = vpop.f32.mrf.mxu0  ;;  %v9324_v59 = vld [vmem:[%s16527_s18 + $0x68] sm:$0xf0] }
 0x802   :  { %6660 = vmatpush.bf16.msrb.mxu2 %v9711_v23  ;;  %6673 = vmatpush.bf16.msrb.mxu3 %v10223_v27  ;;  %v9452_v23 = vld [vmem:[%s16527_s18 + $0x168] sm:$0xf0]  ;;  %v6408_v27 = vpop.f32.mrf.mxu2  ;;  %v6421_v10 = vpop.f32.mrf.mxu3  ;;  %v6857_v63 = vmul.f32 0.1, %v6825_v29  ;;  %vm6841_vm15 = vcmp.ge.f32.partialorder %v6825_v29, 0.0 }
 0x803   :  { %v6409_v31 = vadd.f32 %v6408_v27, %v14567_v42  ;;  %v9455_v39 = vor.u32 %v10661_v16, %v9452_v23  ;;  %v9898_v42 = vld [vmem:[%s16527_s18 + $0x4a8] sm:$0xf]  ;;  %v10757_v60 = vld [vmem:[%s16527_s18 + $0x42c] sm:$0xf]  ;;  %v9780_v16 = vld [vmem:[%s16527_s18 + $0x3f0] sm:$0xf0] }
 0x804   :  { %v9836_v7 = vld [vmem:[%s16527_s18 + $0x468] sm:$0xf0] }
 0x805   :  { %6635 = vmatpush.bf16.msra.mxu0 %v9643_v34  ;;  %6648 = vmatpush.bf16.msra.mxu1 %v10155_v37  ;;  %v6397_v34 = vpop.f32.mrf.mxu1  ;;  %v9451_v37 = vor.u32 %v10669_v26, %v9450_v0  ;;  %v6422_v35 = vadd.f32 %v6421_v10, %v6409_v31  ;;  %v9835_v10 = vor.u32 %v10765_v55, %v9834_v54  ;;  %v10162_v55 = vld [vmem:[%s16527_s18 + $0x6b0] sm:$0xf] }
 0x806   :  { %6661 = vmatpush.bf16.msrb.mxu2 %v9647_v40  ;;  %6674 = vmatpush.bf16.msrb.mxu3 %v10159_v41  ;;  %v9386_v40 = vld [vmem:[%s16527_s18 + $0xa8] sm:$0xf]  ;;  %v6873_v31 = vsel %vm6841_vm15, %v6825_v29, %v6857_v63  ;;  %v9839_v33 = vor.u32 %v10757_v60, %v9836_v7  ;;  %v10226_v29 = vld [vmem:[%s16527_s18 + $0x730] sm:$0xf]  ;;  %v10231_v54 = vor.u32 %v10854_v44, %v10228_v50 }
 0x807   :  { %v10653_v41 = vld [vmem:[%s16527_s18 + $0xe4] sm:$0xf0]  ;;  %v9586_v63 = vld [vmem:[%s16527_s18 + $0x230] sm:$0xf] }
 0x809   :  { %6636 = vmatpush.bf16.msra.mxu0 %v9579_v51  ;;  %6649 = vmatpush.bf16.msra.mxu1 %v10091_v2  ;;  %v6826_v51 = vadd.f32 %v6794_v32, %v6422_v35  ;;  %v9322_v2 = vld [vmem:[%s16527_s18 + $0x28] sm:$0xf]  ;;  %v9327_v32 = vor.u32 %v10629_v45, %v9324_v59  ;;  %v10862_v35 = vld [vmem:[%s16527_s18 + $0x76c] sm:$0xf0]  ;;  %v10838_v45 = vld [vmem:[%s16527_s18 + $0x6b4] sm:$0xf] }
 0x80a   :  { %6662 = vmatpush.bf16.msrb.mxu2 %v9583_v56  ;;  %6675 = vmatpush.bf16.msrb.mxu3 %v10095_v19  ;;  %v9387_v56 = vor.u32 %v10653_v41, %v9386_v40  ;;  %v9899_v19 = vor.u32 %v10781_v43, %v9898_v42  ;;  %v6410_v0 = vpop.f32.mrf.mxu2  ;;  %v6423_v26 = vpop.f32.mrf.mxu3  ;;  %v9323_v27 = vor.u32 %v10637_v52, %v9322_v2  ;;  %v10734_v40 = vld [vmem:[%s16527_s18 + $0x36c] sm:$0xf0]  ;;  %v9716_v43 = vld [vmem:[%s16527_s18 + $0x370] sm:$0xf0] }
 0x80b   :  { %vm6842_vm14 = vcmp.ge.f32.partialorder %v6826_v51, 0.0  ;;  %v6858_v3 = vmul.f32 0.1, %v6826_v51  ;;  %v9783_v41 = vor.u32 %v10742_v15, %v9780_v16  ;;  %v10295_v42 = vor.u32 %v10870_v20, %v10292_v30  ;;  %v10718_v2 = vld [vmem:[%s16527_s18 + $0x2ec] sm:$0xf0] }
 0x80c   :  { %v10164_v59 = vld [vmem:[%s16527_s18 + $0x6f0] sm:$0xf0]  ;;  %v10098_v0 = vld [vmem:[%s16527_s18 + $0x630] sm:$0xf] }
 0x80d   :  { %6637 = vmatpush.bf16.msra.mxu0 %v9515_v21  ;;  %6650 = vmatpush.bf16.msra.mxu1 %v10027_v22  ;;  %v9903_v21 = vor.u32 %v10773_v62, %v9900_v47  ;;  %v9778_v22 = vld [vmem:[%s16527_s18 + $0x3b0] sm:$0xf]  ;;  %v10227_v47 = vor.u32 %v10862_v35, %v10226_v29 }
 0x80e   :  { %6663 = vmatpush.bf16.msrb.mxu2 %v9519_v6  ;;  %6676 = vmatpush.bf16.msrb.mxu3 %v10031_v57  ;;  %v6874_v6 = vsel %vm6842_vm14, %v6826_v51, %v6858_v3  ;;  %v10878_v57 = vld [vmem:[%s16527_s18 + $0x7ec] sm:$0xf0] }
 0x80f   :  { %v6905_v23 = vrot.slane %v6874_v6, 6  ;;  %v9650_v51 = vld [vmem:[%s16527_s18 + $0x2b0] sm:$0xf]  ;;  %v10822_v6 = vld [vmem:[%s16527_s18 + $0x634] sm:$0xf] }
 0x810   :  { %v9651_v60 = vor.u32 %v10718_v2, %v9650_v51  ;;  %v10702_v3 = vld [vmem:[%s16527_s18 + $0x26c] sm:$0xf0]  ;;  %v10662_v2 = vld [vmem:[%s16527_s18 + $0x134] sm:$0xf] }
 0x811   :  { %6638 = vmatpush.bf16.msra.mxu0 %v9451_v37  ;;  %6651 = vmatpush.bf16.msra.mxu1 %v9963_v38  ;;  %v16076_v34 = vsel %vm6917_vm0, %v6873_v31, %v6905_v23  ;;  %v9779_v37 = vor.u32 %v10750_v24, %v9778_v22  ;;  %v10291_v38 = vor.u32 %v10878_v57, %v10290_v25  ;;  %v10830_v26 = vld [vmem:[%s16527_s18 + $0x66c] sm:$0xf0]  ;;  %v10694_v24 = vld [vmem:[%s16527_s18 + $0x234] sm:$0xf] }
 0x812   :  { %6664 = vmatpush.bf16.msrb.mxu2 %v9455_v39  ;;  %6677 = vmatpush.bf16.msrb.mxu3 %v9967_v14  ;;  %v9714_v39 = vld [vmem:[%s16527_s18 + $0x330] sm:$0xf]  ;;  %v10726_v14 = vld [vmem:[%s16527_s18 + $0x334] sm:$0xf]  ;;  %v10167_v22 = vor.u32 %v10838_v45, %v10164_v59  ;;  %v10099_v20 = vor.u32 %v10830_v26, %v10098_v0  ;;  %v6796_v45 = vperm.slane %v15948_v49, 3 }
 0x813   :  { %v9715_v62 = vor.u32 %v10734_v40, %v9714_v39  ;;  %v9719_v52 = vor.u32 %v10726_v14, %v9716_v43  ;;  %v9588_v25 = vld [vmem:[%s16527_s18 + $0x270] sm:$0xf0]  ;;  %v9522_v30 = vld [vmem:[%s16527_s18 + $0x1b0] sm:$0xf] }
 0x814   :  { %v10100_v57 = vld [vmem:[%s16527_s18 + $0x670] sm:$0xf0]  ;;  %v10686_v31 = vld [vmem:[%s16527_s18 + $0x1ec] sm:$0xf0] }
 0x815   :  { %6639 = vmatpush.bf16.msra.mxu0 %v9387_v56  ;;  %6652 = vmatpush.bf16.msra.mxu1 %v9899_v19  ;;  %v10846_v56 = vld [vmem:[%s16527_s18 + $0x6ec] sm:$0xf0]  ;;  %v10710_v19 = vld [vmem:[%s16527_s18 + $0x2b4] sm:$0xf]  ;;  %v9523_v29 = vor.u32 %v10686_v31, %v9522_v30 }
 0x816   :  { %6665 = vmatpush.bf16.msrb.mxu2 %v9391_v58  ;;  %6678 = vmatpush.bf16.msrb.mxu3 %v9903_v21  ;;  %v9652_v58 = vld [vmem:[%s16527_s18 + $0x2f0] sm:$0xf0]  ;;  %v10163_v7 = vor.u32 %v10846_v56, %v10162_v55  ;;  %v9458_v14 = vld [vmem:[%s16527_s18 + $0x130] sm:$0xf] }
 0x817   :  { %v9655_v21 = vor.u32 %v10710_v19, %v9652_v58  ;;  %v9524_v40 = vld [vmem:[%s16527_s18 + $0x1f0] sm:$0xf0]  ;;  %v10670_v43 = vld [vmem:[%s16527_s18 + $0x16c] sm:$0xf0] }
 0x818   :  { %v10798_v51 = vld [vmem:[%s16527_s18 + $0x56c] sm:$0xf0]  ;;  %v9460_v55 = vld [vmem:[%s16527_s18 + $0x170] sm:$0xf0] }
 0x819   :  { %6640 = vmatpush.bf16.msra.mxu0 %v9323_v27  ;;  %6653 = vmatpush.bf16.msra.mxu1 %v9835_v10  ;;  %v6434_v15 = vpop.f32.mrf.mxu0  ;;  %v6447_v16 = vpop.f32.mrf.mxu1  ;;  %v6795_v27 = vperm.slane %v15948_v49, 2  ;;  %v9587_v10 = vor.u32 %v10702_v3, %v9586_v63  ;;  %v10790_v56 = vld [vmem:[%s16527_s18 + $0x534] sm:$0xf]  ;;  %v10654_v63 = vld [vmem:[%s16527_s18 + $0xec] sm:$0xf0]  ;;  %v9459_v3 = vor.u32 %v10670_v43, %v9458_v14 }
 0x81a   :  { %6666 = vmatpush.bf16.msrb.mxu2 %v9327_v32  ;;  %6679 = vmatpush.bf16.msrb.mxu3 %v9839_v33  ;;  %v6435_v23 = vadd.f32 %v6434_v15, %v14620_v9  ;;  %v9591_v32 = vor.u32 %v10694_v24, %v9588_v25  ;;  %v10103_v33 = vor.u32 %v10822_v6, %v10100_v57  ;;  %v10034_v9 = vld [vmem:[%s16527_s18 + $0x5b0] sm:$0xf]  ;;  %v9972_v19 = vld [vmem:[%s16527_s18 + $0x570] sm:$0xf0]  ;;  %v9786_v14 = vld [vmem:[%s16527_s18 + $0x3b8] sm:$0xf] }
 0x81b   :  { %v9463_v24 = vor.u32 %v10662_v2, %v9460_v55  ;;  %v9975_v25 = vor.u32 %v10790_v56, %v9972_v19  ;;  %v10646_v6 = vld [vmem:[%s16527_s18 + $0xb4] sm:$0xf]  ;;  %v10766_v30 = vld [vmem:[%s16527_s18 + $0x46c] sm:$0xf0]  ;;  %v10751_v43 = vld [vmem:[%s16527_s18 + $0x3f4] sm:$0xf0] }
 0x81c   :  { %6641 = vmatmul.bf16.vlgmr.msra.gmra.mxu0 %v13141_v11  ;;  %6654 = vmatmul.bf16.vlgmr.msra.gmra.mxu1 %v13144_v17  ;;  %v6448_v39 = vadd.f32 %v6447_v16, %v6435_v23  ;;  %v9396_v57 = vld [vmem:[%s16527_s18 + $0xf0] sm:$0xf0]  ;;  %v10871_v56 = vld [vmem:[%s16527_s18 + $0x7bc] sm:$0xf] }
 0x81d   :  { %6685 = vmatpush.bf16.msrb.mxu0 %v9779_v37  ;;  %6698 = vmatpush.bf16.msrb.mxu1 %v10291_v38  ;;  %v10814_v37 = vld [vmem:[%s16527_s18 + $0x5ec] sm:$0xf0]  ;;  %v10678_v38 = vld [vmem:[%s16527_s18 + $0x1b4] sm:$0xf]  ;;  %v10300_v19 = vld [vmem:[%s16527_s18 + $0x7f8] sm:$0xf0] }
 0x81e   :  { %6711 = vmatpush.bf16.msra.mxu2 %v9783_v41  ;;  %6724 = vmatpush.bf16.msra.mxu3 %v10295_v42  ;;  %v10806_v41 = vld [vmem:[%s16527_s18 + $0x5b4] sm:$0xf]  ;;  %v10035_v35 = vor.u32 %v10814_v37, %v10034_v9  ;;  %v6827_v44 = vadd.f32 %v6795_v27, %v6448_v39  ;;  %v9527_v50 = vor.u32 %v10678_v38, %v9524_v40  ;;  %v9330_v27 = vld [vmem:[%s16527_s18 + $0x30] sm:$0xf] }
 0x81f   :  { %6667 = vmatmul.bf16.vlgmr.msrb.gmra.mxu2 %v13141_v11  ;;  %6680 = vmatmul.bf16.vlgmr.msrb.gmra.mxu3 %v13144_v17  ;;  %v10036_v42 = vld [vmem:[%s16527_s18 + $0x5f0] sm:$0xf0] }
 0x820   :  { %v6859_v0 = vmul.f32 0.1, %v6827_v44  ;;  %vm6843_vm2 = vcmp.ge.f32.partialorder %v6827_v44, 0.0  ;;  %v10774_v15 = vld [vmem:[%s16527_s18 + $0x4b4] sm:$0xf] }
 0x821   :  { %6686 = vmatpush.bf16.msrb.mxu0 %v9715_v62  ;;  %6699 = vmatpush.bf16.msrb.mxu1 %v10227_v47  ;;  %v10039_v62 = vor.u32 %v10806_v41, %v10036_v42  ;;  %v9970_v47 = vld [vmem:[%s16527_s18 + $0x530] sm:$0xf]  ;;  %v6436_v59 = vpop.f32.mrf.mxu0  ;;  %v9908_v16 = vld [vmem:[%s16527_s18 + $0x4f0] sm:$0xf0] }
 0x822   :  { %6712 = vmatpush.bf16.msra.mxu2 %v9719_v52  ;;  %6725 = vmatpush.bf16.msra.mxu3 %v10231_v54  ;;  %v6460_v52 = vpop.f32.mrf.mxu2  ;;  %v6473_v54 = vpop.f32.mrf.mxu3  ;;  %v10630_v9 = vld [vmem:[%s16527_s18 + $0x34] sm:$0xf]  ;;  %v6875_v39 = vsel %vm6843_vm2, %v6827_v44, %v6859_v0  ;;  %v9911_v41 = vor.u32 %v10774_v15, %v9908_v16  ;;  %v10298_v44 = vld [vmem:[%s16527_s18 + $0x7b8] sm:$0xf] }
 0x823   :  { %v6461_v58 = vadd.f32 %v6460_v52, %v14673_v46  ;;  %v9906_v46 = vld [vmem:[%s16527_s18 + $0x4b0] sm:$0xf]  ;;  %v9332_v37 = vld [vmem:[%s16527_s18 + $0x70] sm:$0xf0]  ;;  %v6906_v2 = vrot.slane %v6875_v39, 4 }
 0x824   :  { %v10758_v38 = vld [vmem:[%s16527_s18 + $0x434] sm:$0xf]  ;;  %v10234_v0 = vld [vmem:[%s16527_s18 + $0x738] sm:$0xf] }
 0x825   :  { %6687 = vmatpush.bf16.msrb.mxu0 %v9651_v60  ;;  %6700 = vmatpush.bf16.msrb.mxu1 %v10163_v7  ;;  %v6449_v60 = vpop.f32.mrf.mxu1  ;;  %v9394_v7 = vld [vmem:[%s16527_s18 + $0xb0] sm:$0xf]  ;;  %v6474_v26 = vadd.f32 %v6473_v54, %v6461_v58  ;;  %v9844_v42 = vld [vmem:[%s16527_s18 + $0x470] sm:$0xf0]  ;;  %v9335_v58 = vor.u32 %v10630_v9, %v9332_v37  ;;  %v9658_v16 = vld [vmem:[%s16527_s18 + $0x2b8] sm:$0xf] }
 0x826   :  { %6713 = vmatpush.bf16.msra.mxu2 %v9655_v21  ;;  %6726 = vmatpush.bf16.msra.mxu3 %v10167_v22  ;;  %v9971_v21 = vor.u32 %v10798_v51, %v9970_v47  ;;  %v10782_v22 = vld [vmem:[%s16527_s18 + $0x4ec] sm:$0xf0]  ;;  %v9395_v31 = vor.u32 %v10654_v63, %v9394_v7  ;;  %v10743_v47 = vld [vmem:[%s16527_s18 + $0x3bc] sm:$0xf]  ;;  %v9787_v60 = vor.u32 %v10751_v43, %v9786_v14  ;;  %v9722_v63 = vld [vmem:[%s16527_s18 + $0x338] sm:$0xf] }
 0x827   :  { %v6828_v23 = vadd.f32 %v6796_v45, %v6474_v26  ;;  %v9788_v51 = vld [vmem:[%s16527_s18 + $0x3f8] sm:$0xf0]  ;;  %v9847_v45 = vor.u32 %v10758_v38, %v9844_v42  ;;  %v10863_v26 = vld [vmem:[%s16527_s18 + $0x774] sm:$0xf0] }
 0x828   :  { %v10235_v15 = vor.u32 %v10863_v26, %v10234_v0  ;;  %v10172_v9 = vld [vmem:[%s16527_s18 + $0x6f8] sm:$0xf0]  ;;  %v9594_v39 = vld [vmem:[%s16527_s18 + $0x238] sm:$0xf] }
 0x829   :  { %6688 = vmatpush.bf16.msrb.mxu0 %v9587_v10  ;;  %6701 = vmatpush.bf16.msrb.mxu1 %v10099_v20  ;;  %v10638_v10 = vld [vmem:[%s16527_s18 + $0x6c] sm:$0xf0]  ;;  %vm6844_vm4 = vcmp.ge.f32.partialorder %v6828_v23, 0.0  ;;  %v6860_v40 = vmul.f32 0.1, %v6828_v23 }
 0x82a   :  { %6714 = vmatpush.bf16.msra.mxu2 %v9591_v32  ;;  %6727 = vmatpush.bf16.msra.mxu3 %v10103_v33  ;;  %v9842_v20 = vld [vmem:[%s16527_s18 + $0x430] sm:$0xf]  ;;  %v9907_v32 = vor.u32 %v10782_v22, %v9906_v46  ;;  %v9399_v33 = vor.u32 %v10646_v6, %v9396_v57  ;;  %v9331_v54 = vor.u32 %v10638_v10, %v9330_v27  ;;  %v10236_v6 = vld [vmem:[%s16527_s18 + $0x778] sm:$0xf0]  ;;  %v9978_v0 = vld [vmem:[%s16527_s18 + $0x538] sm:$0xf] }
 0x82b   :  { %v9843_v55 = vor.u32 %v10766_v30, %v9842_v20  ;;  %v9791_v46 = vor.u32 %v10743_v47, %v9788_v51  ;;  %v10303_v22 = vor.u32 %v10871_v56, %v10300_v19  ;;  %v10170_v20 = vld [vmem:[%s16527_s18 + $0x6b8] sm:$0xf]  ;;  %v10695_v14 = vld [vmem:[%s16527_s18 + $0x23c] sm:$0xf] }
 0x82c   :  { %v10847_v30 = vld [vmem:[%s16527_s18 + $0x6f4] sm:$0xf0]  ;;  %v9596_v43 = vld [vmem:[%s16527_s18 + $0x278] sm:$0xf0] }
 0x82d   :  { %6689 = vmatpush.bf16.msrb.mxu0 %v9523_v29  ;;  %6702 = vmatpush.bf16.msrb.mxu1 %v10035_v35  ;;  %v6462_v29 = vpop.f32.mrf.mxu2  ;;  %v6475_v35 = vpop.f32.mrf.mxu3  ;;  %v10171_v38 = vor.u32 %v10847_v30, %v10170_v20  ;;  %v9599_v56 = vor.u32 %v10695_v14, %v9596_v43  ;;  %v6798_v20 = vperm.slane %v15948_v49, 5  ;;  %v10775_v14 = vld [vmem:[%s16527_s18 + $0x4bc] sm:$0xf] }
 0x82e   :  { %6715 = vmatpush.bf16.msra.mxu2 %v9527_v50  ;;  %6728 = vmatpush.bf16.msra.mxu3 %v10039_v62  ;;  %v6876_v50 = vsel %vm6844_vm4, %v6828_v23, %v6860_v40  ;;  %v10879_v62 = vld [vmem:[%s16527_s18 + $0x7f4] sm:$0xf0]  ;;  %v9916_v43 = vld [vmem:[%s16527_s18 + $0x4f8] sm:$0xf0] }
 0x82f   :  { %v6907_v52 = vrot.slane %v6876_v50, 2  ;;  %v10299_v7 = vor.u32 %v10879_v62, %v10298_v44  ;;  %v10719_v23 = vld [vmem:[%s16527_s18 + $0x2f4] sm:$0xf0]  ;;  %v10823_v44 = vld [vmem:[%s16527_s18 + $0x63c] sm:$0xf] }
 0x830   :  { %v9659_v37 = vor.u32 %v10719_v23, %v9658_v16  ;;  %v10703_v40 = vld [vmem:[%s16527_s18 + $0x274] sm:$0xf0]  ;;  %v10108_v50 = vld [vmem:[%s16527_s18 + $0x678] sm:$0xf0] }
 0x831   :  { %6690 = vmatpush.bf16.msrb.mxu0 %v9459_v3  ;;  %6703 = vmatpush.bf16.msrb.mxu1 %v9971_v21  ;;  %v6920_v59 = vsel %vm6919_vm1, %v6906_v2, %v6907_v52  ;;  %v10735_v3 = vld [vmem:[%s16527_s18 + $0x374] sm:$0xf0]  ;;  %v9595_v51 = vor.u32 %v10703_v40, %v9594_v39  ;;  %v10111_v19 = vor.u32 %v10823_v44, %v10108_v50  ;;  %v10791_v23 = vld [vmem:[%s16527_s18 + $0x53c] sm:$0xf] }
 0x832   :  { %6716 = vmatpush.bf16.msra.mxu2 %v9463_v24  ;;  %6729 = vmatpush.bf16.msra.mxu3 %v9975_v25  ;;  %v6922_v21 = vsel %vm6921_vm3, %v16076_v34, %v6920_v59  ;;  %v10727_v24 = vld [vmem:[%s16527_s18 + $0x33c] sm:$0xf]  ;;  %v9723_v57 = vor.u32 %v10735_v3, %v9722_v63  ;;  %v10106_v29 = vld [vmem:[%s16527_s18 + $0x638] sm:$0xf]  ;;  %v6797_v63 = vperm.slane %v15948_v49, 4 }
 0x833   :  { %6936 = vst [vmem:[%s16529_s21] sm:$0xff] %v6922_v21  ;;  %v9724_v34 = vld [vmem:[%s16527_s18 + $0x378] sm:$0xf0]  ;;  %v10831_v35 = vld [vmem:[%s16527_s18 + $0x674] sm:$0xf0] }
 0x834   :  { %v10855_v25 = vld [vmem:[%s16527_s18 + $0x73c] sm:$0xf]  ;;  %v9727_v27 = vor.u32 %v10727_v24, %v9724_v34  ;;  %v10107_v2 = vor.u32 %v10831_v35, %v10106_v29  ;;  %v9530_v52 = vld [vmem:[%s16527_s18 + $0x1b8] sm:$0xf] }
 0x835   :  { %6691 = vmatpush.bf16.msrb.mxu0 %v9395_v31  ;;  %6704 = vmatpush.bf16.msrb.mxu1 %v9907_v32  ;;  %v10239_v10 = vor.u32 %v10855_v25, %v10236_v6  ;;  %v10711_v31 = vld [vmem:[%s16527_s18 + $0x2bc] sm:$0xf]  ;;  %v10799_v25 = vld [vmem:[%s16527_s18 + $0x574] sm:$0xf0] }
 0x836   :  { %6717 = vmatpush.bf16.msra.mxu2 %v9399_v33  ;;  %6730 = vmatpush.bf16.msra.mxu3 %v9911_v41  ;;  %v9660_v32 = vld [vmem:[%s16527_s18 + $0x2f8] sm:$0xf0]  ;;  %v9338_v50 = vld [vmem:[%s16527_s18 + $0x38] sm:$0xf] }
 0x837   :  { %v10839_v33 = vld [vmem:[%s16527_s18 + $0x6bc] sm:$0xf]  ;;  %v9663_v41 = vor.u32 %v10711_v31, %v9660_v32 }
 0x838   :  { %v10175_v42 = vor.u32 %v10839_v33, %v10172_v9  ;;  %v10679_v59 = vld [vmem:[%s16527_s18 + $0x1bc] sm:$0xf]  ;;  %v9979_v33 = vor.u32 %v10799_v25, %v9978_v0 }
 0x839   :  { %6692 = vmatpush.bf16.msrb.mxu0 %v9331_v54  ;;  %6705 = vmatpush.bf16.msrb.mxu1 %v9843_v55  ;;  %v6486_v62 = vpop.f32.mrf.mxu0  ;;  %v6499_v47 = vpop.f32.mrf.mxu1  ;;  %v10687_v54 = vld [vmem:[%s16527_s18 + $0x1f4] sm:$0xf0]  ;;  %v10663_v6 = vld [vmem:[%s16527_s18 + $0x13c] sm:$0xf] }
 0x83a   :  { %6718 = vmatpush.bf16.msra.mxu2 %v9335_v58  ;;  %6731 = vmatpush.bf16.msra.mxu3 %v9847_v45  ;;  %v6487_v55 = vadd.f32 %v6486_v62, %v14745_v36  ;;  %v10042_v58 = vld [vmem:[%s16527_s18 + $0x5b8] sm:$0xf]  ;;  %v10807_v36 = vld [vmem:[%s16527_s18 + $0x5bc] sm:$0xf]  ;;  %v9531_v3 = vor.u32 %v10687_v54, %v9530_v52 }
 0x83b   :  { %v10815_v45 = vld [vmem:[%s16527_s18 + $0x5f4] sm:$0xf0]  ;;  %v10647_v29 = vld [vmem:[%s16527_s18 + $0xbc] sm:$0xf] }
 0x83c   :  { %6693 = vmatmul.bf16.vlgmr.msrb.gmra.mxu0 %v13141_v11  ;;  %6706 = vmatmul.bf16.vlgmr.msrb.gmra.mxu1 %v13144_v17  ;;  %v10043_v21 = vor.u32 %v10815_v45, %v10042_v58  ;;  %v6500_v26 = vadd.f32 %v6499_v47, %v6487_v55  ;;  %v9404_v35 = vld [vmem:[%s16527_s18 + $0xf8] sm:$0xf0]  ;;  %v10639_v62 = vld [vmem:[%s16527_s18 + $0x74] sm:$0xf0]  ;;  %v9919_v45 = vor.u32 %v10775_v14, %v9916_v43 }
 0x83d   :  { %6737 = vmatpush.bf16.msra.mxu0 %v9787_v60  ;;  %6750 = vmatpush.bf16.msra.mxu1 %v10299_v7  ;;  %v9532_v60 = vld [vmem:[%s16527_s18 + $0x1f8] sm:$0xf0]  ;;  %v9850_v47 = vld [vmem:[%s16527_s18 + $0x438] sm:$0xf]  ;;  %v9407_v52 = vor.u32 %v10647_v29, %v9404_v35  ;;  %v16479_v29 = vld [vmem:[%s16528_s20 + $0x8] sm:$0xff] }
 0x83e   :  { %6763 = vmatpush.bf16.msrb.mxu2 %v9791_v46  ;;  %6776 = vmatpush.bf16.msrb.mxu3 %v10303_v22  ;;  %v10044_v7 = vld [vmem:[%s16527_s18 + $0x5f8] sm:$0xf0]  ;;  %v9466_v46 = vld [vmem:[%s16527_s18 + $0x138] sm:$0xf]  ;;  %v9535_v24 = vor.u32 %v10679_v59, %v9532_v60  ;;  %v6829_v39 = vadd.f32 %v6797_v63, %v6500_v26  ;;  %v6801_v14 = vperm.slane %v16479_v29, 0 }
 0x83f   :  { %6719 = vmatmul.bf16.vlgmr.msra.gmra.mxu2 %v13141_v11  ;;  %6732 = vmatmul.bf16.vlgmr.msra.gmra.mxu3 %v13144_v17  ;;  %v10671_v22 = vld [vmem:[%s16527_s18 + $0x174] sm:$0xf0]  ;;  %v10047_v34 = vor.u32 %v10807_v36, %v10044_v7  ;;  %v10631_v55 = vld [vmem:[%s16527_s18 + $0x3c] sm:$0xf] }
 0x840   :  { %v9467_v32 = vor.u32 %v10671_v22, %v9466_v46  ;;  %v10767_v54 = vld [vmem:[%s16527_s18 + $0x474] sm:$0xf0]  ;;  %vm6845_vm6 = vcmp.ge.f32.partialorder %v6829_v39, 0.0  ;;  %v10759_v36 = vld [vmem:[%s16527_s18 + $0x43c] sm:$0xf] }
 0x841   :  { %6738 = vmatpush.bf16.msra.mxu0 %v9723_v57  ;;  %6751 = vmatpush.bf16.msra.mxu1 %v10235_v15  ;;  %v9468_v57 = vld [vmem:[%s16527_s18 + $0x178] sm:$0xf0]  ;;  %v6488_v30 = vpop.f32.mrf.mxu0  ;;  %v6501_v31 = vpop.f32.mrf.mxu1  ;;  %v9851_v46 = vor.u32 %v10767_v54, %v9850_v47 }
 0x842   :  { %6764 = vmatpush.bf16.msrb.mxu2 %v9727_v27  ;;  %6777 = vmatpush.bf16.msrb.mxu3 %v10239_v10  ;;  %v6512_v15 = vpop.f32.mrf.mxu2  ;;  %v6525_v16 = vpop.f32.mrf.mxu3  ;;  %v9980_v27 = vld [vmem:[%s16527_s18 + $0x578] sm:$0xf0]  ;;  %v9471_v9 = vor.u32 %v10663_v6, %v9468_v57  ;;  %v6799_v57 = vperm.slane %v15948_v49, 6 }
 0x843   :  { %v6513_v10 = vadd.f32 %v6512_v15, %v14795_v53  ;;  %v9914_v53 = vld [vmem:[%s16527_s18 + $0x4b8] sm:$0xf]  ;;  %v9852_v7 = vld [vmem:[%s16527_s18 + $0x478] sm:$0xf0] }
 0x844   :  { %v9855_v26 = vor.u32 %v10759_v36, %v9852_v7 }
 0x845   :  { %6739 = vmatpush.bf16.msra.mxu0 %v9659_v37  ;;  %6752 = vmatpush.bf16.msra.mxu1 %v10171_v38  ;;  %v9402_v37 = vld [vmem:[%s16527_s18 + $0xb8] sm:$0xf]  ;;  %v6526_v40 = vadd.f32 %v6525_v16, %v6513_v10 }
 0x846   :  { %6765 = vmatpush.bf16.msrb.mxu2 %v9663_v41  ;;  %6778 = vmatpush.bf16.msrb.mxu3 %v10175_v42  ;;  %v10655_v38 = vld [vmem:[%s16527_s18 + $0xf4] sm:$0xf0]  ;;  %v9983_v41 = vor.u32 %v10791_v23, %v9980_v27 }
 0x847   :  { %v10783_v42 = vld [vmem:[%s16527_s18 + $0x4f4] sm:$0xf0]  ;;  %v6830_v44 = vadd.f32 %v6798_v20, %v6526_v40  ;;  %v6800_v20 = vperm.slane %v15948_v49, 7 }
 0x849   :  { %6740 = vmatpush.bf16.msra.mxu0 %v9595_v51  ;;  %6753 = vmatpush.bf16.msra.mxu1 %v10107_v2  ;;  %v9403_v51 = vor.u32 %v10655_v38, %v9402_v37  ;;  %v9915_v2 = vor.u32 %v10783_v42, %v9914_v53  ;;  %vm6846_vm5 = vcmp.ge.f32.partialorder %v6830_v44, 0.0  ;;  %v6862_v58 = vmul.f32 0.1, %v6830_v44 }
 0x84a   :  { %6766 = vmatpush.bf16.msrb.mxu2 %v9599_v56  ;;  %6779 = vmatpush.bf16.msrb.mxu3 %v10111_v19  ;;  %v9340_v56 = vld [vmem:[%s16527_s18 + $0x78] sm:$0xf0]  ;;  %v6861_v19 = vmul.f32 0.1, %v6829_v39  ;;  %v6514_v59 = vpop.f32.mrf.mxu2  ;;  %v6527_v60 = vpop.f32.mrf.mxu3 }
 0x84b   :  { %v6878_v63 = vsel %vm6846_vm5, %v6830_v44, %v6862_v58  ;;  %v9343_v0 = vor.u32 %v10631_v55, %v9340_v56 }
 0x84c   :  { %v6877_v22 = vsel %vm6845_vm6, %v6829_v39, %v6861_v19 }
 0x84d   :  { %6741 = vmatpush.bf16.msra.mxu0 %v9531_v3  ;;  %6754 = vmatpush.bf16.msra.mxu1 %v10043_v21  ;;  %v6908_v3 = vrot.slane %v6878_v63, 6  ;;  %v9339_v21 = vor.u32 %v10639_v62, %v9338_v50  ;;  %v6802_v62 = vperm.slane %v16479_v29, 1  ;;  %v6803_v63 = vperm.slane %v16479_v29, 2 }
 0x84e   :  { %6767 = vmatpush.bf16.msrb.mxu2 %v9535_v24  ;;  %6780 = vmatpush.bf16.msrb.mxu3 %v10047_v34 }
 0x84f   :  { %v6923_v24 = vsel %vm6917_vm0, %v6877_v22, %v6908_v3 }
 0x851   :  { %6742 = vmatpush.bf16.msra.mxu0 %v9467_v32  ;;  %6755 = vmatpush.bf16.msra.mxu1 %v9979_v33 }
 0x852   :  { %6768 = vmatpush.bf16.msrb.mxu2 %v9471_v9  ;;  %6781 = vmatpush.bf16.msrb.mxu3 %v9983_v41 }
 0x855   :  { %6743 = vmatpush.bf16.msra.mxu0 %v9403_v51  ;;  %6756 = vmatpush.bf16.msra.mxu1 %v9915_v2 }
 0x856   :  { %6769 = vmatpush.bf16.msrb.mxu2 %v9407_v52  ;;  %6782 = vmatpush.bf16.msrb.mxu3 %v9919_v45 }
 0x859   :  { %6744 = vmatpush.bf16.msra.mxu0 %v9339_v21  ;;  %6757 = vmatpush.bf16.msra.mxu1 %v9851_v46  ;;  %v6538_v34 = vpop.f32.mrf.mxu0  ;;  %v6551_v25 = vpop.f32.mrf.mxu1 }
 0x85a   :  { %6770 = vmatpush.bf16.msrb.mxu2 %v9343_v0  ;;  %6783 = vmatpush.bf16.msrb.mxu3 %v9855_v26  ;;  %v6539_v6 = vadd.f32 %v6538_v34, %v14945_v18  ;;  %v6804_v26 = vperm.slane %v16479_v29, 3 }
 0x85c   :  { %6745 = vmatmul.bf16.vlgmr.msra.gmra.mxu0 %v13141_v11  ;;  %6758 = vmatmul.bf16.vlgmr.msra.gmra.mxu1 %v13144_v17  ;;  %v6552_v15 = vadd.f32 %v6551_v25, %v6539_v6 }
 0x85d   :  { %6771 = vmatmul.bf16.vlgmr.msrb.gmra.mxu2 %v13141_v11  ;;  %6784 = vmatmul.bf16.vlgmr.msrb.gmra.mxu3 %v13144_v17 }
 0x85e   :  { %v6831_v16 = vadd.f32 %v6799_v57, %v6552_v15 }
 0x860   :  { %v6863_v32 = vmul.f32 0.1, %v6831_v16  ;;  %vm6847_vm7 = vcmp.ge.f32.partialorder %v6831_v16, 0.0 }
 0x861   :  { %v6540_v30 = vpop.f32.mrf.mxu0  ;;  %v6553_v31 = vpop.f32.mrf.mxu1 }
 0x862   :  { %v6564_v23 = vpop.f32.mrf.mxu2  ;;  %v6577_v27 = vpop.f32.mrf.mxu3  ;;  %v6879_v33 = vsel %vm6847_vm7, %v6831_v16, %v6863_v32 }
 0x863   :  { %v6565_v10 = vadd.f32 %v6564_v23, %v14995_v1  ;;  %v6909_v53 = vrot.slane %v6879_v33, 4  ;;  %v6805_v33 = vperm.slane %v16479_v29, 4 }
 0x865   :  { %v6578_v11 = vadd.f32 %v6577_v27, %v6565_v10 }
 0x867   :  { %v6832_v17 = vadd.f32 %v6800_v20, %v6578_v11 }
 0x869   :  { %vm6848_vm8 = vcmp.ge.f32.partialorder %v6832_v17, 0.0  ;;  %v6864_v9 = vmul.f32 0.1, %v6832_v17 }
 0x86a   :  { %v6566_v18 = vpop.f32.mrf.mxu2  ;;  %v6579_v37 = vpop.f32.mrf.mxu3 }
 0x86b   :  { %v6880_v38 = vsel %vm6848_vm8, %v6832_v17, %v6864_v9 }
 0x86c   :  { %v6910_v39 = vrot.slane %v6880_v38, 2  ;;  %v6806_v38 = vperm.slane %v16479_v29, 5 }
 0x86e   :  { %v6924_v40 = vsel %vm6919_vm1, %v6909_v53, %v6910_v39 }
 0x86f   :  { %v6925_v1 = vsel %vm6921_vm3, %v6923_v24, %v6924_v40 }
 0x870   :  { %6937 = vst [vmem:[%s16529_s21 + $0x8] sm:$0xff] %v6925_v1 }
 0x879   :  { %v6590_v49 = vpop.f32.mrf.mxu0  ;;  %v6603_v41 = vpop.f32.mrf.mxu1 }
 0x87a   :  { %v6591_v42 = vadd.f32 %v6590_v49, %v15145_v8 }
 0x87c   :  { %v6604_v35 = vadd.f32 %v6603_v41, %v6591_v42 }
 0x87e   :  { %v6833_v2 = vadd.f32 %v6801_v14, %v6604_v35 }
 0x880   :  { %v6865_v8 = vmul.f32 0.1, %v6833_v2  ;;  %vm6849_vm10 = vcmp.ge.f32.partialorder %v6833_v2, 0.0 }
 0x881   :  { %v6592_v47 = vpop.f32.mrf.mxu0  ;;  %v6605_v51 = vpop.f32.mrf.mxu1 }
 0x882   :  { %v6616_v43 = vpop.f32.mrf.mxu2  ;;  %v6629_v44 = vpop.f32.mrf.mxu3  ;;  %v6881_v59 = vsel %vm6849_vm10, %v6833_v2, %v6865_v8  ;;  %v6807_v51 = vperm.slane %v16479_v29, 6 }
 0x883   :  { %v6617_v50 = vadd.f32 %v6616_v43, %v15195_v61 }
 0x885   :  { %v6630_v52 = vadd.f32 %v6629_v44, %v6617_v50 }
 0x887   :  { %v6834_v54 = vadd.f32 %v6802_v62, %v6630_v52 }
 0x889   :  { %vm6850_vm9 = vcmp.ge.f32.partialorder %v6834_v54, 0.0  ;;  %v6866_v55 = vmul.f32 0.1, %v6834_v54 }
 0x88a   :  { %v6618_v56 = vpop.f32.mrf.mxu2  ;;  %v6631_v19 = vpop.f32.mrf.mxu3 }
 0x88b   :  { %v6882_v58 = vsel %vm6850_vm9, %v6834_v54, %v6866_v55  ;;  %v6808_v56 = vperm.slane %v16479_v29, 7 }
 0x88c   :  { %v6911_v45 = vrot.slane %v6882_v58, 6 }
 0x88e   :  { %v6926_v60 = vsel %vm6917_vm0, %v6881_v59, %v6911_v45 }
 0x899   :  { %v6642_v36 = vpop.f32.mrf.mxu0  ;;  %v6655_v61 = vpop.f32.mrf.mxu1 }
 0x89a   :  { %v6643_v7 = vadd.f32 %v6642_v36, %v15345_v12 }
 0x89c   :  { %v6656_v3 = vadd.f32 %v6655_v61, %v6643_v7 }
 0x89e   :  { %v6835_v21 = vadd.f32 %v6803_v63, %v6656_v3 }
 0x8a0   :  { %v6867_v25 = vmul.f32 0.1, %v6835_v21  ;;  %vm6851_vm11 = vcmp.ge.f32.partialorder %v6835_v21, 0.0 }
 0x8a1   :  { %v6644_v24 = vpop.f32.mrf.mxu0  ;;  %v6657_v34 = vpop.f32.mrf.mxu1 }
 0x8a2   :  { %v6668_v46 = vpop.f32.mrf.mxu2  ;;  %v6681_v22 = vpop.f32.mrf.mxu3  ;;  %v6883_v15 = vsel %vm6851_vm11, %v6835_v21, %v6867_v25 }
 0x8a3   :  { %v6669_v0 = vadd.f32 %v6668_v46, %v15395_v48  ;;  %v6912_v10 = vrot.slane %v6883_v15, 4 }
 0x8a5   :  { %v6682_v6 = vadd.f32 %v6681_v22, %v6669_v0 }
 0x8a7   :  { %v6836_v57 = vadd.f32 %v6804_v26, %v6682_v6 }
 0x8a9   :  { %vm6852_vm12 = vcmp.ge.f32.partialorder %v6836_v57, 0.0  ;;  %v6868_v16 = vmul.f32 0.1, %v6836_v57 }
 0x8aa   :  { %v6670_v12 = vpop.f32.mrf.mxu2  ;;  %v6683_v23 = vpop.f32.mrf.mxu3 }
 0x8ab   :  { %v6884_v27 = vsel %vm6852_vm12, %v6836_v57, %v6868_v16 }
 0x8ac   :  { %v6913_v20 = vrot.slane %v6884_v27, 2 }
 0x8ae   :  { %v6927_v30 = vsel %vm6919_vm1, %v6912_v10, %v6913_v20 }
 0x8af   :  { %v6928_v48 = vsel %vm6921_vm3, %v6926_v60, %v6927_v30 }
 0x8b0   :  { %6938 = vst [vmem:[%s16529_s21 + $0x10] sm:$0xff] %v6928_v48 }
 0x8b9   :  { %v6694_v31 = vpop.f32.mrf.mxu0  ;;  %v6707_v32 = vpop.f32.mrf.mxu1 }
 0x8ba   :  { %v6695_v11 = vadd.f32 %v6694_v31, %v15545_v28 }
 0x8bc   :  { %v6708_v17 = vadd.f32 %v6707_v32, %v6695_v11 }
 0x8be   :  { %v6837_v40 = vadd.f32 %v6805_v33, %v6708_v17 }
 0x8c0   :  { %v6869_v41 = vmul.f32 0.1, %v6837_v40  ;;  %vm6853_vm14 = vcmp.ge.f32.partialorder %v6837_v40, 0.0 }
 0x8c1   :  { %v6696_v53 = vpop.f32.mrf.mxu0  ;;  %v6709_v39 = vpop.f32.mrf.mxu1 }
 0x8c2   :  { %v6720_v9 = vpop.f32.mrf.mxu2  ;;  %v6733_v18 = vpop.f32.mrf.mxu3  ;;  %v6885_v44 = vsel %vm6853_vm14, %v6837_v40, %v6869_v41 }
 0x8c3   :  { %v6721_v37 = vadd.f32 %v6720_v9, %v15595_v5 }
 0x8c5   :  { %v6734_v1 = vadd.f32 %v6733_v18, %v6721_v37 }
 0x8c7   :  { %v6838_v49 = vadd.f32 %v6806_v38, %v6734_v1 }
 0x8c9   :  { %vm6854_vm13 = vcmp.ge.f32.partialorder %v6838_v49, 0.0  ;;  %v6870_v42 = vmul.f32 0.1, %v6838_v49 }
 0x8ca   :  { %v6722_v35 = vpop.f32.mrf.mxu2  ;;  %v6735_v28 = vpop.f32.mrf.mxu3 }
 0x8cb   :  { %v6886_v14 = vsel %vm6854_vm13, %v6838_v49, %v6870_v42 }
 0x8cc   :  { %v6914_v43 = vrot.slane %v6886_v14, 6 }
 0x8ce   :  { %v6929_v50 = vsel %vm6917_vm0, %v6885_v44, %v6914_v43 }
 0x8d9   :  { %v6746_v62 = vpop.f32.mrf.mxu0  ;;  %v6759_v5 = vpop.f32.mrf.mxu1 }
 0x8da   :  { %v6747_v47 = vadd.f32 %v6746_v62, %v15745_v13 }
 0x8dc   :  { %v6760_v2 = vadd.f32 %v6759_v5, %v6747_v47 }
 0x8de   :  { %v6839_v52 = vadd.f32 %v6807_v51, %v6760_v2 }
 0x8e0   :  { %v6772_v54 = vpop.f32.mrf.mxu2  ;;  %v6785_v8 = vpop.f32.mrf.mxu3  ;;  %v6871_v45 = vmul.f32 0.1, %v6839_v52  ;;  %vm6855_vm15 = vcmp.ge.f32.partialorder %v6839_v52, 0.0 }
 0x8e1   :  { %v6773_v55 = vadd.f32 %v6772_v54, %v15795_v4  ;;  %v6748_v19 = vpop.f32.mrf.mxu0  ;;  %v6761_v58 = vpop.f32.mrf.mxu1 }
 0x8e2   :  { %v6887_v36 = vsel %vm6855_vm15, %v6839_v52, %v6871_v45 }
 0x8e3   :  { %v6786_v59 = vadd.f32 %v6785_v8, %v6773_v55  ;;  %v6915_v3 = vrot.slane %v6887_v36, 4 }
 0x8e5   :  { %v6840_v60 = vadd.f32 %v6808_v56, %v6786_v59 }
 0x8e7   :  { %vm6856_vm0 = vcmp.ge.f32.partialorder %v6840_v60, 0.0  ;;  %v6872_v61 = vmul.f32 0.1, %v6840_v60 }
 0x8e8   :  { %v6774_v13 = vpop.f32.mrf.mxu2  ;;  %v6787_v7 = vpop.f32.mrf.mxu3 }
 0x8e9   :  { %v6888_v63 = vsel %vm6856_vm0, %v6840_v60, %v6872_v61 }
 0x8ea   :  { %v6916_v21 = vrot.slane %v6888_v63, 2 }
 0x8ec   :  { %v6930_v46 = vsel %vm6919_vm1, %v6915_v3, %v6916_v21 }
 0x8ed   :  { %v6931_v4 = vsel %vm6921_vm3, %v6929_v50, %v6930_v46 }
 0x8ee   :  { %6939 = vst [vmem:[%s16529_s21 + $0x18] sm:$0xff] %v6931_v4 }

// kernel: u_net_forward.6
= control target key start
LH: loop header
LB: loop body
LE: loop exit
PB: predicated region body
PF: predicated region fallthrough
CT: control target
= control target key end

     0   :  { %s833_s12 = smov 0   ;;  %s957_s0 = inlined_call_operand.vmem [shape: bf16[8,4,64], index: 0, kind: input, shape index: {}]   ;;  %s958_s1 = inlined_call_operand.vmem [shape: bf16[8,64,1024], index: 1, kind: input, shape index: {}]   ;;  %s959_s2 = inlined_call_operand.vmem [shape: f32[4,1], index: 2, kind: input, shape index: {}]   ;;  %s960_s3 = inlined_call_operand.vmem [shape: f32[8,4,1024], index: 3, kind: output, shape index: {}]  }
   0x1 LB: > { %s612_s13 = sadd.s32 4294967295, %s810_s12   ;;  %p616_p0 = scmp.ge.s32.totalorder %s810_s12, 1  ;;  %s810_s12 = sphi %s833_s12, %s13_s12  }
   0x2   : > { %p146_p1 = scmp.lt.s32.totalorder %s810_s12, 9 }
   0x4   : > { %p147_p2 = pnand %p616_p0, %p146_p1 }
   0x5   : > { %p174_p3 = scmp.lt.s32.totalorder (!%p147_p2), %s612_s13, 7 }
   0x6   : > { %150 = sbr.rel (%p147_p2) target bundleno = 192 (0xc0), region = 32 }
   0xb   : > { %s962_s13 = smov (!%p174_p3, %s612_s13), 7  ;;  %v812_v0 = vmov 0   ;;  %vm388_vm0 = vcmask 523264   ;;  %vm532_vm3 = vcmask 1043456  }
   0xc   : > { %s760_s14 = sshll.u32 %s962_s13, 8  ;;  %s617_s18 = sshll.u32 %s962_s13, 1  ;;  %803 = vset.pattern.permute.xlu0 %v812_v0 }
   0xd   : > { %s847_s17 = scalar_lea.vmem %s958_s1, %s760_s14  ;;  %s177_s21 = scalar_lea.vmem %s957_s0, %s617_s18 }
   0xe   : > { %v720_v1 = vld [vmem:[%s847_s17 + $0xc0] sm:$0xf]  ;;  %v786_v3 = vld [vmem:[%s847_s17 + $0xc4] sm:$0xf]  ;;  %v728_v6 = vld [vmem:[%s847_s17 + $0xc8] sm:$0xf] }
   0xf   : > { %v790_v2 = vld [vmem:[%s847_s17 + $0xdc] sm:$0xf0]  ;;  %v722_v5 = vld [vmem:[%s847_s17 + $0xe0] sm:$0xf0]  ;;  %v791_v7 = vld [vmem:[%s847_s17 + $0xe4] sm:$0xf0] }
  0x10   : > { %v721_v4 = vor.u32 %v790_v2, %v720_v1  ;;  %v725_v8 = vor.u32 %v786_v3, %v722_v5  ;;  %v729_v9 = vor.u32 %v791_v7, %v728_v6  ;;  %v787_v10 = vld [vmem:[%s847_s17 + $0xcc] sm:$0xf]  ;;  %v688_v12 = vld [vmem:[%s847_s17 + $0x80] sm:$0xf]  ;;  %v778_v15 = vld [vmem:[%s847_s17 + $0x84] sm:$0xf] }
  0x11   : > { %v730_v11 = vld [vmem:[%s847_s17 + $0xe8] sm:$0xf0]  ;;  %v782_v14 = vld [vmem:[%s847_s17 + $0x9c] sm:$0xf0]  ;;  %v690_v16 = vld [vmem:[%s847_s17 + $0xa0] sm:$0xf0] }
  0x12   : > { %396 = vmatpush.bf16.msra.mxu0 %v721_v4  ;;  %v733_v13 = vor.u32 %v787_v10, %v730_v11  ;;  %409 = vmatpush.bf16.msra.mxu1 %v725_v8  ;;  %v689_v17 = vor.u32 %v782_v14, %v688_v12  ;;  %v693_v18 = vor.u32 %v778_v15, %v690_v16  ;;  %v696_v19 = vld [vmem:[%s847_s17 + $0x88] sm:$0xf]  ;;  %v779_v21 = vld [vmem:[%s847_s17 + $0x8c] sm:$0xf]  ;;  %v656_v24 = vld [vmem:[%s847_s17 + $0x40] sm:$0xf] }
  0x13   : > { %422 = vmatpush.bf16.msra.mxu2 %v729_v9  ;;  %v783_v20 = vld [vmem:[%s847_s17 + $0xa4] sm:$0xf0]  ;;  %v698_v23 = vld [vmem:[%s847_s17 + $0xa8] sm:$0xf0]  ;;  %v774_v25 = vld [vmem:[%s847_s17 + $0x5c] sm:$0xf0] }
  0x14   : > { %435 = vmatpush.bf16.msra.mxu3 %v733_v13  ;;  %v697_v22 = vor.u32 %v783_v20, %v696_v19  ;;  %v701_v26 = vor.u32 %v779_v21, %v698_v23  ;;  %v770_v27 = vld [vmem:[%s847_s17 + $0x44] sm:$0xf]  ;;  %v664_v29 = vld [vmem:[%s847_s17 + $0x48] sm:$0xf]  ;;  %v657_v30 = vor.u32 %v774_v25, %v656_v24  ;;  %v771_v32 = vld [vmem:[%s847_s17 + $0x4c] sm:$0xf] }
  0x15   : > { %v658_v28 = vld [vmem:[%s847_s17 + $0x60] sm:$0xf0]  ;;  %v775_v31 = vld [vmem:[%s847_s17 + $0x64] sm:$0xf0]  ;;  %v666_v33 = vld [vmem:[%s847_s17 + $0x68] sm:$0xf0] }
  0x16   : > { %397 = vmatpush.bf16.msra.mxu0 %v689_v17  ;;  %410 = vmatpush.bf16.msra.mxu1 %v693_v18  ;;  %v661_v34 = vor.u32 %v770_v27, %v658_v28  ;;  %v665_v35 = vor.u32 %v775_v31, %v664_v29  ;;  %v624_v36 = vld [vmem:[%s847_s17] sm:$0xf]  ;;  %v762_v38 = vld [vmem:[%s847_s17 + $0x4] sm:$0xf]  ;;  %v669_v39 = vor.u32 %v771_v32, %v666_v33  ;;  %v632_v41 = vld [vmem:[%s847_s17 + $0x8] sm:$0xf] }
  0x17   : > { %423 = vmatpush.bf16.msra.mxu2 %v697_v22  ;;  %v766_v37 = vld [vmem:[%s847_s17 + $0x1c] sm:$0xf0]  ;;  %v626_v40 = vld [vmem:[%s847_s17 + $0x20] sm:$0xf0]  ;;  %v767_v42 = vld [vmem:[%s847_s17 + $0x24] sm:$0xf0] }
  0x18   : > { %436 = vmatpush.bf16.msra.mxu3 %v701_v26  ;;  %v763_v43 = vld [vmem:[%s847_s17 + $0xc] sm:$0xf]  ;;  %v625_v45 = vor.u32 %v766_v37, %v624_v36  ;;  %v789_v46 = vld [vmem:[%s847_s17 + $0xdc] sm:$0xf]  ;;  %v736_v48 = vld [vmem:[%s847_s17 + $0xd0] sm:$0xf]  ;;  %v629_v49 = vor.u32 %v762_v38, %v626_v40  ;;  %v633_v50 = vor.u32 %v767_v42, %v632_v41 }
  0x19   : > { %v634_v44 = vld [vmem:[%s847_s17 + $0x28] sm:$0xf0]  ;;  %v746_v47 = vld [vmem:[%s847_s17 + $0xf8] sm:$0xf0]  ;;  %v792_v51 = vld [vmem:[%s847_s17 + $0xec] sm:$0xf0] }
  0x1a   : > { %398 = vmatpush.bf16.msra.mxu0 %v657_v30  ;;  %411 = vmatpush.bf16.msra.mxu1 %v661_v34  ;;  %v637_v52 = vor.u32 %v763_v43, %v634_v44  ;;  %v737_v53 = vor.u32 %v792_v51, %v736_v48  ;;  %v788_v54 = vld [vmem:[%s847_s17 + $0xd4] sm:$0xf]  ;;  %v744_v56 = vld [vmem:[%s847_s17 + $0xd8] sm:$0xf]  ;;  %v749_v57 = vor.u32 %v789_v46, %v746_v47  ;;  %v704_v59 = vld [vmem:[%s847_s17 + $0x90] sm:$0xf] }
  0x1b   : > { %424 = vmatpush.bf16.msra.mxu2 %v665_v35  ;;  %v738_v55 = vld [vmem:[%s847_s17 + $0xf0] sm:$0xf0]  ;;  %v793_v58 = vld [vmem:[%s847_s17 + $0xf4] sm:$0xf0]  ;;  %v784_v60 = vld [vmem:[%s847_s17 + $0xac] sm:$0xf0] }
  0x1c   : > { %437 = vmatpush.bf16.msra.mxu3 %v669_v39  ;;  %v897_v61 = vld [vmem:[%s177_s21] sm:$0x3]  ;;  %v781_v62 = vld [vmem:[%s847_s17 + $0x9c] sm:$0xf]  ;;  %v741_v0 = vor.u32 %v788_v54, %v738_v55  ;;  %v745_v1 = vor.u32 %v793_v58, %v744_v56  ;;  %v705_v2 = vor.u32 %v784_v60, %v704_v59  ;;  %v780_v3 = vld [vmem:[%s847_s17 + $0x94] sm:$0xf] }
  0x1d   : > { %v714_v63 = vld [vmem:[%s847_s17 + $0xb8] sm:$0xf0]  ;;  %v706_v4 = vld [vmem:[%s847_s17 + $0xb0] sm:$0xf0]  ;;  %v712_v5 = vld [vmem:[%s847_s17 + $0x98] sm:$0xf] }
  0x1e   : > { %399 = vmatpush.bf16.msra.mxu0 %v625_v45  ;;  %412 = vmatpush.bf16.msra.mxu1 %v629_v49  ;;  %v717_v6 = vor.u32 %v781_v62, %v714_v63  ;;  %v785_v7 = vld [vmem:[%s847_s17 + $0xb4] sm:$0xf0]  ;;  %v672_v8 = vld [vmem:[%s847_s17 + $0x50] sm:$0xf]  ;;  %v773_v10 = vld [vmem:[%s847_s17 + $0x5c] sm:$0xf]  ;;  %v709_v12 = vor.u32 %v780_v3, %v706_v4 }
  0x1f   : > { %425 = vmatpush.bf16.msra.mxu2 %v633_v50  ;;  %v776_v9 = vld [vmem:[%s847_s17 + $0x6c] sm:$0xf0]  ;;  %v682_v11 = vld [vmem:[%s847_s17 + $0x78] sm:$0xf0]  ;;  %v772_v13 = vld [vmem:[%s847_s17 + $0x54] sm:$0xf]  ;;  %v713_v14 = vor.u32 %v785_v7, %v712_v5 }
  0x20   : > { %438 = vmatpush.bf16.msra.mxu3 %v637_v52  ;;  %v673_v15 = vor.u32 %v776_v9, %v672_v8  ;;  %v674_v16 = vld [vmem:[%s847_s17 + $0x70] sm:$0xf0]  ;;  %v680_v17 = vld [vmem:[%s847_s17 + $0x58] sm:$0xf]  ;;  %v222_v18 = vld [vmem:[%s959_s2] sm:$0xf]  ;;  %v685_v19 = vor.u32 %v773_v10, %v682_v11 }
  0x21   : > { %750 = vmatmul.msk.bf16.vlgmr.msra.gmra.mxu0 %vm388_vm0, %v897_v61  ;;  %751 = vmatmul.msk.bf16.vlgmr.msra.gmra.mxu1 %vm388_vm0, %v897_v61  ;;  %v777_v20 = vld [vmem:[%s847_s17 + $0x74] sm:$0xf0]  ;;  %v640_v21 = vld [vmem:[%s847_s17 + $0x10] sm:$0xf]  ;;  %v765_v23 = vld [vmem:[%s847_s17 + $0x1c] sm:$0xf]  ;;  %v677_v25 = vor.u32 %v772_v13, %v674_v16 }
  0x22   : > { %448 = vmatpush.bf16.msrb.mxu0 %v737_v53  ;;  %752 = vmatmul.msk.bf16.vlgmr.msra.gmra.mxu2 %vm388_vm0, %v897_v61  ;;  %v768_v22 = vld [vmem:[%s847_s17 + $0x2c] sm:$0xf0]  ;;  %v650_v24 = vld [vmem:[%s847_s17 + $0x38] sm:$0xf0]  ;;  %v681_v26 = vor.u32 %v777_v20, %v680_v17  ;;  %v764_v28 = vld [vmem:[%s847_s17 + $0x14] sm:$0xf] }
  0x23   : > { %753 = vmatmul.msk.bf16.vlgmr.msra.gmra.mxu3 %vm388_vm0, %v897_v61  ;;  %461 = vmatpush.bf16.msrb.mxu1 %v741_v0  ;;  %v641_v27 = vor.u32 %v768_v22, %v640_v21  ;;  %v642_v29 = vld [vmem:[%s847_s17 + $0x30] sm:$0xf0]  ;;  %v653_v30 = vor.u32 %v765_v23, %v650_v24  ;;  %v648_v31 = vld [vmem:[%s847_s17 + $0x18] sm:$0xf]  ;;  %s761_s24 = sshll.u32 %s962_s13, 5 }
  0x24   : > { %487 = vmatpush.bf16.msrb.mxu3 %v749_v57  ;;  %474 = vmatpush.bf16.msrb.mxu2 %v745_v1  ;;  %v769_v32 = vld [vmem:[%s847_s17 + $0x34] sm:$0xf0]  ;;  %v645_v33 = vor.u32 %v764_v28, %v642_v29  ;;  %s944_s27 = scalar_lea.vmem %s960_s3, %s761_s24 }
  0x25   : > { %225 = vperm.xlu0 %803, %v222_v18   ;;  %v649_v34 = vor.u32 %v769_v32, %v648_v31 }
  0x26   : > { %449 = vmatpush.bf16.msrb.mxu0 %v705_v2 }
  0x27   : > { %462 = vmatpush.bf16.msrb.mxu1 %v709_v12 }
  0x28   : > { %488 = vmatpush.bf16.msrb.mxu3 %v717_v6  ;;  %475 = vmatpush.bf16.msrb.mxu2 %v713_v14 }
  0x2a   : > { %450 = vmatpush.bf16.msrb.mxu0 %v673_v15 }
  0x2b   : > { %463 = vmatpush.bf16.msrb.mxu1 %v677_v25 }
  0x2c   : > { %489 = vmatpush.bf16.msrb.mxu3 %v685_v19  ;;  %476 = vmatpush.bf16.msrb.mxu2 %v681_v26 }
  0x2e   : > { %451 = vmatpush.bf16.msrb.mxu0 %v641_v27 }
  0x2f   : > { %464 = vmatpush.bf16.msrb.mxu1 %v645_v33 }
  0x30   : > { %490 = vmatpush.bf16.msrb.mxu3 %v653_v30  ;;  %477 = vmatpush.bf16.msrb.mxu2 %v649_v34 }
  0x31   : > { %754 = vmatmul.msk.bf16.vlgmr.msrb.gmra.mxu0 %vm388_vm0, %v897_v61 }
  0x32   : > { %755 = vmatmul.msk.bf16.vlgmr.msrb.gmra.mxu1 %vm388_vm0, %v897_v61 }
  0x33   : > { %756 = vmatmul.msk.bf16.vlgmr.msrb.gmra.mxu2 %vm388_vm0, %v897_v61  ;;  %757 = vmatmul.msk.bf16.vlgmr.msrb.gmra.mxu3 %vm388_vm0, %v897_v61 }
  0x97   : > { %v226_v35 = vpop.permute.xlu0 %225 }
  0x9e   : > { %v401_v36 = vpop.f32.mrf.mxu0  ;;  %v414_v37 = vpop.f32.mrf.mxu1 }
  0x9f   : > { %v402_v38 = vadd.f32 %v401_v36, %v226_v35  ;;  %v415_v39 = vadd.f32 %v414_v37, %v226_v35 }
  0xa1   : > { %vm496_vm1 = vcmp.ge.f32.partialorder %v402_v38, 0.0  ;;  %v504_v40 = vmul.f32 0.1, %v402_v38  ;;  %vm497_vm2 = vcmp.ge.f32.partialorder %v415_v39, 0.0  ;;  %v505_v41 = vmul.f32 0.1, %v415_v39 }
  0xa3   : > { %v513_v42 = vsel %vm497_vm2, %v415_v39, %v505_v41  ;;  %v512_v43 = vsel %vm496_vm1, %v402_v38, %v504_v40 }
  0xa4   : > { %v528_v44 = vrot.slane %v513_v42, 4 }
  0xa5   : > { %v427_v45 = vpop.f32.mrf.mxu2 }
  0xa6   : > { %v428_v46 = vadd.f32 %v427_v45, %v226_v35  ;;  %v440_v47 = vpop.f32.mrf.mxu3  ;;  %v403_v48 = vpop.f32.mrf.mxu0  ;;  %v533_v50 = vsel %vm532_vm3, %v512_v43, %v528_v44 }
  0xa7   : > { %v441_v49 = vadd.f32 %v440_v47, %v226_v35  ;;  %v416_v51 = vpop.f32.mrf.mxu1  ;;  %541 = vst [vmem:[%s944_s27] sm:$0xff] %v533_v50 }
  0xa8   : > { %v506_v52 = vmul.f32 0.1, %v428_v46  ;;  %vm498_vm5 = vcmp.ge.f32.partialorder %v428_v46, 0.0 }
  0xa9   : > { %vm499_vm4 = vcmp.ge.f32.partialorder %v441_v49, 0.0  ;;  %v507_v53 = vmul.f32 0.1, %v441_v49 }
  0xaa   : > { %v514_v56 = vsel %vm498_vm5, %v428_v46, %v506_v52 }
  0xab   : > { %v515_v54 = vsel %vm499_vm4, %v441_v49, %v507_v53 }
  0xac   : > { %v529_v55 = vrot.slane %v515_v54, 4 }
  0xad   : > { %v429_v57 = vpop.f32.mrf.mxu2 }
  0xae   : > { %v534_v58 = vsel %vm532_vm3, %v514_v56, %v529_v55  ;;  %v442_v59 = vpop.f32.mrf.mxu3  ;;  %v453_v60 = vpop.f32.mrf.mxu0 }
  0xaf   : > { %542 = vst [vmem:[%s944_s27 + $0x8] sm:$0xff] %v534_v58  ;;  %v454_v61 = vadd.f32 %v453_v60, %v226_v35  ;;  %v466_v62 = vpop.f32.mrf.mxu1 }
  0xb0   : > { %v467_v63 = vadd.f32 %v466_v62, %v226_v35 }
  0xb1   : > { %vm500_vm6 = vcmp.ge.f32.partialorder %v454_v61, 0.0  ;;  %v508_v0 = vmul.f32 0.1, %v454_v61 }
  0xb2   : > { %vm501_vm7 = vcmp.ge.f32.partialorder %v467_v63, 0.0  ;;  %v509_v1 = vmul.f32 0.1, %v467_v63 }
  0xb3   : > { %v516_v2 = vsel %vm500_vm6, %v454_v61, %v508_v0 }
  0xb4   : > { %v517_v3 = vsel %vm501_vm7, %v467_v63, %v509_v1 }
  0xb5   : > { %v530_v4 = vrot.slane %v517_v3, 4 }
  0xb6   : > { %v479_v5 = vpop.f32.mrf.mxu2  ;;  %v492_v6 = vpop.f32.mrf.mxu3 }
  0xb7   : > { %v535_v7 = vsel %vm532_vm3, %v516_v2, %v530_v4  ;;  %v480_v8 = vadd.f32 %v479_v5, %v226_v35  ;;  %v493_v9 = vadd.f32 %v492_v6, %v226_v35  ;;  %v455_v10 = vpop.f32.mrf.mxu0  ;;  %v468_v11 = vpop.f32.mrf.mxu1 }
  0xb8   : > { %543 = vst [vmem:[%s944_s27 + $0x10] sm:$0xff] %v535_v7 }
  0xb9   : > { %v510_v12 = vmul.f32 0.1, %v480_v8  ;;  %vm503_vm8 = vcmp.ge.f32.partialorder %v493_v9, 0.0  ;;  %v511_v13 = vmul.f32 0.1, %v493_v9  ;;  %vm502_vm9 = vcmp.ge.f32.partialorder %v480_v8, 0.0 }
  0xbb   : > { %v519_v14 = vsel %vm503_vm8, %v493_v9, %v511_v13  ;;  %v518_v16 = vsel %vm502_vm9, %v480_v8, %v510_v12 }
  0xbc   : > { %v531_v15 = vrot.slane %v519_v14, 4 }
  0xbe   : > { %v536_v17 = vsel %vm532_vm3, %v518_v16, %v531_v15  ;;  %v481_v18 = vpop.f32.mrf.mxu2  ;;  %v494_v19 = vpop.f32.mrf.mxu3 }
  0xbf   : > { %544 = vst [vmem:[%s944_s27 + $0x18] sm:$0xff] %v536_v17 }
  0xc0 PF: > { %s13_s12 = sadd.s32 1, %s810_s12  }
  0xc1   : > { %p10_p4 = scmp.ge.s32.totalorder %s13_s12, 10  }
  0xc3   :  { %12 = sbr.rel (!%p10_p4) target bundleno = 1 (0x1), region = 65 }

// kernel: u_net_forward.7
= control target key start
LH: loop header
LB: loop body
LE: loop exit
PB: predicated region body
PF: predicated region fallthrough
CT: control target
= control target key end

     0   :  { %s3723_s15 = smov 0   ;;  %s3725_s16 = smov 0   ;;  %s4785_s0 = inlined_call_operand.vmem [shape: bf16[4,216], index: 0, kind: input, shape index: {}]   ;;  %s4786_s1 = inlined_call_operand.vmem [shape: bf16[216,8192], index: 1, kind: input, shape index: {}]   ;;  %s4787_s2 = inlined_call_operand.vmem [shape: f32[4,1], index: 2, kind: input, shape index: {}]   ;;  %s4788_s3 = inlined_call_operand.vmem [shape: f32[4,1], index: 3, kind: input, shape index: {}]   ;;  %s4789_s4 = inlined_call_operand.vmem [shape: f32[4,8192], index: 4, kind: output, shape index: {}]  }
   0x1   :  { %s3727_s17 = smov 0  }
   0x2 LB: > { %s2575_s18 = sadd.s32 4294967295, %s3695_s17   ;;  %s3740_s19 = sadd.s32 1, %s3695_s17   ;;  %s3695_s17 = sphi %s3727_s17, %s4792_s17   ;;  %s3691_s16 = sphi %s3725_s16, %s4791_s16   ;;  %s3687_s15 = sphi %s3723_s15, %s4790_s15  }
   0x3   : > { %s39_s20 = ssub.s32 %s3695_s17, %s3740_s19  ;;  %s42_s21 = sadd.s32 1, %s3691_s16 }
   0x4   : > { %p40_p0 = scmp.eq.s32.totalorder %s39_s20, 0  ;;  %p49_p1 = scmp.ne.s32.totalorder %s3691_s16, %s3687_s15 }
   0x5   : > { %p50_p2 = scmp.eq.s32.totalorder %s3695_s17, 0  ;;  %p2578_p4 = scmp.ge.s32.totalorder %s3695_s17, 4 }
   0x6   : > { %s3749_s22 = scalar_select %p40_p0, %s3691_s16, %s42_s21  }
   0x7   : > { %p51_p3 = por %p50_p2, %p49_p1  ;;  %152 = sbr.rel (%p2578_p4) target bundleno = 232 (0xe8), region = 28 }
   0xc   : > { %155 = sbr.rel (!%p51_p3) target bundleno = 232 (0xe8), region = 32  ;;  %s157_s23 = sand.u32 (%p51_p3), 1, %s3691_s16  }
   0xd   : > { %s3434_s24 = sshll.u32 (%p51_p3), %s3695_s17, 6  ;;  %s3643_s25 = smul.u32 (%p51_p3), 1728, %s157_s23 }
   0xe   : > { %s3757_s28 = scalar_lea.vmem (%p51_p3), %s4786_s1, %s3434_s24 }
   0xf   : > { %v175_v0 = vld [vmem:[%s3757_s28] sm:$0xff] (%p51_p3)  ;;  %v177_v1 = vld [vmem:[%s3757_s28 + $0x8] sm:$0xff] (%p51_p3)  ;;  %v179_v2 = vld [vmem:[%s3757_s28 + $0x10] sm:$0xff] (%p51_p3)  ;;  %s3762_s29 = scalar_lea.vmem (%p51_p3), [#allocation2], %s3643_s25 }
  0x10   : > { %176 = vst [vmem:[%s3762_s29] sm:$0xff] (%p51_p3), %v175_v0  ;;  %v181_v3 = vld [vmem:[%s3757_s28 + $0x18] sm:$0xff] (%p51_p3)  ;;  %v183_v4 = vld [vmem:[%s3757_s28 + $0x20] sm:$0xff] (%p51_p3)  ;;  %v185_v5 = vld [vmem:[%s3757_s28 + $0x28] sm:$0xff] (%p51_p3) }
  0x11   : > { %178 = vst [vmem:[%s3762_s29 + $0x8] sm:$0xff] %v177_v1  ;;  %v187_v6 = vld [vmem:[%s3757_s28 + $0x30] sm:$0xff]  ;;  %v189_v7 = vld [vmem:[%s3757_s28 + $0x38] sm:$0xff]  ;;  %v191_v8 = vld [vmem:[%s3757_s28 + $0x100] sm:$0xff] }
  0x12   : > { %180 = vst [vmem:[%s3762_s29 + $0x10] sm:$0xff] %v179_v2  ;;  %v193_v9 = vld [vmem:[%s3757_s28 + $0x108] sm:$0xff]  ;;  %v195_v10 = vld [vmem:[%s3757_s28 + $0x110] sm:$0xff]  ;;  %v197_v11 = vld [vmem:[%s3757_s28 + $0x118] sm:$0xff] }
  0x13   : > { %182 = vst [vmem:[%s3762_s29 + $0x18] sm:$0xff] %v181_v3  ;;  %v199_v12 = vld [vmem:[%s3757_s28 + $0x120] sm:$0xff]  ;;  %v201_v13 = vld [vmem:[%s3757_s28 + $0x128] sm:$0xff]  ;;  %v203_v14 = vld [vmem:[%s3757_s28 + $0x130] sm:$0xff] }
  0x14   : > { %184 = vst [vmem:[%s3762_s29 + $0x20] sm:$0xff] %v183_v4  ;;  %v205_v15 = vld [vmem:[%s3757_s28 + $0x138] sm:$0xff]  ;;  %v207_v16 = vld [vmem:[%s3757_s28 + $0x200] sm:$0xff]  ;;  %v209_v17 = vld [vmem:[%s3757_s28 + $0x208] sm:$0xff] }
  0x15   : > { %186 = vst [vmem:[%s3762_s29 + $0x28] sm:$0xff] %v185_v5  ;;  %v211_v18 = vld [vmem:[%s3757_s28 + $0x210] sm:$0xff]  ;;  %v213_v19 = vld [vmem:[%s3757_s28 + $0x218] sm:$0xff]  ;;  %v215_v20 = vld [vmem:[%s3757_s28 + $0x220] sm:$0xff] }
  0x16   : > { %188 = vst [vmem:[%s3762_s29 + $0x30] sm:$0xff] %v187_v6  ;;  %v217_v21 = vld [vmem:[%s3757_s28 + $0x228] sm:$0xff]  ;;  %v219_v22 = vld [vmem:[%s3757_s28 + $0x230] sm:$0xff]  ;;  %v221_v23 = vld [vmem:[%s3757_s28 + $0x238] sm:$0xff] }
  0x17   : > { %190 = vst [vmem:[%s3762_s29 + $0x38] sm:$0xff] %v189_v7  ;;  %v223_v24 = vld [vmem:[%s3757_s28 + $0x300] sm:$0xff]  ;;  %v225_v25 = vld [vmem:[%s3757_s28 + $0x308] sm:$0xff]  ;;  %v227_v26 = vld [vmem:[%s3757_s28 + $0x310] sm:$0xff] }
  0x18   : > { %192 = vst [vmem:[%s3762_s29 + $0x40] sm:$0xff] %v191_v8  ;;  %v229_v27 = vld [vmem:[%s3757_s28 + $0x318] sm:$0xff]  ;;  %v231_v28 = vld [vmem:[%s3757_s28 + $0x320] sm:$0xff]  ;;  %v233_v29 = vld [vmem:[%s3757_s28 + $0x328] sm:$0xff] }
  0x19   : > { %194 = vst [vmem:[%s3762_s29 + $0x48] sm:$0xff] %v193_v9  ;;  %v235_v30 = vld [vmem:[%s3757_s28 + $0x330] sm:$0xff]  ;;  %v237_v31 = vld [vmem:[%s3757_s28 + $0x338] sm:$0xff]  ;;  %v239_v32 = vld [vmem:[%s3757_s28 + $0x400] sm:$0xff] }
  0x1a   : > { %196 = vst [vmem:[%s3762_s29 + $0x50] sm:$0xff] %v195_v10  ;;  %v241_v33 = vld [vmem:[%s3757_s28 + $0x408] sm:$0xff]  ;;  %v243_v34 = vld [vmem:[%s3757_s28 + $0x410] sm:$0xff]  ;;  %v245_v35 = vld [vmem:[%s3757_s28 + $0x418] sm:$0xff] }
  0x1b   : > { %198 = vst [vmem:[%s3762_s29 + $0x58] sm:$0xff] %v197_v11  ;;  %v247_v36 = vld [vmem:[%s3757_s28 + $0x420] sm:$0xff]  ;;  %v249_v37 = vld [vmem:[%s3757_s28 + $0x428] sm:$0xff]  ;;  %v251_v38 = vld [vmem:[%s3757_s28 + $0x430] sm:$0xff] }
  0x1c   : > { %200 = vst [vmem:[%s3762_s29 + $0x60] sm:$0xff] %v199_v12  ;;  %v253_v39 = vld [vmem:[%s3757_s28 + $0x438] sm:$0xff]  ;;  %v255_v40 = vld [vmem:[%s3757_s28 + $0x500] sm:$0xff]  ;;  %v257_v41 = vld [vmem:[%s3757_s28 + $0x508] sm:$0xff] }
  0x1d   : > { %202 = vst [vmem:[%s3762_s29 + $0x68] sm:$0xff] %v201_v13  ;;  %v259_v42 = vld [vmem:[%s3757_s28 + $0x510] sm:$0xff]  ;;  %v261_v43 = vld [vmem:[%s3757_s28 + $0x518] sm:$0xff]  ;;  %v263_v44 = vld [vmem:[%s3757_s28 + $0x520] sm:$0xff] }
  0x1e   : > { %204 = vst [vmem:[%s3762_s29 + $0x70] sm:$0xff] %v203_v14  ;;  %v265_v45 = vld [vmem:[%s3757_s28 + $0x528] sm:$0xff]  ;;  %v267_v46 = vld [vmem:[%s3757_s28 + $0x530] sm:$0xff]  ;;  %v269_v47 = vld [vmem:[%s3757_s28 + $0x538] sm:$0xff] }
  0x1f   : > { %206 = vst [vmem:[%s3762_s29 + $0x78] sm:$0xff] %v205_v15  ;;  %v271_v48 = vld [vmem:[%s3757_s28 + $0x600] sm:$0xff]  ;;  %v273_v49 = vld [vmem:[%s3757_s28 + $0x608] sm:$0xff]  ;;  %v275_v50 = vld [vmem:[%s3757_s28 + $0x610] sm:$0xff] }
  0x20   : > { %208 = vst [vmem:[%s3762_s29 + $0x80] sm:$0xff] %v207_v16  ;;  %v277_v51 = vld [vmem:[%s3757_s28 + $0x618] sm:$0xff]  ;;  %v279_v52 = vld [vmem:[%s3757_s28 + $0x620] sm:$0xff]  ;;  %v281_v53 = vld [vmem:[%s3757_s28 + $0x628] sm:$0xff] }
  0x21   : > { %210 = vst [vmem:[%s3762_s29 + $0x88] sm:$0xff] %v209_v17  ;;  %v283_v54 = vld [vmem:[%s3757_s28 + $0x630] sm:$0xff]  ;;  %v285_v55 = vld [vmem:[%s3757_s28 + $0x638] sm:$0xff]  ;;  %v287_v56 = vld [vmem:[%s3757_s28 + $0x700] sm:$0xff] }
  0x22   : > { %212 = vst [vmem:[%s3762_s29 + $0x90] sm:$0xff] %v211_v18  ;;  %v289_v57 = vld [vmem:[%s3757_s28 + $0x708] sm:$0xff]  ;;  %v291_v58 = vld [vmem:[%s3757_s28 + $0x710] sm:$0xff]  ;;  %v293_v59 = vld [vmem:[%s3757_s28 + $0x718] sm:$0xff] }
  0x23   : > { %214 = vst [vmem:[%s3762_s29 + $0x98] sm:$0xff] %v213_v19  ;;  %v295_v60 = vld [vmem:[%s3757_s28 + $0x720] sm:$0xff]  ;;  %v297_v61 = vld [vmem:[%s3757_s28 + $0x728] sm:$0xff]  ;;  %v299_v62 = vld [vmem:[%s3757_s28 + $0x730] sm:$0xff] }
  0x24   : > { %216 = vst [vmem:[%s3762_s29 + $0xa0] sm:$0xff] %v215_v20  ;;  %v301_v63 = vld [vmem:[%s3757_s28 + $0x738] sm:$0xff]  ;;  %v303_v0 = vld [vmem:[%s3757_s28 + $0x800] sm:$0xff]  ;;  %v305_v1 = vld [vmem:[%s3757_s28 + $0x808] sm:$0xff] }
  0x25   : > { %218 = vst [vmem:[%s3762_s29 + $0xa8] sm:$0xff] %v217_v21  ;;  %v307_v2 = vld [vmem:[%s3757_s28 + $0x810] sm:$0xff]  ;;  %v309_v3 = vld [vmem:[%s3757_s28 + $0x818] sm:$0xff]  ;;  %v311_v4 = vld [vmem:[%s3757_s28 + $0x820] sm:$0xff] }
  0x26   : > { %220 = vst [vmem:[%s3762_s29 + $0xb0] sm:$0xff] %v219_v22  ;;  %v313_v5 = vld [vmem:[%s3757_s28 + $0x828] sm:$0xff]  ;;  %v315_v6 = vld [vmem:[%s3757_s28 + $0x830] sm:$0xff]  ;;  %v317_v7 = vld [vmem:[%s3757_s28 + $0x838] sm:$0xff] }
  0x27   : > { %222 = vst [vmem:[%s3762_s29 + $0xb8] sm:$0xff] %v221_v23  ;;  %v319_v8 = vld [vmem:[%s3757_s28 + $0x900] sm:$0xff]  ;;  %v321_v9 = vld [vmem:[%s3757_s28 + $0x908] sm:$0xff]  ;;  %v323_v10 = vld [vmem:[%s3757_s28 + $0x910] sm:$0xff] }
  0x28   : > { %224 = vst [vmem:[%s3762_s29 + $0xc0] sm:$0xff] %v223_v24  ;;  %v325_v11 = vld [vmem:[%s3757_s28 + $0x918] sm:$0xff]  ;;  %v327_v12 = vld [vmem:[%s3757_s28 + $0x920] sm:$0xff]  ;;  %v329_v13 = vld [vmem:[%s3757_s28 + $0x928] sm:$0xff] }
  0x29   : > { %226 = vst [vmem:[%s3762_s29 + $0xc8] sm:$0xff] %v225_v25  ;;  %v331_v14 = vld [vmem:[%s3757_s28 + $0x930] sm:$0xff]  ;;  %v333_v15 = vld [vmem:[%s3757_s28 + $0x938] sm:$0xff]  ;;  %v335_v16 = vld [vmem:[%s3757_s28 + $0xa00] sm:$0xff] }
  0x2a   : > { %228 = vst [vmem:[%s3762_s29 + $0xd0] sm:$0xff] %v227_v26  ;;  %v337_v17 = vld [vmem:[%s3757_s28 + $0xa08] sm:$0xff]  ;;  %v339_v18 = vld [vmem:[%s3757_s28 + $0xa10] sm:$0xff]  ;;  %v341_v19 = vld [vmem:[%s3757_s28 + $0xa18] sm:$0xff] }
  0x2b   : > { %230 = vst [vmem:[%s3762_s29 + $0xd8] sm:$0xff] %v229_v27  ;;  %v343_v20 = vld [vmem:[%s3757_s28 + $0xa20] sm:$0xff]  ;;  %v345_v21 = vld [vmem:[%s3757_s28 + $0xa28] sm:$0xff]  ;;  %v347_v22 = vld [vmem:[%s3757_s28 + $0xa30] sm:$0xff] }
  0x2c   : > { %232 = vst [vmem:[%s3762_s29 + $0xe0] sm:$0xff] %v231_v28  ;;  %v349_v23 = vld [vmem:[%s3757_s28 + $0xa38] sm:$0xff]  ;;  %v351_v24 = vld [vmem:[%s3757_s28 + $0xb00] sm:$0xff]  ;;  %v353_v25 = vld [vmem:[%s3757_s28 + $0xb08] sm:$0xff] }
  0x2d   : > { %234 = vst [vmem:[%s3762_s29 + $0xe8] sm:$0xff] %v233_v29  ;;  %v355_v26 = vld [vmem:[%s3757_s28 + $0xb10] sm:$0xff]  ;;  %v357_v27 = vld [vmem:[%s3757_s28 + $0xb18] sm:$0xff]  ;;  %v359_v28 = vld [vmem:[%s3757_s28 + $0xb20] sm:$0xff] }
  0x2e   : > { %236 = vst [vmem:[%s3762_s29 + $0xf0] sm:$0xff] %v235_v30  ;;  %v361_v29 = vld [vmem:[%s3757_s28 + $0xb28] sm:$0xff]  ;;  %v363_v30 = vld [vmem:[%s3757_s28 + $0xb30] sm:$0xff] }
  0x2f   : > { %238 = vst [vmem:[%s3762_s29 + $0xf8] sm:$0xff] %v237_v31  ;;  %v365_v31 = vld [vmem:[%s3757_s28 + $0xb38] sm:$0xff] }
  0x30   : > { %240 = vst [vmem:[%s3762_s29 + $0x100] sm:$0xff] %v239_v32  ;;  %v367_v32 = vld [vmem:[%s3757_s28 + $0xc00] sm:$0xff] }
  0x31   : > { %242 = vst [vmem:[%s3762_s29 + $0x108] sm:$0xff] %v241_v33  ;;  %v369_v33 = vld [vmem:[%s3757_s28 + $0xc08] sm:$0xff] }
  0x32   : > { %244 = vst [vmem:[%s3762_s29 + $0x110] sm:$0xff] %v243_v34  ;;  %v371_v34 = vld [vmem:[%s3757_s28 + $0xc10] sm:$0xff] }
  0x33   : > { %246 = vst [vmem:[%s3762_s29 + $0x118] sm:$0xff] %v245_v35  ;;  %v373_v35 = vld [vmem:[%s3757_s28 + $0xc18] sm:$0xff] }
  0x34   : > { %248 = vst [vmem:[%s3762_s29 + $0x120] sm:$0xff] %v247_v36  ;;  %v375_v36 = vld [vmem:[%s3757_s28 + $0xc20] sm:$0xff] }
  0x35   : > { %250 = vst [vmem:[%s3762_s29 + $0x128] sm:$0xff] %v249_v37  ;;  %v377_v37 = vld [vmem:[%s3757_s28 + $0xc28] sm:$0xff] }
  0x36   : > { %252 = vst [vmem:[%s3762_s29 + $0x130] sm:$0xff] %v251_v38  ;;  %v379_v38 = vld [vmem:[%s3757_s28 + $0xc30] sm:$0xff] }
  0x37   : > { %254 = vst [vmem:[%s3762_s29 + $0x138] sm:$0xff] %v253_v39  ;;  %v381_v39 = vld [vmem:[%s3757_s28 + $0xc38] sm:$0xff] }
  0x38   : > { %256 = vst [vmem:[%s3762_s29 + $0x140] sm:$0xff] %v255_v40  ;;  %v383_v40 = vld [vmem:[%s3757_s28 + $0xd00] sm:$0xff] }
  0x39   : > { %258 = vst [vmem:[%s3762_s29 + $0x148] sm:$0xff] %v257_v41  ;;  %v385_v41 = vld [vmem:[%s3757_s28 + $0xd08] sm:$0xff] }
  0x3a   : > { %260 = vst [vmem:[%s3762_s29 + $0x150] sm:$0xff] %v259_v42  ;;  %v387_v42 = vld [vmem:[%s3757_s28 + $0xd10] sm:$0xff] }
  0x3b   : > { %262 = vst [vmem:[%s3762_s29 + $0x158] sm:$0xff] %v261_v43  ;;  %v389_v43 = vld [vmem:[%s3757_s28 + $0xd18] sm:$0xff] }
  0x3c   : > { %264 = vst [vmem:[%s3762_s29 + $0x160] sm:$0xff] %v263_v44  ;;  %v391_v44 = vld [vmem:[%s3757_s28 + $0xd20] sm:$0xff] }
  0x3d   : > { %266 = vst [vmem:[%s3762_s29 + $0x168] sm:$0xff] %v265_v45  ;;  %v393_v45 = vld [vmem:[%s3757_s28 + $0xd28] sm:$0xff] }
  0x3e   : > { %268 = vst [vmem:[%s3762_s29 + $0x170] sm:$0xff] %v267_v46  ;;  %v395_v46 = vld [vmem:[%s3757_s28 + $0xd30] sm:$0xff] }
  0x3f   : > { %270 = vst [vmem:[%s3762_s29 + $0x178] sm:$0xff] %v269_v47  ;;  %v397_v47 = vld [vmem:[%s3757_s28 + $0xd38] sm:$0xff] }
  0x40   : > { %272 = vst [vmem:[%s3762_s29 + $0x180] sm:$0xff] %v271_v48  ;;  %v399_v48 = vld [vmem:[%s3757_s28 + $0xe00] sm:$0xff] }
  0x41   : > { %274 = vst [vmem:[%s3762_s29 + $0x188] sm:$0xff] %v273_v49  ;;  %v401_v49 = vld [vmem:[%s3757_s28 + $0xe08] sm:$0xff] }
  0x42   : > { %276 = vst [vmem:[%s3762_s29 + $0x190] sm:$0xff] %v275_v50  ;;  %v403_v50 = vld [vmem:[%s3757_s28 + $0xe10] sm:$0xff] }
  0x43   : > { %278 = vst [vmem:[%s3762_s29 + $0x198] sm:$0xff] %v277_v51  ;;  %v405_v51 = vld [vmem:[%s3757_s28 + $0xe18] sm:$0xff] }
  0x44   : > { %280 = vst [vmem:[%s3762_s29 + $0x1a0] sm:$0xff] %v279_v52  ;;  %v407_v52 = vld [vmem:[%s3757_s28 + $0xe20] sm:$0xff] }
  0x45   : > { %282 = vst [vmem:[%s3762_s29 + $0x1a8] sm:$0xff] %v281_v53  ;;  %v409_v53 = vld [vmem:[%s3757_s28 + $0xe28] sm:$0xff] }
  0x46   : > { %284 = vst [vmem:[%s3762_s29 + $0x1b0] sm:$0xff] %v283_v54  ;;  %v411_v54 = vld [vmem:[%s3757_s28 + $0xe30] sm:$0xff] }
  0x47   : > { %286 = vst [vmem:[%s3762_s29 + $0x1b8] sm:$0xff] %v285_v55  ;;  %v413_v55 = vld [vmem:[%s3757_s28 + $0xe38] sm:$0xff] }
  0x48   : > { %288 = vst [vmem:[%s3762_s29 + $0x1c0] sm:$0xff] %v287_v56  ;;  %v415_v56 = vld [vmem:[%s3757_s28 + $0xf00] sm:$0xff] }
  0x49   : > { %290 = vst [vmem:[%s3762_s29 + $0x1c8] sm:$0xff] %v289_v57  ;;  %v417_v57 = vld [vmem:[%s3757_s28 + $0xf08] sm:$0xff] }
  0x4a   : > { %292 = vst [vmem:[%s3762_s29 + $0x1d0] sm:$0xff] %v291_v58  ;;  %v419_v58 = vld [vmem:[%s3757_s28 + $0xf10] sm:$0xff] }
  0x4b   : > { %294 = vst [vmem:[%s3762_s29 + $0x1d8] sm:$0xff] %v293_v59  ;;  %v421_v59 = vld [vmem:[%s3757_s28 + $0xf18] sm:$0xff] }
  0x4c   : > { %296 = vst [vmem:[%s3762_s29 + $0x1e0] sm:$0xff] %v295_v60  ;;  %v423_v60 = vld [vmem:[%s3757_s28 + $0xf20] sm:$0xff] }
  0x4d   : > { %298 = vst [vmem:[%s3762_s29 + $0x1e8] sm:$0xff] %v297_v61  ;;  %v425_v61 = vld [vmem:[%s3757_s28 + $0xf28] sm:$0xff] }
  0x4e   : > { %300 = vst [vmem:[%s3762_s29 + $0x1f0] sm:$0xff] %v299_v62  ;;  %v427_v62 = vld [vmem:[%s3757_s28 + $0xf30] sm:$0xff] }
  0x4f   : > { %302 = vst [vmem:[%s3762_s29 + $0x1f8] sm:$0xff] %v301_v63  ;;  %v429_v63 = vld [vmem:[%s3757_s28 + $0xf38] sm:$0xff] }
  0x50   : > { %304 = vst [vmem:[%s3762_s29 + $0x200] sm:$0xff] %v303_v0  ;;  %v431_v0 = vld [vmem:[%s3757_s28 + $0x1000] sm:$0xff] }
  0x51   : > { %306 = vst [vmem:[%s3762_s29 + $0x208] sm:$0xff] %v305_v1  ;;  %v433_v1 = vld [vmem:[%s3757_s28 + $0x1008] sm:$0xff] }
  0x52   : > { %308 = vst [vmem:[%s3762_s29 + $0x210] sm:$0xff] %v307_v2  ;;  %v435_v2 = vld [vmem:[%s3757_s28 + $0x1010] sm:$0xff] }
  0x53   : > { %310 = vst [vmem:[%s3762_s29 + $0x218] sm:$0xff] %v309_v3  ;;  %v437_v3 = vld [vmem:[%s3757_s28 + $0x1018] sm:$0xff] }
  0x54   : > { %312 = vst [vmem:[%s3762_s29 + $0x220] sm:$0xff] %v311_v4  ;;  %v439_v4 = vld [vmem:[%s3757_s28 + $0x1020] sm:$0xff] }
  0x55   : > { %314 = vst [vmem:[%s3762_s29 + $0x228] sm:$0xff] %v313_v5  ;;  %v441_v5 = vld [vmem:[%s3757_s28 + $0x1028] sm:$0xff] }
  0x56   : > { %316 = vst [vmem:[%s3762_s29 + $0x230] sm:$0xff] %v315_v6  ;;  %v443_v6 = vld [vmem:[%s3757_s28 + $0x1030] sm:$0xff] }
  0x57   : > { %318 = vst [vmem:[%s3762_s29 + $0x238] sm:$0xff] %v317_v7  ;;  %v445_v7 = vld [vmem:[%s3757_s28 + $0x1038] sm:$0xff] }
  0x58   : > { %320 = vst [vmem:[%s3762_s29 + $0x240] sm:$0xff] %v319_v8  ;;  %v447_v8 = vld [vmem:[%s3757_s28 + $0x1100] sm:$0xff] }
  0x59   : > { %322 = vst [vmem:[%s3762_s29 + $0x248] sm:$0xff] %v321_v9  ;;  %v449_v9 = vld [vmem:[%s3757_s28 + $0x1108] sm:$0xff] }
  0x5a   : > { %324 = vst [vmem:[%s3762_s29 + $0x250] sm:$0xff] %v323_v10  ;;  %v451_v10 = vld [vmem:[%s3757_s28 + $0x1110] sm:$0xff] }
  0x5b   : > { %326 = vst [vmem:[%s3762_s29 + $0x258] sm:$0xff] %v325_v11  ;;  %v453_v11 = vld [vmem:[%s3757_s28 + $0x1118] sm:$0xff] }
  0x5c   : > { %328 = vst [vmem:[%s3762_s29 + $0x260] sm:$0xff] %v327_v12  ;;  %v455_v12 = vld [vmem:[%s3757_s28 + $0x1120] sm:$0xff] }
  0x5d   : > { %330 = vst [vmem:[%s3762_s29 + $0x268] sm:$0xff] %v329_v13  ;;  %v457_v13 = vld [vmem:[%s3757_s28 + $0x1128] sm:$0xff] }
  0x5e   : > { %332 = vst [vmem:[%s3762_s29 + $0x270] sm:$0xff] %v331_v14  ;;  %v459_v14 = vld [vmem:[%s3757_s28 + $0x1130] sm:$0xff] }
  0x5f   : > { %334 = vst [vmem:[%s3762_s29 + $0x278] sm:$0xff] %v333_v15  ;;  %v461_v15 = vld [vmem:[%s3757_s28 + $0x1138] sm:$0xff] }
  0x60   : > { %336 = vst [vmem:[%s3762_s29 + $0x280] sm:$0xff] %v335_v16  ;;  %v463_v16 = vld [vmem:[%s3757_s28 + $0x1200] sm:$0xff] }
  0x61   : > { %338 = vst [vmem:[%s3762_s29 + $0x288] sm:$0xff] %v337_v17  ;;  %v465_v17 = vld [vmem:[%s3757_s28 + $0x1208] sm:$0xff] }
  0x62   : > { %340 = vst [vmem:[%s3762_s29 + $0x290] sm:$0xff] %v339_v18  ;;  %v467_v18 = vld [vmem:[%s3757_s28 + $0x1210] sm:$0xff] }
  0x63   : > { %342 = vst [vmem:[%s3762_s29 + $0x298] sm:$0xff] %v341_v19  ;;  %v469_v19 = vld [vmem:[%s3757_s28 + $0x1218] sm:$0xff] }
  0x64   : > { %344 = vst [vmem:[%s3762_s29 + $0x2a0] sm:$0xff] %v343_v20  ;;  %v471_v20 = vld [vmem:[%s3757_s28 + $0x1220] sm:$0xff] }
  0x65   : > { %346 = vst [vmem:[%s3762_s29 + $0x2a8] sm:$0xff] %v345_v21  ;;  %v473_v21 = vld [vmem:[%s3757_s28 + $0x1228] sm:$0xff] }
  0x66   : > { %348 = vst [vmem:[%s3762_s29 + $0x2b0] sm:$0xff] %v347_v22  ;;  %v475_v22 = vld [vmem:[%s3757_s28 + $0x1230] sm:$0xff] }
  0x67   : > { %350 = vst [vmem:[%s3762_s29 + $0x2b8] sm:$0xff] %v349_v23  ;;  %v477_v23 = vld [vmem:[%s3757_s28 + $0x1238] sm:$0xff] }
  0x68   : > { %352 = vst [vmem:[%s3762_s29 + $0x2c0] sm:$0xff] %v351_v24  ;;  %v479_v24 = vld [vmem:[%s3757_s28 + $0x1300] sm:$0xff] }
  0x69   : > { %354 = vst [vmem:[%s3762_s29 + $0x2c8] sm:$0xff] %v353_v25  ;;  %v481_v25 = vld [vmem:[%s3757_s28 + $0x1308] sm:$0xff] }
  0x6a   : > { %356 = vst [vmem:[%s3762_s29 + $0x2d0] sm:$0xff] %v355_v26  ;;  %v483_v26 = vld [vmem:[%s3757_s28 + $0x1310] sm:$0xff] }
  0x6b   : > { %358 = vst [vmem:[%s3762_s29 + $0x2d8] sm:$0xff] %v357_v27  ;;  %v485_v27 = vld [vmem:[%s3757_s28 + $0x1318] sm:$0xff] }
  0x6c   : > { %360 = vst [vmem:[%s3762_s29 + $0x2e0] sm:$0xff] %v359_v28  ;;  %v487_v28 = vld [vmem:[%s3757_s28 + $0x1320] sm:$0xff] }
  0x6d   : > { %362 = vst [vmem:[%s3762_s29 + $0x2e8] sm:$0xff] %v361_v29  ;;  %v489_v29 = vld [vmem:[%s3757_s28 + $0x1328] sm:$0xff] }
  0x6e   : > { %364 = vst [vmem:[%s3762_s29 + $0x2f0] sm:$0xff] %v363_v30  ;;  %v491_v30 = vld [vmem:[%s3757_s28 + $0x1330] sm:$0xff] }
  0x6f   : > { %366 = vst [vmem:[%s3762_s29 + $0x2f8] sm:$0xff] %v365_v31  ;;  %v493_v31 = vld [vmem:[%s3757_s28 + $0x1338] sm:$0xff] }
  0x70   : > { %368 = vst [vmem:[%s3762_s29 + $0x300] sm:$0xff] %v367_v32  ;;  %v495_v32 = vld [vmem:[%s3757_s28 + $0x1400] sm:$0xff] }
  0x71   : > { %370 = vst [vmem:[%s3762_s29 + $0x308] sm:$0xff] %v369_v33  ;;  %v497_v33 = vld [vmem:[%s3757_s28 + $0x1408] sm:$0xff] }
  0x72   : > { %372 = vst [vmem:[%s3762_s29 + $0x310] sm:$0xff] %v371_v34  ;;  %v499_v34 = vld [vmem:[%s3757_s28 + $0x1410] sm:$0xff] }
  0x73   : > { %374 = vst [vmem:[%s3762_s29 + $0x318] sm:$0xff] %v373_v35  ;;  %v501_v35 = vld [vmem:[%s3757_s28 + $0x1418] sm:$0xff] }
  0x74   : > { %376 = vst [vmem:[%s3762_s29 + $0x320] sm:$0xff] %v375_v36  ;;  %v503_v36 = vld [vmem:[%s3757_s28 + $0x1420] sm:$0xff] }
  0x75   : > { %378 = vst [vmem:[%s3762_s29 + $0x328] sm:$0xff] %v377_v37  ;;  %v505_v37 = vld [vmem:[%s3757_s28 + $0x1428] sm:$0xff] }
  0x76   : > { %380 = vst [vmem:[%s3762_s29 + $0x330] sm:$0xff] %v379_v38  ;;  %v507_v38 = vld [vmem:[%s3757_s28 + $0x1430] sm:$0xff] }
  0x77   : > { %382 = vst [vmem:[%s3762_s29 + $0x338] sm:$0xff] %v381_v39  ;;  %v509_v39 = vld [vmem:[%s3757_s28 + $0x1438] sm:$0xff] }
  0x78   : > { %384 = vst [vmem:[%s3762_s29 + $0x340] sm:$0xff] %v383_v40  ;;  %v511_v40 = vld [vmem:[%s3757_s28 + $0x1500] sm:$0xff] }
  0x79   : > { %386 = vst [vmem:[%s3762_s29 + $0x348] sm:$0xff] %v385_v41  ;;  %v513_v41 = vld [vmem:[%s3757_s28 + $0x1508] sm:$0xff] }
  0x7a   : > { %388 = vst [vmem:[%s3762_s29 + $0x350] sm:$0xff] %v387_v42  ;;  %v515_v42 = vld [vmem:[%s3757_s28 + $0x1510] sm:$0xff] }
  0x7b   : > { %390 = vst [vmem:[%s3762_s29 + $0x358] sm:$0xff] %v389_v43  ;;  %v517_v43 = vld [vmem:[%s3757_s28 + $0x1518] sm:$0xff] }
  0x7c   : > { %392 = vst [vmem:[%s3762_s29 + $0x360] sm:$0xff] %v391_v44  ;;  %v519_v44 = vld [vmem:[%s3757_s28 + $0x1520] sm:$0xff] }
  0x7d   : > { %394 = vst [vmem:[%s3762_s29 + $0x368] sm:$0xff] %v393_v45  ;;  %v521_v45 = vld [vmem:[%s3757_s28 + $0x1528] sm:$0xff] }
  0x7e   : > { %396 = vst [vmem:[%s3762_s29 + $0x370] sm:$0xff] %v395_v46  ;;  %v523_v46 = vld [vmem:[%s3757_s28 + $0x1530] sm:$0xff] }
  0x7f   : > { %398 = vst [vmem:[%s3762_s29 + $0x378] sm:$0xff] %v397_v47  ;;  %v525_v47 = vld [vmem:[%s3757_s28 + $0x1538] sm:$0xff] }
  0x80   : > { %400 = vst [vmem:[%s3762_s29 + $0x380] sm:$0xff] %v399_v48  ;;  %v527_v48 = vld [vmem:[%s3757_s28 + $0x1600] sm:$0xff] }
  0x81   : > { %402 = vst [vmem:[%s3762_s29 + $0x388] sm:$0xff] %v401_v49  ;;  %v529_v49 = vld [vmem:[%s3757_s28 + $0x1608] sm:$0xff] }
  0x82   : > { %404 = vst [vmem:[%s3762_s29 + $0x390] sm:$0xff] %v403_v50  ;;  %v531_v50 = vld [vmem:[%s3757_s28 + $0x1610] sm:$0xff] }
  0x83   : > { %406 = vst [vmem:[%s3762_s29 + $0x398] sm:$0xff] %v405_v51  ;;  %v533_v51 = vld [vmem:[%s3757_s28 + $0x1618] sm:$0xff] }
  0x84   : > { %408 = vst [vmem:[%s3762_s29 + $0x3a0] sm:$0xff] %v407_v52  ;;  %v535_v52 = vld [vmem:[%s3757_s28 + $0x1620] sm:$0xff] }
  0x85   : > { %410 = vst [vmem:[%s3762_s29 + $0x3a8] sm:$0xff] %v409_v53  ;;  %v537_v53 = vld [vmem:[%s3757_s28 + $0x1628] sm:$0xff] }
  0x86   : > { %412 = vst [vmem:[%s3762_s29 + $0x3b0] sm:$0xff] %v411_v54  ;;  %v539_v54 = vld [vmem:[%s3757_s28 + $0x1630] sm:$0xff] }
  0x87   : > { %414 = vst [vmem:[%s3762_s29 + $0x3b8] sm:$0xff] %v413_v55  ;;  %v541_v55 = vld [vmem:[%s3757_s28 + $0x1638] sm:$0xff] }
  0x88   : > { %416 = vst [vmem:[%s3762_s29 + $0x3c0] sm:$0xff] %v415_v56  ;;  %v543_v56 = vld [vmem:[%s3757_s28 + $0x1700] sm:$0xff] }
  0x89   : > { %418 = vst [vmem:[%s3762_s29 + $0x3c8] sm:$0xff] %v417_v57  ;;  %v545_v57 = vld [vmem:[%s3757_s28 + $0x1708] sm:$0xff] }
  0x8a   : > { %420 = vst [vmem:[%s3762_s29 + $0x3d0] sm:$0xff] %v419_v58  ;;  %v547_v58 = vld [vmem:[%s3757_s28 + $0x1710] sm:$0xff] }
  0x8b   : > { %422 = vst [vmem:[%s3762_s29 + $0x3d8] sm:$0xff] %v421_v59  ;;  %v549_v59 = vld [vmem:[%s3757_s28 + $0x1718] sm:$0xff] }
  0x8c   : > { %424 = vst [vmem:[%s3762_s29 + $0x3e0] sm:$0xff] %v423_v60  ;;  %v551_v60 = vld [vmem:[%s3757_s28 + $0x1720] sm:$0xff] }
  0x8d   : > { %426 = vst [vmem:[%s3762_s29 + $0x3e8] sm:$0xff] %v425_v61  ;;  %v553_v61 = vld [vmem:[%s3757_s28 + $0x1728] sm:$0xff] }
  0x8e   : > { %428 = vst [vmem:[%s3762_s29 + $0x3f0] sm:$0xff] %v427_v62  ;;  %v555_v62 = vld [vmem:[%s3757_s28 + $0x1730] sm:$0xff] }
  0x8f   : > { %430 = vst [vmem:[%s3762_s29 + $0x3f8] sm:$0xff] %v429_v63  ;;  %v557_v63 = vld [vmem:[%s3757_s28 + $0x1738] sm:$0xff] }
  0x90   : > { %432 = vst [vmem:[%s3762_s29 + $0x400] sm:$0xff] %v431_v0  ;;  %v559_v0 = vld [vmem:[%s3757_s28 + $0x1800] sm:$0xff] }
  0x91   : > { %434 = vst [vmem:[%s3762_s29 + $0x408] sm:$0xff] %v433_v1  ;;  %v561_v1 = vld [vmem:[%s3757_s28 + $0x1808] sm:$0xff] }
  0x92   : > { %436 = vst [vmem:[%s3762_s29 + $0x410] sm:$0xff] %v435_v2  ;;  %v563_v2 = vld [vmem:[%s3757_s28 + $0x1810] sm:$0xff] }
  0x93   : > { %438 = vst [vmem:[%s3762_s29 + $0x418] sm:$0xff] %v437_v3  ;;  %v565_v3 = vld [vmem:[%s3757_s28 + $0x1818] sm:$0xff] }
  0x94   : > { %440 = vst [vmem:[%s3762_s29 + $0x420] sm:$0xff] %v439_v4  ;;  %v567_v4 = vld [vmem:[%s3757_s28 + $0x1820] sm:$0xff] }
  0x95   : > { %442 = vst [vmem:[%s3762_s29 + $0x428] sm:$0xff] %v441_v5  ;;  %v569_v5 = vld [vmem:[%s3757_s28 + $0x1828] sm:$0xff] }
  0x96   : > { %444 = vst [vmem:[%s3762_s29 + $0x430] sm:$0xff] %v443_v6  ;;  %v571_v6 = vld [vmem:[%s3757_s28 + $0x1830] sm:$0xff] }
  0x97   : > { %446 = vst [vmem:[%s3762_s29 + $0x438] sm:$0xff] %v445_v7  ;;  %v573_v7 = vld [vmem:[%s3757_s28 + $0x1838] sm:$0xff] }
  0x98   : > { %448 = vst [vmem:[%s3762_s29 + $0x440] sm:$0xff] %v447_v8  ;;  %v575_v8 = vld [vmem:[%s3757_s28 + $0x1900] sm:$0xff] }
  0x99   : > { %450 = vst [vmem:[%s3762_s29 + $0x448] sm:$0xff] %v449_v9  ;;  %v577_v9 = vld [vmem:[%s3757_s28 + $0x1908] sm:$0xff] }
  0x9a   : > { %452 = vst [vmem:[%s3762_s29 + $0x450] sm:$0xff] %v451_v10  ;;  %v579_v10 = vld [vmem:[%s3757_s28 + $0x1910] sm:$0xff] }
  0x9b   : > { %454 = vst [vmem:[%s3762_s29 + $0x458] sm:$0xff] %v453_v11  ;;  %v581_v11 = vld [vmem:[%s3757_s28 + $0x1918] sm:$0xff] }
  0x9c   : > { %456 = vst [vmem:[%s3762_s29 + $0x460] sm:$0xff] %v455_v12  ;;  %v583_v12 = vld [vmem:[%s3757_s28 + $0x1920] sm:$0xff] }
  0x9d   : > { %458 = vst [vmem:[%s3762_s29 + $0x468] sm:$0xff] %v457_v13  ;;  %v585_v13 = vld [vmem:[%s3757_s28 + $0x1928] sm:$0xff] }
  0x9e   : > { %460 = vst [vmem:[%s3762_s29 + $0x470] sm:$0xff] %v459_v14  ;;  %v587_v14 = vld [vmem:[%s3757_s28 + $0x1930] sm:$0xff] }
  0x9f   : > { %462 = vst [vmem:[%s3762_s29 + $0x478] sm:$0xff] %v461_v15  ;;  %v589_v15 = vld [vmem:[%s3757_s28 + $0x1938] sm:$0xff] }
  0xa0   : > { %464 = vst [vmem:[%s3762_s29 + $0x480] sm:$0xff] %v463_v16  ;;  %v591_v16 = vld [vmem:[%s3757_s28 + $0x1a00] sm:$0xff] }
  0xa1   : > { %466 = vst [vmem:[%s3762_s29 + $0x488] sm:$0xff] %v465_v17  ;;  %v593_v17 = vld [vmem:[%s3757_s28 + $0x1a08] sm:$0xff] }
  0xa2   : > { %468 = vst [vmem:[%s3762_s29 + $0x490] sm:$0xff] %v467_v18  ;;  %v595_v18 = vld [vmem:[%s3757_s28 + $0x1a10] sm:$0xff] }
  0xa3   : > { %470 = vst [vmem:[%s3762_s29 + $0x498] sm:$0xff] %v469_v19  ;;  %v597_v19 = vld [vmem:[%s3757_s28 + $0x1a18] sm:$0xff] }
  0xa4   : > { %472 = vst [vmem:[%s3762_s29 + $0x4a0] sm:$0xff] %v471_v20  ;;  %v599_v20 = vld [vmem:[%s3757_s28 + $0x1a20] sm:$0xff] }
  0xa5   : > { %474 = vst [vmem:[%s3762_s29 + $0x4a8] sm:$0xff] %v473_v21  ;;  %v601_v21 = vld [vmem:[%s3757_s28 + $0x1a28] sm:$0xff] }
  0xa6   : > { %476 = vst [vmem:[%s3762_s29 + $0x4b0] sm:$0xff] %v475_v22  ;;  %v603_v22 = vld [vmem:[%s3757_s28 + $0x1a30] sm:$0xff] }
  0xa7   : > { %478 = vst [vmem:[%s3762_s29 + $0x4b8] sm:$0xff] %v477_v23  ;;  %v605_v23 = vld [vmem:[%s3757_s28 + $0x1a38] sm:$0xff] }
  0xa8   : > { %480 = vst [vmem:[%s3762_s29 + $0x4c0] sm:$0xff] %v479_v24 }
  0xa9   : > { %482 = vst [vmem:[%s3762_s29 + $0x4c8] sm:$0xff] %v481_v25 }
  0xaa   : > { %484 = vst [vmem:[%s3762_s29 + $0x4d0] sm:$0xff] %v483_v26 }
  0xab   : > { %486 = vst [vmem:[%s3762_s29 + $0x4d8] sm:$0xff] %v485_v27 }
  0xac   : > { %488 = vst [vmem:[%s3762_s29 + $0x4e0] sm:$0xff] %v487_v28 }
  0xad   : > { %490 = vst [vmem:[%s3762_s29 + $0x4e8] sm:$0xff] %v489_v29 }
  0xae   : > { %492 = vst [vmem:[%s3762_s29 + $0x4f0] sm:$0xff] %v491_v30 }
  0xaf   : > { %494 = vst [vmem:[%s3762_s29 + $0x4f8] sm:$0xff] %v493_v31 }
  0xb0   : > { %496 = vst [vmem:[%s3762_s29 + $0x500] sm:$0xff] %v495_v32 }
  0xb1   : > { %498 = vst [vmem:[%s3762_s29 + $0x508] sm:$0xff] %v497_v33 }
  0xb2   : > { %500 = vst [vmem:[%s3762_s29 + $0x510] sm:$0xff] %v499_v34 }
  0xb3   : > { %502 = vst [vmem:[%s3762_s29 + $0x518] sm:$0xff] %v501_v35 }
  0xb4   : > { %504 = vst [vmem:[%s3762_s29 + $0x520] sm:$0xff] %v503_v36 }
  0xb5   : > { %506 = vst [vmem:[%s3762_s29 + $0x528] sm:$0xff] %v505_v37 }
  0xb6   : > { %508 = vst [vmem:[%s3762_s29 + $0x530] sm:$0xff] %v507_v38 }
  0xb7   : > { %510 = vst [vmem:[%s3762_s29 + $0x538] sm:$0xff] %v509_v39 }
  0xb8   : > { %512 = vst [vmem:[%s3762_s29 + $0x540] sm:$0xff] %v511_v40 }
  0xb9   : > { %514 = vst [vmem:[%s3762_s29 + $0x548] sm:$0xff] %v513_v41 }
  0xba   : > { %516 = vst [vmem:[%s3762_s29 + $0x550] sm:$0xff] %v515_v42 }
  0xbb   : > { %518 = vst [vmem:[%s3762_s29 + $0x558] sm:$0xff] %v517_v43 }
  0xbc   : > { %520 = vst [vmem:[%s3762_s29 + $0x560] sm:$0xff] %v519_v44 }
  0xbd   : > { %522 = vst [vmem:[%s3762_s29 + $0x568] sm:$0xff] %v521_v45 }
  0xbe   : > { %524 = vst [vmem:[%s3762_s29 + $0x570] sm:$0xff] %v523_v46 }
  0xbf   : > { %526 = vst [vmem:[%s3762_s29 + $0x578] sm:$0xff] %v525_v47 }
  0xc0   : > { %528 = vst [vmem:[%s3762_s29 + $0x580] sm:$0xff] %v527_v48 }
  0xc1   : > { %530 = vst [vmem:[%s3762_s29 + $0x588] sm:$0xff] %v529_v49 }
  0xc2   : > { %532 = vst [vmem:[%s3762_s29 + $0x590] sm:$0xff] %v531_v50 }
  0xc3   : > { %534 = vst [vmem:[%s3762_s29 + $0x598] sm:$0xff] %v533_v51 }
  0xc4   : > { %536 = vst [vmem:[%s3762_s29 + $0x5a0] sm:$0xff] %v535_v52 }
  0xc5   : > { %538 = vst [vmem:[%s3762_s29 + $0x5a8] sm:$0xff] %v537_v53 }
  0xc6   : > { %540 = vst [vmem:[%s3762_s29 + $0x5b0] sm:$0xff] %v539_v54 }
  0xc7   : > { %542 = vst [vmem:[%s3762_s29 + $0x5b8] sm:$0xff] %v541_v55 }
  0xc8   : > { %544 = vst [vmem:[%s3762_s29 + $0x5c0] sm:$0xff] %v543_v56 }
  0xc9   : > { %546 = vst [vmem:[%s3762_s29 + $0x5c8] sm:$0xff] %v545_v57 }
  0xca   : > { %548 = vst [vmem:[%s3762_s29 + $0x5d0] sm:$0xff] %v547_v58 }
  0xcb   : > { %550 = vst [vmem:[%s3762_s29 + $0x5d8] sm:$0xff] %v549_v59 }
  0xcc   : > { %552 = vst [vmem:[%s3762_s29 + $0x5e0] sm:$0xff] %v551_v60 }
  0xcd   : > { %554 = vst [vmem:[%s3762_s29 + $0x5e8] sm:$0xff] %v553_v61 }
  0xce   : > { %556 = vst [vmem:[%s3762_s29 + $0x5f0] sm:$0xff] %v555_v62 }
  0xcf   : > { %558 = vst [vmem:[%s3762_s29 + $0x5f8] sm:$0xff] %v557_v63 }
  0xd0   : > { %560 = vst [vmem:[%s3762_s29 + $0x600] sm:$0xff] %v559_v0 }
  0xd1   : > { %562 = vst [vmem:[%s3762_s29 + $0x608] sm:$0xff] %v561_v1 }
  0xd2   : > { %564 = vst [vmem:[%s3762_s29 + $0x610] sm:$0xff] %v563_v2 }
  0xd3   : > { %566 = vst [vmem:[%s3762_s29 + $0x618] sm:$0xff] %v565_v3 }
  0xd4   : > { %568 = vst [vmem:[%s3762_s29 + $0x620] sm:$0xff] %v567_v4 }
  0xd5   : > { %570 = vst [vmem:[%s3762_s29 + $0x628] sm:$0xff] %v569_v5 }
  0xd6   : > { %572 = vst [vmem:[%s3762_s29 + $0x630] sm:$0xff] %v571_v6 }
  0xd7   : > { %574 = vst [vmem:[%s3762_s29 + $0x638] sm:$0xff] %v573_v7 }
  0xd8   : > { %576 = vst [vmem:[%s3762_s29 + $0x640] sm:$0xff] %v575_v8 }
  0xd9   : > { %578 = vst [vmem:[%s3762_s29 + $0x648] sm:$0xff] %v577_v9 }
  0xda   : > { %580 = vst [vmem:[%s3762_s29 + $0x650] sm:$0xff] %v579_v10 }
  0xdb   : > { %582 = vst [vmem:[%s3762_s29 + $0x658] sm:$0xff] %v581_v11 }
  0xdc   : > { %584 = vst [vmem:[%s3762_s29 + $0x660] sm:$0xff] %v583_v12 }
  0xdd   : > { %586 = vst [vmem:[%s3762_s29 + $0x668] sm:$0xff] %v585_v13 }
  0xde   : > { %588 = vst [vmem:[%s3762_s29 + $0x670] sm:$0xff] %v587_v14 }
  0xdf   : > { %590 = vst [vmem:[%s3762_s29 + $0x678] sm:$0xff] %v589_v15 }
  0xe0   : > { %592 = vst [vmem:[%s3762_s29 + $0x680] sm:$0xff] %v591_v16 }
  0xe1   : > { %594 = vst [vmem:[%s3762_s29 + $0x688] sm:$0xff] %v593_v17 }
  0xe2   : > { %596 = vst [vmem:[%s3762_s29 + $0x690] sm:$0xff] %v595_v18 }
  0xe3   : > { %598 = vst [vmem:[%s3762_s29 + $0x698] sm:$0xff] %v597_v19 }
  0xe4   : > { %600 = vst [vmem:[%s3762_s29 + $0x6a0] sm:$0xff] %v599_v20 }
  0xe5   : > { %602 = vst [vmem:[%s3762_s29 + $0x6a8] sm:$0xff] %v601_v21 }
  0xe6   : > { %604 = vst [vmem:[%s3762_s29 + $0x6b0] sm:$0xff] %v603_v22 }
  0xe7   : > { %606 = vst [vmem:[%s3762_s29 + $0x6b8] sm:$0xff] %v605_v23 }
  0xe8 PF: > { %p2581_p5 = scmp.ge.s32.totalorder %s3695_s17, 1  ;;  %p611_p6 = scmp.lt.s32.totalorder %s3695_s17, 5 }
  0xea   : > { %p612_p7 = pnand %p2581_p5, %p611_p6 }
  0xeb   : > { %s618_s30 = sand.u32 (!%p612_p7), 1, %s3687_s15   ;;  %s4618_s13 = sshll.u32 (!%p612_p7), %s2575_s18, 4 }
  0xec   : > { %615 = sbr.rel (%p612_p7) target bundleno = 612 (0x264), region = 55  ;;  %p645_p8 = scmp.lt.s32.totalorder (!%p612_p7), %s4618_s13, 63 }
  0xed   : > { %s3644_s5 = smul.u32 (!%p612_p7), 1728, %s618_s30 }
  0xef   : > { %s4196_s6 = scalar_lea.vmem (!%p612_p7), [#allocation2], %s3644_s5 }
  0xf1   : > { %v3034_v24 = vld [vmem:[%s4196_s6 + $0x380] sm:$0xf]  ;;  %v3547_v26 = vld [vmem:[%s4196_s6 + $0x384] sm:$0xf]  ;;  %vm1956_vm0 = vcmask 1043456   ;;  %v861_v23 = vld [vmem:[%s4196_s6 + $0x688] sm:$0xff] }
  0xf2   : > { %v3555_v25 = vld [vmem:[%s4196_s6 + $0x3bc] sm:$0xf0]  ;;  %v3036_v28 = vld [vmem:[%s4196_s6 + $0x3c0] sm:$0xf0]  ;;  %vm1953_vm1 = vcmask 719872   ;;  %s4794_s13 = smov (!%p645_p8, %s4618_s13), 63 }
  0xf3   : > { %v3035_v27 = vor.u32 %v3555_v25, %v3034_v24  ;;  %v860_v29 = vld [vmem:[%s4196_s6 + $0x680] sm:$0xff]  ;;  %v3039_v31 = vor.u32 %v3547_v26, %v3036_v28  ;;  %v1507_v24 = vunpack.c.l.b16 %v861_v23  ;;  %s2583_s14 = sshll.u32 %s4794_s13, 2 }
  0xf4   : > { %v2970_v30 = vld [vmem:[%s4196_s6 + $0x300] sm:$0xf]  ;;  %v1505_v32 = vunpack.c.l.b16 %v860_v29  ;;  %v3531_v34 = vld [vmem:[%s4196_s6 + $0x304] sm:$0xf]  ;;  %v1506_v36 = vunpack.c.h.b16 %v860_v29  ;;  %s4669_s18 = scalar_lea.vmem %s4789_s4, %s2583_s14 }
  0xf5   : > { %v3539_v33 = vld [vmem:[%s4196_s6 + $0x33c] sm:$0xf0]  ;;  %v2972_v35 = vld [vmem:[%s4196_s6 + $0x340] sm:$0xf0]  ;;  %2005 = vmatpush.bf16.msra.mxu0 %v3035_v27  ;;  %2031 = vmatpush.bf16.msra.mxu2 %v3039_v31 }
  0xf6   : > { %v2971_v37 = vor.u32 %v3539_v33, %v2970_v30  ;;  %v3354_v38 = vld [vmem:[%s4196_s6 + $0x600] sm:$0xf]  ;;  %v1729_v40 = vpack.c.b16 %v1505_v32, %v1505_v32  ;;  %v2975_v41 = vor.u32 %v3531_v34, %v2972_v35  ;;  %v1730_v42 = vpack.c.b16 %v1506_v36, %v1506_v36  ;;  %v3515_v45 = vld [vmem:[%s4196_s6 + $0x284] sm:$0xf] }
  0xf7   : > { %v3635_v39 = vld [vmem:[%s4196_s6 + $0x63c] sm:$0xf0]  ;;  %v2908_v46 = vld [vmem:[%s4196_s6 + $0x2c0] sm:$0xf0] }
  0xf8   : > { %v2906_v43 = vld [vmem:[%s4196_s6 + $0x280] sm:$0xf]  ;;  %v3627_v47 = vld [vmem:[%s4196_s6 + $0x604] sm:$0xf]  ;;  %v1958_v49 = vsel %vm1956_vm0, %v1729_v40, 0  ;;  %v1961_v50 = vsel %vm1956_vm0, %v1730_v42, 0  ;;  %v3355_v51 = vor.u32 %v3635_v39, %v3354_v38  ;;  %v2911_v55 = vor.u32 %v3515_v45, %v2908_v46 }
  0xf9   : > { %v3523_v44 = vld [vmem:[%s4196_s6 + $0x2bc] sm:$0xf0]  ;;  %v3356_v48 = vld [vmem:[%s4196_s6 + $0x640] sm:$0xf0]  ;;  %2020 = vmatpush.bf16.msra.mxu1 %v1958_v49  ;;  %2006 = vmatpush.bf16.msra.mxu0 %v2971_v37  ;;  %v3042_v37 = vld [vmem:[%s4196_s6 + $0x388] sm:$0xf]  ;;  %v1731_v39 = vpack.c.b16 %v1507_v24, %v1507_v24 }
  0xfa   : > { %v2907_v52 = vor.u32 %v3523_v44, %v2906_v43  ;;  %v3290_v53 = vld [vmem:[%s4196_s6 + $0x580] sm:$0xf]  ;;  %2032 = vmatpush.bf16.msra.mxu2 %v2975_v41  ;;  %2046 = vmatpush.bf16.msra.mxu3 %v1961_v50  ;;  %v3359_v56 = vor.u32 %v3627_v47, %v3356_v48  ;;  %v3499_v59 = vld [vmem:[%s4196_s6 + $0x204] sm:$0xf]  ;;  %v3556_v38 = vld [vmem:[%s4196_s6 + $0x3c4] sm:$0xf0]  ;;  %v1508_v44 = vunpack.c.h.b16 %v861_v23 }
  0xfb   : > { %v3619_v54 = vld [vmem:[%s4196_s6 + $0x5bc] sm:$0xf0]  ;;  %v2844_v60 = vld [vmem:[%s4196_s6 + $0x240] sm:$0xf0]  ;;  %v2978_v49 = vld [vmem:[%s4196_s6 + $0x308] sm:$0xf]  ;;  %v3043_v50 = vor.u32 %v3556_v38, %v3042_v37 }
  0xfc   : > { %v2842_v57 = vld [vmem:[%s4196_s6 + $0x200] sm:$0xf]  ;;  %v3611_v61 = vld [vmem:[%s4196_s6 + $0x584] sm:$0xf]  ;;  %v3291_v63 = vor.u32 %v3619_v54, %v3290_v53  ;;  %v2847_v3 = vor.u32 %v3499_v59, %v2844_v60  ;;  %v3044_v53 = vld [vmem:[%s4196_s6 + $0x3c8] sm:$0xf0] }
  0xfd   : > { %v3507_v58 = vld [vmem:[%s4196_s6 + $0x23c] sm:$0xf0]  ;;  %v3292_v62 = vld [vmem:[%s4196_s6 + $0x5c0] sm:$0xf0]  ;;  %2021 = vmatpush.bf16.msra.mxu1 %v3355_v51  ;;  %2007 = vmatpush.bf16.msra.mxu0 %v2907_v52  ;;  %v3540_v51 = vld [vmem:[%s4196_s6 + $0x344] sm:$0xf0] }
  0xfe   : > { %v2843_v0 = vor.u32 %v3507_v58, %v2842_v57  ;;  %v3226_v1 = vld [vmem:[%s4196_s6 + $0x500] sm:$0xf]  ;;  %2033 = vmatpush.bf16.msra.mxu2 %v2911_v55  ;;  %2047 = vmatpush.bf16.msra.mxu3 %v3359_v56  ;;  %v3295_v4 = vor.u32 %v3611_v61, %v3292_v62  ;;  %v3483_v7 = vld [vmem:[%s4196_s6 + $0x184] sm:$0xf]  ;;  %v3548_v52 = vld [vmem:[%s4196_s6 + $0x38c] sm:$0xf]  ;;  %v1732_v58 = vpack.c.b16 %v1508_v44, %v1508_v44 }
  0xff   : > { %v3603_v2 = vld [vmem:[%s4196_s6 + $0x53c] sm:$0xf0]  ;;  %v2780_v8 = vld [vmem:[%s4196_s6 + $0x1c0] sm:$0xf0]  ;;  %v1964_v54 = vsel %vm1956_vm0, %v1731_v39, 0  ;;  %v3047_v60 = vor.u32 %v3548_v52, %v3044_v53 }
 0x100   : > { %v2778_v5 = vld [vmem:[%s4196_s6 + $0x180] sm:$0xf]  ;;  %v3595_v9 = vld [vmem:[%s4196_s6 + $0x504] sm:$0xf]  ;;  %v3227_v11 = vor.u32 %v3603_v2, %v3226_v1  ;;  %v2783_v16 = vor.u32 %v3483_v7, %v2780_v8  ;;  %v3362_v55 = vld [vmem:[%s4196_s6 + $0x608] sm:$0xf] }
 0x101   : > { %v3491_v6 = vld [vmem:[%s4196_s6 + $0x1bc] sm:$0xf0]  ;;  %v3228_v10 = vld [vmem:[%s4196_s6 + $0x540] sm:$0xf0]  ;;  %2022 = vmatpush.bf16.msra.mxu1 %v3291_v63  ;;  %2008 = vmatpush.bf16.msra.mxu0 %v2843_v0  ;;  %v3636_v56 = vld [vmem:[%s4196_s6 + $0x644] sm:$0xf0]  ;;  %v2979_v63 = vor.u32 %v3540_v51, %v2978_v49 }
 0x102   : > { %v2779_v12 = vor.u32 %v3491_v6, %v2778_v5  ;;  %v3162_v13 = vld [vmem:[%s4196_s6 + $0x480] sm:$0xf]  ;;  %2034 = vmatpush.bf16.msra.mxu2 %v2847_v3  ;;  %2048 = vmatpush.bf16.msra.mxu3 %v3295_v4  ;;  %v3231_v17 = vor.u32 %v3595_v9, %v3228_v10  ;;  %v3467_v19 = vld [vmem:[%s4196_s6 + $0x104] sm:$0xf]  ;;  %v2914_v61 = vld [vmem:[%s4196_s6 + $0x288] sm:$0xf]  ;;  %v3363_v0 = vor.u32 %v3636_v56, %v3362_v55 }
 0x103   : > { %v3587_v14 = vld [vmem:[%s4196_s6 + $0x4bc] sm:$0xf0]  ;;  %v2716_v20 = vld [vmem:[%s4196_s6 + $0x140] sm:$0xf0]  ;;  %v3524_v62 = vld [vmem:[%s4196_s6 + $0x2c4] sm:$0xf0] }
 0x104   : > { %v2714_v15 = vld [vmem:[%s4196_s6 + $0x100] sm:$0xf]  ;;  %v3579_v21 = vld [vmem:[%s4196_s6 + $0x484] sm:$0xf]  ;;  %v3163_v25 = vor.u32 %v3587_v14, %v3162_v13  ;;  %v2719_v29 = vor.u32 %v3467_v19, %v2716_v20  ;;  %v3532_v1 = vld [vmem:[%s4196_s6 + $0x30c] sm:$0xf]  ;;  %v2915_v10 = vor.u32 %v3524_v62, %v2914_v61 }
 0x105   : > { %v3475_v18 = vld [vmem:[%s4196_s6 + $0x13c] sm:$0xf0]  ;;  %v3164_v22 = vld [vmem:[%s4196_s6 + $0x4c0] sm:$0xf0]  ;;  %2023 = vmatpush.bf16.msra.mxu1 %v3227_v11  ;;  %2009 = vmatpush.bf16.msra.mxu0 %v2779_v12  ;;  %v2980_v2 = vld [vmem:[%s4196_s6 + $0x348] sm:$0xf0] }
 0x106   : > { %v2715_v26 = vor.u32 %v3475_v18, %v2714_v15  ;;  %v3098_v27 = vld [vmem:[%s4196_s6 + $0x400] sm:$0xf]  ;;  %2035 = vmatpush.bf16.msra.mxu2 %v2783_v16  ;;  %2049 = vmatpush.bf16.msra.mxu3 %v3231_v17  ;;  %v3167_v30 = vor.u32 %v3579_v21, %v3164_v22  ;;  %v3451_v33 = vld [vmem:[%s4196_s6 + $0x84] sm:$0xf]  ;;  %v651_v3 = vld [vmem:[%s4785_s0] sm:$0xf]  ;;  %v2983_v9 = vor.u32 %v3532_v1, %v2980_v2 }
 0x107   : > { %v3571_v28 = vld [vmem:[%s4196_s6 + $0x43c] sm:$0xf0]  ;;  %v2652_v34 = vld [vmem:[%s4196_s6 + $0xc0] sm:$0xf0]  ;;  %v3298_v4 = vld [vmem:[%s4196_s6 + $0x588] sm:$0xf] }
 0x108   : > { %v2650_v31 = vld [vmem:[%s4196_s6 + $0x80] sm:$0xf]  ;;  %v3563_v35 = vld [vmem:[%s4196_s6 + $0x404] sm:$0xf]  ;;  %v3099_v40 = vor.u32 %v3571_v28, %v3098_v27  ;;  %v2655_v45 = vor.u32 %v3451_v33, %v2652_v34  ;;  %v3620_v5 = vld [vmem:[%s4196_s6 + $0x5c4] sm:$0xf0] }
 0x109   : > { %v3459_v32 = vld [vmem:[%s4196_s6 + $0xbc] sm:$0xf0]  ;;  %v3100_v36 = vld [vmem:[%s4196_s6 + $0x440] sm:$0xf0]  ;;  %2024 = vmatpush.bf16.msra.mxu1 %v3163_v25  ;;  %2010 = vmatpush.bf16.msra.mxu0 %v2715_v26  ;;  %869 = vst [vmem:[#allocation1] ss:$4 sm:$0xff] %v651_v3  ;;  %v3299_v11 = vor.u32 %v3620_v5, %v3298_v4 }
 0x10a   : > { %v2651_v41 = vor.u32 %v3459_v32, %v2650_v31  ;;  %v2586_v42 = vld [vmem:[%s4196_s6] sm:$0xf]  ;;  %2036 = vmatpush.bf16.msra.mxu2 %v2719_v29  ;;  %2050 = vmatpush.bf16.msra.mxu3 %v3167_v30  ;;  %v3103_v46 = vor.u32 %v3563_v35, %v3100_v36  ;;  %v3435_v47 = vld [vmem:[%s4196_s6 + $0x4] sm:$0xf]  ;;  %v1967_v6 = vsel %vm1956_vm0, %v1732_v58, 0  ;;  %v862_v49 = vld [vmem:[%s4196_s6 + $0x690] sm:$0xff] }
 0x10b   : > { %v3443_v43 = vld [vmem:[%s4196_s6 + $0x3c] sm:$0xf0]  ;;  %v2588_v48 = vld [vmem:[%s4196_s6 + $0x40] sm:$0xf0]  ;;  %v3628_v7 = vld [vmem:[%s4196_s6 + $0x60c] sm:$0xf] }
 0x10c   : > { %v2587_v57 = vor.u32 %v3443_v43, %v2586_v42  ;;  %v2591_v59 = vor.u32 %v3435_v47, %v2588_v48  ;;  %v3364_v8 = vld [vmem:[%s4196_s6 + $0x648] sm:$0xf0]  ;;  %v2850_v12 = vld [vmem:[%s4196_s6 + $0x208] sm:$0xf]  ;;  %v3050_v47 = vld [vmem:[%s4196_s6 + $0x390] sm:$0xf] }
 0x10d   : > { %2025 = vmatpush.bf16.msra.mxu1 %v3099_v40  ;;  %2011 = vmatpush.bf16.msra.mxu0 %v2651_v41  ;;  %v3516_v13 = vld [vmem:[%s4196_s6 + $0x28c] sm:$0xf]  ;;  %v3367_v15 = vor.u32 %v3628_v7, %v3364_v8  ;;  %v3508_v16 = vld [vmem:[%s4196_s6 + $0x244] sm:$0xf0]  ;;  %v3557_v48 = vld [vmem:[%s4196_s6 + $0x3cc] sm:$0xf0]  ;;  %v1510_v8 = vunpack.c.h.b16 %v862_v49 }
 0x10e   : > { %2037 = vmatpush.bf16.msra.mxu2 %v2655_v45  ;;  %2051 = vmatpush.bf16.msra.mxu3 %v3103_v46  ;;  %v2916_v14 = vld [vmem:[%s4196_s6 + $0x2c8] sm:$0xf0]  ;;  %v3234_v17 = vld [vmem:[%s4196_s6 + $0x508] sm:$0xf]  ;;  %v2851_v25 = vor.u32 %v3508_v16, %v2850_v12  ;;  %v3697_v61 = vmov 0  }
 0x10f   : > { %v3604_v18 = vld [vmem:[%s4196_s6 + $0x544] sm:$0xf0]  ;;  %v3612_v19 = vld [vmem:[%s4196_s6 + $0x58c] sm:$0xf]  ;;  %v2919_v21 = vor.u32 %v3516_v13, %v2916_v14  ;;  %3670 = vset.pattern.permute.xlu0 %v3697_v61  ;;  %v2421_v62 = vld [vmem:[%s4787_s2] sm:$0xf] }
 0x110   : > { %v3300_v20 = vld [vmem:[%s4196_s6 + $0x5c8] sm:$0xf0]  ;;  %v2786_v22 = vld [vmem:[%s4196_s6 + $0x188] sm:$0xf]  ;;  %v3235_v26 = vor.u32 %v3604_v18, %v3234_v17  ;;  %v3541_v1 = vld [vmem:[%s4196_s6 + $0x34c] sm:$0xf0]  ;;  %2424 = vperm.xlu0 %3670, %v2421_v62  }
 0x111   : > { %2057 = vmatpush.bf16.msrb.mxu1 %v3043_v50  ;;  %2012 = vmatpush.bf16.msra.mxu0 %v2587_v57  ;;  %v3500_v23 = vld [vmem:[%s4196_s6 + $0x20c] sm:$0xf]  ;;  %v4286_v27 = vld.sshfl [vmem:[#allocation1] sm:$0xff pattern:$0x73625140]  ;;  %v3303_v29 = vor.u32 %v3612_v19, %v3300_v20  ;;  %v3051_v57 = vor.u32 %v3557_v48, %v3050_v47 }
 0x112   : > { %2072 = vmatpush.bf16.msrb.mxu3 %v1964_v54  ;;  %2038 = vmatpush.bf16.msra.mxu2 %v2591_v59  ;;  %v2852_v24 = vld [vmem:[%s4196_s6 + $0x248] sm:$0xf0]  ;;  %v4288_v28 = vld.sshfl [vmem:[#allocation1 + $0x8] sm:$0xff pattern:$0x73625140]  ;;  %v863_v62 = vld [vmem:[%s4196_s6 + $0x698] sm:$0xff] }
 0x113   : > { %v3492_v30 = vld [vmem:[%s4196_s6 + $0x1c4] sm:$0xf0]  ;;  %3417 = vmatmul.msk.bf16.vlgmr.msra.gmra.mxu3 %vm1953_vm1, %v4288_v28  ;;  %v3596_v33 = vld [vmem:[%s4196_s6 + $0x50c] sm:$0xf]  ;;  %v2855_v35 = vor.u32 %v3500_v23, %v2852_v24  ;;  %3416 = vmatmul.msk.bf16.vlgmr.msra.gmra.mxu1 %vm1953_vm1, %v4288_v28  ;;  %v3549_v3 = vld [vmem:[%s4196_s6 + $0x394] sm:$0xf]  ;;  %v1734_v24 = vpack.c.b16 %v1510_v8, %v1510_v8 }
 0x114   : > { %v3170_v31 = vld [vmem:[%s4196_s6 + $0x488] sm:$0xf]  ;;  %v3236_v34 = vld [vmem:[%s4196_s6 + $0x548] sm:$0xf0]  ;;  %2013 = vmatmul.bf16.vlgmr.msra.gmra.mxu0 %v4286_v27  ;;  %v2787_v38 = vor.u32 %v3492_v30, %v2786_v22  ;;  %v3052_v4 = vld [vmem:[%s4196_s6 + $0x3d0] sm:$0xf0] }
 0x115   : > { %2083 = vmatpush.bf16.msrb.mxu0 %v3047_v60  ;;  %2058 = vmatpush.bf16.msrb.mxu1 %v2979_v63  ;;  %v3588_v32 = vld [vmem:[%s4196_s6 + $0x4c4] sm:$0xf0]  ;;  %v3484_v41 = vld [vmem:[%s4196_s6 + $0x18c] sm:$0xf]  ;;  %v3239_v43 = vor.u32 %v3596_v33, %v3236_v34  ;;  %v1509_v60 = vunpack.c.l.b16 %v862_v49  ;;  %v3055_v14 = vor.u32 %v3549_v3, %v3052_v4  ;;  %v3525_v16 = vld [vmem:[%s4196_s6 + $0x2cc] sm:$0xf0] }
 0x116   : > { %2073 = vmatpush.bf16.msrb.mxu3 %v3363_v0  ;;  %2098 = vmatpush.bf16.msrb.mxu2 %v1967_v6  ;;  %v2722_v36 = vld [vmem:[%s4196_s6 + $0x108] sm:$0xf]  ;;  %v3171_v39 = vor.u32 %v3588_v32, %v3170_v31  ;;  %v2788_v42 = vld [vmem:[%s4196_s6 + $0x1c8] sm:$0xf0]  ;;  %v2986_v0 = vld [vmem:[%s4196_s6 + $0x310] sm:$0xf] }
 0x117   : > { %2039 = vmatmul.bf16.vlgmr.msra.gmra.mxu2 %v4286_v27  ;;  %v3476_v37 = vld [vmem:[%s4196_s6 + $0x144] sm:$0xf0]  ;;  %v3580_v45 = vld [vmem:[%s4196_s6 + $0x48c] sm:$0xf]  ;;  %v2791_v50 = vor.u32 %v3484_v41, %v2788_v42  ;;  %v1733_v13 = vpack.c.b16 %v1509_v60, %v1509_v60  ;;  %v3533_v18 = vld [vmem:[%s4196_s6 + $0x314] sm:$0xf] }
 0x118   : > { %v3106_v40 = vld [vmem:[%s4196_s6 + $0x408] sm:$0xf]  ;;  %v3172_v46 = vld [vmem:[%s4196_s6 + $0x4c8] sm:$0xf0]  ;;  %v2723_v51 = vor.u32 %v3476_v37, %v2722_v36  ;;  %v2988_v19 = vld [vmem:[%s4196_s6 + $0x350] sm:$0xf0] }
 0x119   : > { %2084 = vmatpush.bf16.msrb.mxu0 %v2983_v9  ;;  %2059 = vmatpush.bf16.msrb.mxu1 %v2915_v10  ;;  %v3572_v44 = vld [vmem:[%s4196_s6 + $0x444] sm:$0xf0]  ;;  %v3468_v54 = vld [vmem:[%s4196_s6 + $0x10c] sm:$0xf]  ;;  %v3175_v56 = vor.u32 %v3580_v45, %v3172_v46  ;;  %v2987_v10 = vor.u32 %v3541_v1, %v2986_v0  ;;  %v2443_v20 = vld [vmem:[%s4788_s3] sm:$0xf]  ;;  %v2991_v30 = vor.u32 %v3533_v18, %v2988_v19 }
 0x11a   : > { %2074 = vmatpush.bf16.msrb.mxu3 %v3299_v11  ;;  %2099 = vmatpush.bf16.msrb.mxu2 %v3367_v15  ;;  %v3107_v52 = vor.u32 %v3572_v44, %v3106_v40  ;;  %v2658_v53 = vld [vmem:[%s4196_s6 + $0x88] sm:$0xf]  ;;  %v2724_v55 = vld [vmem:[%s4196_s6 + $0x148] sm:$0xf0]  ;;  %v2922_v15 = vld [vmem:[%s4196_s6 + $0x290] sm:$0xf] }
 0x11b   : > { %v3460_v58 = vld [vmem:[%s4196_s6 + $0xc4] sm:$0xf0]  ;;  %v3564_v59 = vld [vmem:[%s4196_s6 + $0x40c] sm:$0xf]  ;;  %v2727_v2 = vor.u32 %v3468_v54, %v2724_v55  ;;  %v3637_v31 = vld [vmem:[%s4196_s6 + $0x64c] sm:$0xf0]  ;;  %2446 = vperm.xlu0 %3670, %v2443_v20  }
 0x11c   : > { %v3108_v63 = vld [vmem:[%s4196_s6 + $0x448] sm:$0xf0]  ;;  %v2659_v5 = vor.u32 %v3460_v58, %v2658_v53  ;;  %v2594_v11 = vld [vmem:[%s4196_s6 + $0x8] sm:$0xf]  ;;  %v2858_v32 = vld [vmem:[%s4196_s6 + $0x210] sm:$0xf] }
 0x11d   : > { %2085 = vmatpush.bf16.msrb.mxu0 %v2919_v21  ;;  %2060 = vmatpush.bf16.msrb.mxu1 %v2851_v25  ;;  %v3452_v6 = vld [vmem:[%s4196_s6 + $0x8c] sm:$0xf]  ;;  %v3111_v9 = vor.u32 %v3564_v59, %v3108_v63  ;;  %v3444_v12 = vld [vmem:[%s4196_s6 + $0x44] sm:$0xf0]  ;;  %v1970_v25 = vsel %vm1956_vm0, %v1733_v13, 0  ;;  %v1973_v37 = vsel %vm1956_vm0, %v1734_v24, 0 }
 0x11e   : > { %2075 = vmatpush.bf16.msrb.mxu3 %v3235_v26  ;;  %2100 = vmatpush.bf16.msrb.mxu2 %v3303_v29  ;;  %v2660_v7 = vld [vmem:[%s4196_s6 + $0xc8] sm:$0xf0]  ;;  %v2595_v21 = vor.u32 %v3444_v12, %v2594_v11  ;;  %v2923_v26 = vor.u32 %v3525_v16, %v2922_v15  ;;  %v3370_v29 = vld [vmem:[%s4196_s6 + $0x610] sm:$0xf]  ;;  %v2924_v36 = vld [vmem:[%s4196_s6 + $0x2d0] sm:$0xf0]  ;;  %v1511_v12 = vunpack.c.l.b16 %v863_v62 }
 0x11f   : > { %v2663_v17 = vor.u32 %v3452_v6, %v2660_v7  ;;  %v3436_v22 = vld [vmem:[%s4196_s6 + $0xc] sm:$0xf]  ;;  %v3509_v33 = vld [vmem:[%s4196_s6 + $0x24c] sm:$0xf0]  ;;  %v3629_v41 = vld [vmem:[%s4196_s6 + $0x614] sm:$0xf] }
 0x120   : > { %v2596_v23 = vld [vmem:[%s4196_s6 + $0x48] sm:$0xf0]  ;;  %v3306_v40 = vld [vmem:[%s4196_s6 + $0x590] sm:$0xf]  ;;  %v3372_v42 = vld [vmem:[%s4196_s6 + $0x650] sm:$0xf0] }
 0x121   : > { %2086 = vmatpush.bf16.msrb.mxu0 %v2855_v35  ;;  %2061 = vmatpush.bf16.msrb.mxu1 %v2787_v38  ;;  %v2599_v34 = vor.u32 %v3436_v22, %v2596_v23  ;;  %v3517_v35 = vld [vmem:[%s4196_s6 + $0x294] sm:$0xf]  ;;  %v3371_v38 = vor.u32 %v3637_v31, %v3370_v29  ;;  %v3621_v44 = vld [vmem:[%s4196_s6 + $0x5cc] sm:$0xf0]  ;;  %v3375_v49 = vor.u32 %v3629_v41, %v3372_v42  ;;  %v1512_v22 = vunpack.c.h.b16 %v863_v62  ;;  %v3058_v24 = vld [vmem:[%s4196_s6 + $0x398] sm:$0xf] }
 0x122   : > { %2076 = vmatpush.bf16.msrb.mxu3 %v3171_v39  ;;  %2101 = vmatpush.bf16.msrb.mxu2 %v3239_v43  ;;  %v2859_v39 = vor.u32 %v3509_v33, %v2858_v32  ;;  %v2927_v43 = vor.u32 %v3517_v35, %v2924_v36  ;;  %v2794_v45 = vld [vmem:[%s4196_s6 + $0x190] sm:$0xf]  ;;  %v3501_v47 = vld [vmem:[%s4196_s6 + $0x214] sm:$0xf]  ;;  %v1735_v29 = vpack.c.b16 %v1511_v12, %v1511_v12  ;;  %v2994_v41 = vld [vmem:[%s4196_s6 + $0x318] sm:$0xf] }
 0x123   : > { %v3493_v46 = vld [vmem:[%s4196_s6 + $0x1cc] sm:$0xf0]  ;;  %v2860_v48 = vld [vmem:[%s4196_s6 + $0x250] sm:$0xf0]  ;;  %v3542_v42 = vld [vmem:[%s4196_s6 + $0x354] sm:$0xf0] }
 0x124   : > { %v3613_v53 = vld [vmem:[%s4196_s6 + $0x594] sm:$0xf]  ;;  %v2863_v55 = vor.u32 %v3501_v47, %v2860_v48  ;;  %v3477_v58 = vld [vmem:[%s4196_s6 + $0x14c] sm:$0xf0]  ;;  %v3518_v62 = vld [vmem:[%s4196_s6 + $0x29c] sm:$0xf] }
 0x125   : > { %2087 = vmatpush.bf16.msrb.mxu0 %v2791_v50  ;;  %2062 = vmatpush.bf16.msrb.mxu1 %v2723_v51  ;;  %v3307_v50 = vor.u32 %v3621_v44, %v3306_v40  ;;  %v2795_v51 = vor.u32 %v3493_v46, %v2794_v45  ;;  %v3308_v54 = vld [vmem:[%s4196_s6 + $0x5d0] sm:$0xf0]  ;;  %v3178_v1 = vld [vmem:[%s4196_s6 + $0x490] sm:$0xf]  ;;  %v3378_v45 = vld [vmem:[%s4196_s6 + $0x618] sm:$0xf] }
 0x126   : > { %2077 = vmatpush.bf16.msrb.mxu3 %v3107_v52  ;;  %2102 = vmatpush.bf16.msrb.mxu2 %v3175_v56  ;;  %v3242_v52 = vld [vmem:[%s4196_s6 + $0x510] sm:$0xf]  ;;  %v3485_v59 = vld [vmem:[%s4196_s6 + $0x194] sm:$0xf]  ;;  %v3311_v61 = vor.u32 %v3613_v53, %v3308_v54  ;;  %v3638_v46 = vld [vmem:[%s4196_s6 + $0x654] sm:$0xf0] }
 0x127   : > { %v3605_v56 = vld [vmem:[%s4196_s6 + $0x54c] sm:$0xf0]  ;;  %v2796_v60 = vld [vmem:[%s4196_s6 + $0x1d0] sm:$0xf0]  ;;  %v3379_v53 = vor.u32 %v3638_v46, %v3378_v45  ;;  %v2930_v54 = vld [vmem:[%s4196_s6 + $0x298] sm:$0xf] }
 0x128   : > { %v3243_v63 = vor.u32 %v3605_v56, %v3242_v52  ;;  %v3244_v3 = vld [vmem:[%s4196_s6 + $0x550] sm:$0xf0]  ;;  %v2799_v4 = vor.u32 %v3485_v59, %v2796_v60  ;;  %v2666_v6 = vld [vmem:[%s4196_s6 + $0x90] sm:$0xf]  ;;  %v2996_v52 = vld [vmem:[%s4196_s6 + $0x358] sm:$0xf0] }
 0x129   : > { %2088 = vmatpush.bf16.msrb.mxu0 %v2727_v2  ;;  %2063 = vmatpush.bf16.msrb.mxu1 %v2659_v5  ;;  %v3597_v2 = vld [vmem:[%s4196_s6 + $0x514] sm:$0xf]  ;;  %v3589_v5 = vld [vmem:[%s4196_s6 + $0x4cc] sm:$0xf0]  ;;  %v3314_v56 = vld [vmem:[%s4196_s6 + $0x598] sm:$0xf] }
 0x12a   : > { %2109 = vmatpush.bf16.msra.mxu3 %v3051_v57  ;;  %2103 = vmatpush.bf16.msrb.mxu2 %v3111_v9  ;;  %v2730_v57 = vld [vmem:[%s4196_s6 + $0x110] sm:$0xf]  ;;  %v3469_v8 = vld [vmem:[%s4196_s6 + $0x114] sm:$0xf]  ;;  %v3179_v13 = vor.u32 %v3589_v5, %v3178_v1  ;;  %v3380_v59 = vld [vmem:[%s4196_s6 + $0x658] sm:$0xf0] }
 0x12b   : > { %3418 = vmatmul.msk.bf16.vlgmr.msrb.gmra.mxu3 %vm1953_vm1, %v4288_v28  ;;  %v2731_v0 = vor.u32 %v3477_v58, %v2730_v57  ;;  %v3461_v7 = vld [vmem:[%s4196_s6 + $0xcc] sm:$0xf0]  ;;  %v2732_v9 = vld [vmem:[%s4196_s6 + $0x150] sm:$0xf0]  ;;  %v3622_v57 = vld [vmem:[%s4196_s6 + $0x5d4] sm:$0xf0] }
 0x12c   : > { %v3114_v11 = vld [vmem:[%s4196_s6 + $0x410] sm:$0xf]  ;;  %v3581_v16 = vld [vmem:[%s4196_s6 + $0x494] sm:$0xf]  ;;  %v2735_v18 = vor.u32 %v3469_v8, %v2732_v9  ;;  %v3630_v58 = vld [vmem:[%s4196_s6 + $0x61c] sm:$0xf] }
 0x12d   : > { %2089 = vmatpush.bf16.msrb.mxu0 %v2663_v17  ;;  %2064 = vmatpush.bf16.msrb.mxu1 %v2595_v21  ;;  %v3573_v15 = vld [vmem:[%s4196_s6 + $0x44c] sm:$0xf0]  ;;  %v3180_v17 = vld [vmem:[%s4196_s6 + $0x4d0] sm:$0xf0]  ;;  %v3383_v1 = vor.u32 %v3630_v58, %v3380_v59  ;;  %v3606_v5 = vld [vmem:[%s4196_s6 + $0x554] sm:$0xf0] }
 0x12e   : > { %2110 = vmatpush.bf16.msra.mxu3 %v2987_v10  ;;  %2135 = vmatpush.bf16.msra.mxu2 %v3055_v14  ;;  %v3247_v10 = vor.u32 %v3597_v2, %v3244_v3  ;;  %v2667_v14 = vor.u32 %v3461_v7, %v2666_v6  ;;  %v2602_v19 = vld [vmem:[%s4196_s6 + $0x10] sm:$0xf]  ;;  %v3453_v21 = vld [vmem:[%s4196_s6 + $0x94] sm:$0xf]  ;;  %v2866_v2 = vld [vmem:[%s4196_s6 + $0x218] sm:$0xf] }
 0x12f   : > { %3419 = vmatmul.msk.bf16.vlgmr.msrb.gmra.mxu2 %vm1953_vm1, %v4288_v28  ;;  %v3445_v20 = vld [vmem:[%s4196_s6 + $0x4c] sm:$0xf0]  ;;  %v2668_v23 = vld [vmem:[%s4196_s6 + $0xd0] sm:$0xf0]  ;;  %v3510_v3 = vld [vmem:[%s4196_s6 + $0x254] sm:$0xf0] }
 0x130   : > { %2065 = vmatmul.bf16.vlgmr.msrb.gmra.mxu1 %v4286_v27  ;;  %v2603_v31 = vor.u32 %v3445_v20, %v2602_v19  ;;  %v3565_v32 = vld [vmem:[%s4196_s6 + $0x414] sm:$0xf]  ;;  %v3614_v6 = vld [vmem:[%s4196_s6 + $0x59c] sm:$0xf]  ;;  %v2867_v9 = vor.u32 %v3510_v3, %v2866_v2  ;;  %v2610_v58 = vld [vmem:[%s4196_s6 + $0x18] sm:$0xf] }
 0x131   : > { %2124 = vmatpush.bf16.msra.mxu1 %v1970_v25  ;;  %2090 = vmatpush.bf16.msrb.mxu0 %v2599_v34  ;;  %v3558_v25 = vld [vmem:[%s4196_s6 + $0x3d4] sm:$0xf0]  ;;  %v3116_v33 = vld [vmem:[%s4196_s6 + $0x450] sm:$0xf0]  ;;  %v2671_v34 = vor.u32 %v3453_v21, %v2668_v23  ;;  %v3316_v7 = vld [vmem:[%s4196_s6 + $0x5d8] sm:$0xf0] }
 0x132   : > { %2111 = vmatpush.bf16.msra.mxu3 %v2923_v26  ;;  %2136 = vmatpush.bf16.msra.mxu2 %v2991_v30  ;;  %v3183_v26 = vor.u32 %v3581_v16, %v3180_v17  ;;  %v3115_v30 = vor.u32 %v3573_v15, %v3114_v11  ;;  %v3059_v35 = vor.u32 %v3558_v25, %v3058_v24  ;;  %v3437_v36 = vld [vmem:[%s4196_s6 + $0x14] sm:$0xf]  ;;  %v2868_v11 = vld [vmem:[%s4196_s6 + $0x258] sm:$0xf0]  ;;  %v3494_v15 = vld [vmem:[%s4196_s6 + $0x1d4] sm:$0xf0] }
 0x133   : > { %v2604_v40 = vld [vmem:[%s4196_s6 + $0x50] sm:$0xf0]  ;;  %v3119_v44 = vor.u32 %v3565_v32, %v3116_v33  ;;  %v3186_v16 = vld [vmem:[%s4196_s6 + $0x498] sm:$0xf]  ;;  %v3252_v19 = vld [vmem:[%s4196_s6 + $0x558] sm:$0xf0] }
 0x134   : > { %2091 = vmatmul.bf16.vlgmr.msrb.gmra.mxu0 %v4286_v27  ;;  %v2607_v48 = vor.u32 %v3437_v36, %v2604_v40  ;;  %v3590_v17 = vld [vmem:[%s4196_s6 + $0x4d4] sm:$0xf0]  ;;  %v2804_v23 = vld [vmem:[%s4196_s6 + $0x1d8] sm:$0xf0]  ;;  %v3559_v36 = vld [vmem:[%s4196_s6 + $0x3dc] sm:$0xf0] }
 0x135   : > { %2150 = vmatpush.bf16.msra.mxu0 %v1973_v37  ;;  %2125 = vmatpush.bf16.msra.mxu1 %v3371_v38  ;;  %v3550_v37 = vld [vmem:[%s4196_s6 + $0x39c] sm:$0xf]  ;;  %v3187_v24 = vor.u32 %v3590_v17, %v3186_v16  ;;  %v3446_v59 = vld [vmem:[%s4196_s6 + $0x54] sm:$0xf0]  ;;  %v3527_v2 = vld [vmem:[%s4196_s6 + $0x2dc] sm:$0xf0] }
 0x136   : > { %2112 = vmatpush.bf16.msra.mxu3 %v2859_v39  ;;  %2137 = vmatpush.bf16.msra.mxu2 %v2927_v43  ;;  %v3060_v38 = vld [vmem:[%s4196_s6 + $0x3d8] sm:$0xf0]  ;;  %v1736_v39 = vpack.c.b16 %v1512_v22, %v1512_v22  ;;  %v1976_v43 = vsel %vm1956_vm0, %v1735_v29, 0  ;;  %v3478_v29 = vld [vmem:[%s4196_s6 + $0x154] sm:$0xf0] }
 0x137   : > { %v3063_v47 = vor.u32 %v3550_v37, %v3060_v38  ;;  %v3486_v22 = vld [vmem:[%s4196_s6 + $0x19c] sm:$0xf]  ;;  %v864_v37 = vld [vmem:[%s4196_s6 + $0x6a0] sm:$0xff] }
 0x138   : > { %v3582_v32 = vld [vmem:[%s4196_s6 + $0x49c] sm:$0xf]  ;;  %v3535_v3 = vld [vmem:[%s4196_s6 + $0x324] sm:$0xf]  ;;  %v3511_v16 = vld [vmem:[%s4196_s6 + $0x25c] sm:$0xf0] }
 0x139   : > { %2151 = vmatpush.bf16.msra.mxu0 %v3375_v49  ;;  %2126 = vmatpush.bf16.msra.mxu1 %v3307_v50  ;;  %v2995_v49 = vor.u32 %v3542_v42, %v2994_v41  ;;  %v1979_v50 = vsel %vm1956_vm0, %v1736_v39, 0  ;;  %v3188_v33 = vld [vmem:[%s4196_s6 + $0x4d8] sm:$0xf0]  ;;  %v3519_v17 = vld [vmem:[%s4196_s6 + $0x2a4] sm:$0xf] }
 0x13a   : > { %2113 = vmatpush.bf16.msra.mxu3 %v2795_v51  ;;  %2138 = vmatpush.bf16.msra.mxu2 %v2863_v55  ;;  %v3534_v51 = vld [vmem:[%s4196_s6 + $0x31c] sm:$0xf]  ;;  %v3526_v55 = vld [vmem:[%s4196_s6 + $0x2d4] sm:$0xf0]  ;;  %v3191_v42 = vor.u32 %v3582_v32, %v3188_v33  ;;  %v2876_v32 = vld [vmem:[%s4196_s6 + $0x260] sm:$0xf0] }
 0x13b   : > { %v2999_v60 = vor.u32 %v3534_v51, %v2996_v52  ;;  %v3470_v39 = vld [vmem:[%s4196_s6 + $0x11c] sm:$0xf]  ;;  %v3543_v51 = vld [vmem:[%s4196_s6 + $0x35c] sm:$0xf0]  ;;  %v3551_v52 = vld [vmem:[%s4196_s6 + $0x3a4] sm:$0xf] }
 0x13c   : > { %v2740_v40 = vld [vmem:[%s4196_s6 + $0x158] sm:$0xf0] }
 0x13d   : > { %2152 = vmatpush.bf16.msra.mxu0 %v3311_v61  ;;  %2127 = vmatpush.bf16.msra.mxu1 %v3243_v63  ;;  %v2931_v61 = vor.u32 %v3526_v55, %v2930_v54  ;;  %v2932_v63 = vld [vmem:[%s4196_s6 + $0x2d8] sm:$0xf0] }
 0x13e   : > { %2114 = vmatpush.bf16.msra.mxu3 %v2731_v0  ;;  %2139 = vmatpush.bf16.msra.mxu2 %v2799_v4  ;;  %v3315_v0 = vor.u32 %v3622_v57, %v3314_v56  ;;  %v3250_v4 = vld [vmem:[%s4196_s6 + $0x518] sm:$0xf]  ;;  %v2935_v8 = vor.u32 %v3518_v62, %v2932_v63  ;;  %v3566_v46 = vld [vmem:[%s4196_s6 + $0x41c] sm:$0xf] }
 0x13f   : > { %v3251_v12 = vor.u32 %v3606_v5, %v3250_v4  ;;  %v3454_v55 = vld [vmem:[%s4196_s6 + $0x9c] sm:$0xf]  ;;  %v3004_v4 = vld [vmem:[%s4196_s6 + $0x360] sm:$0xf0]  ;;  %v2611_v5 = vor.u32 %v3446_v59, %v2610_v58 }
 0x140   : > { %v2676_v56 = vld [vmem:[%s4196_s6 + $0xd8] sm:$0xf0]  ;;  %v2748_v58 = vld [vmem:[%s4196_s6 + $0x160] sm:$0xf0] }
 0x141   : > { %2153 = vmatpush.bf16.msra.mxu0 %v3247_v10  ;;  %2128 = vmatpush.bf16.msra.mxu1 %v3179_v13  ;;  %v3502_v10 = vld [vmem:[%s4196_s6 + $0x21c] sm:$0xf]  ;;  %v3319_v13 = vor.u32 %v3614_v6, %v3316_v7 }
 0x142   : > { %2115 = vmatpush.bf16.msra.mxu3 %v2667_v14  ;;  %2140 = vmatpush.bf16.msra.mxu2 %v2735_v18  ;;  %v2802_v14 = vld [vmem:[%s4196_s6 + $0x198] sm:$0xf]  ;;  %v3598_v18 = vld [vmem:[%s4196_s6 + $0x51c] sm:$0xf]  ;;  %v2871_v20 = vor.u32 %v3502_v10, %v2868_v11 }
 0x143   : > { %v2803_v21 = vor.u32 %v3494_v15, %v2802_v14  ;;  %v3255_v25 = vor.u32 %v3598_v18, %v3252_v19  ;;  %v3438_v6 = vld [vmem:[%s4196_s6 + $0x1c] sm:$0xf]  ;;  %v2874_v14 = vld [vmem:[%s4196_s6 + $0x220] sm:$0xf]  ;;  %v2940_v18 = vld [vmem:[%s4196_s6 + $0x2e0] sm:$0xf0] }
 0x144   : > { %v2612_v7 = vld [vmem:[%s4196_s6 + $0x58] sm:$0xf0] }
 0x145   : > { %2154 = vmatpush.bf16.msra.mxu0 %v3183_v26  ;;  %2129 = vmatpush.bf16.msra.mxu1 %v3115_v30  ;;  %v2738_v26 = vld [vmem:[%s4196_s6 + $0x118] sm:$0xf]  ;;  %v2615_v15 = vor.u32 %v3438_v6, %v2612_v7  ;;  %v3455_v6 = vld [vmem:[%s4196_s6 + $0xa4] sm:$0xf] }
 0x146   : > { %2116 = vmatpush.bf16.msra.mxu3 %v2603_v31  ;;  %2141 = vmatpush.bf16.msra.mxu2 %v2671_v34  ;;  %v3122_v30 = vld [vmem:[%s4196_s6 + $0x418] sm:$0xf]  ;;  %v2807_v34 = vor.u32 %v3486_v22, %v2804_v23  ;;  %v2739_v38 = vor.u32 %v3478_v29, %v2738_v26  ;;  %v3388_v22 = vld [vmem:[%s4196_s6 + $0x660] sm:$0xf0]  ;;  %v2875_v23 = vor.u32 %v3511_v16, %v2874_v14  ;;  %v3623_v26 = vld [vmem:[%s4196_s6 + $0x5dc] sm:$0xf0] }
 0x147   : > { %v3574_v31 = vld [vmem:[%s4196_s6 + $0x454] sm:$0xf0]  ;;  %v2810_v29 = vld [vmem:[%s4196_s6 + $0x1a0] sm:$0xf]  ;;  %v2684_v7 = vld [vmem:[%s4196_s6 + $0xe0] sm:$0xf0] }
 0x148   : > { %3420 = vmatmul.msk.bf16.vlgmr.msra.gmra.mxu1 %vm1953_vm1, %v4288_v28  ;;  %v3123_v41 = vor.u32 %v3574_v31, %v3122_v30  ;;  %v3495_v30 = vld [vmem:[%s4196_s6 + $0x1dc] sm:$0xf0]  ;;  %v3503_v31 = vld [vmem:[%s4196_s6 + $0x224] sm:$0xf]  ;;  %v2687_v16 = vor.u32 %v3455_v6, %v2684_v7  ;;  %v2754_v7 = vld [vmem:[%s4196_s6 + $0x128] sm:$0xf] }
 0x149   : > { %2161 = vmatpush.bf16.msrb.mxu1 %v3059_v35  ;;  %2155 = vmatpush.bf16.msra.mxu0 %v3119_v44  ;;  %v3066_v35 = vld [vmem:[%s4196_s6 + $0x3a0] sm:$0xf]  ;;  %v3462_v44 = vld [vmem:[%s4196_s6 + $0xd4] sm:$0xf0] }
 0x14a   : > { %2176 = vmatpush.bf16.msrb.mxu3 %v1976_v43  ;;  %2142 = vmatpush.bf16.msra.mxu2 %v2607_v48  ;;  %v2674_v43 = vld [vmem:[%s4196_s6 + $0x98] sm:$0xf]  ;;  %v3067_v45 = vor.u32 %v3559_v36, %v3066_v35  ;;  %v3002_v48 = vld [vmem:[%s4196_s6 + $0x320] sm:$0xf]  ;;  %v3615_v36 = vld [vmem:[%s4196_s6 + $0x5a4] sm:$0xf] }
 0x14b   : > { %2117 = vmatmul.bf16.vlgmr.msra.gmra.mxu3 %v4286_v27  ;;  %v2675_v54 = vor.u32 %v3462_v44, %v2674_v43  ;;  %v3258_v35 = vld [vmem:[%s4196_s6 + $0x520] sm:$0xf]  ;;  %v3487_v43 = vld [vmem:[%s4196_s6 + $0x1a4] sm:$0xf] }
 0x14c   : > { %3421 = vmatmul.msk.bf16.vlgmr.msra.gmra.mxu0 %vm1953_vm1, %v4288_v28  ;;  %v2812_v44 = vld [vmem:[%s4196_s6 + $0x1e0] sm:$0xf0] }
 0x14d   : > { %2187 = vmatpush.bf16.msrb.mxu0 %v3063_v47  ;;  %2162 = vmatpush.bf16.msrb.mxu1 %v2995_v49  ;;  %v3124_v47 = vld [vmem:[%s4196_s6 + $0x458] sm:$0xf0]  ;;  %v1513_v49 = vunpack.c.l.b16 %v864_v37 }
 0x14e   : > { %2177 = vmatpush.bf16.msrb.mxu3 %v3379_v53  ;;  %2202 = vmatpush.bf16.msrb.mxu2 %v1979_v50  ;;  %v2743_v50 = vor.u32 %v3470_v39, %v2740_v40  ;;  %v3068_v53 = vld [vmem:[%s4196_s6 + $0x3e0] sm:$0xf0]  ;;  %v3127_v57 = vor.u32 %v3566_v46, %v3124_v47  ;;  %v2879_v39 = vor.u32 %v3503_v31, %v2876_v32  ;;  %v3607_v40 = vld [vmem:[%s4196_s6 + $0x55c] sm:$0xf0] }
 0x14f   : > { %2143 = vmatmul.bf16.vlgmr.msra.gmra.mxu2 %v4286_v27  ;;  %v3071_v62 = vor.u32 %v3551_v52, %v3068_v53  ;;  %v1737_v63 = vpack.c.b16 %v1513_v49, %v1513_v49  ;;  %v3259_v47 = vor.u32 %v3607_v40, %v3258_v35  ;;  %v3260_v49 = vld [vmem:[%s4196_s6 + $0x560] sm:$0xf0]  ;;  %v3194_v52 = vld [vmem:[%s4196_s6 + $0x4a0] sm:$0xf]  ;;  %v3624_v40 = vld [vmem:[%s4196_s6 + $0x5e4] sm:$0xf0] }
 0x150   : > { %v3591_v53 = vld [vmem:[%s4196_s6 + $0x4dc] sm:$0xf0] }
 0x151   : > { %2188 = vmatpush.bf16.msrb.mxu0 %v2999_v60  ;;  %2163 = vmatpush.bf16.msrb.mxu1 %v2931_v61  ;;  %v1514_v60 = vunpack.c.h.b16 %v864_v37  ;;  %v3003_v61 = vor.u32 %v3543_v51, %v3002_v48  ;;  %v1982_v10 = vsel %vm1956_vm0, %v1737_v63, 0  ;;  %v3324_v37 = vld [vmem:[%s4196_s6 + $0x5e0] sm:$0xf0]  ;;  %v2815_v51 = vor.u32 %v3487_v43, %v2812_v44  ;;  %v3632_v43 = vld [vmem:[%s4196_s6 + $0x62c] sm:$0xf] }
 0x152   : > { %2178 = vmatpush.bf16.msrb.mxu3 %v3315_v0  ;;  %2203 = vmatpush.bf16.msrb.mxu2 %v3383_v1  ;;  %v2938_v0 = vld [vmem:[%s4196_s6 + $0x2a0] sm:$0xf]  ;;  %v2679_v1 = vor.u32 %v3454_v55, %v2676_v56  ;;  %v3327_v46 = vor.u32 %v3615_v36, %v3324_v37  ;;  %v3599_v48 = vld [vmem:[%s4196_s6 + $0x524] sm:$0xf]  ;;  %v2946_v37 = vld [vmem:[%s4196_s6 + $0x2a8] sm:$0xf] }
 0x153   : > { %v2939_v11 = vor.u32 %v3527_v2, %v2938_v0  ;;  %v3463_v56 = vld [vmem:[%s4196_s6 + $0xdc] sm:$0xf0]  ;;  %v3263_v59 = vor.u32 %v3599_v48, %v3260_v49  ;;  %v3396_v44 = vld [vmem:[%s4196_s6 + $0x668] sm:$0xf0]  ;;  %v2882_v49 = vld [vmem:[%s4196_s6 + $0x228] sm:$0xf] }
 0x154   : > { %v3575_v2 = vld [vmem:[%s4196_s6 + $0x45c] sm:$0xf0] }
 0x155   : > { %2189 = vmatpush.bf16.msrb.mxu0 %v2935_v8  ;;  %2164 = vmatpush.bf16.msrb.mxu1 %v2867_v9  ;;  %v3386_v8 = vld [vmem:[%s4196_s6 + $0x620] sm:$0xf]  ;;  %v1738_v9 = vpack.c.b16 %v1514_v60, %v1514_v60  ;;  %v3195_v60 = vor.u32 %v3591_v53, %v3194_v52  ;;  %v3266_v52 = vld [vmem:[%s4196_s6 + $0x528] sm:$0xf] }
 0x156   : > { %2179 = vmatpush.bf16.msrb.mxu3 %v3251_v12  ;;  %2204 = vmatpush.bf16.msrb.mxu2 %v3319_v13  ;;  %v3007_v12 = vor.u32 %v3535_v3, %v3004_v4  ;;  %v3639_v13 = vld [vmem:[%s4196_s6 + $0x65c] sm:$0xf0]  ;;  %v3608_v53 = vld [vmem:[%s4196_s6 + $0x564] sm:$0xf0] }
 0x157   : > { %v3387_v19 = vor.u32 %v3639_v13, %v3386_v8  ;;  %v2618_v3 = vld [vmem:[%s4196_s6 + $0x20] sm:$0xf]  ;;  %v3132_v13 = vld [vmem:[%s4196_s6 + $0x460] sm:$0xf0] }
 0x159   : > { %2190 = vmatpush.bf16.msrb.mxu0 %v2871_v20  ;;  %2165 = vmatpush.bf16.msrb.mxu1 %v2803_v21  ;;  %v1985_v20 = vsel %vm1956_vm0, %v1738_v9, 0  ;;  %v3631_v21 = vld [vmem:[%s4196_s6 + $0x624] sm:$0xf]  ;;  %v3074_v9 = vld [vmem:[%s4196_s6 + $0x3a8] sm:$0xf] }
 0x15a   : > { %2180 = vmatpush.bf16.msrb.mxu3 %v3187_v24  ;;  %2205 = vmatpush.bf16.msrb.mxu2 %v3255_v25  ;;  %v2943_v24 = vor.u32 %v3519_v17, %v2940_v18  ;;  %v3322_v25 = vld [vmem:[%s4196_s6 + $0x5a0] sm:$0xf]  ;;  %v3391_v33 = vor.u32 %v3631_v21, %v3388_v22  ;;  %v3552_v18 = vld [vmem:[%s4196_s6 + $0x3ac] sm:$0xf]  ;;  %v3439_v21 = vld [vmem:[%s4196_s6 + $0x24] sm:$0xf] }
 0x15b   : > { %v2620_v22 = vld [vmem:[%s4196_s6 + $0x60] sm:$0xf0] }
 0x15c   : > { %v2623_v32 = vor.u32 %v3439_v21, %v2620_v22  ;;  %v2690_v22 = vld [vmem:[%s4196_s6 + $0xa8] sm:$0xf] }
 0x15d   : > { %2191 = vmatpush.bf16.msrb.mxu0 %v2807_v34  ;;  %2166 = vmatpush.bf16.msrb.mxu1 %v2739_v38  ;;  %v3323_v34 = vor.u32 %v3623_v26, %v3322_v25  ;;  %v2811_v38 = vor.u32 %v3495_v30, %v2810_v29  ;;  %v3544_v25 = vld [vmem:[%s4196_s6 + $0x364] sm:$0xf0] }
 0x15e   : > { %2181 = vmatpush.bf16.msrb.mxu3 %v3123_v41  ;;  %2206 = vmatpush.bf16.msrb.mxu2 %v3191_v42  ;;  %v2746_v41 = vld [vmem:[%s4196_s6 + $0x120] sm:$0xf]  ;;  %v3394_v26 = vld [vmem:[%s4196_s6 + $0x628] sm:$0xf] }
 0x15f   : > { %v3479_v42 = vld [vmem:[%s4196_s6 + $0x15c] sm:$0xf0]  ;;  %v3640_v29 = vld [vmem:[%s4196_s6 + $0x664] sm:$0xf0] }
 0x160   : > { %v3395_v36 = vor.u32 %v3640_v29, %v3394_v26  ;;  %v3568_v26 = vld [vmem:[%s4196_s6 + $0x42c] sm:$0xf] }
 0x161   : > { %2192 = vmatpush.bf16.msrb.mxu0 %v2743_v50  ;;  %2167 = vmatpush.bf16.msrb.mxu1 %v2675_v54  ;;  %v2747_v50 = vor.u32 %v3479_v42, %v2746_v41  ;;  %v2682_v54 = vld [vmem:[%s4196_s6 + $0xa0] sm:$0xf]  ;;  %v3140_v29 = vld [vmem:[%s4196_s6 + $0x468] sm:$0xf0] }
 0x162   : > { %2213 = vmatpush.bf16.msra.mxu3 %v3067_v45  ;;  %2207 = vmatpush.bf16.msrb.mxu2 %v3127_v57  ;;  %v4491_v45 = vld [vmem:[%s4196_s6 + $0x6a8] sm:$0xff]  ;;  %v3471_v57 = vld [vmem:[%s4196_s6 + $0x124] sm:$0xf]  ;;  %v2683_v63 = vor.u32 %v3463_v56, %v2682_v54 }
 0x163   : > { %3422 = vmatmul.msk.bf16.vlgmr.msrb.gmra.mxu3 %vm1953_vm1, %v4288_v28  ;;  %v1515_v55 = vunpack.c.l.b16 %v4491_v45  ;;  %v2751_v0 = vor.u32 %v3471_v57, %v2748_v58  ;;  %v1516_v14 = vunpack.c.h.b16 %v4491_v45  ;;  %v3520_v45 = vld [vmem:[%s4196_s6 + $0x2ac] sm:$0xf] }
 0x164   : > { %v3332_v56 = vld [vmem:[%s4196_s6 + $0x5e8] sm:$0xf0] }
 0x165   : > { %2193 = vmatpush.bf16.msrb.mxu0 %v2679_v1  ;;  %2168 = vmatpush.bf16.msrb.mxu1 %v2611_v5  ;;  %v3130_v1 = vld [vmem:[%s4196_s6 + $0x420] sm:$0xf]  ;;  %v1739_v4 = vpack.c.b16 %v1515_v55, %v1515_v55  ;;  %v1740_v31 = vpack.c.b16 %v1516_v14, %v1516_v14  ;;  %v3616_v55 = vld [vmem:[%s4196_s6 + $0x5ac] sm:$0xf] }
 0x166   : > { %2214 = vmatpush.bf16.msra.mxu3 %v3003_v61  ;;  %2239 = vmatpush.bf16.msra.mxu2 %v3071_v62  ;;  %v3583_v61 = vld [vmem:[%s4196_s6 + $0x4a4] sm:$0xf]  ;;  %v3447_v5 = vld [vmem:[%s4196_s6 + $0x5c] sm:$0xf0]  ;;  %v3504_v57 = vld [vmem:[%s4196_s6 + $0x22c] sm:$0xf] }
 0x167   : > { %3423 = vmatmul.msk.bf16.vlgmr.msrb.gmra.mxu2 %vm1953_vm1, %v4288_v28  ;;  %v3196_v62 = vld [vmem:[%s4196_s6 + $0x4e0] sm:$0xf0]  ;;  %v1988_v17 = vsel %vm1956_vm0, %v1739_v4, 0  ;;  %v1991_v41 = vsel %vm1956_vm0, %v1740_v31, 0  ;;  %v2884_v58 = vld [vmem:[%s4196_s6 + $0x268] sm:$0xf0] }
 0x168   : > { %2169 = vmatmul.bf16.vlgmr.msrb.gmra.mxu1 %v4286_v27  ;;  %v3199_v8 = vor.u32 %v3583_v61, %v3196_v62  ;;  %v2818_v61 = vld [vmem:[%s4196_s6 + $0x1a8] sm:$0xf]  ;;  %v2820_v4 = vld [vmem:[%s4196_s6 + $0x1e8] sm:$0xf0] }
 0x169   : > { %2228 = vmatpush.bf16.msra.mxu1 %v1982_v10  ;;  %2194 = vmatpush.bf16.msrb.mxu0 %v2615_v15  ;;  %v3560_v10 = vld [vmem:[%s4196_s6 + $0x3e4] sm:$0xf0]  ;;  %v2619_v15 = vor.u32 %v3447_v5, %v2618_v3  ;;  %v3488_v3 = vld [vmem:[%s4196_s6 + $0x1ac] sm:$0xf] }
 0x16a   : > { %2215 = vmatpush.bf16.msra.mxu3 %v2939_v11  ;;  %2240 = vmatpush.bf16.msra.mxu2 %v3007_v12  ;;  %v3131_v11 = vor.u32 %v3575_v2, %v3130_v1  ;;  %v3567_v12 = vld [vmem:[%s4196_s6 + $0x424] sm:$0xf]  ;;  %v3496_v62 = vld [vmem:[%s4196_s6 + $0x1e4] sm:$0xf0]  ;;  %v3600_v1 = vld [vmem:[%s4196_s6 + $0x52c] sm:$0xf]  ;;  %v2823_v14 = vor.u32 %v3488_v3, %v2820_v4 }
 0x16b   : > { %v3268_v2 = vld [vmem:[%s4196_s6 + $0x568] sm:$0xf0]  ;;  %v2819_v5 = vor.u32 %v3496_v62, %v2818_v61  ;;  %v3641_v61 = vld [vmem:[%s4196_s6 + $0x66c] sm:$0xf0] }
 0x16c   : > { %2195 = vmatmul.bf16.vlgmr.msrb.gmra.mxu0 %v4286_v27  ;;  %v3513_v62 = vld [vmem:[%s4196_s6 + $0x26c] sm:$0xf0] }
 0x16d   : > { %2254 = vmatpush.bf16.msra.mxu0 %v1985_v20  ;;  %2229 = vmatpush.bf16.msra.mxu1 %v3387_v19  ;;  %v3076_v19 = vld [vmem:[%s4196_s6 + $0x3e8] sm:$0xf0]  ;;  %v3075_v20 = vor.u32 %v3560_v10, %v3074_v9  ;;  %v3138_v9 = vld [vmem:[%s4196_s6 + $0x428] sm:$0xf]  ;;  %v3271_v10 = vor.u32 %v3600_v1, %v3268_v2  ;;  %v3633_v1 = vld [vmem:[%s4196_s6 + $0x634] sm:$0xf] }
 0x16e   : > { %2216 = vmatpush.bf16.msra.mxu3 %v2875_v23  ;;  %2241 = vmatpush.bf16.msra.mxu2 %v2943_v24  ;;  %v3010_v23 = vld [vmem:[%s4196_s6 + $0x328] sm:$0xf]  ;;  %v3135_v24 = vor.u32 %v3567_v12, %v3132_v13  ;;  %v3079_v30 = vor.u32 %v3552_v18, %v3076_v19  ;;  %v3584_v12 = vld [vmem:[%s4196_s6 + $0x4ac] sm:$0xf]  ;;  %v3404_v2 = vld [vmem:[%s4196_s6 + $0x670] sm:$0xf0] }
 0x16f   : > { %v3011_v35 = vor.u32 %v3544_v25, %v3010_v23  ;;  %v3204_v13 = vld [vmem:[%s4196_s6 + $0x4e8] sm:$0xf0]  ;;  %v3464_v25 = vld [vmem:[%s4196_s6 + $0xe4] sm:$0xf0] }
 0x170   : > { %v3472_v18 = vld [vmem:[%s4196_s6 + $0x12c] sm:$0xf]  ;;  %v3207_v23 = vor.u32 %v3584_v12, %v3204_v13  ;;  %v3407_v12 = vor.u32 %v3633_v1, %v3404_v2  ;;  %v4608_v13 = vld.sshfl [vmem:[#allocation1] sm:$0xff pattern:$0x73625140] }
 0x171   : > { %2255 = vmatpush.bf16.msra.mxu0 %v3391_v33  ;;  %2230 = vmatpush.bf16.msra.mxu1 %v3323_v34  ;;  %v3536_v33 = vld [vmem:[%s4196_s6 + $0x32c] sm:$0xf]  ;;  %v3562_v1 = vld [vmem:[%s4196_s6 + $0x3f4] sm:$0xf0] }
 0x172   : > { %2217 = vmatpush.bf16.msra.mxu3 %v2811_v38  ;;  %2242 = vmatpush.bf16.msra.mxu2 %v2879_v39  ;;  %v3012_v34 = vld [vmem:[%s4196_s6 + $0x368] sm:$0xf0]  ;;  %v3528_v38 = vld [vmem:[%s4196_s6 + $0x2e4] sm:$0xf0] }
 0x173   : > { %v3330_v39 = vld [vmem:[%s4196_s6 + $0x5a8] sm:$0xf]  ;;  %v3015_v42 = vor.u32 %v3536_v33, %v3012_v34  ;;  %v2756_v19 = vld [vmem:[%s4196_s6 + $0x168] sm:$0xf0]  ;;  %v3545_v33 = vld [vmem:[%s4196_s6 + $0x36c] sm:$0xf0] }
 0x174   : > { %v3331_v48 = vor.u32 %v3624_v40, %v3330_v39  ;;  %v2759_v31 = vor.u32 %v3472_v18, %v2756_v19  ;;  %v3553_v34 = vld [vmem:[%s4196_s6 + $0x3b4] sm:$0xf]  ;;  %v3143_v40 = vor.u32 %v3568_v26, %v3140_v29  ;;  %v3274_v19 = vld [vmem:[%s4196_s6 + $0x530] sm:$0xf] }
 0x175   : > { %2256 = vmatpush.bf16.msra.mxu0 %v3327_v46  ;;  %2231 = vmatpush.bf16.msra.mxu1 %v3259_v47  ;;  %v2948_v46 = vld [vmem:[%s4196_s6 + $0x2e8] sm:$0xf0]  ;;  %v2947_v47 = vor.u32 %v3528_v38, %v2946_v37  ;;  %v2691_v38 = vor.u32 %v3464_v25, %v2690_v22  ;;  %v2762_v22 = vld [vmem:[%s4196_s6 + $0x130] sm:$0xf]  ;;  %v3489_v25 = vld [vmem:[%s4196_s6 + $0x1b4] sm:$0xf] }
 0x176   : > { %2218 = vmatpush.bf16.msra.mxu3 %v2747_v50  ;;  %2243 = vmatpush.bf16.msra.mxu2 %v2815_v51  ;;  %v3399_v50 = vor.u32 %v3632_v43, %v3396_v44  ;;  %v3512_v51 = vld [vmem:[%s4196_s6 + $0x264] sm:$0xf0]  ;;  %v2951_v54 = vor.u32 %v3520_v45, %v2948_v46  ;;  %v2692_v37 = vld [vmem:[%s4196_s6 + $0xe8] sm:$0xf0]  ;;  %v2828_v26 = vld [vmem:[%s4196_s6 + $0x1f0] sm:$0xf0] }
 0x177   : > { %v3448_v43 = vld [vmem:[%s4196_s6 + $0x64] sm:$0xf0] }
 0x179   : > { %2257 = vmatpush.bf16.msra.mxu0 %v3263_v59  ;;  %2232 = vmatpush.bf16.msra.mxu1 %v3195_v60  ;;  %v2883_v59 = vor.u32 %v3512_v51, %v2882_v49  ;;  %v3267_v60 = vor.u32 %v3608_v53, %v3266_v52  ;;  %v3537_v49 = vld [vmem:[%s4196_s6 + $0x334] sm:$0xf]  ;;  %v3440_v51 = vld [vmem:[%s4196_s6 + $0x2c] sm:$0xf] }
 0x17a   : > { %2219 = vmatpush.bf16.msra.mxu3 %v2683_v63  ;;  %2244 = vmatpush.bf16.msra.mxu2 %v2751_v0  ;;  %v3202_v63 = vld [vmem:[%s4196_s6 + $0x4a8] sm:$0xf]  ;;  %v2628_v52 = vld [vmem:[%s4196_s6 + $0x68] sm:$0xf0] }
 0x17b   : > { %v3592_v0 = vld [vmem:[%s4196_s6 + $0x4e4] sm:$0xf0]  ;;  %v4586_v53 = vld.sshfl [vmem:[#allocation1 + $0x8] sm:$0xff pattern:$0x73625140] }
 0x17c   : > { %v3203_v6 = vor.u32 %v3592_v0, %v3202_v63  ;;  %v3521_v63 = vld [vmem:[%s4196_s6 + $0x2b4] sm:$0xf] }
 0x17d   : > { %2258 = vmatpush.bf16.msra.mxu0 %v3199_v8  ;;  %2233 = vmatpush.bf16.msra.mxu1 %v3131_v11  ;;  %v3480_v8 = vld [vmem:[%s4196_s6 + $0x164] sm:$0xf0]  ;;  %v2956_v0 = vld [vmem:[%s4196_s6 + $0x2f0] sm:$0xf0] }
 0x17e   : > { %2220 = vmatpush.bf16.msra.mxu3 %v2619_v15  ;;  %2245 = vmatpush.bf16.msra.mxu2 %v2687_v16  ;;  %v3576_v11 = vld [vmem:[%s4196_s6 + $0x464] sm:$0xf0]  ;;  %v3082_v15 = vld [vmem:[%s4196_s6 + $0x3b0] sm:$0xf] }
 0x17f   : > { %v3561_v16 = vld [vmem:[%s4196_s6 + $0x3ec] sm:$0xf0]  ;;  %v3139_v21 = vor.u32 %v3576_v11, %v3138_v9  ;;  %v2892_v11 = vld [vmem:[%s4196_s6 + $0x270] sm:$0xf0] }
 0x180   : > { %3424 = vmatmul.msk.bf16.vlgmr.msra.gmra.mxu1 %vm1953_vm1, %v4288_v28  ;;  %v3497_v9 = vld [vmem:[%s4196_s6 + $0x1ec] sm:$0xf0] }
 0x181   : > { %2265 = vmatpush.bf16.msrb.mxu1 %v3075_v20  ;;  %2259 = vmatpush.bf16.msra.mxu0 %v3135_v24  ;;  %v2755_v20 = vor.u32 %v3480_v8, %v2754_v7  ;;  %v3083_v24 = vor.u32 %v3561_v16, %v3082_v15  ;;  %v3625_v7 = vld [vmem:[%s4196_s6 + $0x5ec] sm:$0xf0]  ;;  %v3340_v15 = vld [vmem:[%s4196_s6 + $0x5f0] sm:$0xf0] }
 0x182   : > { %2280 = vmatpush.bf16.msrb.mxu3 %v1988_v17  ;;  %2246 = vmatpush.bf16.msra.mxu2 %v2623_v32  ;;  %v866_v17 = vld [vmem:[%s4196_s6 + $0x6b0] sm:$0xff]  ;;  %v4613_v16 = vpop.permute.xlu0 %2424 }
 0x183   : > { %2221 = vmatmul.bf16.vlgmr.msra.gmra.mxu3 %v4286_v27  ;;  %v3018_v32 = vld [vmem:[%s4196_s6 + $0x330] sm:$0xf]  ;;  %v1518_v39 = vunpack.c.h.b16 %v866_v17 }
 0x184   : > { %3425 = vmatmul.msk.bf16.vlgmr.msra.gmra.mxu0 %vm1953_vm1, %v4288_v28  ;;  %v3335_v28 = vor.u32 %v3616_v55, %v3332_v56  ;;  %v2826_v8 = vld [vmem:[%s4196_s6 + $0x1b0] sm:$0xf] }
 0x185   : > { %2291 = vmatpush.bf16.msrb.mxu0 %v3079_v30  ;;  %2266 = vmatpush.bf16.msrb.mxu1 %v3011_v35  ;;  %v1517_v30 = vunpack.c.l.b16 %v866_v17  ;;  %v3084_v35 = vld [vmem:[%s4196_s6 + $0x3f0] sm:$0xf0]  ;;  %v1742_v55 = vpack.c.b16 %v1518_v39, %v1518_v39  ;;  %v2827_v18 = vor.u32 %v3497_v9, %v2826_v8  ;;  %v2831_v39 = vor.u32 %v3489_v25, %v2828_v26  ;;  %v3554_v9 = vld [vmem:[%s4196_s6 + $0x3bc] sm:$0xf]  ;;  %v3410_v26 = vld [vmem:[%s4196_s6 + $0x638] sm:$0xf] }
 0x186   : > { %2281 = vmatpush.bf16.msrb.mxu3 %v3395_v36  ;;  %2306 = vmatpush.bf16.msrb.mxu2 %v1991_v41  ;;  %v3456_v36 = vld [vmem:[%s4196_s6 + $0xac] sm:$0xf]  ;;  %v3019_v41 = vor.u32 %v3545_v33, %v3018_v32  ;;  %v3087_v45 = vor.u32 %v3553_v34, %v3084_v35  ;;  %v3276_v32 = vld [vmem:[%s4196_s6 + $0x570] sm:$0xf0]  ;;  %v3210_v35 = vld [vmem:[%s4196_s6 + $0x4b0] sm:$0xf] }
 0x187   : > { %2247 = vmatmul.bf16.vlgmr.msra.gmra.mxu2 %v4286_v27  ;;  %v2887_v27 = vor.u32 %v3504_v57, %v2884_v58  ;;  %v1741_v44 = vpack.c.b16 %v1517_v30, %v1517_v30  ;;  %v2695_v46 = vor.u32 %v3456_v36, %v2692_v37  ;;  %v3402_v58 = vld [vmem:[%s4196_s6 + $0x630] sm:$0xf]  ;;  %v867_v37 = vld [vmem:[%s4196_s6 + $0x6b8] sm:$0xff] }
 0x188   : > { %v3403_v3 = vor.u32 %v3641_v61, %v3402_v58  ;;  %v3593_v36 = vld [vmem:[%s4196_s6 + $0x4ec] sm:$0xf0]  ;;  %v1520_v61 = vunpack.c.h.b16 %v867_v37 }
 0x189   : > { %2292 = vmatpush.bf16.msrb.mxu0 %v3015_v42  ;;  %2267 = vmatpush.bf16.msrb.mxu1 %v2947_v47  ;;  %v2626_v42 = vld [vmem:[%s4196_s6 + $0x28] sm:$0xf]  ;;  %v2954_v47 = vld [vmem:[%s4196_s6 + $0x2b0] sm:$0xf]  ;;  %v1994_v56 = vsel %vm1956_vm0, %v1741_v44, 0 }
 0x18a   : > { %2282 = vmatpush.bf16.msrb.mxu3 %v3331_v48  ;;  %2307 = vmatpush.bf16.msrb.mxu2 %v3399_v50  ;;  %v3529_v48 = vld [vmem:[%s4196_s6 + $0x2ec] sm:$0xf0]  ;;  %v3020_v50 = vld [vmem:[%s4196_s6 + $0x370] sm:$0xf0] }
 0x18b   : > { %v2955_v57 = vor.u32 %v3529_v48, %v2954_v47  ;;  %v3585_v47 = vld [vmem:[%s4196_s6 + $0x4b4] sm:$0xf]  ;;  %v2634_v58 = vld [vmem:[%s4196_s6 + $0x30] sm:$0xf] }
 0x18c   : > { %v3212_v48 = vld [vmem:[%s4196_s6 + $0x4f0] sm:$0xf0] }
 0x18d   : > { %2293 = vmatpush.bf16.msrb.mxu0 %v2951_v54  ;;  %2268 = vmatpush.bf16.msrb.mxu1 %v2883_v59  ;;  %v2627_v54 = vor.u32 %v3448_v43, %v2626_v42  ;;  %v3023_v59 = vor.u32 %v3537_v49, %v3020_v50  ;;  %v3473_v42 = vld [vmem:[%s4196_s6 + $0x134] sm:$0xf]  ;;  %v1519_v50 = vunpack.c.l.b16 %v867_v37 }
 0x18e   : > { %2283 = vmatpush.bf16.msrb.mxu3 %v3267_v60  ;;  %2308 = vmatpush.bf16.msrb.mxu2 %v3335_v28  ;;  %v2631_v60 = vor.u32 %v3440_v51, %v2628_v52  ;;  %v2890_v28 = vld [vmem:[%s4196_s6 + $0x230] sm:$0xf]  ;;  %v2764_v43 = vld [vmem:[%s4196_s6 + $0x170] sm:$0xf0] }
 0x18f   : > { %v2891_v4 = vor.u32 %v3513_v62, %v2890_v28  ;;  %v3146_v52 = vld [vmem:[%s4196_s6 + $0x430] sm:$0xf]  ;;  %v4649_v62 = vpop.permute.xlu0 %2446 }
 0x190   : > { %v2027_v30 = vpop.f32.mrf.mxu1 }
 0x191   : > { %2294 = vmatpush.bf16.msrb.mxu0 %v2887_v27  ;;  %2269 = vmatpush.bf16.msrb.mxu1 %v2819_v5  ;;  %v1997_v27 = vsel %vm1956_vm0, %v1742_v55, 0  ;;  %v3338_v5 = vld [vmem:[%s4196_s6 + $0x5b0] sm:$0xf] }
 0x192   : > { %2284 = vmatpush.bf16.msrb.mxu3 %v3203_v6  ;;  %2309 = vmatpush.bf16.msrb.mxu2 %v3271_v10  ;;  %v2959_v6 = vor.u32 %v3521_v63, %v2956_v0  ;;  %v3505_v10 = vld [vmem:[%s4196_s6 + $0x234] sm:$0xf]  ;;  %v3339_v17 = vor.u32 %v3625_v7, %v3338_v5  ;;  %v3215_v0 = vor.u32 %v3585_v47, %v3212_v48  ;;  %v2964_v47 = vld [vmem:[%s4196_s6 + $0x2f8] sm:$0xf0] }
 0x193   : > { %v2700_v63 = vld [vmem:[%s4196_s6 + $0xf0] sm:$0xf0]  ;;  %v1743_v5 = vpack.c.b16 %v1519_v50, %v1519_v50 }
 0x194   : > { %v3148_v7 = vld [vmem:[%s4196_s6 + $0x470] sm:$0xf0] }
 0x195   : > { %2295 = vmatpush.bf16.msrb.mxu0 %v2823_v14  ;;  %2270 = vmatpush.bf16.msrb.mxu1 %v2755_v20  ;;  %v3617_v14 = vld [vmem:[%s4196_s6 + $0x5b4] sm:$0xf]  ;;  %v2895_v20 = vor.u32 %v3505_v10, %v2892_v11  ;;  %v3092_v10 = vld [vmem:[%s4196_s6 + $0x3f8] sm:$0xf0]  ;;  %v2000_v25 = vsel %vm1956_vm0, %v1743_v5, 0 }
 0x196   : > { %2285 = vmatpush.bf16.msrb.mxu3 %v3139_v21  ;;  %2310 = vmatpush.bf16.msrb.mxu2 %v3207_v23  ;;  %v3609_v21 = vld [vmem:[%s4196_s6 + $0x56c] sm:$0xf0]  ;;  %v3343_v29 = vor.u32 %v3617_v14, %v3340_v15  ;;  %v3498_v5 = vld [vmem:[%s4196_s6 + $0x1f4] sm:$0xf0] }
 0x197   : > { %v3481_v23 = vld [vmem:[%s4196_s6 + $0x16c] sm:$0xf0]  ;;  %v3275_v33 = vor.u32 %v3609_v21, %v3274_v19  ;;  %v1744_v19 = vpack.c.b16 %v1520_v61, %v1520_v61  ;;  %v3026_v21 = vld [vmem:[%s4196_s6 + $0x338] sm:$0xf]  ;;  %v2900_v61 = vld [vmem:[%s4196_s6 + $0x278] sm:$0xf0] }
 0x198   : > { %v2763_v34 = vor.u32 %v3481_v23, %v2762_v22  ;;  %v3546_v22 = vld [vmem:[%s4196_s6 + $0x374] sm:$0xf0] }
 0x199   : > { %2296 = vmatpush.bf16.msrb.mxu0 %v2759_v31  ;;  %3426 = vmatmul.msk.bf16.vlgmr.msrb.gmra.mxu3 %vm1953_vm1, %v4586_v53  ;;  %v3601_v31 = vld [vmem:[%s4196_s6 + $0x534] sm:$0xf]  ;;  %v2003_v37 = vsel %vm1956_vm0, %v1744_v19, 0 }
 0x19a   : > { %2317 = vmatpush.bf16.msra.mxu3 %v3083_v24  ;;  %2271 = vmatpush.bf16.msrb.mxu1 %v2691_v38  ;;  %v2014_v24 = vpop.f32.mrf.mxu0  ;;  %v3279_v44 = vor.u32 %v3601_v31, %v3276_v32  ;;  %v2040_v49 = vpop.f32.mrf.mxu2  ;;  %v3538_v32 = vld [vmem:[%s4196_s6 + $0x33c] sm:$0xf] }
 0x19b   : > { %2311 = vmatpush.bf16.msrb.mxu2 %v3143_v40  ;;  %v2028_v38 = vadd.f32 %v2027_v30, %v2014_v24  ;;  %v2698_v40 = vld [vmem:[%s4196_s6 + $0xb0] sm:$0xf]  ;;  %v3095_v30 = vor.u32 %v3554_v9, %v3092_v10  ;;  %v3602_v10 = vld [vmem:[%s4196_s6 + $0x53c] sm:$0xf] }
 0x19d   : > { %2297 = vmatpush.bf16.msrb.mxu0 %v2695_v46  ;;  %v3211_v46 = vor.u32 %v3593_v36, %v3210_v35  ;;  %v2427_v55 = vmul.f32 %v4613_v16, %v2028_v38  ;;  %v3027_v36 = vor.u32 %v3546_v22, %v3026_v21  ;;  %v2770_v21 = vld [vmem:[%s4196_s6 + $0x138] sm:$0xf] }
 0x19e   : > { %2318 = vmatpush.bf16.msra.mxu3 %v3019_v41  ;;  %2272 = vmatpush.bf16.msrb.mxu1 %v2627_v54  ;;  %v3465_v41 = vld [vmem:[%s4196_s6 + $0xec] sm:$0xf0]  ;;  %v3482_v22 = vld [vmem:[%s4196_s6 + $0x174] sm:$0xf0] }
 0x19f   : > { %2343 = vmatpush.bf16.msra.mxu2 %v3087_v45  ;;  %v2053_v45 = vpop.f32.mrf.mxu3  ;;  %v2699_v51 = vor.u32 %v3465_v41, %v2698_v40  ;;  %v3577_v54 = vld [vmem:[%s4196_s6 + $0x46c] sm:$0xf0]  ;;  %v2449_v11 = vadd.f32 %v4649_v62, %v2427_v55  ;;  %v3530_v40 = vld [vmem:[%s4196_s6 + $0x2f4] sm:$0xf0] }
 0x1a0   : > { %3427 = vmatmul.msk.bf16.vlgmr.msrb.gmra.mxu2 %vm1953_vm1, %v4586_v53  ;;  %v3346_v41 = vld [vmem:[%s4196_s6 + $0x5b8] sm:$0xf] }
 0x1a1   : > { %2298 = vmatpush.bf16.msrb.mxu0 %v2631_v60  ;;  %2273 = vmatmul.bf16.vlgmr.msrb.gmra.mxu1 %v4608_v13  ;;  %v3457_v60 = vld [vmem:[%s4196_s6 + $0xb4] sm:$0xf] }
 0x1a2   : > { %2332 = vmatpush.bf16.msra.mxu1 %v1994_v56  ;;  %2319 = vmatpush.bf16.msra.mxu3 %v2955_v57  ;;  %v2054_v56 = vadd.f32 %v2053_v45, %v2040_v49  ;;  %v2767_v57 = vor.u32 %v3473_v42, %v2764_v43  ;;  %v2016_v28 = vpop.f32.mrf.mxu0  ;;  %v2703_v14 = vor.u32 %v3457_v60, %v2700_v63  ;;  %v2042_v31 = vpop.f32.mrf.mxu2  ;;  %v3626_v42 = vld [vmem:[%s4196_s6 + $0x5f4] sm:$0xf0]  ;;  %v3412_v45 = vld [vmem:[%s4196_s6 + $0x678] sm:$0xf0] }
 0x1a3   : > { %2344 = vmatpush.bf16.msra.mxu2 %v3023_v59  ;;  %v3449_v59 = vld [vmem:[%s4196_s6 + $0x6c] sm:$0xf0]  ;;  %v3347_v49 = vor.u32 %v3626_v42, %v3346_v41  ;;  %v3506_v60 = vld [vmem:[%s4196_s6 + $0x23c] sm:$0xf]  ;;  %v2706_v42 = vld [vmem:[%s4196_s6 + $0xb8] sm:$0xf] }
 0x1a4   : > { %2299 = vmatmul.bf16.vlgmr.msrb.gmra.mxu0 %v4608_v13  ;;  %v2428_v2 = vmul.f32 %v4613_v16, %v2054_v56  ;;  %v2635_v8 = vor.u32 %v3449_v59, %v2634_v58  ;;  %v3610_v56 = vld [vmem:[%s4196_s6 + $0x574] sm:$0xf0]  ;;  %v3618_v58 = vld [vmem:[%s4196_s6 + $0x5bc] sm:$0xf]  ;;  %v2903_v9 = vor.u32 %v3506_v60, %v2900_v61 }
 0x1a5   : > { %2358 = vmatpush.bf16.msra.mxu0 %v1997_v27  ;;  %v3090_v27 = vld [vmem:[%s4196_s6 + $0x3b8] sm:$0xf]  ;;  %v3348_v59 = vld [vmem:[%s4196_s6 + $0x5f8] sm:$0xf0] }
 0x1a6   : > { %2333 = vmatpush.bf16.msra.mxu1 %v3403_v3  ;;  %2320 = vmatpush.bf16.msra.mxu3 %v2891_v4  ;;  %v2029_v3 = vpop.f32.mrf.mxu1  ;;  %v3147_v4 = vor.u32 %v3577_v54, %v3146_v52  ;;  %v3091_v15 = vor.u32 %v3562_v1, %v3090_v27  ;;  %v3514_v52 = vld [vmem:[%s4196_s6 + $0x274] sm:$0xf0]  ;;  %v3586_v31 = vld [vmem:[%s4196_s6 + $0x4bc] sm:$0xf] }
 0x1a7   : > { %2345 = vmatpush.bf16.msra.mxu2 %v2959_v6  ;;  %v3569_v6 = vld [vmem:[%s4196_s6 + $0x434] sm:$0xf]  ;;  %v2055_v23 = vpop.f32.mrf.mxu3  ;;  %v3282_v54 = vld [vmem:[%s4196_s6 + $0x538] sm:$0xf] }
 0x1a8   : > { %v3283_v3 = vor.u32 %v3610_v56, %v3282_v54  ;;  %v3154_v23 = vld [vmem:[%s4196_s6 + $0x438] sm:$0xf]  ;;  %v3442_v56 = vld [vmem:[%s4196_s6 + $0x3c] sm:$0xf] }
 0x1a9   : > { %2359 = vmatpush.bf16.msra.mxu0 %v3407_v12  ;;  %v2450_v12 = vadd.f32 %v4649_v62, %v2428_v2  ;;  %v3450_v54 = vld [vmem:[%s4196_s6 + $0x74] sm:$0xf0] }
 0x1aa   : > { %2334 = vmatpush.bf16.msra.mxu1 %v3339_v17  ;;  %2321 = vmatpush.bf16.msra.mxu3 %v2827_v18  ;;  %v3441_v17 = vld [vmem:[%s4196_s6 + $0x34] sm:$0xf] }
 0x1ab   : > { %2346 = vmatpush.bf16.msra.mxu2 %v2895_v20  ;;  %v2636_v18 = vld [vmem:[%s4196_s6 + $0x70] sm:$0xf0]  ;;  %v3151_v20 = vor.u32 %v3569_v6, %v3148_v7  ;;  %v2481_v24 = vrot.slane %v2450_v12, 4  ;;  %v3218_v6 = vld [vmem:[%s4196_s6 + $0x4b8] sm:$0xf] }
 0x1ac   : > { %v2639_v35 = vor.u32 %v3441_v17, %v2636_v18  ;;  %v3594_v7 = vld [vmem:[%s4196_s6 + $0x4f4] sm:$0xf0] }
 0x1ad   : > { %2360 = vmatpush.bf16.msra.mxu0 %v3343_v29  ;;  %v3642_v29 = vld [vmem:[%s4196_s6 + $0x674] sm:$0xf0]  ;;  %v3219_v19 = vor.u32 %v3594_v7, %v3218_v6 }
 0x1ae   : > { %2335 = vmatpush.bf16.msra.mxu1 %v3275_v33  ;;  %2322 = vmatpush.bf16.msra.mxu3 %v2763_v34  ;;  %v3028_v33 = vld [vmem:[%s4196_s6 + $0x378] sm:$0xf0]  ;;  %v2489_v34 = vsel %vm1956_vm0, %v2449_v11, %v2481_v24  ;;  %v3411_v38 = vor.u32 %v3642_v29, %v3410_v26  ;;  %v2066_v55 = vpop.f32.mrf.mxu1  ;;  %v3578_v29 = vld [vmem:[%s4196_s6 + $0x474] sm:$0xf0] }
 0x1af   : > { %2347 = vmatpush.bf16.msra.mxu2 %v2831_v39  ;;  %2505 = vst [vmem:[%s4669_s18] sm:$0xff] %v2489_v34  ;;  %v2962_v39 = vld [vmem:[%s4196_s6 + $0x2b8] sm:$0xf]  ;;  %v3031_v43 = vor.u32 %v3538_v32, %v3028_v33  ;;  %v2079_v28 = vpop.f32.mrf.mxu3  ;;  %v3284_v11 = vld [vmem:[%s4196_s6 + $0x578] sm:$0xf0] }
 0x1b0   : > { %v2963_v48 = vor.u32 %v3530_v40, %v2962_v39  ;;  %v2080_v2 = vadd.f32 %v2079_v28, %v2066_v55  ;;  %v3220_v32 = vld [vmem:[%s4196_s6 + $0x4f8] sm:$0xf0]  ;;  %v3155_v40 = vor.u32 %v3578_v29, %v3154_v23 }
 0x1b1   : > { %2361 = vmatpush.bf16.msra.mxu0 %v3279_v44  ;;  %v3634_v44 = vld [vmem:[%s4196_s6 + $0x63c] sm:$0xf]  ;;  %v2092_v27 = vpop.f32.mrf.mxu0  ;;  %v3223_v41 = vor.u32 %v3586_v31, %v3220_v32 }
 0x1b2   : > { %2336 = vmatpush.bf16.msra.mxu1 %v3211_v46  ;;  %2323 = vmatpush.bf16.msra.mxu3 %v2699_v51  ;;  %v3522_v46 = vld [vmem:[%s4196_s6 + $0x2bc] sm:$0xf]  ;;  %v3415_v50 = vor.u32 %v3634_v44, %v3412_v45  ;;  %v2898_v51 = vld [vmem:[%s4196_s6 + $0x238] sm:$0xf]  ;;  %v2105_v1 = vpop.f32.mrf.mxu2  ;;  %v2429_v12 = vmul.f32 %v4613_v16, %v2080_v2 }
 0x1b3   : > { %2348 = vmatpush.bf16.msra.mxu2 %v2767_v57  ;;  %v2967_v57 = vor.u32 %v3522_v46, %v2964_v47  ;;  %v2899_v63 = vor.u32 %v3514_v52, %v2898_v51  ;;  %v3474_v33 = vld [vmem:[%s4196_s6 + $0x13c] sm:$0xf]  ;;  %v2642_v52 = vld [vmem:[%s4196_s6 + $0x38] sm:$0xf] }
 0x1b4   : > { %v2451_v26 = vadd.f32 %v4649_v62, %v2429_v12  ;;  %v2772_v34 = vld [vmem:[%s4196_s6 + $0x178] sm:$0xf0] }
 0x1b5   : > { %2362 = vmatpush.bf16.msra.mxu0 %v3215_v0  ;;  %v2834_v0 = vld [vmem:[%s4196_s6 + $0x1b8] sm:$0xf]  ;;  %v2775_v45 = vor.u32 %v3474_v33, %v2772_v34  ;;  %v3570_v46 = vld [vmem:[%s4196_s6 + $0x43c] sm:$0xf] }
 0x1b6   : > { %2337 = vmatpush.bf16.msra.mxu1 %v3147_v4  ;;  %2324 = vmatpush.bf16.msra.mxu3 %v2635_v8  ;;  %v3351_v4 = vor.u32 %v3618_v58, %v3348_v59  ;;  %v2106_v8 = vadd.f32 %v2105_v1, %v2092_v27  ;;  %v2835_v18 = vor.u32 %v3498_v5, %v2834_v0  ;;  %v3156_v47 = vld [vmem:[%s4196_s6 + $0x478] sm:$0xf0] }
 0x1b7   : > { %2349 = vmatpush.bf16.msra.mxu2 %v2703_v14  ;;  %v3490_v14 = vld [vmem:[%s4196_s6 + $0x1bc] sm:$0xf]  ;;  %v3159_v51 = vor.u32 %v3570_v46, %v3156_v47  ;;  %v2643_v58 = vor.u32 %v3450_v54, %v2642_v52 }
 0x1b8   : > { %v2430_v17 = vmul.f32 %v4613_v16, %v2106_v8 }
 0x1b9   : > { %2363 = vmatpush.bf16.msra.mxu0 %v3151_v20  ;;  %2325 = vmatmul.bf16.vlgmr.msra.gmra.mxu3 %v4608_v13  ;;  %v3287_v20 = vor.u32 %v3602_v10, %v3284_v11 }
 0x1ba   : > { %2369 = vmatpush.bf16.msrb.mxu1 %v3091_v15  ;;  %2384 = vmatpush.bf16.msrb.mxu3 %v2000_v25  ;;  %v2836_v15 = vld [vmem:[%s4196_s6 + $0x1f8] sm:$0xf0]  ;;  %v2452_v24 = vadd.f32 %v4649_v62, %v2430_v17  ;;  %v2068_v25 = vpop.f32.mrf.mxu1  ;;  %v2107_v39 = vpop.f32.mrf.mxu2 }
 0x1bb   : > { %3428 = vmatmul.msk.bf16.vlgmr.msra.gmra.mxu1 %vm1953_vm1, %v4586_v53  ;;  %2350 = vmatpush.bf16.msra.mxu2 %v2639_v35 }
 0x1bc   : > { %3429 = vmatmul.msk.bf16.vlgmr.msra.gmra.mxu0 %vm1953_vm1, %v4586_v53  ;;  %v2482_v35 = vrot.slane %v2452_v24, 4 }
 0x1bd   : > { %2395 = vmatpush.bf16.msrb.mxu0 %v3095_v30  ;;  %v2839_v30 = vor.u32 %v3490_v14, %v2836_v15 }
 0x1be   : > { %2370 = vmatpush.bf16.msrb.mxu1 %v3027_v36  ;;  %2385 = vmatpush.bf16.msrb.mxu3 %v3411_v38  ;;  %v2081_v36 = vpop.f32.mrf.mxu3  ;;  %v2094_v38 = vpop.f32.mrf.mxu0  ;;  %v2490_v44 = vsel %vm1956_vm0, %v2451_v26, %v2482_v35 }
 0x1bf   : > { %2410 = vmatpush.bf16.msrb.mxu2 %v2003_v37  ;;  %v2771_v37 = vor.u32 %v3482_v22, %v2770_v21  ;;  %2506 = vst [vmem:[%s4669_s18 + $0x8] sm:$0xff] %v2490_v44 }
 0x1c0   : > { %2351 = vmatmul.bf16.vlgmr.msra.gmra.mxu2 %v4608_v13 }
 0x1c1   : > { %2396 = vmatpush.bf16.msrb.mxu0 %v3031_v43  ;;  %v3466_v43 = vld [vmem:[%s4196_s6 + $0xf4] sm:$0xf0] }
 0x1c2   : > { %2371 = vmatpush.bf16.msrb.mxu1 %v2963_v48  ;;  %2386 = vmatpush.bf16.msrb.mxu3 %v3347_v49  ;;  %v3458_v48 = vld [vmem:[%s4196_s6 + $0xbc] sm:$0xf] }
 0x1c3   : > { %2411 = vmatpush.bf16.msrb.mxu2 %v3415_v50  ;;  %v2708_v49 = vld [vmem:[%s4196_s6 + $0xf8] sm:$0xf0]  ;;  %v2707_v50 = vor.u32 %v3466_v43, %v2706_v42 }
 0x1c4   : > { %v2711_v55 = vor.u32 %v3458_v48, %v2708_v49 }
 0x1c5   : > { %2397 = vmatpush.bf16.msrb.mxu0 %v2967_v57  ;;  %v2644_v57 = vld [vmem:[%s4196_s6 + $0x78] sm:$0xf0]  ;;  %v2131_v60 = vpop.f32.mrf.mxu1 }
 0x1c6   : > { %2372 = vmatpush.bf16.msrb.mxu1 %v2899_v63  ;;  %2387 = vmatpush.bf16.msrb.mxu3 %v3283_v3  ;;  %v2647_v59 = vor.u32 %v3442_v56, %v2644_v57 }
 0x1c7   : > { %2412 = vmatpush.bf16.msrb.mxu2 %v3351_v4 }
 0x1c9   : > { %2398 = vmatpush.bf16.msrb.mxu0 %v2903_v9  ;;  %v2157_v61 = vpop.f32.mrf.mxu0 }
 0x1ca   : > { %2373 = vmatpush.bf16.msrb.mxu1 %v2835_v18  ;;  %2388 = vmatpush.bf16.msrb.mxu3 %v3219_v19 }
 0x1cb   : > { %2413 = vmatpush.bf16.msrb.mxu2 %v3287_v20 }
 0x1cd   : > { %2399 = vmatpush.bf16.msrb.mxu0 %v2839_v30  ;;  %v2133_v0 = vpop.f32.mrf.mxu1 }
 0x1ce   : > { %2374 = vmatpush.bf16.msrb.mxu1 %v2771_v37  ;;  %2389 = vmatpush.bf16.msrb.mxu3 %v3155_v40  ;;  %v2118_v28 = vpop.f32.mrf.mxu3 }
 0x1cf   : > { %2414 = vmatpush.bf16.msrb.mxu2 %v3223_v41  ;;  %v2132_v63 = vadd.f32 %v2131_v60, %v2118_v28 }
 0x1d1   : > { %2400 = vmatpush.bf16.msrb.mxu0 %v2775_v45  ;;  %3430 = vmatmul.msk.bf16.vlgmr.msrb.gmra.mxu3 %vm1953_vm1, %v4586_v53  ;;  %v2431_v2 = vmul.f32 %v4613_v16, %v2132_v63  ;;  %v2159_v3 = vpop.f32.mrf.mxu0 }
 0x1d2   : > { %2375 = vmatpush.bf16.msrb.mxu1 %v2707_v50  ;;  %v2144_v27 = vpop.f32.mrf.mxu2 }
 0x1d3   : > { %2415 = vmatpush.bf16.msrb.mxu2 %v3159_v51  ;;  %v2158_v1 = vadd.f32 %v2157_v61, %v2144_v27  ;;  %v2453_v6 = vadd.f32 %v4649_v62, %v2431_v2 }
 0x1d5   : > { %2401 = vmatpush.bf16.msrb.mxu0 %v2711_v55  ;;  %v2432_v4 = vmul.f32 %v4613_v16, %v2158_v1 }
 0x1d6   : > { %2376 = vmatpush.bf16.msrb.mxu1 %v2643_v58  ;;  %3431 = vmatmul.msk.bf16.vlgmr.msrb.gmra.mxu2 %vm1953_vm1, %v4586_v53  ;;  %v2120_v5 = vpop.f32.mrf.mxu3 }
 0x1d7   : > { %v2454_v53 = vadd.f32 %v4649_v62, %v2432_v4 }
 0x1d9   : > { %2402 = vmatpush.bf16.msrb.mxu0 %v2647_v59  ;;  %2377 = vmatmul.bf16.vlgmr.msrb.gmra.mxu1 %v4608_v13  ;;  %v2483_v7 = vrot.slane %v2454_v53, 4 }
 0x1da   : > { %v2146_v8 = vpop.f32.mrf.mxu2 }
 0x1db   : > { %v2491_v9 = vsel %vm1956_vm0, %v2453_v6, %v2483_v7 }
 0x1dc   : > { %2403 = vmatmul.bf16.vlgmr.msrb.gmra.mxu0 %v4608_v13  ;;  %2507 = vst [vmem:[%s4669_s18 + $0x10] sm:$0xff] %v2491_v9 }
 0x1e5   : > { %v2170_v10 = vpop.f32.mrf.mxu1 }
 0x1e6   : > { %v2183_v13 = vpop.f32.mrf.mxu3 }
 0x1e7   : > { %v2184_v11 = vadd.f32 %v2183_v13, %v2170_v10 }
 0x1e9   : > { %v2196_v14 = vpop.f32.mrf.mxu0  ;;  %v2433_v17 = vmul.f32 %v4613_v16, %v2184_v11 }
 0x1ea   : > { %v2209_v12 = vpop.f32.mrf.mxu2 }
 0x1eb   : > { %v2210_v15 = vadd.f32 %v2209_v12, %v2196_v14  ;;  %v2455_v22 = vadd.f32 %v4649_v62, %v2433_v17 }
 0x1ed   : > { %v2434_v18 = vmul.f32 %v4613_v16, %v2210_v15  ;;  %v2172_v20 = vpop.f32.mrf.mxu1 }
 0x1ee   : > { %v2185_v19 = vpop.f32.mrf.mxu3 }
 0x1ef   : > { %v2456_v21 = vadd.f32 %v4649_v62, %v2434_v18 }
 0x1f1   : > { %v2484_v23 = vrot.slane %v2456_v21, 4  ;;  %v2198_v25 = vpop.f32.mrf.mxu0 }
 0x1f2   : > { %v2211_v24 = vpop.f32.mrf.mxu2 }
 0x1f3   : > { %v2492_v26 = vsel %vm1956_vm0, %v2455_v22, %v2484_v23 }
 0x1f4   : > { %2508 = vst [vmem:[%s4669_s18 + $0x18] sm:$0xff] %v2492_v26 }
 0x1fd   : > { %v2235_v29 = vpop.f32.mrf.mxu1 }
 0x201   : > { %v2261_v30 = vpop.f32.mrf.mxu0 }
 0x205   : > { %v2237_v33 = vpop.f32.mrf.mxu1 }
 0x206   : > { %v2222_v31 = vpop.f32.mrf.mxu3 }
 0x207   : > { %v2236_v32 = vadd.f32 %v2235_v29, %v2222_v31 }
 0x209   : > { %v2435_v36 = vmul.f32 %v4613_v16, %v2236_v32  ;;  %v2263_v37 = vpop.f32.mrf.mxu0 }
 0x20a   : > { %v2248_v34 = vpop.f32.mrf.mxu2 }
 0x20b   : > { %v2262_v35 = vadd.f32 %v2261_v30, %v2248_v34  ;;  %v2457_v41 = vadd.f32 %v4649_v62, %v2435_v36 }
 0x20d   : > { %v2436_v38 = vmul.f32 %v4613_v16, %v2262_v35 }
 0x20e   : > { %v2224_v39 = vpop.f32.mrf.mxu3 }
 0x20f   : > { %v2458_v40 = vadd.f32 %v4649_v62, %v2436_v38 }
 0x211   : > { %v2485_v42 = vrot.slane %v2458_v40, 4 }
 0x212   : > { %v2250_v43 = vpop.f32.mrf.mxu2 }
 0x213   : > { %v2493_v44 = vsel %vm1956_vm0, %v2457_v41, %v2485_v42 }
 0x214   : > { %2509 = vst [vmem:[%s4669_s18 + $0x20] sm:$0xff] %v2493_v44 }
 0x21c   : > { %v2287_v45 = vpop.f32.mrf.mxu3 }
 0x21e   : > { %v2274_v46 = vpop.f32.mrf.mxu1 }
 0x21f   : > { %v2288_v47 = vadd.f32 %v2287_v45, %v2274_v46 }
 0x221   : > { %v2300_v48 = vpop.f32.mrf.mxu0  ;;  %v2437_v51 = vmul.f32 %v4613_v16, %v2288_v47 }
 0x223   : > { %v2313_v49 = vpop.f32.mrf.mxu2  ;;  %v2459_v56 = vadd.f32 %v4649_v62, %v2437_v51 }
 0x224   : > { %v2314_v50 = vadd.f32 %v2313_v49, %v2300_v48  ;;  %v2289_v54 = vpop.f32.mrf.mxu3 }
 0x226   : > { %v2438_v52 = vmul.f32 %v4613_v16, %v2314_v50  ;;  %v2276_v57 = vpop.f32.mrf.mxu1 }
 0x228   : > { %v2460_v55 = vadd.f32 %v4649_v62, %v2438_v52 }
 0x229   : > { %v2302_v59 = vpop.f32.mrf.mxu0 }
 0x22a   : > { %v2486_v58 = vrot.slane %v2460_v55, 4 }
 0x22b   : > { %v2315_v60 = vpop.f32.mrf.mxu2 }
 0x22c   : > { %v2494_v61 = vsel %vm1956_vm0, %v2459_v56, %v2486_v58 }
 0x22d   : > { %2510 = vst [vmem:[%s4669_s18 + $0x28] sm:$0xff] %v2494_v61 }
 0x238   : > { %v2339_v28 = vpop.f32.mrf.mxu1 }
 0x239   : > { %v2365_v63 = vpop.f32.mrf.mxu0 }
 0x23c   : > { %v2326_v0 = vpop.f32.mrf.mxu3 }
 0x23d   : > { %v2340_v27 = vadd.f32 %v2339_v28, %v2326_v0 }
 0x23f   : > { %v2439_v4 = vmul.f32 %v4613_v16, %v2340_v27 }
 0x240   : > { %v2341_v1 = vpop.f32.mrf.mxu1 }
 0x241   : > { %v2367_v5 = vpop.f32.mrf.mxu0  ;;  %v2461_v8 = vadd.f32 %v4649_v62, %v2439_v4 }
 0x243   : > { %v2352_v2 = vpop.f32.mrf.mxu2 }
 0x244   : > { %v2366_v3 = vadd.f32 %v2365_v63, %v2352_v2  ;;  %v2328_v6 = vpop.f32.mrf.mxu3 }
 0x246   : > { %v2440_v53 = vmul.f32 %v4613_v16, %v2366_v3 }
 0x248   : > { %v2462_v7 = vadd.f32 %v4649_v62, %v2440_v53 }
 0x24a   : > { %v2487_v9 = vrot.slane %v2462_v7, 4 }
 0x24b   : > { %v2354_v13 = vpop.f32.mrf.mxu2 }
 0x24c   : > { %v2495_v10 = vsel %vm1956_vm0, %v2461_v8, %v2487_v9 }
 0x24d   : > { %2511 = vst [vmem:[%s4669_s18 + $0x30] sm:$0xff] %v2495_v10 }
 0x254   : > { %v2391_v11 = vpop.f32.mrf.mxu3 }
 0x256   : > { %v2378_v12 = vpop.f32.mrf.mxu1 }
 0x257   : > { %v2392_v14 = vadd.f32 %v2391_v11, %v2378_v12 }
 0x259   : > { %v2404_v15 = vpop.f32.mrf.mxu0  ;;  %v2417_v17 = vpop.f32.mrf.mxu2  ;;  %v2441_v19 = vmul.f32 %v4613_v16, %v2392_v14 }
 0x25a   : > { %v2418_v18 = vadd.f32 %v2417_v17, %v2404_v15 }
 0x25b   : > { %v2463_v24 = vadd.f32 %v4649_v62, %v2441_v19 }
 0x25c   : > { %v2442_v20 = vmul.f32 %v4613_v16, %v2418_v18  ;;  %v2393_v21 = vpop.f32.mrf.mxu3 }
 0x25e   : > { %v2464_v22 = vadd.f32 %v4649_v62, %v2442_v20  ;;  %v2380_v23 = vpop.f32.mrf.mxu1 }
 0x260   : > { %v2488_v25 = vrot.slane %v2464_v22, 4 }
 0x261   : > { %v2406_v26 = vpop.f32.mrf.mxu0  ;;  %v2419_v29 = vpop.f32.mrf.mxu2 }
 0x262   : > { %v2496_v30 = vsel %vm1956_vm0, %v2463_v24, %v2488_v25 }
 0x263   : > { %2512 = vst [vmem:[%s4669_s18 + $0x38] sm:$0xff] %v2496_v30 }
 0x264 PF: > { %p11_p9 = scmp.ge.s32.totalorder %s3740_s19, 6   ;;  %s4790_s15 = smov %s3691_s16 }
 0x265   : > { %s4791_s16 = smov %s3749_s22  ;;  %s4792_s17 = smov %s3740_s19 }
 0x266   :  { %13 = sbr.rel (!%p11_p9) target bundleno = 2 (0x2), region = 94 }

</bundles_post_ra>
